<compile_context>
chip_gen: v5e
topology: v5e:2x2
jax: 0.10.0
libtpu: 0.0.40
codegen_flags: <defaults>
</compile_context>

<pallas_src>
import functools

import jax
import jax.numpy as jnp
from jax import lax
from jax.experimental import pallas as pl
from jax.experimental.pallas import tpu as pltpu

# --------------------------------------------------------------------------
# Small synthetic CLIP config (structure matches ViT-L/14, sizes shrunk)
# --------------------------------------------------------------------------
OPENAI_CLIP_MEAN = (0.48145466, 0.4578275, 0.40821073)
OPENAI_CLIP_STD = (0.26862954, 0.26130258, 0.27577711)

IMG_RES = 16          # self.img_resolution
PATCH = 4
PATCH_GRID = IMG_RES // PATCH
NUM_PATCHES = PATCH_GRID * PATCH_GRID     # 16
VIS_TOKENS = NUM_PATCHES + 1              # 17 (cls + patches)
VIS_WIDTH = 128
VIS_LAYERS = 2
VIS_HEADS = 4
TXT_WIDTH = 128
TXT_LAYERS = 2
TXT_HEADS = 4
CTX_LEN = 8
VOCAB = 64
EMBED_DIM = 64        # CLIP joint embedding dim -> output is (B, 2*EMBED_DIM)
LN_EPS = 1e-5
NORM_EPS = 1e-12      # F.normalize eps
NEG_INF = -1e30       # additive mask value (kept in f32 logits)

# stacked per-layer block parameters, in kernel-argument order
BLOCK_KEYS = ('ln1_g', 'ln1_b', 'wqkv', 'bqkv', 'wo', 'bo',
              'ln2_g', 'ln2_b', 'w1', 'b1', 'w2', 'b2')


# --------------------------------------------------------------------------
# In-kernel helpers (traced inside the Pallas kernel)
# --------------------------------------------------------------------------
def _layernorm(x, g, b):
    mu = jnp.mean(x, axis=-1, keepdims=True)
    var = jnp.mean((x - mu) ** 2, axis=-1, keepdims=True)
    return (x - mu) * lax.rsqrt(var + LN_EPS) * g + b


def _mm(a, b):
    # MXU matmul: bf16 operands, f32 accumulation.
    return jnp.dot(a.astype(jnp.bfloat16), b.astype(jnp.bfloat16),
                   preferred_element_type=jnp.float32)


def _mm_nt(a, b):
    # a @ b.T (contract last dims of both), bf16 operands, f32 accumulation.
    return lax.dot_general(a.astype(jnp.bfloat16), b.astype(jnp.bfloat16),
                           (((1,), (1,)), ((), ())),
                           preferred_element_type=jnp.float32)


def _l2_normalize(x):
    ss = jnp.sum(x * x, axis=-1, keepdims=True)
    return x * lax.rsqrt(jnp.maximum(ss, NORM_EPS * NORM_EPS))


def _attention_block(x, blk, li, attn_bias, heads):
    # One pre-norm residual attention block (open_clip ResidualAttentionBlock),
    # applied to the whole flattened batch x: (N=B*T, D).  Cross-batch mixing
    # (and causality for the text tower) is removed via the additive bias.
    n, d = x.shape
    hd = d // heads
    scale = 1.0 / (hd ** 0.5)
    ln1_g, ln1_b, wqkv, bqkv, wo, bo, ln2_g, ln2_b, w1, b1, w2, b2 = blk

    # ---- attention branch ----
    h = _layernorm(x, ln1_g[li], ln1_b[li])
    qkv = _mm(h, wqkv[li]) + bqkv[li]                       # (N, 3D) f32

    head_outs = []
    for hi in range(heads):
        q = qkv[:, hi * hd:(hi + 1) * hd]
        k = qkv[:, d + hi * hd:d + (hi + 1) * hd]
        v = qkv[:, 2 * d + hi * hd:2 * d + (hi + 1) * hd]
        logits = _mm_nt(q, k) * scale + attn_bias           # (N, N) f32
        logits = logits - jnp.max(logits, axis=-1, keepdims=True)
        p = jnp.exp(logits)
        p = p * pl.reciprocal(jnp.sum(p, axis=-1, keepdims=True), approx=True)
        head_outs.append(_mm(p, v))                         # (N, hd)
    attn = jnp.concatenate(head_outs, axis=-1)              # (N, D)
    x = x + _mm(attn, wo[li]) + bo[li]

    # ---- MLP branch (QuickGELU, as in openai-pretrained CLIP) ----
    h2 = _layernorm(x, ln2_g[li], ln2_b[li])
    h2 = _mm(h2, w1[li]) + b1[li]
    h2 = h2 * jax.nn.sigmoid(1.702 * h2)
    return x + _mm(h2, w2[li]) + b2[li]


# --------------------------------------------------------------------------
# Single fused Pallas kernel: whole CLIP forward
# --------------------------------------------------------------------------
def _clip_forward_kernel(*refs, vis_heads, vis_layers, txt_heads, txt_layers):
    it = iter(refs)
    # --- vision tower inputs ---
    patches = next(it); v_wext = next(it); v_pos = next(it)
    v_lnpre_g = next(it); v_lnpre_b = next(it)
    v_bias = next(it); v_cls_sel = next(it)
    v_lnpost_g = next(it); v_lnpost_b = next(it); v_proj = next(it)
    v_blk = tuple(next(it) for _ in BLOCK_KEYS)
    # --- text tower inputs ---
    tok = next(it); t_emb = next(it); t_pos = next(it)
    t_bias = next(it); t_eot_sel = next(it)
    t_lnf_g = next(it); t_lnf_b = next(it); t_proj = next(it)
    t_blk = tuple(next(it) for _ in BLOCK_KEYS)
    o_ref = next(it)

    # ---------------- vision tower ----------------
    # patches already carry a [cls]-indicator row/column, so one matmul gives
    # [cls ; patch embeddings]; then add (batch-tiled) positional embedding.
    xv = _mm(patches[...], v_wext[...]) + v_pos[...]        # (B*Tv, D) f32
    xv = _layernorm(xv, v_lnpre_g[...], v_lnpre_b[...])
    vb = v_bias[...]
    for li in range(vis_layers):
        xv = _attention_block(xv, v_blk, li, vb, vis_heads)
    cls = _mm(v_cls_sel[...], xv)                           # (B, D) cls-token rows
    cls = _layernorm(cls, v_lnpost_g[...], v_lnpost_b[...])
    img = _l2_normalize(_mm(cls, v_proj[...]))              # (B, E)

    # ---------------- text tower ----------------
    toks = tok[...]                                         # (B*Tt, 1) int32
    n_txt = toks.shape[0]
    onehot = jnp.where(
        lax.broadcasted_iota(jnp.int32, (n_txt, VOCAB), 1) == toks, 1.0, 0.0)
    xt = _mm(onehot, t_emb[...]) + t_pos[...]               # (B*Tt, D) f32
    tb = t_bias[...]
    for li in range(txt_layers):
        xt = _attention_block(xt, t_blk, li, tb, txt_heads)
    xt = _layernorm(xt, t_lnf_g[...], t_lnf_b[...])
    xe = _mm(t_eot_sel[...], xt)                            # (B, D) EOT rows
    txt = _l2_normalize(_mm(xe, t_proj[...]))               # (B, E)

    # lane-dense (B, 2E = 128) output, concat done in-kernel
    o_ref[...] = jnp.concatenate([img, txt], axis=-1).astype(o_ref.dtype)


def _full_spec(arr):
    zeros = (0,) * arr.ndim
    return pl.BlockSpec(arr.shape, lambda: zeros)


def _tower_block_args(blocks):
    return [blocks[k] for k in BLOCK_KEYS]


# --------------------------------------------------------------------------
# Forward (mirrors model.forward)
# --------------------------------------------------------------------------
@functools.partial(jax.jit, static_argnames=('div255',))
def clip_forward(params, images, tokens, div255=False):
    B = images.shape[0]

    # ---------- image preprocessing (JAX glue) ----------
    if div255:
        images = images.astype(jnp.float32) / 255.0
    # TODO(synk): jax.image.resize bicubic (half-pixel centers) approximates
    # F.interpolate(mode='bicubic', align_corners=False) up to antialias details.
    images = jax.image.resize(images, (B, 3, IMG_RES, IMG_RES),
                              method='bicubic', antialias=False)
    mean = jnp.asarray(OPENAI_CLIP_MEAN, jnp.float32).reshape(1, 3, 1, 1)
    std = jnp.asarray(OPENAI_CLIP_STD, jnp.float32).reshape(1, 3, 1, 1)
    images = (images - mean) / std

    # non-overlapping conv == patch flatten + matmul (flatten order: C, ph, pw)
    cpp = 3 * PATCH * PATCH
    p = images.reshape(B, 3, PATCH_GRID, PATCH, PATCH_GRID, PATCH)
    p = p.transpose(0, 2, 4, 1, 3, 5).reshape(B, NUM_PATCHES, cpp)
    # prepend a [cls]-indicator column + row so the kernel's single matmul with
    # w_ext = [cls ; patch_w] produces [cls ; patch embeddings] directly.
    p = jnp.concatenate([jnp.zeros((B, NUM_PATCHES, 1), jnp.float32), p], axis=-1)
    cls_row = jnp.zeros((B, 1, cpp + 1), jnp.float32).at[:, :, 0].set(1.0)
    patches_ext = jnp.concatenate([cls_row, p], axis=1).reshape(
        B * VIS_TOKENS, cpp + 1).astype(jnp.float32)
    v_wext = jnp.concatenate([params['v_cls'], params['v_patch_w']], axis=0)

    n_vis = B * VIS_TOKENS
    v_pos_t = jnp.tile(params['v_pos'], (B, 1))                       # (B*Tv, D)
    rv = jnp.arange(n_vis)
    v_keep = (rv[:, None] // VIS_TOKENS) == (rv[None, :] // VIS_TOKENS)
    v_bias = jnp.where(v_keep, 0.0, NEG_INF).astype(jnp.float32)      # block-diag mask
    v_cls_sel = (rv[None, :] == (jnp.arange(B) * VIS_TOKENS)[:, None]).astype(jnp.float32)

    # ---------- text preprocessing ----------
    # TODO(synk): open_clip's string tokenizer has no Pallas equivalent; this
    # path takes pre-tokenized int32 token ids of shape (B, CTX_LEN).
    n_txt = B * CTX_LEN
    tok2 = tokens.reshape(n_txt, 1).astype(jnp.int32)
    t_pos_t = jnp.tile(params['t_pos'], (B, 1))                       # (B*Tt, D)
    rt = jnp.arange(n_txt)
    same = (rt[:, None] // CTX_LEN) == (rt[None, :] // CTX_LEN)
    causal = (rt[None, :] % CTX_LEN) <= (rt[:, None] % CTX_LEN)
    t_bias = jnp.where(same & causal, 0.0, NEG_INF).astype(jnp.float32)
    eot = jnp.argmax(tokens, axis=-1)        # EOT token has the max id (open_clip)
    t_eot_sel = (rt[None, :] == (jnp.arange(B) * CTX_LEN + eot)[:, None]).astype(jnp.float32)

    inputs = ([patches_ext, v_wext, v_pos_t,
               params['v_ln_pre_g'], params['v_ln_pre_b'],
               v_bias, v_cls_sel,
               params['v_ln_post_g'], params['v_ln_post_b'], params['v_proj']]
              + _tower_block_args(params['v_blocks'])
              + [tok2, params['t_tok_emb'], t_pos_t, t_bias, t_eot_sel,
                 params['t_ln_final_g'], params['t_ln_final_b'], params['t_proj']]
              + _tower_block_args(params['t_blocks']))

    kernel = functools.partial(_clip_forward_kernel,
                               vis_heads=VIS_HEADS, vis_layers=VIS_LAYERS,
                               txt_heads=TXT_HEADS, txt_layers=TXT_LAYERS)

    # Single fused kernel: no grid, every operand lives in VMEM for the whole call.
    # TODO(synk): on v7x the image/text towers could be split across the 2 TCs
    # via core_map; at these sizes the single fused kernel is already launch-bound.
    return pl.pallas_call(
        kernel,
        out_shape=jax.ShapeDtypeStruct((B, 2 * EMBED_DIM), jnp.float32),
        in_specs=[_full_spec(a) for a in inputs],
        out_specs=pl.BlockSpec((B, 2 * EMBED_DIM), lambda: (0, 0)),
        compiler_params=pltpu.CompilerParams(vmem_limit_bytes=32 * 1024 * 1024),
    )(*inputs)


# --------------------------------------------------------------------------
# Parameter init (deterministic, synthetic); matmul weights stored in bf16,
# biases / LN params / positional embeddings in f32.
# --------------------------------------------------------------------------
def init_params(key):
    keys = iter(jax.random.split(key, 64))

    def nxt(shape, scale=0.02, dtype=jnp.float32):
        return (scale * jax.random.normal(next(keys), shape)).astype(dtype)

    def tower_blocks(layers, width):
        d = width
        return {
            'ln1_g': jnp.ones((layers, 1, d), jnp.float32),
            'ln1_b': jnp.zeros((layers, 1, d), jnp.float32),
            'wqkv': nxt((layers, d, 3 * d), dtype=jnp.bfloat16),
            'bqkv': nxt((layers, 1, 3 * d)),
            'wo': nxt((layers, d, d), dtype=jnp.bfloat16),
            'bo': nxt((layers, 1, d)),
            'ln2_g': jnp.ones((layers, 1, d), jnp.float32),
            'ln2_b': jnp.zeros((layers, 1, d), jnp.float32),
            'w1': nxt((layers, d, 4 * d), dtype=jnp.bfloat16),
            'b1': nxt((layers, 1, 4 * d)),
            'w2': nxt((layers, 4 * d, d), dtype=jnp.bfloat16),
            'b2': nxt((layers, 1, d)),
        }

    return {
        # vision tower
        'v_patch_w': nxt((3 * PATCH * PATCH, VIS_WIDTH)),
        'v_cls': nxt((1, VIS_WIDTH)),
        'v_pos': nxt((VIS_TOKENS, VIS_WIDTH)),
        'v_ln_pre_g': jnp.ones((1, VIS_WIDTH), jnp.float32),
        'v_ln_pre_b': jnp.zeros((1, VIS_WIDTH), jnp.float32),
        'v_blocks': tower_blocks(VIS_LAYERS, VIS_WIDTH),
        'v_ln_post_g': jnp.ones((1, VIS_WIDTH), jnp.float32),
        'v_ln_post_b': jnp.zeros((1, VIS_WIDTH), jnp.float32),
        'v_proj': nxt((VIS_WIDTH, EMBED_DIM), dtype=jnp.bfloat16),
        # text tower
        't_tok_emb': nxt((VOCAB, TXT_WIDTH), dtype=jnp.bfloat16),
        't_pos': nxt((CTX_LEN, TXT_WIDTH)),
        't_blocks': tower_blocks(TXT_LAYERS, TXT_WIDTH),
        't_ln_final_g': jnp.ones((1, TXT_WIDTH), jnp.float32),
        't_ln_final_b': jnp.zeros((1, TXT_WIDTH), jnp.float32),
        't_proj': nxt((TXT_WIDTH, EMBED_DIM), dtype=jnp.bfloat16),
    }


# --------------------------------------------------------------------------
if __name__ == "__main__":
    key = jax.random.PRNGKey(0)
    kp, ki, kt = jax.random.split(key, 3)

    params = init_params(kp)

    B = 2
    images = jax.random.uniform(ki, (B, 3, 20, 20), jnp.float32,
                                minval=0.0, maxval=255.0)        # raw pixels, div255=True
    tokens = jax.random.randint(kt, (B, CTX_LEN), 1, VOCAB - 2).astype(jnp.int32)
    tokens = tokens.at[:, CTX_LEN - 3].set(VOCAB - 1)            # plant an "EOT" token

    out = clip_forward(params, images, tokens, div255=True)
    out = jax.block_until_ready(out)

    assert out.shape == (B, 2 * EMBED_DIM), out.shape
    assert bool(jnp.all(jnp.isfinite(out)))
    print("KERNEL_OK")
</pallas_src>

<mosaic_0001>
module attributes {stable_mosaic.version = 11 : i64} {
  func.func @_clip_forward_kernel(%arg0: memref<34x49xf32, #tpu.memory_space<vmem>>, %arg1: memref<49x128xf32, #tpu.memory_space<vmem>>, %arg2: memref<34x128xf32, #tpu.memory_space<vmem>>, %arg3: memref<1x128xf32, #tpu.memory_space<vmem>>, %arg4: memref<1x128xf32, #tpu.memory_space<vmem>>, %arg5: memref<34x34xf32, #tpu.memory_space<vmem>>, %arg6: memref<2x34xf32, #tpu.memory_space<vmem>>, %arg7: memref<1x128xf32, #tpu.memory_space<vmem>>, %arg8: memref<1x128xf32, #tpu.memory_space<vmem>>, %arg9: memref<128x64xbf16, #tpu.memory_space<vmem>>, %arg10: memref<2x1x128xf32, #tpu.memory_space<vmem>>, %arg11: memref<2x1x128xf32, #tpu.memory_space<vmem>>, %arg12: memref<2x128x384xbf16, #tpu.memory_space<vmem>>, %arg13: memref<2x1x384xf32, #tpu.memory_space<vmem>>, %arg14: memref<2x128x128xbf16, #tpu.memory_space<vmem>>, %arg15: memref<2x1x128xf32, #tpu.memory_space<vmem>>, %arg16: memref<2x1x128xf32, #tpu.memory_space<vmem>>, %arg17: memref<2x1x128xf32, #tpu.memory_space<vmem>>, %arg18: memref<2x128x512xbf16, #tpu.memory_space<vmem>>, %arg19: memref<2x1x512xf32, #tpu.memory_space<vmem>>, %arg20: memref<2x512x128xbf16, #tpu.memory_space<vmem>>, %arg21: memref<2x1x128xf32, #tpu.memory_space<vmem>>, %arg22: memref<16x1xi32, #tpu.memory_space<vmem>>, %arg23: memref<64x128xbf16, #tpu.memory_space<vmem>>, %arg24: memref<16x128xf32, #tpu.memory_space<vmem>>, %arg25: memref<16x16xf32, #tpu.memory_space<vmem>>, %arg26: memref<2x16xf32, #tpu.memory_space<vmem>>, %arg27: memref<1x128xf32, #tpu.memory_space<vmem>>, %arg28: memref<1x128xf32, #tpu.memory_space<vmem>>, %arg29: memref<128x64xbf16, #tpu.memory_space<vmem>>, %arg30: memref<2x1x128xf32, #tpu.memory_space<vmem>>, %arg31: memref<2x1x128xf32, #tpu.memory_space<vmem>>, %arg32: memref<2x128x384xbf16, #tpu.memory_space<vmem>>, %arg33: memref<2x1x384xf32, #tpu.memory_space<vmem>>, %arg34: memref<2x128x128xbf16, #tpu.memory_space<vmem>>, %arg35: memref<2x1x128xf32, #tpu.memory_space<vmem>>, %arg36: memref<2x1x128xf32, #tpu.memory_space<vmem>>, %arg37: memref<2x1x128xf32, #tpu.memory_space<vmem>>, %arg38: memref<2x128x512xbf16, #tpu.memory_space<vmem>>, %arg39: memref<2x1x512xf32, #tpu.memory_space<vmem>>, %arg40: memref<2x512x128xbf16, #tpu.memory_space<vmem>>, %arg41: memref<2x1x128xf32, #tpu.memory_space<vmem>>, %arg42: memref<2x128xf32, #tpu.memory_space<vmem>>) attributes {dimension_semantics = [], scalar_prefetch = 0 : i64, scratch_operands = 0 : i64, tpu.core_type = #tpu.core_type<tc>} {
    %c0 = arith.constant 0 : index
    %c0_0 = arith.constant 0 : index
    %0 = vector.load %arg0[%c0, %c0_0] : memref<34x49xf32, #tpu.memory_space<vmem>>, vector<34x49xf32>
    %c0_1 = arith.constant 0 : index
    %c0_2 = arith.constant 0 : index
    %1 = vector.load %arg1[%c0_1, %c0_2] : memref<49x128xf32, #tpu.memory_space<vmem>>, vector<49x128xf32>
    %2 = arith.truncf %0 : vector<34x49xf32> to vector<34x49xbf16>
    %3 = arith.truncf %1 : vector<49x128xf32> to vector<49x128xbf16>
    %cst = arith.constant dense<0.000000e+00> : vector<34x128xf32>
    %4 = tpu.matmul %2, %3, %cst {dimension_numbers = #tpu.dot_dimension_numbers<[1], [0], [0], [1], [0, 0, 1, 1], [], []>} : vector<34x49xbf16>, vector<49x128xbf16>, vector<34x128xf32> -> vector<34x128xf32>
    %c0_3 = arith.constant 0 : index
    %c0_4 = arith.constant 0 : index
    %5 = vector.load %arg2[%c0_3, %c0_4] : memref<34x128xf32, #tpu.memory_space<vmem>>, vector<34x128xf32>
    %6 = arith.addf %4, %5 : vector<34x128xf32>
    %c0_5 = arith.constant 0 : index
    %c0_6 = arith.constant 0 : index
    %7 = vector.load %arg3[%c0_5, %c0_6] : memref<1x128xf32, #tpu.memory_space<vmem>>, vector<1x128xf32>
    %c0_7 = arith.constant 0 : index
    %c0_8 = arith.constant 0 : index
    %8 = vector.load %arg4[%c0_7, %c0_8] : memref<1x128xf32, #tpu.memory_space<vmem>>, vector<1x128xf32>
    %cst_9 = arith.constant dense<0.000000e+00> : vector<34xf32>
    %9 = vector.multi_reduction <add>, %6, %cst_9 [1] : vector<34x128xf32> to vector<34xf32>
    %10 = vector.shape_cast %9 : vector<34xf32> to vector<34x1xf32>
    %cst_10 = arith.constant 1.280000e+02 : f32
    %11 = vector.broadcast %cst_10 : f32 to vector<34x1xf32>
    %12 = arith.divf %10, %11 : vector<34x1xf32>
    %13 = vector.broadcast %12 : vector<34x1xf32> to vector<34x128xf32>
    %14 = arith.subf %6, %13 : vector<34x128xf32>
    %15 = arith.mulf %14, %14 : vector<34x128xf32>
    %cst_11 = arith.constant dense<0.000000e+00> : vector<34xf32>
    %16 = vector.multi_reduction <add>, %15, %cst_11 [1] : vector<34x128xf32> to vector<34xf32>
    %17 = vector.shape_cast %16 : vector<34xf32> to vector<34x1xf32>
    %cst_12 = arith.constant 1.280000e+02 : f32
    %18 = vector.broadcast %cst_12 : f32 to vector<34x1xf32>
    %19 = arith.divf %17, %18 : vector<34x1xf32>
    %20 = vector.broadcast %12 : vector<34x1xf32> to vector<34x128xf32>
    %21 = arith.subf %6, %20 : vector<34x128xf32>
    %cst_13 = arith.constant 9.99999974E-6 : f32
    %22 = vector.broadcast %cst_13 : f32 to vector<34x1xf32>
    %23 = arith.addf %19, %22 : vector<34x1xf32>
    %24 = math.rsqrt %23 : vector<34x1xf32>
    %25 = vector.broadcast %24 : vector<34x1xf32> to vector<34x128xf32>
    %26 = arith.mulf %21, %25 : vector<34x128xf32>
    %27 = vector.broadcast %7 : vector<1x128xf32> to vector<34x128xf32>
    %28 = arith.mulf %26, %27 : vector<34x128xf32>
    %29 = vector.broadcast %8 : vector<1x128xf32> to vector<34x128xf32>
    %30 = arith.addf %28, %29 : vector<34x128xf32>
    %c0_14 = arith.constant 0 : index
    %c0_15 = arith.constant 0 : index
    %31 = vector.load %arg5[%c0_14, %c0_15] : memref<34x34xf32, #tpu.memory_space<vmem>>, vector<34x34xf32>
    %c0_16 = arith.constant 0 : index
    %c0_17 = arith.constant 0 : index
    %c0_18 = arith.constant 0 : index
    %32 = vector.load %arg10[%c0_16, %c0_17, %c0_18] : memref<2x1x128xf32, #tpu.memory_space<vmem>>, vector<1x1x128xf32>
    %33 = vector.shape_cast %32 : vector<1x1x128xf32> to vector<1x128xf32>
    %c0_19 = arith.constant 0 : index
    %c0_20 = arith.constant 0 : index
    %c0_21 = arith.constant 0 : index
    %34 = vector.load %arg11[%c0_19, %c0_20, %c0_21] : memref<2x1x128xf32, #tpu.memory_space<vmem>>, vector<1x1x128xf32>
    %35 = vector.shape_cast %34 : vector<1x1x128xf32> to vector<1x128xf32>
    %cst_22 = arith.constant dense<0.000000e+00> : vector<34xf32>
    %36 = vector.multi_reduction <add>, %30, %cst_22 [1] : vector<34x128xf32> to vector<34xf32>
    %37 = vector.shape_cast %36 : vector<34xf32> to vector<34x1xf32>
    %cst_23 = arith.constant 1.280000e+02 : f32
    %38 = vector.broadcast %cst_23 : f32 to vector<34x1xf32>
    %39 = arith.divf %37, %38 : vector<34x1xf32>
    %40 = vector.broadcast %39 : vector<34x1xf32> to vector<34x128xf32>
    %41 = arith.subf %30, %40 : vector<34x128xf32>
    %42 = arith.mulf %41, %41 : vector<34x128xf32>
    %cst_24 = arith.constant dense<0.000000e+00> : vector<34xf32>
    %43 = vector.multi_reduction <add>, %42, %cst_24 [1] : vector<34x128xf32> to vector<34xf32>
    %44 = vector.shape_cast %43 : vector<34xf32> to vector<34x1xf32>
    %cst_25 = arith.constant 1.280000e+02 : f32
    %45 = vector.broadcast %cst_25 : f32 to vector<34x1xf32>
    %46 = arith.divf %44, %45 : vector<34x1xf32>
    %47 = vector.broadcast %39 : vector<34x1xf32> to vector<34x128xf32>
    %48 = arith.subf %30, %47 : vector<34x128xf32>
    %cst_26 = arith.constant 9.99999974E-6 : f32
    %49 = vector.broadcast %cst_26 : f32 to vector<34x1xf32>
    %50 = arith.addf %46, %49 : vector<34x1xf32>
    %51 = math.rsqrt %50 : vector<34x1xf32>
    %52 = vector.broadcast %51 : vector<34x1xf32> to vector<34x128xf32>
    %53 = arith.mulf %48, %52 : vector<34x128xf32>
    %54 = vector.broadcast %33 : vector<1x128xf32> to vector<34x128xf32>
    %55 = arith.mulf %53, %54 : vector<34x128xf32>
    %56 = vector.broadcast %35 : vector<1x128xf32> to vector<34x128xf32>
    %57 = arith.addf %55, %56 : vector<34x128xf32>
    %c0_27 = arith.constant 0 : index
    %c0_28 = arith.constant 0 : index
    %c0_29 = arith.constant 0 : index
    %58 = vector.load %arg12[%c0_27, %c0_28, %c0_29] : memref<2x128x384xbf16, #tpu.memory_space<vmem>>, vector<1x128x384xbf16>
    %59 = vector.shape_cast %58 : vector<1x128x384xbf16> to vector<128x384xbf16>
    %60 = arith.truncf %57 : vector<34x128xf32> to vector<34x128xbf16>
    %cst_30 = arith.constant dense<0.000000e+00> : vector<34x384xf32>
    %61 = tpu.matmul %60, %59, %cst_30 {dimension_numbers = #tpu.dot_dimension_numbers<[1], [0], [0], [1], [0, 0, 1, 1], [], []>} : vector<34x128xbf16>, vector<128x384xbf16>, vector<34x384xf32> -> vector<34x384xf32>
    %c0_31 = arith.constant 0 : index
    %c0_32 = arith.constant 0 : index
    %c0_33 = arith.constant 0 : index
    %62 = vector.load %arg13[%c0_31, %c0_32, %c0_33] : memref<2x1x384xf32, #tpu.memory_space<vmem>>, vector<1x1x384xf32>
    %63 = vector.shape_cast %62 : vector<1x1x384xf32> to vector<1x384xf32>
    %64 = vector.broadcast %63 : vector<1x384xf32> to vector<34x384xf32>
    %65 = arith.addf %61, %64 : vector<34x384xf32>
    %66 = vector.extract_strided_slice %65 {offsets = [0, 0], sizes = [34, 32], strides = [1, 1]} : vector<34x384xf32> to vector<34x32xf32>
    %67 = vector.extract_strided_slice %65 {offsets = [0, 128], sizes = [34, 32], strides = [1, 1]} : vector<34x384xf32> to vector<34x32xf32>
    %68 = vector.extract_strided_slice %65 {offsets = [0, 256], sizes = [34, 32], strides = [1, 1]} : vector<34x384xf32> to vector<34x32xf32>
    %69 = arith.truncf %66 : vector<34x32xf32> to vector<34x32xbf16>
    %70 = arith.truncf %67 : vector<34x32xf32> to vector<34x32xbf16>
    %cst_34 = arith.constant dense<0.000000e+00> : vector<34x34xf32>
    %71 = tpu.matmul %69, %70, %cst_34 {dimension_numbers = #tpu.dot_dimension_numbers<[1], [1], [0], [0], [0, 0, 1, 0], [], []>} : vector<34x32xbf16>, vector<34x32xbf16>, vector<34x34xf32> -> vector<34x34xf32>
    %cst_35 = arith.constant 0.176776692 : f32
    %72 = vector.broadcast %cst_35 : f32 to vector<34x34xf32>
    %73 = arith.mulf %71, %72 : vector<34x34xf32>
    %74 = arith.addf %73, %31 : vector<34x34xf32>
    %cst_36 = arith.constant dense<0xFF800000> : vector<34xf32>
    %75 = vector.multi_reduction <maximumf>, %74, %cst_36 [1] : vector<34x34xf32> to vector<34xf32>
    %76 = vector.shape_cast %75 : vector<34xf32> to vector<34x1xf32>
    %77 = vector.broadcast %76 : vector<34x1xf32> to vector<34x34xf32>
    %78 = arith.subf %74, %77 : vector<34x34xf32>
    %79 = math.exp %78 : vector<34x34xf32>
    %cst_37 = arith.constant dense<0.000000e+00> : vector<34xf32>
    %80 = vector.multi_reduction <add>, %79, %cst_37 [1] : vector<34x34xf32> to vector<34xf32>
    %81 = vector.shape_cast %80 : vector<34xf32> to vector<34x1xf32>
    %82 = tpu.reciprocal %81 {approx = true} : vector<34x1xf32> -> vector<34x1xf32>
    %83 = vector.broadcast %82 : vector<34x1xf32> to vector<34x34xf32>
    %84 = arith.mulf %79, %83 : vector<34x34xf32>
    %85 = arith.truncf %84 : vector<34x34xf32> to vector<34x34xbf16>
    %86 = arith.truncf %68 : vector<34x32xf32> to vector<34x32xbf16>
    %cst_38 = arith.constant dense<0.000000e+00> : vector<34x32xf32>
    %87 = tpu.matmul %85, %86, %cst_38 {dimension_numbers = #tpu.dot_dimension_numbers<[1], [0], [0], [1], [0, 0, 1, 1], [], []>} : vector<34x34xbf16>, vector<34x32xbf16>, vector<34x32xf32> -> vector<34x32xf32>
    %88 = vector.extract_strided_slice %65 {offsets = [0, 32], sizes = [34, 32], strides = [1, 1]} : vector<34x384xf32> to vector<34x32xf32>
    %89 = vector.extract_strided_slice %65 {offsets = [0, 160], sizes = [34, 32], strides = [1, 1]} : vector<34x384xf32> to vector<34x32xf32>
    %90 = vector.extract_strided_slice %65 {offsets = [0, 288], sizes = [34, 32], strides = [1, 1]} : vector<34x384xf32> to vector<34x32xf32>
    %91 = arith.truncf %88 : vector<34x32xf32> to vector<34x32xbf16>
    %92 = arith.truncf %89 : vector<34x32xf32> to vector<34x32xbf16>
    %cst_39 = arith.constant dense<0.000000e+00> : vector<34x34xf32>
    %93 = tpu.matmul %91, %92, %cst_39 {dimension_numbers = #tpu.dot_dimension_numbers<[1], [1], [0], [0], [0, 0, 1, 0], [], []>} : vector<34x32xbf16>, vector<34x32xbf16>, vector<34x34xf32> -> vector<34x34xf32>
    %cst_40 = arith.constant 0.176776692 : f32
    %94 = vector.broadcast %cst_40 : f32 to vector<34x34xf32>
    %95 = arith.mulf %93, %94 : vector<34x34xf32>
    %96 = arith.addf %95, %31 : vector<34x34xf32>
    %cst_41 = arith.constant dense<0xFF800000> : vector<34xf32>
    %97 = vector.multi_reduction <maximumf>, %96, %cst_41 [1] : vector<34x34xf32> to vector<34xf32>
    %98 = vector.shape_cast %97 : vector<34xf32> to vector<34x1xf32>
    %99 = vector.broadcast %98 : vector<34x1xf32> to vector<34x34xf32>
    %100 = arith.subf %96, %99 : vector<34x34xf32>
    %101 = math.exp %100 : vector<34x34xf32>
    %cst_42 = arith.constant dense<0.000000e+00> : vector<34xf32>
    %102 = vector.multi_reduction <add>, %101, %cst_42 [1] : vector<34x34xf32> to vector<34xf32>
    %103 = vector.shape_cast %102 : vector<34xf32> to vector<34x1xf32>
    %104 = tpu.reciprocal %103 {approx = true} : vector<34x1xf32> -> vector<34x1xf32>
    %105 = vector.broadcast %104 : vector<34x1xf32> to vector<34x34xf32>
    %106 = arith.mulf %101, %105 : vector<34x34xf32>
    %107 = arith.truncf %106 : vector<34x34xf32> to vector<34x34xbf16>
    %108 = arith.truncf %90 : vector<34x32xf32> to vector<34x32xbf16>
    %cst_43 = arith.constant dense<0.000000e+00> : vector<34x32xf32>
    %109 = tpu.matmul %107, %108, %cst_43 {dimension_numbers = #tpu.dot_dimension_numbers<[1], [0], [0], [1], [0, 0, 1, 1], [], []>} : vector<34x34xbf16>, vector<34x32xbf16>, vector<34x32xf32> -> vector<34x32xf32>
    %110 = vector.extract_strided_slice %65 {offsets = [0, 64], sizes = [34, 32], strides = [1, 1]} : vector<34x384xf32> to vector<34x32xf32>
    %111 = vector.extract_strided_slice %65 {offsets = [0, 192], sizes = [34, 32], strides = [1, 1]} : vector<34x384xf32> to vector<34x32xf32>
    %112 = vector.extract_strided_slice %65 {offsets = [0, 320], sizes = [34, 32], strides = [1, 1]} : vector<34x384xf32> to vector<34x32xf32>
    %113 = arith.truncf %110 : vector<34x32xf32> to vector<34x32xbf16>
    %114 = arith.truncf %111 : vector<34x32xf32> to vector<34x32xbf16>
    %cst_44 = arith.constant dense<0.000000e+00> : vector<34x34xf32>
    %115 = tpu.matmul %113, %114, %cst_44 {dimension_numbers = #tpu.dot_dimension_numbers<[1], [1], [0], [0], [0, 0, 1, 0], [], []>} : vector<34x32xbf16>, vector<34x32xbf16>, vector<34x34xf32> -> vector<34x34xf32>
    %cst_45 = arith.constant 0.176776692 : f32
    %116 = vector.broadcast %cst_45 : f32 to vector<34x34xf32>
    %117 = arith.mulf %115, %116 : vector<34x34xf32>
    %118 = arith.addf %117, %31 : vector<34x34xf32>
    %cst_46 = arith.constant dense<0xFF800000> : vector<34xf32>
    %119 = vector.multi_reduction <maximumf>, %118, %cst_46 [1] : vector<34x34xf32> to vector<34xf32>
    %120 = vector.shape_cast %119 : vector<34xf32> to vector<34x1xf32>
    %121 = vector.broadcast %120 : vector<34x1xf32> to vector<34x34xf32>
    %122 = arith.subf %118, %121 : vector<34x34xf32>
    %123 = math.exp %122 : vector<34x34xf32>
    %cst_47 = arith.constant dense<0.000000e+00> : vector<34xf32>
    %124 = vector.multi_reduction <add>, %123, %cst_47 [1] : vector<34x34xf32> to vector<34xf32>
    %125 = vector.shape_cast %124 : vector<34xf32> to vector<34x1xf32>
    %126 = tpu.reciprocal %125 {approx = true} : vector<34x1xf32> -> vector<34x1xf32>
    %127 = vector.broadcast %126 : vector<34x1xf32> to vector<34x34xf32>
    %128 = arith.mulf %123, %127 : vector<34x34xf32>
    %129 = arith.truncf %128 : vector<34x34xf32> to vector<34x34xbf16>
    %130 = arith.truncf %112 : vector<34x32xf32> to vector<34x32xbf16>
    %cst_48 = arith.constant dense<0.000000e+00> : vector<34x32xf32>
    %131 = tpu.matmul %129, %130, %cst_48 {dimension_numbers = #tpu.dot_dimension_numbers<[1], [0], [0], [1], [0, 0, 1, 1], [], []>} : vector<34x34xbf16>, vector<34x32xbf16>, vector<34x32xf32> -> vector<34x32xf32>
    %132 = vector.extract_strided_slice %65 {offsets = [0, 96], sizes = [34, 32], strides = [1, 1]} : vector<34x384xf32> to vector<34x32xf32>
    %133 = vector.extract_strided_slice %65 {offsets = [0, 224], sizes = [34, 32], strides = [1, 1]} : vector<34x384xf32> to vector<34x32xf32>
    %134 = vector.extract_strided_slice %65 {offsets = [0, 352], sizes = [34, 32], strides = [1, 1]} : vector<34x384xf32> to vector<34x32xf32>
    %135 = arith.truncf %132 : vector<34x32xf32> to vector<34x32xbf16>
    %136 = arith.truncf %133 : vector<34x32xf32> to vector<34x32xbf16>
    %cst_49 = arith.constant dense<0.000000e+00> : vector<34x34xf32>
    %137 = tpu.matmul %135, %136, %cst_49 {dimension_numbers = #tpu.dot_dimension_numbers<[1], [1], [0], [0], [0, 0, 1, 0], [], []>} : vector<34x32xbf16>, vector<34x32xbf16>, vector<34x34xf32> -> vector<34x34xf32>
    %cst_50 = arith.constant 0.176776692 : f32
    %138 = vector.broadcast %cst_50 : f32 to vector<34x34xf32>
    %139 = arith.mulf %137, %138 : vector<34x34xf32>
    %140 = arith.addf %139, %31 : vector<34x34xf32>
    %cst_51 = arith.constant dense<0xFF800000> : vector<34xf32>
    %141 = vector.multi_reduction <maximumf>, %140, %cst_51 [1] : vector<34x34xf32> to vector<34xf32>
    %142 = vector.shape_cast %141 : vector<34xf32> to vector<34x1xf32>
    %143 = vector.broadcast %142 : vector<34x1xf32> to vector<34x34xf32>
    %144 = arith.subf %140, %143 : vector<34x34xf32>
    %145 = math.exp %144 : vector<34x34xf32>
    %cst_52 = arith.constant dense<0.000000e+00> : vector<34xf32>
    %146 = vector.multi_reduction <add>, %145, %cst_52 [1] : vector<34x34xf32> to vector<34xf32>
    %147 = vector.shape_cast %146 : vector<34xf32> to vector<34x1xf32>
    %148 = tpu.reciprocal %147 {approx = true} : vector<34x1xf32> -> vector<34x1xf32>
    %149 = vector.broadcast %148 : vector<34x1xf32> to vector<34x34xf32>
    %150 = arith.mulf %145, %149 : vector<34x34xf32>
    %151 = arith.truncf %150 : vector<34x34xf32> to vector<34x34xbf16>
    %152 = arith.truncf %134 : vector<34x32xf32> to vector<34x32xbf16>
    %cst_53 = arith.constant dense<0.000000e+00> : vector<34x32xf32>
    %153 = tpu.matmul %151, %152, %cst_53 {dimension_numbers = #tpu.dot_dimension_numbers<[1], [0], [0], [1], [0, 0, 1, 1], [], []>} : vector<34x34xbf16>, vector<34x32xbf16>, vector<34x32xf32> -> vector<34x32xf32>
    %154 = tpu.concatenate %87, %109, %131, %153 in 1 : vector<34x32xf32>, vector<34x32xf32>, vector<34x32xf32>, vector<34x32xf32> -> vector<34x128xf32>
    %c0_54 = arith.constant 0 : index
    %c0_55 = arith.constant 0 : index
    %c0_56 = arith.constant 0 : index
    %155 = vector.load %arg14[%c0_54, %c0_55, %c0_56] : memref<2x128x128xbf16, #tpu.memory_space<vmem>>, vector<1x128x128xbf16>
    %156 = vector.shape_cast %155 : vector<1x128x128xbf16> to vector<128x128xbf16>
    %157 = arith.truncf %154 : vector<34x128xf32> to vector<34x128xbf16>
    %cst_57 = arith.constant dense<0.000000e+00> : vector<34x128xf32>
    %158 = tpu.matmul %157, %156, %cst_57 {dimension_numbers = #tpu.dot_dimension_numbers<[1], [0], [0], [1], [0, 0, 1, 1], [], []>} : vector<34x128xbf16>, vector<128x128xbf16>, vector<34x128xf32> -> vector<34x128xf32>
    %159 = arith.addf %30, %158 : vector<34x128xf32>
    %c0_58 = arith.constant 0 : index
    %c0_59 = arith.constant 0 : index
    %c0_60 = arith.constant 0 : index
    %160 = vector.load %arg15[%c0_58, %c0_59, %c0_60] : memref<2x1x128xf32, #tpu.memory_space<vmem>>, vector<1x1x128xf32>
    %161 = vector.shape_cast %160 : vector<1x1x128xf32> to vector<1x128xf32>
    %162 = vector.broadcast %161 : vector<1x128xf32> to vector<34x128xf32>
    %163 = arith.addf %159, %162 : vector<34x128xf32>
    %c0_61 = arith.constant 0 : index
    %c0_62 = arith.constant 0 : index
    %c0_63 = arith.constant 0 : index
    %164 = vector.load %arg16[%c0_61, %c0_62, %c0_63] : memref<2x1x128xf32, #tpu.memory_space<vmem>>, vector<1x1x128xf32>
    %165 = vector.shape_cast %164 : vector<1x1x128xf32> to vector<1x128xf32>
    %c0_64 = arith.constant 0 : index
    %c0_65 = arith.constant 0 : index
    %c0_66 = arith.constant 0 : index
    %166 = vector.load %arg17[%c0_64, %c0_65, %c0_66] : memref<2x1x128xf32, #tpu.memory_space<vmem>>, vector<1x1x128xf32>
    %167 = vector.shape_cast %166 : vector<1x1x128xf32> to vector<1x128xf32>
    %cst_67 = arith.constant dense<0.000000e+00> : vector<34xf32>
    %168 = vector.multi_reduction <add>, %163, %cst_67 [1] : vector<34x128xf32> to vector<34xf32>
    %169 = vector.shape_cast %168 : vector<34xf32> to vector<34x1xf32>
    %cst_68 = arith.constant 1.280000e+02 : f32
    %170 = vector.broadcast %cst_68 : f32 to vector<34x1xf32>
    %171 = arith.divf %169, %170 : vector<34x1xf32>
    %172 = vector.broadcast %171 : vector<34x1xf32> to vector<34x128xf32>
    %173 = arith.subf %163, %172 : vector<34x128xf32>
    %174 = arith.mulf %173, %173 : vector<34x128xf32>
    %cst_69 = arith.constant dense<0.000000e+00> : vector<34xf32>
    %175 = vector.multi_reduction <add>, %174, %cst_69 [1] : vector<34x128xf32> to vector<34xf32>
    %176 = vector.shape_cast %175 : vector<34xf32> to vector<34x1xf32>
    %cst_70 = arith.constant 1.280000e+02 : f32
    %177 = vector.broadcast %cst_70 : f32 to vector<34x1xf32>
    %178 = arith.divf %176, %177 : vector<34x1xf32>
    %179 = vector.broadcast %171 : vector<34x1xf32> to vector<34x128xf32>
    %180 = arith.subf %163, %179 : vector<34x128xf32>
    %cst_71 = arith.constant 9.99999974E-6 : f32
    %181 = vector.broadcast %cst_71 : f32 to vector<34x1xf32>
    %182 = arith.addf %178, %181 : vector<34x1xf32>
    %183 = math.rsqrt %182 : vector<34x1xf32>
    %184 = vector.broadcast %183 : vector<34x1xf32> to vector<34x128xf32>
    %185 = arith.mulf %180, %184 : vector<34x128xf32>
    %186 = vector.broadcast %165 : vector<1x128xf32> to vector<34x128xf32>
    %187 = arith.mulf %185, %186 : vector<34x128xf32>
    %188 = vector.broadcast %167 : vector<1x128xf32> to vector<34x128xf32>
    %189 = arith.addf %187, %188 : vector<34x128xf32>
    %c0_72 = arith.constant 0 : index
    %c0_73 = arith.constant 0 : index
    %c0_74 = arith.constant 0 : index
    %190 = vector.load %arg18[%c0_72, %c0_73, %c0_74] : memref<2x128x512xbf16, #tpu.memory_space<vmem>>, vector<1x128x512xbf16>
    %191 = vector.shape_cast %190 : vector<1x128x512xbf16> to vector<128x512xbf16>
    %192 = arith.truncf %189 : vector<34x128xf32> to vector<34x128xbf16>
    %cst_75 = arith.constant dense<0.000000e+00> : vector<34x512xf32>
    %193 = tpu.matmul %192, %191, %cst_75 {dimension_numbers = #tpu.dot_dimension_numbers<[1], [0], [0], [1], [0, 0, 1, 1], [], []>} : vector<34x128xbf16>, vector<128x512xbf16>, vector<34x512xf32> -> vector<34x512xf32>
    %c0_76 = arith.constant 0 : index
    %c0_77 = arith.constant 0 : index
    %c0_78 = arith.constant 0 : index
    %194 = vector.load %arg19[%c0_76, %c0_77, %c0_78] : memref<2x1x512xf32, #tpu.memory_space<vmem>>, vector<1x1x512xf32>
    %195 = vector.shape_cast %194 : vector<1x1x512xf32> to vector<1x512xf32>
    %196 = vector.broadcast %195 : vector<1x512xf32> to vector<34x512xf32>
    %197 = arith.addf %193, %196 : vector<34x512xf32>
    %cst_79 = arith.constant 1.702000e+00 : f32
    %198 = vector.broadcast %cst_79 : f32 to vector<34x512xf32>
    %199 = arith.mulf %198, %197 : vector<34x512xf32>
    %200 = arith.negf %199 : vector<34x512xf32>
    %201 = math.exp %200 : vector<34x512xf32>
    %cst_80 = arith.constant 1.000000e+00 : f32
    %202 = vector.broadcast %cst_80 : f32 to vector<34x512xf32>
    %203 = arith.addf %202, %201 : vector<34x512xf32>
    %204 = arith.divf %202, %203 : vector<34x512xf32>
    %205 = arith.mulf %197, %204 : vector<34x512xf32>
    %c0_81 = arith.constant 0 : index
    %c0_82 = arith.constant 0 : index
    %c0_83 = arith.constant 0 : index
    %206 = vector.load %arg20[%c0_81, %c0_82, %c0_83] : memref<2x512x128xbf16, #tpu.memory_space<vmem>>, vector<1x512x128xbf16>
    %207 = vector.shape_cast %206 : vector<1x512x128xbf16> to vector<512x128xbf16>
    %208 = arith.truncf %205 : vector<34x512xf32> to vector<34x512xbf16>
    %cst_84 = arith.constant dense<0.000000e+00> : vector<34x128xf32>
    %209 = tpu.matmul %208, %207, %cst_84 {dimension_numbers = #tpu.dot_dimension_numbers<[1], [0], [0], [1], [0, 0, 1, 1], [], []>} : vector<34x512xbf16>, vector<512x128xbf16>, vector<34x128xf32> -> vector<34x128xf32>
    %210 = arith.addf %163, %209 : vector<34x128xf32>
    %c0_85 = arith.constant 0 : index
    %c0_86 = arith.constant 0 : index
    %c0_87 = arith.constant 0 : index
    %211 = vector.load %arg21[%c0_85, %c0_86, %c0_87] : memref<2x1x128xf32, #tpu.memory_space<vmem>>, vector<1x1x128xf32>
    %212 = vector.shape_cast %211 : vector<1x1x128xf32> to vector<1x128xf32>
    %213 = vector.broadcast %212 : vector<1x128xf32> to vector<34x128xf32>
    %214 = arith.addf %210, %213 : vector<34x128xf32>
    %c1 = arith.constant 1 : index
    %c0_88 = arith.constant 0 : index
    %c0_89 = arith.constant 0 : index
    %215 = vector.load %arg10[%c1, %c0_88, %c0_89] : memref<2x1x128xf32, #tpu.memory_space<vmem>>, vector<1x1x128xf32>
    %216 = vector.shape_cast %215 : vector<1x1x128xf32> to vector<1x128xf32>
    %c1_90 = arith.constant 1 : index
    %c0_91 = arith.constant 0 : index
    %c0_92 = arith.constant 0 : index
    %217 = vector.load %arg11[%c1_90, %c0_91, %c0_92] : memref<2x1x128xf32, #tpu.memory_space<vmem>>, vector<1x1x128xf32>
    %218 = vector.shape_cast %217 : vector<1x1x128xf32> to vector<1x128xf32>
    %cst_93 = arith.constant dense<0.000000e+00> : vector<34xf32>
    %219 = vector.multi_reduction <add>, %214, %cst_93 [1] : vector<34x128xf32> to vector<34xf32>
    %220 = vector.shape_cast %219 : vector<34xf32> to vector<34x1xf32>
    %cst_94 = arith.constant 1.280000e+02 : f32
    %221 = vector.broadcast %cst_94 : f32 to vector<34x1xf32>
    %222 = arith.divf %220, %221 : vector<34x1xf32>
    %223 = vector.broadcast %222 : vector<34x1xf32> to vector<34x128xf32>
    %224 = arith.subf %214, %223 : vector<34x128xf32>
    %225 = arith.mulf %224, %224 : vector<34x128xf32>
    %cst_95 = arith.constant dense<0.000000e+00> : vector<34xf32>
    %226 = vector.multi_reduction <add>, %225, %cst_95 [1] : vector<34x128xf32> to vector<34xf32>
    %227 = vector.shape_cast %226 : vector<34xf32> to vector<34x1xf32>
    %cst_96 = arith.constant 1.280000e+02 : f32
    %228 = vector.broadcast %cst_96 : f32 to vector<34x1xf32>
    %229 = arith.divf %227, %228 : vector<34x1xf32>
    %230 = vector.broadcast %222 : vector<34x1xf32> to vector<34x128xf32>
    %231 = arith.subf %214, %230 : vector<34x128xf32>
    %cst_97 = arith.constant 9.99999974E-6 : f32
    %232 = vector.broadcast %cst_97 : f32 to vector<34x1xf32>
    %233 = arith.addf %229, %232 : vector<34x1xf32>
    %234 = math.rsqrt %233 : vector<34x1xf32>
    %235 = vector.broadcast %234 : vector<34x1xf32> to vector<34x128xf32>
    %236 = arith.mulf %231, %235 : vector<34x128xf32>
    %237 = vector.broadcast %216 : vector<1x128xf32> to vector<34x128xf32>
    %238 = arith.mulf %236, %237 : vector<34x128xf32>
    %239 = vector.broadcast %218 : vector<1x128xf32> to vector<34x128xf32>
    %240 = arith.addf %238, %239 : vector<34x128xf32>
    %c1_98 = arith.constant 1 : index
    %c0_99 = arith.constant 0 : index
    %c0_100 = arith.constant 0 : index
    %241 = vector.load %arg12[%c1_98, %c0_99, %c0_100] : memref<2x128x384xbf16, #tpu.memory_space<vmem>>, vector<1x128x384xbf16>
    %242 = vector.shape_cast %241 : vector<1x128x384xbf16> to vector<128x384xbf16>
    %243 = arith.truncf %240 : vector<34x128xf32> to vector<34x128xbf16>
    %cst_101 = arith.constant dense<0.000000e+00> : vector<34x384xf32>
    %244 = tpu.matmul %243, %242, %cst_101 {dimension_numbers = #tpu.dot_dimension_numbers<[1], [0], [0], [1], [0, 0, 1, 1], [], []>} : vector<34x128xbf16>, vector<128x384xbf16>, vector<34x384xf32> -> vector<34x384xf32>
    %c1_102 = arith.constant 1 : index
    %c0_103 = arith.constant 0 : index
    %c0_104 = arith.constant 0 : index
    %245 = vector.load %arg13[%c1_102, %c0_103, %c0_104] : memref<2x1x384xf32, #tpu.memory_space<vmem>>, vector<1x1x384xf32>
    %246 = vector.shape_cast %245 : vector<1x1x384xf32> to vector<1x384xf32>
    %247 = vector.broadcast %246 : vector<1x384xf32> to vector<34x384xf32>
    %248 = arith.addf %244, %247 : vector<34x384xf32>
    %249 = vector.extract_strided_slice %248 {offsets = [0, 0], sizes = [34, 32], strides = [1, 1]} : vector<34x384xf32> to vector<34x32xf32>
    %250 = vector.extract_strided_slice %248 {offsets = [0, 128], sizes = [34, 32], strides = [1, 1]} : vector<34x384xf32> to vector<34x32xf32>
    %251 = vector.extract_strided_slice %248 {offsets = [0, 256], sizes = [34, 32], strides = [1, 1]} : vector<34x384xf32> to vector<34x32xf32>
    %252 = arith.truncf %249 : vector<34x32xf32> to vector<34x32xbf16>
    %253 = arith.truncf %250 : vector<34x32xf32> to vector<34x32xbf16>
    %cst_105 = arith.constant dense<0.000000e+00> : vector<34x34xf32>
    %254 = tpu.matmul %252, %253, %cst_105 {dimension_numbers = #tpu.dot_dimension_numbers<[1], [1], [0], [0], [0, 0, 1, 0], [], []>} : vector<34x32xbf16>, vector<34x32xbf16>, vector<34x34xf32> -> vector<34x34xf32>
    %cst_106 = arith.constant 0.176776692 : f32
    %255 = vector.broadcast %cst_106 : f32 to vector<34x34xf32>
    %256 = arith.mulf %254, %255 : vector<34x34xf32>
    %257 = arith.addf %256, %31 : vector<34x34xf32>
    %cst_107 = arith.constant dense<0xFF800000> : vector<34xf32>
    %258 = vector.multi_reduction <maximumf>, %257, %cst_107 [1] : vector<34x34xf32> to vector<34xf32>
    %259 = vector.shape_cast %258 : vector<34xf32> to vector<34x1xf32>
    %260 = vector.broadcast %259 : vector<34x1xf32> to vector<34x34xf32>
    %261 = arith.subf %257, %260 : vector<34x34xf32>
    %262 = math.exp %261 : vector<34x34xf32>
    %cst_108 = arith.constant dense<0.000000e+00> : vector<34xf32>
    %263 = vector.multi_reduction <add>, %262, %cst_108 [1] : vector<34x34xf32> to vector<34xf32>
    %264 = vector.shape_cast %263 : vector<34xf32> to vector<34x1xf32>
    %265 = tpu.reciprocal %264 {approx = true} : vector<34x1xf32> -> vector<34x1xf32>
    %266 = vector.broadcast %265 : vector<34x1xf32> to vector<34x34xf32>
    %267 = arith.mulf %262, %266 : vector<34x34xf32>
    %268 = arith.truncf %267 : vector<34x34xf32> to vector<34x34xbf16>
    %269 = arith.truncf %251 : vector<34x32xf32> to vector<34x32xbf16>
    %cst_109 = arith.constant dense<0.000000e+00> : vector<34x32xf32>
    %270 = tpu.matmul %268, %269, %cst_109 {dimension_numbers = #tpu.dot_dimension_numbers<[1], [0], [0], [1], [0, 0, 1, 1], [], []>} : vector<34x34xbf16>, vector<34x32xbf16>, vector<34x32xf32> -> vector<34x32xf32>
    %271 = vector.extract_strided_slice %248 {offsets = [0, 32], sizes = [34, 32], strides = [1, 1]} : vector<34x384xf32> to vector<34x32xf32>
    %272 = vector.extract_strided_slice %248 {offsets = [0, 160], sizes = [34, 32], strides = [1, 1]} : vector<34x384xf32> to vector<34x32xf32>
    %273 = vector.extract_strided_slice %248 {offsets = [0, 288], sizes = [34, 32], strides = [1, 1]} : vector<34x384xf32> to vector<34x32xf32>
    %274 = arith.truncf %271 : vector<34x32xf32> to vector<34x32xbf16>
    %275 = arith.truncf %272 : vector<34x32xf32> to vector<34x32xbf16>
    %cst_110 = arith.constant dense<0.000000e+00> : vector<34x34xf32>
    %276 = tpu.matmul %274, %275, %cst_110 {dimension_numbers = #tpu.dot_dimension_numbers<[1], [1], [0], [0], [0, 0, 1, 0], [], []>} : vector<34x32xbf16>, vector<34x32xbf16>, vector<34x34xf32> -> vector<34x34xf32>
    %cst_111 = arith.constant 0.176776692 : f32
    %277 = vector.broadcast %cst_111 : f32 to vector<34x34xf32>
    %278 = arith.mulf %276, %277 : vector<34x34xf32>
    %279 = arith.addf %278, %31 : vector<34x34xf32>
    %cst_112 = arith.constant dense<0xFF800000> : vector<34xf32>
    %280 = vector.multi_reduction <maximumf>, %279, %cst_112 [1] : vector<34x34xf32> to vector<34xf32>
    %281 = vector.shape_cast %280 : vector<34xf32> to vector<34x1xf32>
    %282 = vector.broadcast %281 : vector<34x1xf32> to vector<34x34xf32>
    %283 = arith.subf %279, %282 : vector<34x34xf32>
    %284 = math.exp %283 : vector<34x34xf32>
    %cst_113 = arith.constant dense<0.000000e+00> : vector<34xf32>
    %285 = vector.multi_reduction <add>, %284, %cst_113 [1] : vector<34x34xf32> to vector<34xf32>
    %286 = vector.shape_cast %285 : vector<34xf32> to vector<34x1xf32>
    %287 = tpu.reciprocal %286 {approx = true} : vector<34x1xf32> -> vector<34x1xf32>
    %288 = vector.broadcast %287 : vector<34x1xf32> to vector<34x34xf32>
    %289 = arith.mulf %284, %288 : vector<34x34xf32>
    %290 = arith.truncf %289 : vector<34x34xf32> to vector<34x34xbf16>
    %291 = arith.truncf %273 : vector<34x32xf32> to vector<34x32xbf16>
    %cst_114 = arith.constant dense<0.000000e+00> : vector<34x32xf32>
    %292 = tpu.matmul %290, %291, %cst_114 {dimension_numbers = #tpu.dot_dimension_numbers<[1], [0], [0], [1], [0, 0, 1, 1], [], []>} : vector<34x34xbf16>, vector<34x32xbf16>, vector<34x32xf32> -> vector<34x32xf32>
    %293 = vector.extract_strided_slice %248 {offsets = [0, 64], sizes = [34, 32], strides = [1, 1]} : vector<34x384xf32> to vector<34x32xf32>
    %294 = vector.extract_strided_slice %248 {offsets = [0, 192], sizes = [34, 32], strides = [1, 1]} : vector<34x384xf32> to vector<34x32xf32>
    %295 = vector.extract_strided_slice %248 {offsets = [0, 320], sizes = [34, 32], strides = [1, 1]} : vector<34x384xf32> to vector<34x32xf32>
    %296 = arith.truncf %293 : vector<34x32xf32> to vector<34x32xbf16>
    %297 = arith.truncf %294 : vector<34x32xf32> to vector<34x32xbf16>
    %cst_115 = arith.constant dense<0.000000e+00> : vector<34x34xf32>
    %298 = tpu.matmul %296, %297, %cst_115 {dimension_numbers = #tpu.dot_dimension_numbers<[1], [1], [0], [0], [0, 0, 1, 0], [], []>} : vector<34x32xbf16>, vector<34x32xbf16>, vector<34x34xf32> -> vector<34x34xf32>
    %cst_116 = arith.constant 0.176776692 : f32
    %299 = vector.broadcast %cst_116 : f32 to vector<34x34xf32>
    %300 = arith.mulf %298, %299 : vector<34x34xf32>
    %301 = arith.addf %300, %31 : vector<34x34xf32>
    %cst_117 = arith.constant dense<0xFF800000> : vector<34xf32>
    %302 = vector.multi_reduction <maximumf>, %301, %cst_117 [1] : vector<34x34xf32> to vector<34xf32>
    %303 = vector.shape_cast %302 : vector<34xf32> to vector<34x1xf32>
    %304 = vector.broadcast %303 : vector<34x1xf32> to vector<34x34xf32>
    %305 = arith.subf %301, %304 : vector<34x34xf32>
    %306 = math.exp %305 : vector<34x34xf32>
    %cst_118 = arith.constant dense<0.000000e+00> : vector<34xf32>
    %307 = vector.multi_reduction <add>, %306, %cst_118 [1] : vector<34x34xf32> to vector<34xf32>
    %308 = vector.shape_cast %307 : vector<34xf32> to vector<34x1xf32>
    %309 = tpu.reciprocal %308 {approx = true} : vector<34x1xf32> -> vector<34x1xf32>
    %310 = vector.broadcast %309 : vector<34x1xf32> to vector<34x34xf32>
    %311 = arith.mulf %306, %310 : vector<34x34xf32>
    %312 = arith.truncf %311 : vector<34x34xf32> to vector<34x34xbf16>
    %313 = arith.truncf %295 : vector<34x32xf32> to vector<34x32xbf16>
    %cst_119 = arith.constant dense<0.000000e+00> : vector<34x32xf32>
    %314 = tpu.matmul %312, %313, %cst_119 {dimension_numbers = #tpu.dot_dimension_numbers<[1], [0], [0], [1], [0, 0, 1, 1], [], []>} : vector<34x34xbf16>, vector<34x32xbf16>, vector<34x32xf32> -> vector<34x32xf32>
    %315 = vector.extract_strided_slice %248 {offsets = [0, 96], sizes = [34, 32], strides = [1, 1]} : vector<34x384xf32> to vector<34x32xf32>
    %316 = vector.extract_strided_slice %248 {offsets = [0, 224], sizes = [34, 32], strides = [1, 1]} : vector<34x384xf32> to vector<34x32xf32>
    %317 = vector.extract_strided_slice %248 {offsets = [0, 352], sizes = [34, 32], strides = [1, 1]} : vector<34x384xf32> to vector<34x32xf32>
    %318 = arith.truncf %315 : vector<34x32xf32> to vector<34x32xbf16>
    %319 = arith.truncf %316 : vector<34x32xf32> to vector<34x32xbf16>
    %cst_120 = arith.constant dense<0.000000e+00> : vector<34x34xf32>
    %320 = tpu.matmul %318, %319, %cst_120 {dimension_numbers = #tpu.dot_dimension_numbers<[1], [1], [0], [0], [0, 0, 1, 0], [], []>} : vector<34x32xbf16>, vector<34x32xbf16>, vector<34x34xf32> -> vector<34x34xf32>
    %cst_121 = arith.constant 0.176776692 : f32
    %321 = vector.broadcast %cst_121 : f32 to vector<34x34xf32>
    %322 = arith.mulf %320, %321 : vector<34x34xf32>
    %323 = arith.addf %322, %31 : vector<34x34xf32>
    %cst_122 = arith.constant dense<0xFF800000> : vector<34xf32>
    %324 = vector.multi_reduction <maximumf>, %323, %cst_122 [1] : vector<34x34xf32> to vector<34xf32>
    %325 = vector.shape_cast %324 : vector<34xf32> to vector<34x1xf32>
    %326 = vector.broadcast %325 : vector<34x1xf32> to vector<34x34xf32>
    %327 = arith.subf %323, %326 : vector<34x34xf32>
    %328 = math.exp %327 : vector<34x34xf32>
    %cst_123 = arith.constant dense<0.000000e+00> : vector<34xf32>
    %329 = vector.multi_reduction <add>, %328, %cst_123 [1] : vector<34x34xf32> to vector<34xf32>
    %330 = vector.shape_cast %329 : vector<34xf32> to vector<34x1xf32>
    %331 = tpu.reciprocal %330 {approx = true} : vector<34x1xf32> -> vector<34x1xf32>
    %332 = vector.broadcast %331 : vector<34x1xf32> to vector<34x34xf32>
    %333 = arith.mulf %328, %332 : vector<34x34xf32>
    %334 = arith.truncf %333 : vector<34x34xf32> to vector<34x34xbf16>
    %335 = arith.truncf %317 : vector<34x32xf32> to vector<34x32xbf16>
    %cst_124 = arith.constant dense<0.000000e+00> : vector<34x32xf32>
    %336 = tpu.matmul %334, %335, %cst_124 {dimension_numbers = #tpu.dot_dimension_numbers<[1], [0], [0], [1], [0, 0, 1, 1], [], []>} : vector<34x34xbf16>, vector<34x32xbf16>, vector<34x32xf32> -> vector<34x32xf32>
    %337 = tpu.concatenate %270, %292, %314, %336 in 1 : vector<34x32xf32>, vector<34x32xf32>, vector<34x32xf32>, vector<34x32xf32> -> vector<34x128xf32>
    %c1_125 = arith.constant 1 : index
    %c0_126 = arith.constant 0 : index
    %c0_127 = arith.constant 0 : index
    %338 = vector.load %arg14[%c1_125, %c0_126, %c0_127] : memref<2x128x128xbf16, #tpu.memory_space<vmem>>, vector<1x128x128xbf16>
    %339 = vector.shape_cast %338 : vector<1x128x128xbf16> to vector<128x128xbf16>
    %340 = arith.truncf %337 : vector<34x128xf32> to vector<34x128xbf16>
    %cst_128 = arith.constant dense<0.000000e+00> : vector<34x128xf32>
    %341 = tpu.matmul %340, %339, %cst_128 {dimension_numbers = #tpu.dot_dimension_numbers<[1], [0], [0], [1], [0, 0, 1, 1], [], []>} : vector<34x128xbf16>, vector<128x128xbf16>, vector<34x128xf32> -> vector<34x128xf32>
    %342 = arith.addf %214, %341 : vector<34x128xf32>
    %c1_129 = arith.constant 1 : index
    %c0_130 = arith.constant 0 : index
    %c0_131 = arith.constant 0 : index
    %343 = vector.load %arg15[%c1_129, %c0_130, %c0_131] : memref<2x1x128xf32, #tpu.memory_space<vmem>>, vector<1x1x128xf32>
    %344 = vector.shape_cast %343 : vector<1x1x128xf32> to vector<1x128xf32>
    %345 = vector.broadcast %344 : vector<1x128xf32> to vector<34x128xf32>
    %346 = arith.addf %342, %345 : vector<34x128xf32>
    %c1_132 = arith.constant 1 : index
    %c0_133 = arith.constant 0 : index
    %c0_134 = arith.constant 0 : index
    %347 = vector.load %arg16[%c1_132, %c0_133, %c0_134] : memref<2x1x128xf32, #tpu.memory_space<vmem>>, vector<1x1x128xf32>
    %348 = vector.shape_cast %347 : vector<1x1x128xf32> to vector<1x128xf32>
    %c1_135 = arith.constant 1 : index
    %c0_136 = arith.constant 0 : index
    %c0_137 = arith.constant 0 : index
    %349 = vector.load %arg17[%c1_135, %c0_136, %c0_137] : memref<2x1x128xf32, #tpu.memory_space<vmem>>, vector<1x1x128xf32>
    %350 = vector.shape_cast %349 : vector<1x1x128xf32> to vector<1x128xf32>
    %cst_138 = arith.constant dense<0.000000e+00> : vector<34xf32>
    %351 = vector.multi_reduction <add>, %346, %cst_138 [1] : vector<34x128xf32> to vector<34xf32>
    %352 = vector.shape_cast %351 : vector<34xf32> to vector<34x1xf32>
    %cst_139 = arith.constant 1.280000e+02 : f32
    %353 = vector.broadcast %cst_139 : f32 to vector<34x1xf32>
    %354 = arith.divf %352, %353 : vector<34x1xf32>
    %355 = vector.broadcast %354 : vector<34x1xf32> to vector<34x128xf32>
    %356 = arith.subf %346, %355 : vector<34x128xf32>
    %357 = arith.mulf %356, %356 : vector<34x128xf32>
    %cst_140 = arith.constant dense<0.000000e+00> : vector<34xf32>
    %358 = vector.multi_reduction <add>, %357, %cst_140 [1] : vector<34x128xf32> to vector<34xf32>
    %359 = vector.shape_cast %358 : vector<34xf32> to vector<34x1xf32>
    %cst_141 = arith.constant 1.280000e+02 : f32
    %360 = vector.broadcast %cst_141 : f32 to vector<34x1xf32>
    %361 = arith.divf %359, %360 : vector<34x1xf32>
    %362 = vector.broadcast %354 : vector<34x1xf32> to vector<34x128xf32>
    %363 = arith.subf %346, %362 : vector<34x128xf32>
    %cst_142 = arith.constant 9.99999974E-6 : f32
    %364 = vector.broadcast %cst_142 : f32 to vector<34x1xf32>
    %365 = arith.addf %361, %364 : vector<34x1xf32>
    %366 = math.rsqrt %365 : vector<34x1xf32>
    %367 = vector.broadcast %366 : vector<34x1xf32> to vector<34x128xf32>
    %368 = arith.mulf %363, %367 : vector<34x128xf32>
    %369 = vector.broadcast %348 : vector<1x128xf32> to vector<34x128xf32>
    %370 = arith.mulf %368, %369 : vector<34x128xf32>
    %371 = vector.broadcast %350 : vector<1x128xf32> to vector<34x128xf32>
    %372 = arith.addf %370, %371 : vector<34x128xf32>
    %c1_143 = arith.constant 1 : index
    %c0_144 = arith.constant 0 : index
    %c0_145 = arith.constant 0 : index
    %373 = vector.load %arg18[%c1_143, %c0_144, %c0_145] : memref<2x128x512xbf16, #tpu.memory_space<vmem>>, vector<1x128x512xbf16>
    %374 = vector.shape_cast %373 : vector<1x128x512xbf16> to vector<128x512xbf16>
    %375 = arith.truncf %372 : vector<34x128xf32> to vector<34x128xbf16>
    %cst_146 = arith.constant dense<0.000000e+00> : vector<34x512xf32>
    %376 = tpu.matmul %375, %374, %cst_146 {dimension_numbers = #tpu.dot_dimension_numbers<[1], [0], [0], [1], [0, 0, 1, 1], [], []>} : vector<34x128xbf16>, vector<128x512xbf16>, vector<34x512xf32> -> vector<34x512xf32>
    %c1_147 = arith.constant 1 : index
    %c0_148 = arith.constant 0 : index
    %c0_149 = arith.constant 0 : index
    %377 = vector.load %arg19[%c1_147, %c0_148, %c0_149] : memref<2x1x512xf32, #tpu.memory_space<vmem>>, vector<1x1x512xf32>
    %378 = vector.shape_cast %377 : vector<1x1x512xf32> to vector<1x512xf32>
    %379 = vector.broadcast %378 : vector<1x512xf32> to vector<34x512xf32>
    %380 = arith.addf %376, %379 : vector<34x512xf32>
    %cst_150 = arith.constant 1.702000e+00 : f32
    %381 = vector.broadcast %cst_150 : f32 to vector<34x512xf32>
    %382 = arith.mulf %381, %380 : vector<34x512xf32>
    %383 = arith.negf %382 : vector<34x512xf32>
    %384 = math.exp %383 : vector<34x512xf32>
    %cst_151 = arith.constant 1.000000e+00 : f32
    %385 = vector.broadcast %cst_151 : f32 to vector<34x512xf32>
    %386 = arith.addf %385, %384 : vector<34x512xf32>
    %387 = arith.divf %385, %386 : vector<34x512xf32>
    %388 = arith.mulf %380, %387 : vector<34x512xf32>
    %c1_152 = arith.constant 1 : index
    %c0_153 = arith.constant 0 : index
    %c0_154 = arith.constant 0 : index
    %389 = vector.load %arg20[%c1_152, %c0_153, %c0_154] : memref<2x512x128xbf16, #tpu.memory_space<vmem>>, vector<1x512x128xbf16>
    %390 = vector.shape_cast %389 : vector<1x512x128xbf16> to vector<512x128xbf16>
    %391 = arith.truncf %388 : vector<34x512xf32> to vector<34x512xbf16>
    %cst_155 = arith.constant dense<0.000000e+00> : vector<34x128xf32>
    %392 = tpu.matmul %391, %390, %cst_155 {dimension_numbers = #tpu.dot_dimension_numbers<[1], [0], [0], [1], [0, 0, 1, 1], [], []>} : vector<34x512xbf16>, vector<512x128xbf16>, vector<34x128xf32> -> vector<34x128xf32>
    %393 = arith.addf %346, %392 : vector<34x128xf32>
    %c1_156 = arith.constant 1 : index
    %c0_157 = arith.constant 0 : index
    %c0_158 = arith.constant 0 : index
    %394 = vector.load %arg21[%c1_156, %c0_157, %c0_158] : memref<2x1x128xf32, #tpu.memory_space<vmem>>, vector<1x1x128xf32>
    %395 = vector.shape_cast %394 : vector<1x1x128xf32> to vector<1x128xf32>
    %396 = vector.broadcast %395 : vector<1x128xf32> to vector<34x128xf32>
    %397 = arith.addf %393, %396 : vector<34x128xf32>
    %c0_159 = arith.constant 0 : index
    %c0_160 = arith.constant 0 : index
    %398 = vector.load %arg6[%c0_159, %c0_160] : memref<2x34xf32, #tpu.memory_space<vmem>>, vector<2x34xf32>
    %399 = arith.truncf %398 : vector<2x34xf32> to vector<2x34xbf16>
    %400 = arith.truncf %397 : vector<34x128xf32> to vector<34x128xbf16>
    %cst_161 = arith.constant dense<0.000000e+00> : vector<2x128xf32>
    %401 = tpu.matmul %399, %400, %cst_161 {dimension_numbers = #tpu.dot_dimension_numbers<[1], [0], [0], [1], [0, 0, 1, 1], [], []>} : vector<2x34xbf16>, vector<34x128xbf16>, vector<2x128xf32> -> vector<2x128xf32>
    %c0_162 = arith.constant 0 : index
    %c0_163 = arith.constant 0 : index
    %402 = vector.load %arg7[%c0_162, %c0_163] : memref<1x128xf32, #tpu.memory_space<vmem>>, vector<1x128xf32>
    %c0_164 = arith.constant 0 : index
    %c0_165 = arith.constant 0 : index
    %403 = vector.load %arg8[%c0_164, %c0_165] : memref<1x128xf32, #tpu.memory_space<vmem>>, vector<1x128xf32>
    %cst_166 = arith.constant dense<0.000000e+00> : vector<2xf32>
    %404 = vector.multi_reduction <add>, %401, %cst_166 [1] : vector<2x128xf32> to vector<2xf32>
    %405 = vector.shape_cast %404 : vector<2xf32> to vector<2x1xf32>
    %cst_167 = arith.constant 1.280000e+02 : f32
    %406 = vector.broadcast %cst_167 : f32 to vector<2x1xf32>
    %407 = arith.divf %405, %406 : vector<2x1xf32>
    %408 = vector.broadcast %407 : vector<2x1xf32> to vector<2x128xf32>
    %409 = arith.subf %401, %408 : vector<2x128xf32>
    %410 = arith.mulf %409, %409 : vector<2x128xf32>
    %cst_168 = arith.constant dense<0.000000e+00> : vector<2xf32>
    %411 = vector.multi_reduction <add>, %410, %cst_168 [1] : vector<2x128xf32> to vector<2xf32>
    %412 = vector.shape_cast %411 : vector<2xf32> to vector<2x1xf32>
    %cst_169 = arith.constant 1.280000e+02 : f32
    %413 = vector.broadcast %cst_169 : f32 to vector<2x1xf32>
    %414 = arith.divf %412, %413 : vector<2x1xf32>
    %415 = vector.broadcast %407 : vector<2x1xf32> to vector<2x128xf32>
    %416 = arith.subf %401, %415 : vector<2x128xf32>
    %cst_170 = arith.constant 9.99999974E-6 : f32
    %417 = vector.broadcast %cst_170 : f32 to vector<2x1xf32>
    %418 = arith.addf %414, %417 : vector<2x1xf32>
    %419 = math.rsqrt %418 : vector<2x1xf32>
    %420 = vector.broadcast %419 : vector<2x1xf32> to vector<2x128xf32>
    %421 = arith.mulf %416, %420 : vector<2x128xf32>
    %422 = vector.broadcast %402 : vector<1x128xf32> to vector<2x128xf32>
    %423 = arith.mulf %421, %422 : vector<2x128xf32>
    %424 = vector.broadcast %403 : vector<1x128xf32> to vector<2x128xf32>
    %425 = arith.addf %423, %424 : vector<2x128xf32>
    %c0_171 = arith.constant 0 : index
    %c0_172 = arith.constant 0 : index
    %426 = vector.load %arg9[%c0_171, %c0_172] : memref<128x64xbf16, #tpu.memory_space<vmem>>, vector<128x64xbf16>
    %427 = arith.truncf %425 : vector<2x128xf32> to vector<2x128xbf16>
    %cst_173 = arith.constant dense<0.000000e+00> : vector<2x64xf32>
    %428 = tpu.matmul %427, %426, %cst_173 {dimension_numbers = #tpu.dot_dimension_numbers<[1], [0], [0], [1], [0, 0, 1, 1], [], []>} : vector<2x128xbf16>, vector<128x64xbf16>, vector<2x64xf32> -> vector<2x64xf32>
    %429 = arith.mulf %428, %428 : vector<2x64xf32>
    %cst_174 = arith.constant dense<0.000000e+00> : vector<2xf32>
    %430 = vector.multi_reduction <add>, %429, %cst_174 [1] : vector<2x64xf32> to vector<2xf32>
    %431 = vector.shape_cast %430 : vector<2xf32> to vector<2x1xf32>
    %cst_175 = arith.constant 1.000000e-24 : f32
    %432 = vector.broadcast %cst_175 : f32 to vector<2x1xf32>
    %433 = arith.maximumf %431, %432 : vector<2x1xf32>
    %434 = math.rsqrt %433 : vector<2x1xf32>
    %435 = vector.broadcast %434 : vector<2x1xf32> to vector<2x64xf32>
    %436 = arith.mulf %428, %435 : vector<2x64xf32>
    %c0_176 = arith.constant 0 : index
    %c0_177 = arith.constant 0 : index
    %437 = vector.load %arg22[%c0_176, %c0_177] : memref<16x1xi32, #tpu.memory_space<vmem>>, vector<16x1xi32>
    %438 = tpu.iota {dimensions = array<i32: 1>} : vector<16x64xi32>
    %439 = vector.broadcast %437 : vector<16x1xi32> to vector<16x64xi32>
    %440 = arith.cmpi eq, %438, %439 : vector<16x64xi32>
    %cst_178 = arith.constant 1.000000e+00 : f32
    %cst_179 = arith.constant 0.000000e+00 : f32
    %441 = vector.broadcast %cst_178 : f32 to vector<16x64xf32>
    %442 = vector.broadcast %cst_179 : f32 to vector<16x64xf32>
    %443 = arith.select %440, %441, %442 : vector<16x64xi1>, vector<16x64xf32>
    %c0_180 = arith.constant 0 : index
    %c0_181 = arith.constant 0 : index
    %444 = vector.load %arg23[%c0_180, %c0_181] : memref<64x128xbf16, #tpu.memory_space<vmem>>, vector<64x128xbf16>
    %445 = arith.truncf %443 : vector<16x64xf32> to vector<16x64xbf16>
    %cst_182 = arith.constant dense<0.000000e+00> : vector<16x128xf32>
    %446 = tpu.matmul %445, %444, %cst_182 {dimension_numbers = #tpu.dot_dimension_numbers<[1], [0], [0], [1], [0, 0, 1, 1], [], []>} : vector<16x64xbf16>, vector<64x128xbf16>, vector<16x128xf32> -> vector<16x128xf32>
    %c0_183 = arith.constant 0 : index
    %c0_184 = arith.constant 0 : index
    %447 = vector.load %arg24[%c0_183, %c0_184] : memref<16x128xf32, #tpu.memory_space<vmem>>, vector<16x128xf32>
    %448 = arith.addf %446, %447 : vector<16x128xf32>
    %c0_185 = arith.constant 0 : index
    %c0_186 = arith.constant 0 : index
    %449 = vector.load %arg25[%c0_185, %c0_186] : memref<16x16xf32, #tpu.memory_space<vmem>>, vector<16x16xf32>
    %c0_187 = arith.constant 0 : index
    %c0_188 = arith.constant 0 : index
    %c0_189 = arith.constant 0 : index
    %450 = vector.load %arg30[%c0_187, %c0_188, %c0_189] : memref<2x1x128xf32, #tpu.memory_space<vmem>>, vector<1x1x128xf32>
    %451 = vector.shape_cast %450 : vector<1x1x128xf32> to vector<1x128xf32>
    %c0_190 = arith.constant 0 : index
    %c0_191 = arith.constant 0 : index
    %c0_192 = arith.constant 0 : index
    %452 = vector.load %arg31[%c0_190, %c0_191, %c0_192] : memref<2x1x128xf32, #tpu.memory_space<vmem>>, vector<1x1x128xf32>
    %453 = vector.shape_cast %452 : vector<1x1x128xf32> to vector<1x128xf32>
    %cst_193 = arith.constant dense<0.000000e+00> : vector<16xf32>
    %454 = vector.multi_reduction <add>, %448, %cst_193 [1] : vector<16x128xf32> to vector<16xf32>
    %455 = vector.shape_cast %454 : vector<16xf32> to vector<16x1xf32>
    %cst_194 = arith.constant 1.280000e+02 : f32
    %456 = vector.broadcast %cst_194 : f32 to vector<16x1xf32>
    %457 = arith.divf %455, %456 : vector<16x1xf32>
    %458 = vector.broadcast %457 : vector<16x1xf32> to vector<16x128xf32>
    %459 = arith.subf %448, %458 : vector<16x128xf32>
    %460 = arith.mulf %459, %459 : vector<16x128xf32>
    %cst_195 = arith.constant dense<0.000000e+00> : vector<16xf32>
    %461 = vector.multi_reduction <add>, %460, %cst_195 [1] : vector<16x128xf32> to vector<16xf32>
    %462 = vector.shape_cast %461 : vector<16xf32> to vector<16x1xf32>
    %cst_196 = arith.constant 1.280000e+02 : f32
    %463 = vector.broadcast %cst_196 : f32 to vector<16x1xf32>
    %464 = arith.divf %462, %463 : vector<16x1xf32>
    %465 = vector.broadcast %457 : vector<16x1xf32> to vector<16x128xf32>
    %466 = arith.subf %448, %465 : vector<16x128xf32>
    %cst_197 = arith.constant 9.99999974E-6 : f32
    %467 = vector.broadcast %cst_197 : f32 to vector<16x1xf32>
    %468 = arith.addf %464, %467 : vector<16x1xf32>
    %469 = math.rsqrt %468 : vector<16x1xf32>
    %470 = vector.broadcast %469 : vector<16x1xf32> to vector<16x128xf32>
    %471 = arith.mulf %466, %470 : vector<16x128xf32>
    %472 = vector.broadcast %451 : vector<1x128xf32> to vector<16x128xf32>
    %473 = arith.mulf %471, %472 : vector<16x128xf32>
    %474 = vector.broadcast %453 : vector<1x128xf32> to vector<16x128xf32>
    %475 = arith.addf %473, %474 : vector<16x128xf32>
    %c0_198 = arith.constant 0 : index
    %c0_199 = arith.constant 0 : index
    %c0_200 = arith.constant 0 : index
    %476 = vector.load %arg32[%c0_198, %c0_199, %c0_200] : memref<2x128x384xbf16, #tpu.memory_space<vmem>>, vector<1x128x384xbf16>
    %477 = vector.shape_cast %476 : vector<1x128x384xbf16> to vector<128x384xbf16>
    %478 = arith.truncf %475 : vector<16x128xf32> to vector<16x128xbf16>
    %cst_201 = arith.constant dense<0.000000e+00> : vector<16x384xf32>
    %479 = tpu.matmul %478, %477, %cst_201 {dimension_numbers = #tpu.dot_dimension_numbers<[1], [0], [0], [1], [0, 0, 1, 1], [], []>} : vector<16x128xbf16>, vector<128x384xbf16>, vector<16x384xf32> -> vector<16x384xf32>
    %c0_202 = arith.constant 0 : index
    %c0_203 = arith.constant 0 : index
    %c0_204 = arith.constant 0 : index
    %480 = vector.load %arg33[%c0_202, %c0_203, %c0_204] : memref<2x1x384xf32, #tpu.memory_space<vmem>>, vector<1x1x384xf32>
    %481 = vector.shape_cast %480 : vector<1x1x384xf32> to vector<1x384xf32>
    %482 = vector.broadcast %481 : vector<1x384xf32> to vector<16x384xf32>
    %483 = arith.addf %479, %482 : vector<16x384xf32>
    %484 = vector.extract_strided_slice %483 {offsets = [0, 0], sizes = [16, 32], strides = [1, 1]} : vector<16x384xf32> to vector<16x32xf32>
    %485 = vector.extract_strided_slice %483 {offsets = [0, 128], sizes = [16, 32], strides = [1, 1]} : vector<16x384xf32> to vector<16x32xf32>
    %486 = vector.extract_strided_slice %483 {offsets = [0, 256], sizes = [16, 32], strides = [1, 1]} : vector<16x384xf32> to vector<16x32xf32>
    %487 = arith.truncf %484 : vector<16x32xf32> to vector<16x32xbf16>
    %488 = arith.truncf %485 : vector<16x32xf32> to vector<16x32xbf16>
    %cst_205 = arith.constant dense<0.000000e+00> : vector<16x16xf32>
    %489 = tpu.matmul %487, %488, %cst_205 {dimension_numbers = #tpu.dot_dimension_numbers<[1], [1], [0], [0], [0, 0, 1, 0], [], []>} : vector<16x32xbf16>, vector<16x32xbf16>, vector<16x16xf32> -> vector<16x16xf32>
    %cst_206 = arith.constant 0.176776692 : f32
    %490 = vector.broadcast %cst_206 : f32 to vector<16x16xf32>
    %491 = arith.mulf %489, %490 : vector<16x16xf32>
    %492 = arith.addf %491, %449 : vector<16x16xf32>
    %cst_207 = arith.constant dense<0xFF800000> : vector<16xf32>
    %493 = vector.multi_reduction <maximumf>, %492, %cst_207 [1] : vector<16x16xf32> to vector<16xf32>
    %494 = vector.shape_cast %493 : vector<16xf32> to vector<16x1xf32>
    %495 = vector.broadcast %494 : vector<16x1xf32> to vector<16x16xf32>
    %496 = arith.subf %492, %495 : vector<16x16xf32>
    %497 = math.exp %496 : vector<16x16xf32>
    %cst_208 = arith.constant dense<0.000000e+00> : vector<16xf32>
    %498 = vector.multi_reduction <add>, %497, %cst_208 [1] : vector<16x16xf32> to vector<16xf32>
    %499 = vector.shape_cast %498 : vector<16xf32> to vector<16x1xf32>
    %500 = tpu.reciprocal %499 {approx = true} : vector<16x1xf32> -> vector<16x1xf32>
    %501 = vector.broadcast %500 : vector<16x1xf32> to vector<16x16xf32>
    %502 = arith.mulf %497, %501 : vector<16x16xf32>
    %503 = arith.truncf %502 : vector<16x16xf32> to vector<16x16xbf16>
    %504 = arith.truncf %486 : vector<16x32xf32> to vector<16x32xbf16>
    %cst_209 = arith.constant dense<0.000000e+00> : vector<16x32xf32>
    %505 = tpu.matmul %503, %504, %cst_209 {dimension_numbers = #tpu.dot_dimension_numbers<[1], [0], [0], [1], [0, 0, 1, 1], [], []>} : vector<16x16xbf16>, vector<16x32xbf16>, vector<16x32xf32> -> vector<16x32xf32>
    %506 = vector.extract_strided_slice %483 {offsets = [0, 32], sizes = [16, 32], strides = [1, 1]} : vector<16x384xf32> to vector<16x32xf32>
    %507 = vector.extract_strided_slice %483 {offsets = [0, 160], sizes = [16, 32], strides = [1, 1]} : vector<16x384xf32> to vector<16x32xf32>
    %508 = vector.extract_strided_slice %483 {offsets = [0, 288], sizes = [16, 32], strides = [1, 1]} : vector<16x384xf32> to vector<16x32xf32>
    %509 = arith.truncf %506 : vector<16x32xf32> to vector<16x32xbf16>
    %510 = arith.truncf %507 : vector<16x32xf32> to vector<16x32xbf16>
    %cst_210 = arith.constant dense<0.000000e+00> : vector<16x16xf32>
    %511 = tpu.matmul %509, %510, %cst_210 {dimension_numbers = #tpu.dot_dimension_numbers<[1], [1], [0], [0], [0, 0, 1, 0], [], []>} : vector<16x32xbf16>, vector<16x32xbf16>, vector<16x16xf32> -> vector<16x16xf32>
    %cst_211 = arith.constant 0.176776692 : f32
    %512 = vector.broadcast %cst_211 : f32 to vector<16x16xf32>
    %513 = arith.mulf %511, %512 : vector<16x16xf32>
    %514 = arith.addf %513, %449 : vector<16x16xf32>
    %cst_212 = arith.constant dense<0xFF800000> : vector<16xf32>
    %515 = vector.multi_reduction <maximumf>, %514, %cst_212 [1] : vector<16x16xf32> to vector<16xf32>
    %516 = vector.shape_cast %515 : vector<16xf32> to vector<16x1xf32>
    %517 = vector.broadcast %516 : vector<16x1xf32> to vector<16x16xf32>
    %518 = arith.subf %514, %517 : vector<16x16xf32>
    %519 = math.exp %518 : vector<16x16xf32>
    %cst_213 = arith.constant dense<0.000000e+00> : vector<16xf32>
    %520 = vector.multi_reduction <add>, %519, %cst_213 [1] : vector<16x16xf32> to vector<16xf32>
    %521 = vector.shape_cast %520 : vector<16xf32> to vector<16x1xf32>
    %522 = tpu.reciprocal %521 {approx = true} : vector<16x1xf32> -> vector<16x1xf32>
    %523 = vector.broadcast %522 : vector<16x1xf32> to vector<16x16xf32>
    %524 = arith.mulf %519, %523 : vector<16x16xf32>
    %525 = arith.truncf %524 : vector<16x16xf32> to vector<16x16xbf16>
    %526 = arith.truncf %508 : vector<16x32xf32> to vector<16x32xbf16>
    %cst_214 = arith.constant dense<0.000000e+00> : vector<16x32xf32>
    %527 = tpu.matmul %525, %526, %cst_214 {dimension_numbers = #tpu.dot_dimension_numbers<[1], [0], [0], [1], [0, 0, 1, 1], [], []>} : vector<16x16xbf16>, vector<16x32xbf16>, vector<16x32xf32> -> vector<16x32xf32>
    %528 = vector.extract_strided_slice %483 {offsets = [0, 64], sizes = [16, 32], strides = [1, 1]} : vector<16x384xf32> to vector<16x32xf32>
    %529 = vector.extract_strided_slice %483 {offsets = [0, 192], sizes = [16, 32], strides = [1, 1]} : vector<16x384xf32> to vector<16x32xf32>
    %530 = vector.extract_strided_slice %483 {offsets = [0, 320], sizes = [16, 32], strides = [1, 1]} : vector<16x384xf32> to vector<16x32xf32>
    %531 = arith.truncf %528 : vector<16x32xf32> to vector<16x32xbf16>
    %532 = arith.truncf %529 : vector<16x32xf32> to vector<16x32xbf16>
    %cst_215 = arith.constant dense<0.000000e+00> : vector<16x16xf32>
    %533 = tpu.matmul %531, %532, %cst_215 {dimension_numbers = #tpu.dot_dimension_numbers<[1], [1], [0], [0], [0, 0, 1, 0], [], []>} : vector<16x32xbf16>, vector<16x32xbf16>, vector<16x16xf32> -> vector<16x16xf32>
    %cst_216 = arith.constant 0.176776692 : f32
    %534 = vector.broadcast %cst_216 : f32 to vector<16x16xf32>
    %535 = arith.mulf %533, %534 : vector<16x16xf32>
    %536 = arith.addf %535, %449 : vector<16x16xf32>
    %cst_217 = arith.constant dense<0xFF800000> : vector<16xf32>
    %537 = vector.multi_reduction <maximumf>, %536, %cst_217 [1] : vector<16x16xf32> to vector<16xf32>
    %538 = vector.shape_cast %537 : vector<16xf32> to vector<16x1xf32>
    %539 = vector.broadcast %538 : vector<16x1xf32> to vector<16x16xf32>
    %540 = arith.subf %536, %539 : vector<16x16xf32>
    %541 = math.exp %540 : vector<16x16xf32>
    %cst_218 = arith.constant dense<0.000000e+00> : vector<16xf32>
    %542 = vector.multi_reduction <add>, %541, %cst_218 [1] : vector<16x16xf32> to vector<16xf32>
    %543 = vector.shape_cast %542 : vector<16xf32> to vector<16x1xf32>
    %544 = tpu.reciprocal %543 {approx = true} : vector<16x1xf32> -> vector<16x1xf32>
    %545 = vector.broadcast %544 : vector<16x1xf32> to vector<16x16xf32>
    %546 = arith.mulf %541, %545 : vector<16x16xf32>
    %547 = arith.truncf %546 : vector<16x16xf32> to vector<16x16xbf16>
    %548 = arith.truncf %530 : vector<16x32xf32> to vector<16x32xbf16>
    %cst_219 = arith.constant dense<0.000000e+00> : vector<16x32xf32>
    %549 = tpu.matmul %547, %548, %cst_219 {dimension_numbers = #tpu.dot_dimension_numbers<[1], [0], [0], [1], [0, 0, 1, 1], [], []>} : vector<16x16xbf16>, vector<16x32xbf16>, vector<16x32xf32> -> vector<16x32xf32>
    %550 = vector.extract_strided_slice %483 {offsets = [0, 96], sizes = [16, 32], strides = [1, 1]} : vector<16x384xf32> to vector<16x32xf32>
    %551 = vector.extract_strided_slice %483 {offsets = [0, 224], sizes = [16, 32], strides = [1, 1]} : vector<16x384xf32> to vector<16x32xf32>
    %552 = vector.extract_strided_slice %483 {offsets = [0, 352], sizes = [16, 32], strides = [1, 1]} : vector<16x384xf32> to vector<16x32xf32>
    %553 = arith.truncf %550 : vector<16x32xf32> to vector<16x32xbf16>
    %554 = arith.truncf %551 : vector<16x32xf32> to vector<16x32xbf16>
    %cst_220 = arith.constant dense<0.000000e+00> : vector<16x16xf32>
    %555 = tpu.matmul %553, %554, %cst_220 {dimension_numbers = #tpu.dot_dimension_numbers<[1], [1], [0], [0], [0, 0, 1, 0], [], []>} : vector<16x32xbf16>, vector<16x32xbf16>, vector<16x16xf32> -> vector<16x16xf32>
    %cst_221 = arith.constant 0.176776692 : f32
    %556 = vector.broadcast %cst_221 : f32 to vector<16x16xf32>
    %557 = arith.mulf %555, %556 : vector<16x16xf32>
    %558 = arith.addf %557, %449 : vector<16x16xf32>
    %cst_222 = arith.constant dense<0xFF800000> : vector<16xf32>
    %559 = vector.multi_reduction <maximumf>, %558, %cst_222 [1] : vector<16x16xf32> to vector<16xf32>
    %560 = vector.shape_cast %559 : vector<16xf32> to vector<16x1xf32>
    %561 = vector.broadcast %560 : vector<16x1xf32> to vector<16x16xf32>
    %562 = arith.subf %558, %561 : vector<16x16xf32>
    %563 = math.exp %562 : vector<16x16xf32>
    %cst_223 = arith.constant dense<0.000000e+00> : vector<16xf32>
    %564 = vector.multi_reduction <add>, %563, %cst_223 [1] : vector<16x16xf32> to vector<16xf32>
    %565 = vector.shape_cast %564 : vector<16xf32> to vector<16x1xf32>
    %566 = tpu.reciprocal %565 {approx = true} : vector<16x1xf32> -> vector<16x1xf32>
    %567 = vector.broadcast %566 : vector<16x1xf32> to vector<16x16xf32>
    %568 = arith.mulf %563, %567 : vector<16x16xf32>
    %569 = arith.truncf %568 : vector<16x16xf32> to vector<16x16xbf16>
    %570 = arith.truncf %552 : vector<16x32xf32> to vector<16x32xbf16>
    %cst_224 = arith.constant dense<0.000000e+00> : vector<16x32xf32>
    %571 = tpu.matmul %569, %570, %cst_224 {dimension_numbers = #tpu.dot_dimension_numbers<[1], [0], [0], [1], [0, 0, 1, 1], [], []>} : vector<16x16xbf16>, vector<16x32xbf16>, vector<16x32xf32> -> vector<16x32xf32>
    %572 = tpu.concatenate %505, %527, %549, %571 in 1 : vector<16x32xf32>, vector<16x32xf32>, vector<16x32xf32>, vector<16x32xf32> -> vector<16x128xf32>
    %c0_225 = arith.constant 0 : index
    %c0_226 = arith.constant 0 : index
    %c0_227 = arith.constant 0 : index
    %573 = vector.load %arg34[%c0_225, %c0_226, %c0_227] : memref<2x128x128xbf16, #tpu.memory_space<vmem>>, vector<1x128x128xbf16>
    %574 = vector.shape_cast %573 : vector<1x128x128xbf16> to vector<128x128xbf16>
    %575 = arith.truncf %572 : vector<16x128xf32> to vector<16x128xbf16>
    %cst_228 = arith.constant dense<0.000000e+00> : vector<16x128xf32>
    %576 = tpu.matmul %575, %574, %cst_228 {dimension_numbers = #tpu.dot_dimension_numbers<[1], [0], [0], [1], [0, 0, 1, 1], [], []>} : vector<16x128xbf16>, vector<128x128xbf16>, vector<16x128xf32> -> vector<16x128xf32>
    %577 = arith.addf %448, %576 : vector<16x128xf32>
    %c0_229 = arith.constant 0 : index
    %c0_230 = arith.constant 0 : index
    %c0_231 = arith.constant 0 : index
    %578 = vector.load %arg35[%c0_229, %c0_230, %c0_231] : memref<2x1x128xf32, #tpu.memory_space<vmem>>, vector<1x1x128xf32>
    %579 = vector.shape_cast %578 : vector<1x1x128xf32> to vector<1x128xf32>
    %580 = vector.broadcast %579 : vector<1x128xf32> to vector<16x128xf32>
    %581 = arith.addf %577, %580 : vector<16x128xf32>
    %c0_232 = arith.constant 0 : index
    %c0_233 = arith.constant 0 : index
    %c0_234 = arith.constant 0 : index
    %582 = vector.load %arg36[%c0_232, %c0_233, %c0_234] : memref<2x1x128xf32, #tpu.memory_space<vmem>>, vector<1x1x128xf32>
    %583 = vector.shape_cast %582 : vector<1x1x128xf32> to vector<1x128xf32>
    %c0_235 = arith.constant 0 : index
    %c0_236 = arith.constant 0 : index
    %c0_237 = arith.constant 0 : index
    %584 = vector.load %arg37[%c0_235, %c0_236, %c0_237] : memref<2x1x128xf32, #tpu.memory_space<vmem>>, vector<1x1x128xf32>
    %585 = vector.shape_cast %584 : vector<1x1x128xf32> to vector<1x128xf32>
    %cst_238 = arith.constant dense<0.000000e+00> : vector<16xf32>
    %586 = vector.multi_reduction <add>, %581, %cst_238 [1] : vector<16x128xf32> to vector<16xf32>
    %587 = vector.shape_cast %586 : vector<16xf32> to vector<16x1xf32>
    %cst_239 = arith.constant 1.280000e+02 : f32
    %588 = vector.broadcast %cst_239 : f32 to vector<16x1xf32>
    %589 = arith.divf %587, %588 : vector<16x1xf32>
    %590 = vector.broadcast %589 : vector<16x1xf32> to vector<16x128xf32>
    %591 = arith.subf %581, %590 : vector<16x128xf32>
    %592 = arith.mulf %591, %591 : vector<16x128xf32>
    %cst_240 = arith.constant dense<0.000000e+00> : vector<16xf32>
    %593 = vector.multi_reduction <add>, %592, %cst_240 [1] : vector<16x128xf32> to vector<16xf32>
    %594 = vector.shape_cast %593 : vector<16xf32> to vector<16x1xf32>
    %cst_241 = arith.constant 1.280000e+02 : f32
    %595 = vector.broadcast %cst_241 : f32 to vector<16x1xf32>
    %596 = arith.divf %594, %595 : vector<16x1xf32>
    %597 = vector.broadcast %589 : vector<16x1xf32> to vector<16x128xf32>
    %598 = arith.subf %581, %597 : vector<16x128xf32>
    %cst_242 = arith.constant 9.99999974E-6 : f32
    %599 = vector.broadcast %cst_242 : f32 to vector<16x1xf32>
    %600 = arith.addf %596, %599 : vector<16x1xf32>
    %601 = math.rsqrt %600 : vector<16x1xf32>
    %602 = vector.broadcast %601 : vector<16x1xf32> to vector<16x128xf32>
    %603 = arith.mulf %598, %602 : vector<16x128xf32>
    %604 = vector.broadcast %583 : vector<1x128xf32> to vector<16x128xf32>
    %605 = arith.mulf %603, %604 : vector<16x128xf32>
    %606 = vector.broadcast %585 : vector<1x128xf32> to vector<16x128xf32>
    %607 = arith.addf %605, %606 : vector<16x128xf32>
    %c0_243 = arith.constant 0 : index
    %c0_244 = arith.constant 0 : index
    %c0_245 = arith.constant 0 : index
    %608 = vector.load %arg38[%c0_243, %c0_244, %c0_245] : memref<2x128x512xbf16, #tpu.memory_space<vmem>>, vector<1x128x512xbf16>
    %609 = vector.shape_cast %608 : vector<1x128x512xbf16> to vector<128x512xbf16>
    %610 = arith.truncf %607 : vector<16x128xf32> to vector<16x128xbf16>
    %cst_246 = arith.constant dense<0.000000e+00> : vector<16x512xf32>
    %611 = tpu.matmul %610, %609, %cst_246 {dimension_numbers = #tpu.dot_dimension_numbers<[1], [0], [0], [1], [0, 0, 1, 1], [], []>} : vector<16x128xbf16>, vector<128x512xbf16>, vector<16x512xf32> -> vector<16x512xf32>
    %c0_247 = arith.constant 0 : index
    %c0_248 = arith.constant 0 : index
    %c0_249 = arith.constant 0 : index
    %612 = vector.load %arg39[%c0_247, %c0_248, %c0_249] : memref<2x1x512xf32, #tpu.memory_space<vmem>>, vector<1x1x512xf32>
    %613 = vector.shape_cast %612 : vector<1x1x512xf32> to vector<1x512xf32>
    %614 = vector.broadcast %613 : vector<1x512xf32> to vector<16x512xf32>
    %615 = arith.addf %611, %614 : vector<16x512xf32>
    %cst_250 = arith.constant 1.702000e+00 : f32
    %616 = vector.broadcast %cst_250 : f32 to vector<16x512xf32>
    %617 = arith.mulf %616, %615 : vector<16x512xf32>
    %618 = arith.negf %617 : vector<16x512xf32>
    %619 = math.exp %618 : vector<16x512xf32>
    %cst_251 = arith.constant 1.000000e+00 : f32
    %620 = vector.broadcast %cst_251 : f32 to vector<16x512xf32>
    %621 = arith.addf %620, %619 : vector<16x512xf32>
    %622 = arith.divf %620, %621 : vector<16x512xf32>
    %623 = arith.mulf %615, %622 : vector<16x512xf32>
    %c0_252 = arith.constant 0 : index
    %c0_253 = arith.constant 0 : index
    %c0_254 = arith.constant 0 : index
    %624 = vector.load %arg40[%c0_252, %c0_253, %c0_254] : memref<2x512x128xbf16, #tpu.memory_space<vmem>>, vector<1x512x128xbf16>
    %625 = vector.shape_cast %624 : vector<1x512x128xbf16> to vector<512x128xbf16>
    %626 = arith.truncf %623 : vector<16x512xf32> to vector<16x512xbf16>
    %cst_255 = arith.constant dense<0.000000e+00> : vector<16x128xf32>
    %627 = tpu.matmul %626, %625, %cst_255 {dimension_numbers = #tpu.dot_dimension_numbers<[1], [0], [0], [1], [0, 0, 1, 1], [], []>} : vector<16x512xbf16>, vector<512x128xbf16>, vector<16x128xf32> -> vector<16x128xf32>
    %628 = arith.addf %581, %627 : vector<16x128xf32>
    %c0_256 = arith.constant 0 : index
    %c0_257 = arith.constant 0 : index
    %c0_258 = arith.constant 0 : index
    %629 = vector.load %arg41[%c0_256, %c0_257, %c0_258] : memref<2x1x128xf32, #tpu.memory_space<vmem>>, vector<1x1x128xf32>
    %630 = vector.shape_cast %629 : vector<1x1x128xf32> to vector<1x128xf32>
    %631 = vector.broadcast %630 : vector<1x128xf32> to vector<16x128xf32>
    %632 = arith.addf %628, %631 : vector<16x128xf32>
    %c1_259 = arith.constant 1 : index
    %c0_260 = arith.constant 0 : index
    %c0_261 = arith.constant 0 : index
    %633 = vector.load %arg30[%c1_259, %c0_260, %c0_261] : memref<2x1x128xf32, #tpu.memory_space<vmem>>, vector<1x1x128xf32>
    %634 = vector.shape_cast %633 : vector<1x1x128xf32> to vector<1x128xf32>
    %c1_262 = arith.constant 1 : index
    %c0_263 = arith.constant 0 : index
    %c0_264 = arith.constant 0 : index
    %635 = vector.load %arg31[%c1_262, %c0_263, %c0_264] : memref<2x1x128xf32, #tpu.memory_space<vmem>>, vector<1x1x128xf32>
    %636 = vector.shape_cast %635 : vector<1x1x128xf32> to vector<1x128xf32>
    %cst_265 = arith.constant dense<0.000000e+00> : vector<16xf32>
    %637 = vector.multi_reduction <add>, %632, %cst_265 [1] : vector<16x128xf32> to vector<16xf32>
    %638 = vector.shape_cast %637 : vector<16xf32> to vector<16x1xf32>
    %cst_266 = arith.constant 1.280000e+02 : f32
    %639 = vector.broadcast %cst_266 : f32 to vector<16x1xf32>
    %640 = arith.divf %638, %639 : vector<16x1xf32>
    %641 = vector.broadcast %640 : vector<16x1xf32> to vector<16x128xf32>
    %642 = arith.subf %632, %641 : vector<16x128xf32>
    %643 = arith.mulf %642, %642 : vector<16x128xf32>
    %cst_267 = arith.constant dense<0.000000e+00> : vector<16xf32>
    %644 = vector.multi_reduction <add>, %643, %cst_267 [1] : vector<16x128xf32> to vector<16xf32>
    %645 = vector.shape_cast %644 : vector<16xf32> to vector<16x1xf32>
    %cst_268 = arith.constant 1.280000e+02 : f32
    %646 = vector.broadcast %cst_268 : f32 to vector<16x1xf32>
    %647 = arith.divf %645, %646 : vector<16x1xf32>
    %648 = vector.broadcast %640 : vector<16x1xf32> to vector<16x128xf32>
    %649 = arith.subf %632, %648 : vector<16x128xf32>
    %cst_269 = arith.constant 9.99999974E-6 : f32
    %650 = vector.broadcast %cst_269 : f32 to vector<16x1xf32>
    %651 = arith.addf %647, %650 : vector<16x1xf32>
    %652 = math.rsqrt %651 : vector<16x1xf32>
    %653 = vector.broadcast %652 : vector<16x1xf32> to vector<16x128xf32>
    %654 = arith.mulf %649, %653 : vector<16x128xf32>
    %655 = vector.broadcast %634 : vector<1x128xf32> to vector<16x128xf32>
    %656 = arith.mulf %654, %655 : vector<16x128xf32>
    %657 = vector.broadcast %636 : vector<1x128xf32> to vector<16x128xf32>
    %658 = arith.addf %656, %657 : vector<16x128xf32>
    %c1_270 = arith.constant 1 : index
    %c0_271 = arith.constant 0 : index
    %c0_272 = arith.constant 0 : index
    %659 = vector.load %arg32[%c1_270, %c0_271, %c0_272] : memref<2x128x384xbf16, #tpu.memory_space<vmem>>, vector<1x128x384xbf16>
    %660 = vector.shape_cast %659 : vector<1x128x384xbf16> to vector<128x384xbf16>
    %661 = arith.truncf %658 : vector<16x128xf32> to vector<16x128xbf16>
    %cst_273 = arith.constant dense<0.000000e+00> : vector<16x384xf32>
    %662 = tpu.matmul %661, %660, %cst_273 {dimension_numbers = #tpu.dot_dimension_numbers<[1], [0], [0], [1], [0, 0, 1, 1], [], []>} : vector<16x128xbf16>, vector<128x384xbf16>, vector<16x384xf32> -> vector<16x384xf32>
    %c1_274 = arith.constant 1 : index
    %c0_275 = arith.constant 0 : index
    %c0_276 = arith.constant 0 : index
    %663 = vector.load %arg33[%c1_274, %c0_275, %c0_276] : memref<2x1x384xf32, #tpu.memory_space<vmem>>, vector<1x1x384xf32>
    %664 = vector.shape_cast %663 : vector<1x1x384xf32> to vector<1x384xf32>
    %665 = vector.broadcast %664 : vector<1x384xf32> to vector<16x384xf32>
    %666 = arith.addf %662, %665 : vector<16x384xf32>
    %667 = vector.extract_strided_slice %666 {offsets = [0, 0], sizes = [16, 32], strides = [1, 1]} : vector<16x384xf32> to vector<16x32xf32>
    %668 = vector.extract_strided_slice %666 {offsets = [0, 128], sizes = [16, 32], strides = [1, 1]} : vector<16x384xf32> to vector<16x32xf32>
    %669 = vector.extract_strided_slice %666 {offsets = [0, 256], sizes = [16, 32], strides = [1, 1]} : vector<16x384xf32> to vector<16x32xf32>
    %670 = arith.truncf %667 : vector<16x32xf32> to vector<16x32xbf16>
    %671 = arith.truncf %668 : vector<16x32xf32> to vector<16x32xbf16>
    %cst_277 = arith.constant dense<0.000000e+00> : vector<16x16xf32>
    %672 = tpu.matmul %670, %671, %cst_277 {dimension_numbers = #tpu.dot_dimension_numbers<[1], [1], [0], [0], [0, 0, 1, 0], [], []>} : vector<16x32xbf16>, vector<16x32xbf16>, vector<16x16xf32> -> vector<16x16xf32>
    %cst_278 = arith.constant 0.176776692 : f32
    %673 = vector.broadcast %cst_278 : f32 to vector<16x16xf32>
    %674 = arith.mulf %672, %673 : vector<16x16xf32>
    %675 = arith.addf %674, %449 : vector<16x16xf32>
    %cst_279 = arith.constant dense<0xFF800000> : vector<16xf32>
    %676 = vector.multi_reduction <maximumf>, %675, %cst_279 [1] : vector<16x16xf32> to vector<16xf32>
    %677 = vector.shape_cast %676 : vector<16xf32> to vector<16x1xf32>
    %678 = vector.broadcast %677 : vector<16x1xf32> to vector<16x16xf32>
    %679 = arith.subf %675, %678 : vector<16x16xf32>
    %680 = math.exp %679 : vector<16x16xf32>
    %cst_280 = arith.constant dense<0.000000e+00> : vector<16xf32>
    %681 = vector.multi_reduction <add>, %680, %cst_280 [1] : vector<16x16xf32> to vector<16xf32>
    %682 = vector.shape_cast %681 : vector<16xf32> to vector<16x1xf32>
    %683 = tpu.reciprocal %682 {approx = true} : vector<16x1xf32> -> vector<16x1xf32>
    %684 = vector.broadcast %683 : vector<16x1xf32> to vector<16x16xf32>
    %685 = arith.mulf %680, %684 : vector<16x16xf32>
    %686 = arith.truncf %685 : vector<16x16xf32> to vector<16x16xbf16>
    %687 = arith.truncf %669 : vector<16x32xf32> to vector<16x32xbf16>
    %cst_281 = arith.constant dense<0.000000e+00> : vector<16x32xf32>
    %688 = tpu.matmul %686, %687, %cst_281 {dimension_numbers = #tpu.dot_dimension_numbers<[1], [0], [0], [1], [0, 0, 1, 1], [], []>} : vector<16x16xbf16>, vector<16x32xbf16>, vector<16x32xf32> -> vector<16x32xf32>
    %689 = vector.extract_strided_slice %666 {offsets = [0, 32], sizes = [16, 32], strides = [1, 1]} : vector<16x384xf32> to vector<16x32xf32>
    %690 = vector.extract_strided_slice %666 {offsets = [0, 160], sizes = [16, 32], strides = [1, 1]} : vector<16x384xf32> to vector<16x32xf32>
    %691 = vector.extract_strided_slice %666 {offsets = [0, 288], sizes = [16, 32], strides = [1, 1]} : vector<16x384xf32> to vector<16x32xf32>
    %692 = arith.truncf %689 : vector<16x32xf32> to vector<16x32xbf16>
    %693 = arith.truncf %690 : vector<16x32xf32> to vector<16x32xbf16>
    %cst_282 = arith.constant dense<0.000000e+00> : vector<16x16xf32>
    %694 = tpu.matmul %692, %693, %cst_282 {dimension_numbers = #tpu.dot_dimension_numbers<[1], [1], [0], [0], [0, 0, 1, 0], [], []>} : vector<16x32xbf16>, vector<16x32xbf16>, vector<16x16xf32> -> vector<16x16xf32>
    %cst_283 = arith.constant 0.176776692 : f32
    %695 = vector.broadcast %cst_283 : f32 to vector<16x16xf32>
    %696 = arith.mulf %694, %695 : vector<16x16xf32>
    %697 = arith.addf %696, %449 : vector<16x16xf32>
    %cst_284 = arith.constant dense<0xFF800000> : vector<16xf32>
    %698 = vector.multi_reduction <maximumf>, %697, %cst_284 [1] : vector<16x16xf32> to vector<16xf32>
    %699 = vector.shape_cast %698 : vector<16xf32> to vector<16x1xf32>
    %700 = vector.broadcast %699 : vector<16x1xf32> to vector<16x16xf32>
    %701 = arith.subf %697, %700 : vector<16x16xf32>
    %702 = math.exp %701 : vector<16x16xf32>
    %cst_285 = arith.constant dense<0.000000e+00> : vector<16xf32>
    %703 = vector.multi_reduction <add>, %702, %cst_285 [1] : vector<16x16xf32> to vector<16xf32>
    %704 = vector.shape_cast %703 : vector<16xf32> to vector<16x1xf32>
    %705 = tpu.reciprocal %704 {approx = true} : vector<16x1xf32> -> vector<16x1xf32>
    %706 = vector.broadcast %705 : vector<16x1xf32> to vector<16x16xf32>
    %707 = arith.mulf %702, %706 : vector<16x16xf32>
    %708 = arith.truncf %707 : vector<16x16xf32> to vector<16x16xbf16>
    %709 = arith.truncf %691 : vector<16x32xf32> to vector<16x32xbf16>
    %cst_286 = arith.constant dense<0.000000e+00> : vector<16x32xf32>
    %710 = tpu.matmul %708, %709, %cst_286 {dimension_numbers = #tpu.dot_dimension_numbers<[1], [0], [0], [1], [0, 0, 1, 1], [], []>} : vector<16x16xbf16>, vector<16x32xbf16>, vector<16x32xf32> -> vector<16x32xf32>
    %711 = vector.extract_strided_slice %666 {offsets = [0, 64], sizes = [16, 32], strides = [1, 1]} : vector<16x384xf32> to vector<16x32xf32>
    %712 = vector.extract_strided_slice %666 {offsets = [0, 192], sizes = [16, 32], strides = [1, 1]} : vector<16x384xf32> to vector<16x32xf32>
    %713 = vector.extract_strided_slice %666 {offsets = [0, 320], sizes = [16, 32], strides = [1, 1]} : vector<16x384xf32> to vector<16x32xf32>
    %714 = arith.truncf %711 : vector<16x32xf32> to vector<16x32xbf16>
    %715 = arith.truncf %712 : vector<16x32xf32> to vector<16x32xbf16>
    %cst_287 = arith.constant dense<0.000000e+00> : vector<16x16xf32>
    %716 = tpu.matmul %714, %715, %cst_287 {dimension_numbers = #tpu.dot_dimension_numbers<[1], [1], [0], [0], [0, 0, 1, 0], [], []>} : vector<16x32xbf16>, vector<16x32xbf16>, vector<16x16xf32> -> vector<16x16xf32>
    %cst_288 = arith.constant 0.176776692 : f32
    %717 = vector.broadcast %cst_288 : f32 to vector<16x16xf32>
    %718 = arith.mulf %716, %717 : vector<16x16xf32>
    %719 = arith.addf %718, %449 : vector<16x16xf32>
    %cst_289 = arith.constant dense<0xFF800000> : vector<16xf32>
    %720 = vector.multi_reduction <maximumf>, %719, %cst_289 [1] : vector<16x16xf32> to vector<16xf32>
    %721 = vector.shape_cast %720 : vector<16xf32> to vector<16x1xf32>
    %722 = vector.broadcast %721 : vector<16x1xf32> to vector<16x16xf32>
    %723 = arith.subf %719, %722 : vector<16x16xf32>
    %724 = math.exp %723 : vector<16x16xf32>
    %cst_290 = arith.constant dense<0.000000e+00> : vector<16xf32>
    %725 = vector.multi_reduction <add>, %724, %cst_290 [1] : vector<16x16xf32> to vector<16xf32>
    %726 = vector.shape_cast %725 : vector<16xf32> to vector<16x1xf32>
    %727 = tpu.reciprocal %726 {approx = true} : vector<16x1xf32> -> vector<16x1xf32>
    %728 = vector.broadcast %727 : vector<16x1xf32> to vector<16x16xf32>
    %729 = arith.mulf %724, %728 : vector<16x16xf32>
    %730 = arith.truncf %729 : vector<16x16xf32> to vector<16x16xbf16>
    %731 = arith.truncf %713 : vector<16x32xf32> to vector<16x32xbf16>
    %cst_291 = arith.constant dense<0.000000e+00> : vector<16x32xf32>
    %732 = tpu.matmul %730, %731, %cst_291 {dimension_numbers = #tpu.dot_dimension_numbers<[1], [0], [0], [1], [0, 0, 1, 1], [], []>} : vector<16x16xbf16>, vector<16x32xbf16>, vector<16x32xf32> -> vector<16x32xf32>
    %733 = vector.extract_strided_slice %666 {offsets = [0, 96], sizes = [16, 32], strides = [1, 1]} : vector<16x384xf32> to vector<16x32xf32>
    %734 = vector.extract_strided_slice %666 {offsets = [0, 224], sizes = [16, 32], strides = [1, 1]} : vector<16x384xf32> to vector<16x32xf32>
    %735 = vector.extract_strided_slice %666 {offsets = [0, 352], sizes = [16, 32], strides = [1, 1]} : vector<16x384xf32> to vector<16x32xf32>
    %736 = arith.truncf %733 : vector<16x32xf32> to vector<16x32xbf16>
    %737 = arith.truncf %734 : vector<16x32xf32> to vector<16x32xbf16>
    %cst_292 = arith.constant dense<0.000000e+00> : vector<16x16xf32>
    %738 = tpu.matmul %736, %737, %cst_292 {dimension_numbers = #tpu.dot_dimension_numbers<[1], [1], [0], [0], [0, 0, 1, 0], [], []>} : vector<16x32xbf16>, vector<16x32xbf16>, vector<16x16xf32> -> vector<16x16xf32>
    %cst_293 = arith.constant 0.176776692 : f32
    %739 = vector.broadcast %cst_293 : f32 to vector<16x16xf32>
    %740 = arith.mulf %738, %739 : vector<16x16xf32>
    %741 = arith.addf %740, %449 : vector<16x16xf32>
    %cst_294 = arith.constant dense<0xFF800000> : vector<16xf32>
    %742 = vector.multi_reduction <maximumf>, %741, %cst_294 [1] : vector<16x16xf32> to vector<16xf32>
    %743 = vector.shape_cast %742 : vector<16xf32> to vector<16x1xf32>
    %744 = vector.broadcast %743 : vector<16x1xf32> to vector<16x16xf32>
    %745 = arith.subf %741, %744 : vector<16x16xf32>
    %746 = math.exp %745 : vector<16x16xf32>
    %cst_295 = arith.constant dense<0.000000e+00> : vector<16xf32>
    %747 = vector.multi_reduction <add>, %746, %cst_295 [1] : vector<16x16xf32> to vector<16xf32>
    %748 = vector.shape_cast %747 : vector<16xf32> to vector<16x1xf32>
    %749 = tpu.reciprocal %748 {approx = true} : vector<16x1xf32> -> vector<16x1xf32>
    %750 = vector.broadcast %749 : vector<16x1xf32> to vector<16x16xf32>
    %751 = arith.mulf %746, %750 : vector<16x16xf32>
    %752 = arith.truncf %751 : vector<16x16xf32> to vector<16x16xbf16>
    %753 = arith.truncf %735 : vector<16x32xf32> to vector<16x32xbf16>
    %cst_296 = arith.constant dense<0.000000e+00> : vector<16x32xf32>
    %754 = tpu.matmul %752, %753, %cst_296 {dimension_numbers = #tpu.dot_dimension_numbers<[1], [0], [0], [1], [0, 0, 1, 1], [], []>} : vector<16x16xbf16>, vector<16x32xbf16>, vector<16x32xf32> -> vector<16x32xf32>
    %755 = tpu.concatenate %688, %710, %732, %754 in 1 : vector<16x32xf32>, vector<16x32xf32>, vector<16x32xf32>, vector<16x32xf32> -> vector<16x128xf32>
    %c1_297 = arith.constant 1 : index
    %c0_298 = arith.constant 0 : index
    %c0_299 = arith.constant 0 : index
    %756 = vector.load %arg34[%c1_297, %c0_298, %c0_299] : memref<2x128x128xbf16, #tpu.memory_space<vmem>>, vector<1x128x128xbf16>
    %757 = vector.shape_cast %756 : vector<1x128x128xbf16> to vector<128x128xbf16>
    %758 = arith.truncf %755 : vector<16x128xf32> to vector<16x128xbf16>
    %cst_300 = arith.constant dense<0.000000e+00> : vector<16x128xf32>
    %759 = tpu.matmul %758, %757, %cst_300 {dimension_numbers = #tpu.dot_dimension_numbers<[1], [0], [0], [1], [0, 0, 1, 1], [], []>} : vector<16x128xbf16>, vector<128x128xbf16>, vector<16x128xf32> -> vector<16x128xf32>
    %760 = arith.addf %632, %759 : vector<16x128xf32>
    %c1_301 = arith.constant 1 : index
    %c0_302 = arith.constant 0 : index
    %c0_303 = arith.constant 0 : index
    %761 = vector.load %arg35[%c1_301, %c0_302, %c0_303] : memref<2x1x128xf32, #tpu.memory_space<vmem>>, vector<1x1x128xf32>
    %762 = vector.shape_cast %761 : vector<1x1x128xf32> to vector<1x128xf32>
    %763 = vector.broadcast %762 : vector<1x128xf32> to vector<16x128xf32>
    %764 = arith.addf %760, %763 : vector<16x128xf32>
    %c1_304 = arith.constant 1 : index
    %c0_305 = arith.constant 0 : index
    %c0_306 = arith.constant 0 : index
    %765 = vector.load %arg36[%c1_304, %c0_305, %c0_306] : memref<2x1x128xf32, #tpu.memory_space<vmem>>, vector<1x1x128xf32>
    %766 = vector.shape_cast %765 : vector<1x1x128xf32> to vector<1x128xf32>
    %c1_307 = arith.constant 1 : index
    %c0_308 = arith.constant 0 : index
    %c0_309 = arith.constant 0 : index
    %767 = vector.load %arg37[%c1_307, %c0_308, %c0_309] : memref<2x1x128xf32, #tpu.memory_space<vmem>>, vector<1x1x128xf32>
    %768 = vector.shape_cast %767 : vector<1x1x128xf32> to vector<1x128xf32>
    %cst_310 = arith.constant dense<0.000000e+00> : vector<16xf32>
    %769 = vector.multi_reduction <add>, %764, %cst_310 [1] : vector<16x128xf32> to vector<16xf32>
    %770 = vector.shape_cast %769 : vector<16xf32> to vector<16x1xf32>
    %cst_311 = arith.constant 1.280000e+02 : f32
    %771 = vector.broadcast %cst_311 : f32 to vector<16x1xf32>
    %772 = arith.divf %770, %771 : vector<16x1xf32>
    %773 = vector.broadcast %772 : vector<16x1xf32> to vector<16x128xf32>
    %774 = arith.subf %764, %773 : vector<16x128xf32>
    %775 = arith.mulf %774, %774 : vector<16x128xf32>
    %cst_312 = arith.constant dense<0.000000e+00> : vector<16xf32>
    %776 = vector.multi_reduction <add>, %775, %cst_312 [1] : vector<16x128xf32> to vector<16xf32>
    %777 = vector.shape_cast %776 : vector<16xf32> to vector<16x1xf32>
    %cst_313 = arith.constant 1.280000e+02 : f32
    %778 = vector.broadcast %cst_313 : f32 to vector<16x1xf32>
    %779 = arith.divf %777, %778 : vector<16x1xf32>
    %780 = vector.broadcast %772 : vector<16x1xf32> to vector<16x128xf32>
    %781 = arith.subf %764, %780 : vector<16x128xf32>
    %cst_314 = arith.constant 9.99999974E-6 : f32
    %782 = vector.broadcast %cst_314 : f32 to vector<16x1xf32>
    %783 = arith.addf %779, %782 : vector<16x1xf32>
    %784 = math.rsqrt %783 : vector<16x1xf32>
    %785 = vector.broadcast %784 : vector<16x1xf32> to vector<16x128xf32>
    %786 = arith.mulf %781, %785 : vector<16x128xf32>
    %787 = vector.broadcast %766 : vector<1x128xf32> to vector<16x128xf32>
    %788 = arith.mulf %786, %787 : vector<16x128xf32>
    %789 = vector.broadcast %768 : vector<1x128xf32> to vector<16x128xf32>
    %790 = arith.addf %788, %789 : vector<16x128xf32>
    %c1_315 = arith.constant 1 : index
    %c0_316 = arith.constant 0 : index
    %c0_317 = arith.constant 0 : index
    %791 = vector.load %arg38[%c1_315, %c0_316, %c0_317] : memref<2x128x512xbf16, #tpu.memory_space<vmem>>, vector<1x128x512xbf16>
    %792 = vector.shape_cast %791 : vector<1x128x512xbf16> to vector<128x512xbf16>
    %793 = arith.truncf %790 : vector<16x128xf32> to vector<16x128xbf16>
    %cst_318 = arith.constant dense<0.000000e+00> : vector<16x512xf32>
    %794 = tpu.matmul %793, %792, %cst_318 {dimension_numbers = #tpu.dot_dimension_numbers<[1], [0], [0], [1], [0, 0, 1, 1], [], []>} : vector<16x128xbf16>, vector<128x512xbf16>, vector<16x512xf32> -> vector<16x512xf32>
    %c1_319 = arith.constant 1 : index
    %c0_320 = arith.constant 0 : index
    %c0_321 = arith.constant 0 : index
    %795 = vector.load %arg39[%c1_319, %c0_320, %c0_321] : memref<2x1x512xf32, #tpu.memory_space<vmem>>, vector<1x1x512xf32>
    %796 = vector.shape_cast %795 : vector<1x1x512xf32> to vector<1x512xf32>
    %797 = vector.broadcast %796 : vector<1x512xf32> to vector<16x512xf32>
    %798 = arith.addf %794, %797 : vector<16x512xf32>
    %cst_322 = arith.constant 1.702000e+00 : f32
    %799 = vector.broadcast %cst_322 : f32 to vector<16x512xf32>
    %800 = arith.mulf %799, %798 : vector<16x512xf32>
    %801 = arith.negf %800 : vector<16x512xf32>
    %802 = math.exp %801 : vector<16x512xf32>
    %cst_323 = arith.constant 1.000000e+00 : f32
    %803 = vector.broadcast %cst_323 : f32 to vector<16x512xf32>
    %804 = arith.addf %803, %802 : vector<16x512xf32>
    %805 = arith.divf %803, %804 : vector<16x512xf32>
    %806 = arith.mulf %798, %805 : vector<16x512xf32>
    %c1_324 = arith.constant 1 : index
    %c0_325 = arith.constant 0 : index
    %c0_326 = arith.constant 0 : index
    %807 = vector.load %arg40[%c1_324, %c0_325, %c0_326] : memref<2x512x128xbf16, #tpu.memory_space<vmem>>, vector<1x512x128xbf16>
    %808 = vector.shape_cast %807 : vector<1x512x128xbf16> to vector<512x128xbf16>
    %809 = arith.truncf %806 : vector<16x512xf32> to vector<16x512xbf16>
    %cst_327 = arith.constant dense<0.000000e+00> : vector<16x128xf32>
    %810 = tpu.matmul %809, %808, %cst_327 {dimension_numbers = #tpu.dot_dimension_numbers<[1], [0], [0], [1], [0, 0, 1, 1], [], []>} : vector<16x512xbf16>, vector<512x128xbf16>, vector<16x128xf32> -> vector<16x128xf32>
    %811 = arith.addf %764, %810 : vector<16x128xf32>
    %c1_328 = arith.constant 1 : index
    %c0_329 = arith.constant 0 : index
    %c0_330 = arith.constant 0 : index
    %812 = vector.load %arg41[%c1_328, %c0_329, %c0_330] : memref<2x1x128xf32, #tpu.memory_space<vmem>>, vector<1x1x128xf32>
    %813 = vector.shape_cast %812 : vector<1x1x128xf32> to vector<1x128xf32>
    %814 = vector.broadcast %813 : vector<1x128xf32> to vector<16x128xf32>
    %815 = arith.addf %811, %814 : vector<16x128xf32>
    %c0_331 = arith.constant 0 : index
    %c0_332 = arith.constant 0 : index
    %816 = vector.load %arg27[%c0_331, %c0_332] : memref<1x128xf32, #tpu.memory_space<vmem>>, vector<1x128xf32>
    %c0_333 = arith.constant 0 : index
    %c0_334 = arith.constant 0 : index
    %817 = vector.load %arg28[%c0_333, %c0_334] : memref<1x128xf32, #tpu.memory_space<vmem>>, vector<1x128xf32>
    %cst_335 = arith.constant dense<0.000000e+00> : vector<16xf32>
    %818 = vector.multi_reduction <add>, %815, %cst_335 [1] : vector<16x128xf32> to vector<16xf32>
    %819 = vector.shape_cast %818 : vector<16xf32> to vector<16x1xf32>
    %cst_336 = arith.constant 1.280000e+02 : f32
    %820 = vector.broadcast %cst_336 : f32 to vector<16x1xf32>
    %821 = arith.divf %819, %820 : vector<16x1xf32>
    %822 = vector.broadcast %821 : vector<16x1xf32> to vector<16x128xf32>
    %823 = arith.subf %815, %822 : vector<16x128xf32>
    %824 = arith.mulf %823, %823 : vector<16x128xf32>
    %cst_337 = arith.constant dense<0.000000e+00> : vector<16xf32>
    %825 = vector.multi_reduction <add>, %824, %cst_337 [1] : vector<16x128xf32> to vector<16xf32>
    %826 = vector.shape_cast %825 : vector<16xf32> to vector<16x1xf32>
    %cst_338 = arith.constant 1.280000e+02 : f32
    %827 = vector.broadcast %cst_338 : f32 to vector<16x1xf32>
    %828 = arith.divf %826, %827 : vector<16x1xf32>
    %829 = vector.broadcast %821 : vector<16x1xf32> to vector<16x128xf32>
    %830 = arith.subf %815, %829 : vector<16x128xf32>
    %cst_339 = arith.constant 9.99999974E-6 : f32
    %831 = vector.broadcast %cst_339 : f32 to vector<16x1xf32>
    %832 = arith.addf %828, %831 : vector<16x1xf32>
    %833 = math.rsqrt %832 : vector<16x1xf32>
    %834 = vector.broadcast %833 : vector<16x1xf32> to vector<16x128xf32>
    %835 = arith.mulf %830, %834 : vector<16x128xf32>
    %836 = vector.broadcast %816 : vector<1x128xf32> to vector<16x128xf32>
    %837 = arith.mulf %835, %836 : vector<16x128xf32>
    %838 = vector.broadcast %817 : vector<1x128xf32> to vector<16x128xf32>
    %839 = arith.addf %837, %838 : vector<16x128xf32>
    %c0_340 = arith.constant 0 : index
    %c0_341 = arith.constant 0 : index
    %840 = vector.load %arg26[%c0_340, %c0_341] : memref<2x16xf32, #tpu.memory_space<vmem>>, vector<2x16xf32>
    %841 = arith.truncf %840 : vector<2x16xf32> to vector<2x16xbf16>
    %842 = arith.truncf %839 : vector<16x128xf32> to vector<16x128xbf16>
    %cst_342 = arith.constant dense<0.000000e+00> : vector<2x128xf32>
    %843 = tpu.matmul %841, %842, %cst_342 {dimension_numbers = #tpu.dot_dimension_numbers<[1], [0], [0], [1], [0, 0, 1, 1], [], []>} : vector<2x16xbf16>, vector<16x128xbf16>, vector<2x128xf32> -> vector<2x128xf32>
    %c0_343 = arith.constant 0 : index
    %c0_344 = arith.constant 0 : index
    %844 = vector.load %arg29[%c0_343, %c0_344] : memref<128x64xbf16, #tpu.memory_space<vmem>>, vector<128x64xbf16>
    %845 = arith.truncf %843 : vector<2x128xf32> to vector<2x128xbf16>
    %cst_345 = arith.constant dense<0.000000e+00> : vector<2x64xf32>
    %846 = tpu.matmul %845, %844, %cst_345 {dimension_numbers = #tpu.dot_dimension_numbers<[1], [0], [0], [1], [0, 0, 1, 1], [], []>} : vector<2x128xbf16>, vector<128x64xbf16>, vector<2x64xf32> -> vector<2x64xf32>
    %847 = arith.mulf %846, %846 : vector<2x64xf32>
    %cst_346 = arith.constant dense<0.000000e+00> : vector<2xf32>
    %848 = vector.multi_reduction <add>, %847, %cst_346 [1] : vector<2x64xf32> to vector<2xf32>
    %849 = vector.shape_cast %848 : vector<2xf32> to vector<2x1xf32>
    %cst_347 = arith.constant 1.000000e-24 : f32
    %850 = vector.broadcast %cst_347 : f32 to vector<2x1xf32>
    %851 = arith.maximumf %849, %850 : vector<2x1xf32>
    %852 = math.rsqrt %851 : vector<2x1xf32>
    %853 = vector.broadcast %852 : vector<2x1xf32> to vector<2x64xf32>
    %854 = arith.mulf %846, %853 : vector<2x64xf32>
    %855 = tpu.concatenate %436, %854 in 1 : vector<2x64xf32>, vector<2x64xf32> -> vector<2x128xf32>
    %c0_348 = arith.constant 0 : index
    %c0_349 = arith.constant 0 : index
    %856 = vector.load %arg42[%c0_348, %c0_349] : memref<2x128xf32, #tpu.memory_space<vmem>>, vector<2x128xf32>
    tpu.vector_store %arg42[%c0_348, %c0_349], %855 {strides = array<i32>} : memref<2x128xf32, #tpu.memory_space<vmem>>, vector<2x128xf32>,
    return
  }
}

</mosaic_0001>

<bundles_post_ra>
// kernel: tile.14
= control target key start
LH: loop header
LB: loop body
LE: loop exit
PB: predicated region body
PF: predicated region fallthrough
CT: control target
= control target key end

     0   :  { %s9_s6 = smov 3  ;;  %s69_s0 = inlined_call_operand.vmem [shape: f32[2,17,128], index: 0, kind: input, shape index: {}]   ;;  %s70_s1 = inlined_call_operand.vmem [shape: f32[34,128], index: 1, kind: output, shape index: {}]  }
   0x1   :  { %v2_v0 = vld [vmem:[%s69_s0] sm:$0xff]   ;;  %v21_v1 = vld [vmem:[%s69_s0 + $0x8] sm:$0xff]  }
   0x2   :  { %v23_v2 = vld [vmem:[%s69_s0 + $0x10] ss:$8 sm:%s9_s6]   ;;  %3 = vst [vmem:[%s70_s1] sm:$0xff] %v2_v0  }
   0x3   :  { %v25_v3 = vld [vmem:[%s69_s0 + $0x19] sm:$0xff]   ;;  %22 = vst [vmem:[%s70_s1 + $0x8] sm:$0xff] %v21_v1   ;;  %v27_v4 = vld [vmem:[%s69_s0 + $0x21] sm:$0xff]  }
   0x4   :  { %24 = vst [vmem:[%s70_s1 + $0x10] sm:$0x3] %v23_v2  }
   0x5   :  { %26 = vst [vmem:[%s70_s1 + $0x12] sm:$0xff] %v25_v3  }
   0x6   :  { %28 = vst [vmem:[%s70_s1 + $0x1a] sm:$0xff] %v27_v4  }

// kernel: clip_forward.1
= control target key start
LH: loop header
LB: loop body
LE: loop exit
PB: predicated region body
PF: predicated region fallthrough
CT: control target
= control target key end

     0   :  { %s11788_s6 = smov 1   ;;  %s11789_s10 = smov 2   ;;  %s15076_s0 = inlined_call_operand.smem [shape: u32[43], index: -1, kind: input, shape index: {}] }
   0x1   :  { %s11848_s5 = sld [smem:[%s15076_s0]]   ;;  %s11790_s14 = smov 3  }
   0x2   :  { %s11853_s9 = sld [smem:[%s15076_s0 + %s11788_s6]]   ;;  %s11791_s18 = smov 4  }
   0x3   :  { %s11858_s13 = sld [smem:[%s15076_s0 + %s11789_s10]]   ;;  %s11792_s22 = smov 5  }
   0x4   :  { %s11863_s17 = sld [smem:[%s15076_s0 + %s11790_s14]]   ;;  %s11793_s26 = smov 6  }
   0x5   :  { %s11868_s21 = sld [smem:[%s15076_s0 + %s11791_s18]]   ;;  %s11794_s30 = smov 7  }
   0x6   :  { %s11873_s25 = sld [smem:[%s15076_s0 + %s11792_s22]]   ;;  %s11795_s4 = smov 8  }
   0x7   :  { %s11878_s29 = sld [smem:[%s15076_s0 + %s11793_s26]]   ;;  %s11796_s10 = smov 9  }
   0x8   :  { %s11883_s3 = sld [smem:[%s15076_s0 + %s11794_s30]]   ;;  %s11797_s15 = smov 10  }
   0x9   :  { %s11888_s8 = sld [smem:[%s15076_s0 + %s11795_s4]]   ;;  %s11798_s20 = smov 11  }
   0xa   :  { %s11893_s14 = sld [smem:[%s15076_s0 + %s11796_s10]]   ;;  %s11799_s26 = smov 12  }
   0xb   :  { %s11898_s19 = sld [smem:[%s15076_s0 + %s11797_s15]]   ;;  %s11800_s1 = smov 13  }
   0xc   :  { %s11903_s24 = sld [smem:[%s15076_s0 + %s11798_s20]]   ;;  %s11801_s7 = smov 14  }
   0xd   :  { %15097 = sst [smem:[#allocation8_spill]] %s11878_s29  ;;  %s11802_s15 = smov 15  }
   0xe   :  { %15098 = sst [smem:[#allocation9_spill]] %s11883_s3  ;;  %s11803_s22 = smov 16  }
   0xf   :  { %15099 = sst [smem:[#allocation10_spill]] %s11888_s8  ;;  %s11804_s28 = smov 17  }
  0x10   :  { %15100 = sst [smem:[#allocation11_spill]] %s11893_s14 }
  0x11   :  { %s11908_s30 = sld [smem:[%s15076_s0 + %s11799_s26]]  }
  0x12   :  { %s11913_s6 = sld [smem:[%s15076_s0 + %s11800_s1]]  }
  0x13   :  { %s11918_s12 = sld [smem:[%s15076_s0 + %s11801_s7]]   ;;  %s11805_s7 = smov 18  }
  0x14   :  { %s11923_s20 = sld [smem:[%s15076_s0 + %s11802_s15]]   ;;  %s11806_s15 = smov 19  }
  0x15   :  { %s11928_s27 = sld [smem:[%s15076_s0 + %s11803_s22]]   ;;  %s11807_s22 = smov 20  }
  0x16   :  { %s11933_s4 = sld [smem:[%s15076_s0 + %s11804_s28]]   ;;  %s11808_s28 = smov 21  }
  0x17   :  { %s11938_s8 = sld [smem:[%s15076_s0 + %s11805_s7]]   ;;  %s11809_s7 = smov 22  }
  0x18   :  { %s11943_s3 = sld [smem:[%s15076_s0 + %s11806_s15]]   ;;  %s11810_s15 = smov 23  }
  0x19   :  { %s11948_s14 = sld [smem:[%s15076_s0 + %s11807_s22]]   ;;  %s11811_s22 = smov 24  }
  0x1a   :  { %s11953_s29 = sld [smem:[%s15076_s0 + %s11808_s28]]   ;;  %s11812_s28 = smov 25  }
  0x1b   :  { %15101 = sst [smem:[#allocation12_spill]] %s11928_s27 }
  0x1c   :  { %15102 = sst [smem:[#allocation13_spill]] %s11933_s4 }
  0x1d   :  { %s11958_s4 = sld [smem:[%s15076_s0 + %s11809_s7]]   ;;  %s11813_s7 = smov 26  }
  0x1e   :  { %15103 = sst [smem:[#allocation14_spill]] %s11943_s3 }
  0x1f   :  { %15104 = sst [smem:[#allocation15_spill]] %s11948_s14 }
  0x20   :  { %15105 = sst [smem:[#allocation16_spill]] %s11953_s29 }
  0x21   :  { %s11963_s3 = sld [smem:[%s15076_s0 + %s11810_s15]]   ;;  %s11814_s15 = smov 27  }
  0x22   :  { %s11968_s14 = sld [smem:[%s15076_s0 + %s11811_s22]]   ;;  %s11815_s22 = smov 28  }
  0x23   :  { %15106 = sst [smem:[#allocation17_spill]] %s11958_s4 }
  0x24   :  { %s11973_s29 = sld [smem:[%s15076_s0 + %s11812_s28]]   ;;  %s11816_s28 = smov 29  }
  0x25   :  { %s11978_s4 = sld [smem:[%s15076_s0 + %s11813_s7]]   ;;  %s11817_s7 = smov 30  }
  0x27   :  { %15107 = sst [smem:[#allocation18_spill]] %s11963_s3 }
  0x28   :  { %15108 = sst [smem:[#allocation19_spill]] %s11968_s14 }
  0x29   :  { %s11983_s3 = sld [smem:[%s15076_s0 + %s11814_s15]]   ;;  %s11818_s15 = smov 31  }
  0x2a   :  { %15109 = sst [smem:[#allocation20_spill]] %s11973_s29 }
  0x2b   :  { %15110 = sst [smem:[#allocation21_spill]] %s11978_s4 }
  0x2c   :  { %s11988_s14 = sld [smem:[%s15076_s0 + %s11815_s22]]   ;;  %s11819_s22 = smov 32  }
  0x2d   :  { %s11993_s29 = sld [smem:[%s15076_s0 + %s11816_s28]]   ;;  %s11820_s28 = smov 33  }
  0x2e   :  { %s11998_s4 = sld [smem:[%s15076_s0 + %s11817_s7]]   ;;  %s11821_s7 = smov 34  }
  0x2f   :  { %15111 = sst [smem:[#allocation22_spill]] %s11983_s3 }
  0x30   :  { %s12003_s3 = sld [smem:[%s15076_s0 + %s11818_s15]]   ;;  %s11822_s15 = smov 35  }
  0x32   :  { %15112 = sst [smem:[#allocation23_spill]] %s11988_s14 }
  0x33   :  { %15113 = sst [smem:[#allocation24_spill]] %s11993_s29 }
  0x34   :  { %15114 = sst [smem:[#allocation25_spill]] %s11998_s4 }
  0x35   :  { %s12008_s14 = sld [smem:[%s15076_s0 + %s11819_s22]]   ;;  %s11823_s22 = smov 36  }
  0x36   :  { %15115 = sst [smem:[#allocation26_spill]] %s12003_s3 }
  0x37   :  { %s12013_s29 = sld [smem:[%s15076_s0 + %s11820_s28]]   ;;  %s11824_s28 = smov 37  }
  0x38   :  { %s12018_s4 = sld [smem:[%s15076_s0 + %s11821_s7]]   ;;  %s11825_s7 = smov 38  }
  0x39   :  { %s12023_s3 = sld [smem:[%s15076_s0 + %s11822_s15]]   ;;  %s11826_s15 = smov 39  }
  0x3a   :  { %s12028_s27 = sld [smem:[%s15076_s0 + %s11823_s22]]   ;;  %s11827_s22 = smov 40  }
  0x3d   :  { %15116 = sst [smem:[#allocation27_spill]] %s12013_s29 }
  0x3e   :  { %15117 = sst [smem:[#allocation28_spill]] %s12018_s4 }
  0x3f   :  { %15118 = sst [smem:[#allocation29_spill]] %s12023_s3 }
  0x40   :  { %15119 = sst [smem:[#allocation30_spill]] %s12028_s27 }
  0x41   :  { %s12033_s29 = sld [smem:[%s15076_s0 + %s11824_s28]]   ;;  %s11828_s28 = smov 41  }
  0x42   :  { %s12038_s4 = sld [smem:[%s15076_s0 + %s11825_s7]]   ;;  %s11829_s7 = smov 42  }
  0x43   :  { %s12043_s3 = sld [smem:[%s15076_s0 + %s11826_s15]]  }
  0x44   :  { %s12048_s27 = sld [smem:[%s15076_s0 + %s11827_s22]]  }
  0x47   :  { %15120 = sst [smem:[#allocation31_spill]] %s12033_s29 }
  0x48   :  { %15121 = sst [smem:[#allocation32_spill]] %s12038_s4 }
  0x49   :  { %s12053_s29 = sld [smem:[%s15076_s0 + %s11828_s28]]  }
  0x4a   :  { %s12058_s4 = sld [smem:[%s15076_s0 + %s11829_s7]]  }
  0x4b   :  { %90 = vsyncpa [#allocation3], 0 }
  0x4c   :  { %91 = vsyncpa [#allocation4], 0  ;;  %s160_s15 = sshll.u32 %s12008_s14, 4  ;;  %s11830_s16 = smov [#allocation2]   ;;  %s161_s15 = int_to_ptr.hbm [resolvable:$true] %s160_s15 }
  0x4d   :  { %s162_s18 = sshll.u32 %s11830_s16, 4  ;;  %s11736_s22 = sshra.s32 %s161_s15, 4  ;;  %s163_s18 = int_to_ptr.vmem [resolvable:$true] %s162_s18  ;;  %s11737_s22 = int_to_ptr.hbm [resolvable:$true] %s11736_s22 }
  0x4e   :  { %s11738_s23 = scalar_lea.hbm %s11737_s22, 384  ;;  %s11740_s26 = scalar_lea.hbm %s12008_s14, 384 }
  0x4f   :  { %p11739_p0 = scmp.ne.s32.totalorder %s11737_s22, %s11738_s23  ;;  %p11741_p1 = scmp.lt.s32.totalorder %s11737_s22, %s12008_s14 }
  0x50   :  { %p11742_p2 = scmp.lt.s32.totalorder %s11740_s26, %s11738_s23 }
  0x52   :  { %p11743_p3 = por %p11742_p2, %p11741_p1 }
  0x54   :  { %p11744_p4 = pnand %p11743_p3, %p11739_p0 }
  0x56   :  { %11747 = shalt.err (!%p11744_p4)
}
  0x57   :  { %s11831_s0 = smov 192   ;;  %s11832_s28 = smov 12  }
  0x58   :  { %168 = dma.hbm_to_vmem [thread:$0]  %s161_s15, 6144, %s163_s18, [#allocation3], %s11831_s0, %s11831_s0, %s11832_s28  }
  0x59   :  { %11784 = dma.done.wait [#allocation3], 6144  }
  0x5a   :  { %11785 = vsyncadd [#allocation3], 4294961152  ;;  %v11833_v0 = vmov 0   ;;  %vm226_vm0 = vcmask 1040384   ;;  %v203_v1 = vld [vmem:[%s11853_s9 + $0x30] sm:$0x1] }
  0x5b   :  { %11142 = vset.pattern.permute.xlu1 %v11833_v0  ;;  %11141 = vset.pattern.permute.xlu0 %v11833_v0  ;;  %v228_v2 = vsel %vm226_vm0, 65535, %v11833_v0  ;;  %v210_v3 = vpack.c.bf16 %v203_v1, %v203_v1  ;;  %v201_v4 = vld [vmem:[%s11853_s9 + $0x20] sm:$0xff]  ;;  %v202_v5 = vld [vmem:[%s11853_s9 + $0x28] sm:$0xff]  ;;  %v199_v7 = vld [vmem:[%s11853_s9 + $0x10] sm:$0xff]  ;;  %vm216_vm1 = vcmask 400384   ;;  %vm265_vm2 = vcmask 1041408  }
  0x5c   :  { %v200_v8 = vld [vmem:[%s11853_s9 + $0x18] sm:$0xff]  ;;  %v209_v9 = vpack.c.bf16 %v202_v5, %v201_v4  ;;  %v197_v10 = vld [vmem:[%s11853_s9] sm:$0xff]  ;;  %v198_v11 = vld [vmem:[%s11853_s9 + $0x8] sm:$0xff]  ;;  %v11834_v39 = vmov 128.0   ;;  %s11836_s9 = smov 32   ;;  %s15124_s14 = sld [smem:[#allocation14_spill]] }
  0x5d   :  { %v230_v6 = vand.u32 %v228_v2, %v210_v3  ;;  %v208_v12 = vpack.c.bf16 %v200_v8, %v199_v7  ;;  %v192_v13 = vld [vmem:[%s11848_s5] sm:$0xff]  ;;  %v193_v14 = vld [vmem:[%s11848_s5 + $0x8] sm:$0xff]  ;;  %v207_v16 = vpack.c.bf16 %v198_v11, %v197_v10  ;;  %v194_v19 = vld [vmem:[%s11848_s5 + $0x10] sm:$0xff]  ;;  %11203 = vrcp.f32 %v11834_v39  ;;  %s15125_s1 = sld [smem:[#allocation15_spill]]  ;;  %s11839_s0 = smov [#allocation5]  }
  0x5e   :  { %v196_v15 = vld [vmem:[%s11848_s5 + $0x20] sm:$0x3]  ;;  %v204_v17 = vpack.c.bf16 %v193_v14, %v192_v13  ;;  %v195_v20 = vld [vmem:[%s11848_s5 + $0x18] sm:$0xff]  ;;  %v212_v29 = vld [vmem:[%s11858_s13 + $0x8] sm:$0xff]  ;;  %s11835_s5 = smov 96   ;;  %s15156_s2 = sld [smem:[#allocation16_spill]] }
  0x5f   :  { %236 = vmatpush.bf16.msra.mxu0 %v230_v6  ;;  %11025 = vmatpush.bf16.msra.mxu1 %v230_v6  ;;  %v206_v18 = vpack.c.bf16 %v196_v15, %v196_v15  ;;  %v205_v21 = vpack.c.bf16 %v195_v20, %v194_v19  ;;  %v211_v22 = vld [vmem:[%s11858_s13] sm:$0xff]  ;;  %v213_v33 = vld [vmem:[%s11858_s13 + $0x10] sm:$0xff]  ;;  %v214_v36 = vld [vmem:[%s11858_s13 + $0x18] sm:$0xff]  ;;  %s15202_s7 = sld [smem:[#allocation10_spill]]  ;;  %s8553_s28 = sshll.u32 %s11839_s0, 4  ;;  %s8554_s28 = int_to_ptr.vmem [resolvable:$true] %s8553_s28 }
  0x60   :  { %v215_v23 = vld [vmem:[%s11858_s13 + $0x20] sm:$0x3]  ;;  %s11837_s13 = smov 64   ;;  %s15203_s10 = sld [smem:[#allocation27_spill]] }
  0x61   :  { %s15204_s11 = sld [smem:[#allocation20_spill]] }
  0x62   :  { %s15205_s15 = sld [smem:[#allocation28_spill]] }
  0x63   :  { %237 = vmatpush.bf16.msra.mxu0 %v209_v9  ;;  %11026 = vmatpush.bf16.msra.mxu1 %v209_v9  ;;  %v11204_v40 = vpop.eup %11203  ;;  %s15206_s16 = sld [smem:[#allocation29_spill]] }
  0x64   :  { %v270_v41 = vmul.f32 128.0, %v11204_v40  ;;  %vm274_vm3 = vweird.f32 %v11204_v40  ;;  %s15209_s18 = sld [smem:[#allocation32_spill]] }
  0x65   :  { %s15210_s22 = sld [smem:[#allocation30_spill]] }
  0x66   :  { %v271_v42 = vsub.f32 1.0, %v270_v41  ;;  %s15211_s23 = sld [smem:[#allocation31_spill]] }
  0x67   :  { %238 = vmatpush.bf16.msra.mxu0 %v208_v12  ;;  %11027 = vmatpush.bf16.msra.mxu1 %v208_v12  ;;  %s15237_s26 = sld [smem:[#allocation21_spill]] }
  0x68   :  { %v272_v43 = vmul.f32 %v11204_v40, %v271_v42 }
  0x6a   :  { %v273_v44 = vadd.f32 %v11204_v40, %v272_v43 }
  0x6b   :  { %239 = vmatpush.bf16.msra.mxu0 %v207_v16  ;;  %11028 = vmatpush.bf16.msra.mxu1 %v207_v16 }
  0x6c   :  { %v12082_v45 = vsel %vm274_vm3, %v11204_v40, %v273_v44 }
  0x6e   :  { %8607 = vmatmul.msk.bf16.vlgmr.msra.gmra.mxu0 %vm216_vm1, %v204_v17  ;;  %8609 = vmatmul.msk.bf16.vlgmr.msra.gmra.mxu1 %vm216_vm1, %v206_v18 }
  0x7e   :  { %8608 = vmatmul.msk.bf16.gmra.mxu0 %vm216_vm1, %v205_v21 }
  0xeb   :  { %v241_v24 = vpop.f32.mrf.mxu0  ;;  %v251_v25 = vpop.f32.mrf.mxu1 }
  0xec   :  { %v242_v26 = vadd.f32 %v241_v24, %v211_v22  ;;  %v252_v27 = vadd.f32 %v251_v25, %v215_v23  ;;  %v12111_v23 = vld [vmem:[%s11863_s17] ss:$0 sm:$0xff]  ;;  %s15122_s17 = sld [smem:[#allocation12_spill]] }
  0xee   :  { %257 = vadd.xlane.f32.xlu0 %v242_v26  ;;  %v266_v28 = vsel %vm265_vm2, %v252_v27, 0.0 }
  0xef   :  { %267 = vadd.xlane.f32.xlu2 %v266_v28 }
  0xf3   :  { %v243_v30 = vpop.f32.mrf.mxu0  ;;  %v253_v31 = vpop.f32.mrf.mxu1 }
  0xf4   :  { %v244_v32 = vadd.f32 %v243_v30, %v212_v29 }
  0xf6   :  { %259 = vadd.xlane.f32.xlu0 %v244_v32 }
  0xfb   :  { %v246_v34 = vpop.f32.mrf.mxu0 }
  0xfc   :  { %v247_v35 = vadd.f32 %v246_v34, %v213_v33 }
  0xfe   :  { %261 = vadd.xlane.f32.xlu1 %v247_v35 }
 0x103   :  { %v248_v37 = vpop.f32.mrf.mxu0 }
 0x104   :  { %v249_v38 = vadd.f32 %v248_v37, %v214_v36 }
 0x106   :  { %263 = vadd.xlane.f32.xlu1 %v249_v38 }
 0x161   :  { %v258_v46 = vpop.xlane.xlu0 %257 }
 0x162   :  { %v276_v47 = vmul.f32 %v12082_v45, %v258_v46  ;;  %v268_v50 = vpop.xlane.xlu2 %267 }
 0x163   :  { %v280_v53 = vmul.f32 %v12082_v45, %v268_v50 }
 0x164   :  { %v281_v48 = vsub.f32 %v242_v26, %v276_v47 }
 0x165   :  { %v12091_v56 = vsub.f32 %v252_v27, %v280_v53  ;;  %v11174_v27 = vld [vmem:[%s11868_s21] ss:$0 sm:$0xff]  ;;  %s15123_s21 = sld [smem:[#allocation13_spill]] }
 0x166   :  { %v286_v49 = vmul.f32 %v281_v48, %v281_v48 }
 0x167   :  { %v290_v59 = vmul.f32 %v12091_v56, %v12091_v56 }
 0x168   :  { %291 = vadd.xlane.f32.xlu2 %v286_v49 }
 0x169   :  { %v260_v51 = vpop.xlane.xlu0 %259  ;;  %v299_v62 = vsel %vm265_vm2, %v290_v59, 0.0 }
 0x16a   :  { %v277_v52 = vmul.f32 %v12082_v45, %v260_v51 }
 0x16c   :  { %v12087_v54 = vsub.f32 %v244_v32, %v277_v52 }
 0x16e   :  { %v287_v55 = vmul.f32 %v12087_v54, %v12087_v54 }
 0x170   :  { %293 = vadd.xlane.f32.xlu0 %v287_v55 }
 0x171   :  { %v262_v57 = vpop.xlane.xlu1 %261 }
 0x172   :  { %v278_v58 = vmul.f32 %v12082_v45, %v262_v57 }
 0x174   :  { %v12096_v60 = vsub.f32 %v247_v35, %v278_v58 }
 0x176   :  { %v288_v61 = vmul.f32 %v12096_v60, %v12096_v60 }
 0x178   :  { %295 = vadd.xlane.f32.xlu1 %v288_v61  ;;  %300 = vadd.xlane.f32.xlu0 %v299_v62 }
 0x179   :  { %v264_v63 = vpop.xlane.xlu1 %263 }
 0x17a   :  { %v279_v0 = vmul.f32 %v12082_v45, %v264_v63 }
 0x17c   :  { %v12102_v1 = vsub.f32 %v249_v38, %v279_v0 }
 0x17e   :  { %v289_v2 = vmul.f32 %v12102_v1, %v12102_v1 }
 0x180   :  { %297 = vadd.xlane.f32.xlu2 %v289_v2 }
 0x1db   :  { %v292_v3 = vpop.xlane.xlu2 %291 }
 0x1dc   :  { %v302_v4 = vmul.f32 %v292_v3, %v12082_v45 }
 0x1de   :  { %v307_v5 = vadd.f32 1e-05, %v302_v4 }
 0x1e0   :  { %11205 = vrsqrt.f32 %v307_v5  ;;  %vm318_vm5 = vweird.f32 %v307_v5 }
 0x1e3   :  { %v294_v6 = vpop.xlane.xlu0 %293 }
 0x1e4   :  { %v303_v7 = vmul.f32 %v294_v6, %v12082_v45 }
 0x1e6   :  { %v11206_v8 = vpop.eup %11205  ;;  %v308_v9 = vadd.f32 1e-05, %v303_v7 }
 0x1e7   :  { %v313_v10 = vmul.f32 %v11206_v8, %v307_v5  ;;  %vm319_vm4 = vweird.f32 %v11206_v8 }
 0x1e8   :  { %11207 = vrsqrt.f32 %v308_v9  ;;  %vm320_vm6 = vmor %vm318_vm5, %vm319_vm4  ;;  %vm328_vm8 = vweird.f32 %v308_v9 }
 0x1e9   :  { %v314_v11 = vmul.f32 %v11206_v8, %v313_v10 }
 0x1eb   :  { %v315_v12 = vmul.f32 0.5, %v314_v11  ;;  %v296_v13 = vpop.xlane.xlu1 %295  ;;  %v301_v14 = vpop.xlane.xlu0 %300 }
 0x1ec   :  { %v304_v15 = vmul.f32 %v296_v13, %v12082_v45  ;;  %v306_v16 = vmul.f32 %v301_v14, %v12082_v45 }
 0x1ed   :  { %v316_v17 = vsub.f32 1.5, %v315_v12 }
 0x1ee   :  { %v11208_v18 = vpop.eup %11207  ;;  %v309_v19 = vadd.f32 1e-05, %v304_v15  ;;  %v311_v20 = vadd.f32 1e-05, %v306_v16 }
 0x1ef   :  { %v317_v21 = vmul.f32 %v11206_v8, %v316_v17  ;;  %v323_v22 = vmul.f32 %v11208_v18, %v308_v9  ;;  %vm329_vm7 = vweird.f32 %v11208_v18 }
 0x1f0   :  { %11209 = vrsqrt.f32 %v309_v19  ;;  %vm330_vm9 = vmor %vm328_vm8, %vm329_vm7  ;;  %vm338_vm12 = vweird.f32 %v309_v19  ;;  %vm358_vm14 = vweird.f32 %v311_v20 }
 0x1f1   :  { %v324_v24 = vmul.f32 %v11208_v18, %v323_v22  ;;  %11211 = vrsqrt.f32 %v311_v20  ;;  %v321_v25 = vsel %vm320_vm6, %v11206_v8, %v317_v21 }
 0x1f2   :  { %v362_v26 = vmul.f32 %v321_v25, %v281_v48 }
 0x1f3   :  { %v325_v28 = vmul.f32 0.5, %v324_v24  ;;  %v298_v29 = vpop.xlane.xlu2 %297 }
 0x1f4   :  { %v305_v30 = vmul.f32 %v298_v29, %v12082_v45  ;;  %v370_v31 = vmul.f32 %v12111_v23, %v362_v26  ;;  %v8696_v29 = vld [vmem:[%s11908_s30 + $0xa8] sm:$0xf] }
 0x1f5   :  { %v326_v32 = vsub.f32 1.5, %v325_v28 }
 0x1f6   :  { %v11210_v33 = vpop.eup %11209  ;;  %v310_v34 = vadd.f32 1e-05, %v305_v30  ;;  %v12116_v35 = vadd.f32 %v11174_v27, %v370_v31  ;;  %v10643_v30 = vld [vmem:[%s11908_s30 + $0xb0] sm:$0xf0]  ;;  %v10642_v31 = vld [vmem:[%s11908_s30 + $0xac] sm:$0xf] }
 0x1f7   :  { %v11212_v36 = vpop.eup %11211  ;;  %v327_v37 = vmul.f32 %v11208_v18, %v326_v32  ;;  %v333_v38 = vmul.f32 %v11210_v33, %v309_v19  ;;  %vm339_vm10 = vweird.f32 %v11210_v33  ;;  %v8697_v32 = vor.u32 %v10643_v30, %v8696_v29  ;;  %v8624_v30 = vld [vmem:[%s11908_s30 + $0x18] sm:$0xf] }
 0x1f8   :  { %v353_v39 = vmul.f32 %v11212_v36, %v311_v20  ;;  %11213 = vrsqrt.f32 %v310_v34  ;;  %390 = vadd.xlane.f32.xlu1 %v12116_v35  ;;  %vm359_vm11 = vweird.f32 %v11212_v36  ;;  %vm340_vm13 = vmor %vm338_vm12, %vm339_vm10  ;;  %vm348_vm3 = vweird.f32 %v310_v34 }
 0x1f9   :  { %v334_v40 = vmul.f32 %v11210_v33, %v333_v38  ;;  %v331_v41 = vsel %vm330_vm9, %v11208_v18, %v327_v37  ;;  %vm360_vm15 = vmor %vm358_vm14, %vm359_vm11  ;;  %679 = vmatpush.bf16.msrb.mxu1 %v8697_v32  ;;  %v10624_v32 = vld [vmem:[%s11908_s30 + $0x1c] sm:$0xf] }
 0x1fa   :  { %v354_v42 = vmul.f32 %v11212_v36, %v353_v39  ;;  %v363_v43 = vmul.f32 %v331_v41, %v12087_v54  ;;  %v8684_v39 = vld [vmem:[%s11908_s30 + $0x90] sm:$0xf]  ;;  %v10639_v41 = vld [vmem:[%s11908_s30 + $0x94] sm:$0xf] }
 0x1fb   :  { %v335_v44 = vmul.f32 0.5, %v334_v40  ;;  %v10640_v40 = vld [vmem:[%s11908_s30 + $0x98] sm:$0xf0] }
 0x1fc   :  { %v355_v46 = vmul.f32 0.5, %v354_v42  ;;  %v371_v47 = vmul.f32 %v12111_v23, %v363_v43  ;;  %v8685_v42 = vor.u32 %v10640_v40, %v8684_v39  ;;  %v8686_v43 = vld [vmem:[%s11908_s30 + $0x9c] sm:$0xf0] }
 0x1fd   :  { %v336_v48 = vsub.f32 1.5, %v335_v44  ;;  %v8692_v44 = vld [vmem:[%s11908_s30 + $0x98] sm:$0xf] }
 0x1fe   :  { %v11214_v49 = vpop.eup %11213  ;;  %v356_v50 = vsub.f32 1.5, %v355_v46  ;;  %v12121_v51 = vadd.f32 %v11174_v27, %v371_v47  ;;  %v10641_v46 = vld [vmem:[%s11908_s30 + $0xa0] sm:$0xf0]  ;;  %v8689_v47 = vor.u32 %v10639_v41, %v8686_v43  ;;  %680 = vmatpush.bf16.msrb.mxu1 %v8685_v42  ;;  %v8612_v42 = vld [vmem:[%s11908_s30] sm:$0xf] }
 0x1ff   :  { %v337_v52 = vmul.f32 %v11210_v33, %v336_v48  ;;  %v343_v53 = vmul.f32 %v11214_v49, %v310_v34  ;;  %vm349_vm1 = vweird.f32 %v11214_v49  ;;  %v8704_v34 = vld [vmem:[%s11908_s30 + $0xb0] sm:$0xf]  ;;  %v8693_v48 = vor.u32 %v10641_v46, %v8692_v44  ;;  %v10622_v43 = vld [vmem:[%s11908_s30 + $0x8] sm:$0xf0]  ;;  %v10621_v44 = vld [vmem:[%s11908_s30 + $0x4] sm:$0xf] }
 0x200   :  { %v357_v55 = vmul.f32 %v11212_v36, %v356_v50  ;;  %392 = vadd.xlane.f32.xlu2 %v12121_v51  ;;  %vm350_vm4 = vmor %vm348_vm3, %vm349_vm1  ;;  %v10637_v50 = vld [vmem:[%s11908_s30 + $0x80] sm:$0xf0] }
 0x201   :  { %v344_v54 = vmul.f32 %v11214_v49, %v343_v53  ;;  %v341_v57 = vsel %vm340_vm13, %v11210_v33, %v337_v52  ;;  %v8698_v33 = vld [vmem:[%s11908_s30 + $0xb4] sm:$0xf0]  ;;  %v10636_v52 = vld [vmem:[%s11908_s30 + $0x7c] sm:$0xf] }
 0x202   :  { %v364_v58 = vmul.f32 %v341_v57, %v12096_v60  ;;  %v361_v59 = vsel %vm360_vm15, %v11212_v36, %v357_v55  ;;  %v10644_v36 = vld [vmem:[%s11908_s30 + $0xb8] sm:$0xf0]  ;;  %v8701_v37 = vor.u32 %v10642_v31, %v8698_v33  ;;  %v8674_v55 = vld [vmem:[%s11908_s30 + $0x84] sm:$0xf0]  ;;  %v10638_v57 = vld [vmem:[%s11908_s30 + $0x88] sm:$0xf0] }
 0x203   :  { %v345_v61 = vmul.f32 0.5, %v344_v54  ;;  %v366_v62 = vmul.f32 %v361_v59, %v12091_v56  ;;  %v8705_v38 = vor.u32 %v10644_v36, %v8704_v34  ;;  %v8680_v54 = vld [vmem:[%s11908_s30 + $0x80] sm:$0xf]  ;;  %v10625_v31 = vld [vmem:[%s11908_s30 + $0x20] sm:$0xf0] }
 0x204   :  { %v372_v63 = vmul.f32 %v12111_v23, %v364_v58  ;;  %702 = vmatpush.bf16.msra.mxu2 %v8701_v37  ;;  %v8677_v58 = vor.u32 %v10636_v52, %v8674_v55  ;;  %v8681_v59 = vor.u32 %v10638_v57, %v8680_v54  ;;  %v8625_v33 = vor.u32 %v10625_v31, %v8624_v30  ;;  %v8626_v34 = vld [vmem:[%s11908_s30 + $0x24] sm:$0xf0]  ;;  %v8632_v36 = vld [vmem:[%s11908_s30 + $0x20] sm:$0xf]  ;;  %v10626_v37 = vld [vmem:[%s11908_s30 + $0x28] sm:$0xf0] }
 0x205   :  { %v346_v0 = vsub.f32 1.5, %v345_v61  ;;  %v374_v2 = vmul.f32 %v12111_v23, %v366_v62  ;;  %725 = vmatpush.bf16.msra.mxu3 %v8705_v38  ;;  %v8660_v61 = vld [vmem:[%s11908_s30 + $0x60] sm:$0xf]  ;;  %v10634_v62 = vld [vmem:[%s11908_s30 + $0x68] sm:$0xf0]  ;;  %v8629_v39 = vor.u32 %v10624_v32, %v8626_v34  ;;  %v8633_v40 = vor.u32 %v10626_v37, %v8632_v36 }
 0x206   :  { %v12128_v3 = vadd.f32 %v11174_v27, %v372_v63  ;;  %v10633_v63 = vld [vmem:[%s11908_s30 + $0x64] sm:$0xf]  ;;  %v10623_v52 = vld [vmem:[%s11908_s30 + $0x10] sm:$0xf0]  ;;  %v11176_v32 = vld [vmem:[%s11903_s24] ss:$0 sm:$0xff] }
 0x207   :  { %v347_v4 = vmul.f32 %v11214_v49, %v346_v0  ;;  %v12130_v5 = vadd.f32 %v11174_v27, %v374_v2  ;;  %v8661_v0 = vor.u32 %v10634_v62, %v8660_v61  ;;  %v8662_v2 = vld [vmem:[%s11908_s30 + $0x6c] sm:$0xf0] }
 0x208   :  { %394 = vadd.xlane.f32.xlu0 %v12128_v3  ;;  %703 = vmatpush.bf16.msra.mxu2 %v8689_v47  ;;  %v8613_v47 = vor.u32 %v10622_v43, %v8612_v42 }
 0x209   :  { %v398_v60 = vsel %vm265_vm2, %v12130_v5, 0.0  ;;  %v351_v6 = vsel %vm350_vm4, %v11214_v49, %v347_v4  ;;  %726 = vmatpush.bf16.msra.mxu3 %v8693_v48  ;;  %v8672_v49 = vld [vmem:[%s11908_s30 + $0x78] sm:$0xf]  ;;  %v8668_v4 = vld [vmem:[%s11908_s30 + $0x68] sm:$0xf] }
 0x20a   :  { %399 = vadd.xlane.f32.xlu2 %v398_v60  ;;  %v365_v56 = vmul.f32 %v351_v6, %v12102_v1  ;;  %v8673_v53 = vor.u32 %v10637_v50, %v8672_v49  ;;  %v10635_v60 = vld [vmem:[%s11908_s30 + $0x70] sm:$0xf0]  ;;  %v8665_v6 = vor.u32 %v10633_v63, %v8662_v2  ;;  %v8614_v48 = vld [vmem:[%s11908_s30 + $0xc] sm:$0xf0]  ;;  %v8620_v49 = vld [vmem:[%s11908_s30 + $0x8] sm:$0xf] }
 0x20b   :  { %v8617_v50 = vor.u32 %v10621_v44, %v8614_v48 }
 0x20c   :  { %v373_v7 = vmul.f32 %v12111_v23, %v365_v56  ;;  %681 = vmatpush.bf16.msrb.mxu1 %v8673_v53  ;;  %704 = vmatpush.bf16.msra.mxu2 %v8677_v58  ;;  %v8669_v56 = vor.u32 %v10635_v60, %v8668_v4  ;;  %v8621_v53 = vor.u32 %v10623_v52, %v8620_v49 }
 0x20d   :  { %727 = vmatpush.bf16.msra.mxu3 %v8681_v59 }
 0x20e   :  { %v12137_v8 = vadd.f32 %v11174_v27, %v373_v7  ;;  %v8648_v7 = vld [vmem:[%s11908_s30 + $0x48] sm:$0xf] }
 0x210   :  { %396 = vadd.xlane.f32.xlu1 %v12137_v8  ;;  %682 = vmatpush.bf16.msrb.mxu1 %v8661_v0 }
 0x211   :  { %705 = vmatpush.bf16.msra.mxu2 %v8665_v6  ;;  %728 = vmatpush.bf16.msra.mxu3 %v8669_v56 }
 0x26b   :  { %v391_v9 = vpop.xlane.xlu1 %390 }
 0x26c   :  { %v401_v10 = vmul.f32 %v391_v9, %v12082_v45  ;;  %v10631_v9 = vld [vmem:[%s11908_s30 + $0x50] sm:$0xf0] }
 0x26e   :  { %v12142_v11 = vsub.f32 %v12116_v35, %v401_v10  ;;  %v10630_v10 = vld [vmem:[%s11908_s30 + $0x4c] sm:$0xf] }
 0x270   :  { %v411_v12 = vmul.f32 %v12142_v11, %v12142_v11 }
 0x272   :  { %416 = vadd.xlane.f32.xlu0 %v411_v12  ;;  %v8649_v12 = vor.u32 %v10631_v9, %v8648_v7 }
 0x273   :  { %v393_v13 = vpop.xlane.xlu2 %392 }
 0x274   :  { %v402_v14 = vmul.f32 %v393_v13, %v12082_v45  ;;  %v8650_v13 = vld [vmem:[%s11908_s30 + $0x54] sm:$0xf0]  ;;  %683 = vmatpush.bf16.msrb.mxu1 %v8649_v12 }
 0x276   :  { %v12148_v1 = vsub.f32 %v12121_v51, %v402_v14  ;;  %v8656_v14 = vld [vmem:[%s11908_s30 + $0x50] sm:$0xf] }
 0x278   :  { %v412_v15 = vmul.f32 %v12148_v1, %v12148_v1 }
 0x27a   :  { %418 = vadd.xlane.f32.xlu1 %v412_v15  ;;  %v10632_v15 = vld [vmem:[%s11908_s30 + $0x58] sm:$0xf0] }
 0x27b   :  { %v395_v16 = vpop.xlane.xlu0 %394 }
 0x27c   :  { %v403_v17 = vmul.f32 %v395_v16, %v12082_v45  ;;  %v8653_v16 = vor.u32 %v10630_v10, %v8650_v13 }
 0x27d   :  { %v400_v18 = vpop.xlane.xlu2 %399 }
 0x27e   :  { %v405_v19 = vmul.f32 %v400_v18, %v12082_v45  ;;  %v12155_v20 = vsub.f32 %v12128_v3, %v403_v17  ;;  %v8657_v17 = vor.u32 %v10632_v15, %v8656_v14  ;;  %706 = vmatpush.bf16.msra.mxu2 %v8653_v16  ;;  %v8636_v18 = vld [vmem:[%s11908_s30 + $0x30] sm:$0xf] }
 0x280   :  { %v12158_v21 = vsub.f32 %v12130_v5, %v405_v19  ;;  %v413_v22 = vmul.f32 %v12155_v20, %v12155_v20  ;;  %729 = vmatpush.bf16.msra.mxu3 %v8657_v17  ;;  %v10628_v19 = vld [vmem:[%s11908_s30 + $0x38] sm:$0xf0] }
 0x282   :  { %420 = vadd.xlane.f32.xlu2 %v413_v22  ;;  %v415_v23 = vmul.f32 %v12158_v21, %v12158_v21  ;;  %v10627_v22 = vld [vmem:[%s11908_s30 + $0x34] sm:$0xf] }
 0x283   :  { %v397_v24 = vpop.xlane.xlu1 %396 }
 0x284   :  { %v404_v25 = vmul.f32 %v397_v24, %v12082_v45  ;;  %v424_v26 = vsel %vm265_vm2, %v415_v23, 0.0  ;;  %v8637_v23 = vor.u32 %v10628_v19, %v8636_v18  ;;  %v8638_v24 = vld [vmem:[%s11908_s30 + $0x3c] sm:$0xf0] }
 0x285   :  { %425 = vadd.xlane.f32.xlu1 %v424_v26  ;;  %v10629_v26 = vld [vmem:[%s11908_s30 + $0x40] sm:$0xf0] }
 0x286   :  { %v12167_v27 = vsub.f32 %v12137_v8, %v404_v25  ;;  %v8644_v25 = vld [vmem:[%s11908_s30 + $0x38] sm:$0xf]  ;;  %684 = vmatpush.bf16.msrb.mxu1 %v8637_v23  ;;  %v11175_v23 = vld [vmem:[%s11898_s19] ss:$0 sm:$0xff] }
 0x287   :  { %v8645_v29 = vor.u32 %v10629_v26, %v8644_v25 }
 0x288   :  { %v414_v28 = vmul.f32 %v12167_v27, %v12167_v27 }
 0x289   :  { %730 = vmatpush.bf16.msra.mxu3 %v8645_v29 }
 0x28a   :  { %422 = vadd.xlane.f32.xlu0 %v414_v28  ;;  %v8641_v28 = vor.u32 %v10627_v22, %v8638_v24  ;;  %685 = vmatpush.bf16.msrb.mxu1 %v8625_v33 }
 0x28c   :  { %707 = vmatpush.bf16.msra.mxu2 %v8641_v28 }
 0x28d   :  { %731 = vmatpush.bf16.msra.mxu3 %v8633_v40 }
 0x28e   :  { %686 = vmatpush.bf16.msrb.mxu1 %v8613_v47 }
 0x290   :  { %708 = vmatpush.bf16.msra.mxu2 %v8629_v39 }
 0x291   :  { %732 = vmatpush.bf16.msra.mxu3 %v8621_v53 }
 0x294   :  { %709 = vmatpush.bf16.msra.mxu2 %v8617_v50 }
 0x2e5   :  { %v417_v38 = vpop.xlane.xlu0 %416 }
 0x2e6   :  { %v427_v41 = vmul.f32 %v417_v38, %v12082_v45 }
 0x2e8   :  { %v432_v46 = vadd.f32 1e-05, %v427_v41 }
 0x2ea   :  { %11215 = vrsqrt.f32 %v432_v46  ;;  %vm443_vm6 = vweird.f32 %v432_v46 }
 0x2ed   :  { %v419_v55 = vpop.xlane.xlu1 %418 }
 0x2ee   :  { %v428_v54 = vmul.f32 %v419_v55, %v12082_v45 }
 0x2f0   :  { %v11216_v57 = vpop.eup %11215  ;;  %v433_v58 = vadd.f32 1e-05, %v428_v54 }
 0x2f1   :  { %v438_v59 = vmul.f32 %v11216_v57, %v432_v46  ;;  %vm444_vm5 = vweird.f32 %v11216_v57 }
 0x2f2   :  { %11217 = vrsqrt.f32 %v433_v58  ;;  %vm445_vm7 = vmor %vm443_vm6, %vm444_vm5  ;;  %vm453_vm9 = vweird.f32 %v433_v58  ;;  %vm754_vm6 = vcmask 261120  }
 0x2f3   :  { %v439_v61 = vmul.f32 %v11216_v57, %v438_v59 }
 0x2f5   :  { %v440_v62 = vmul.f32 0.5, %v439_v61  ;;  %v421_v63 = vpop.xlane.xlu2 %420 }
 0x2f6   :  { %v429_v0 = vmul.f32 %v421_v63, %v12082_v45 }
 0x2f7   :  { %v441_v2 = vsub.f32 1.5, %v440_v62 }
 0x2f8   :  { %v11218_v4 = vpop.eup %11217  ;;  %v434_v60 = vadd.f32 1e-05, %v429_v0  ;;  %v426_v6 = vpop.xlane.xlu1 %425 }
 0x2f9   :  { %v442_v56 = vmul.f32 %v11216_v57, %v441_v2  ;;  %v448_v7 = vmul.f32 %v11218_v4, %v433_v58  ;;  %v431_v9 = vmul.f32 %v426_v6, %v12082_v45  ;;  %vm454_vm8 = vweird.f32 %v11218_v4 }
 0x2fa   :  { %11219 = vrsqrt.f32 %v434_v60  ;;  %vm455_vm10 = vmor %vm453_vm9, %vm454_vm8  ;;  %vm463_vm12 = vweird.f32 %v434_v60  ;;  %vm819_vm8 = vcmask 271360   ;;  %vm1470_vm9 = vcmask 523264  }
 0x2fb   :  { %v449_v10 = vmul.f32 %v11218_v4, %v448_v7  ;;  %v436_v12 = vadd.f32 1e-05, %v431_v9  ;;  %v446_v13 = vsel %vm445_vm7, %v11216_v57, %v442_v56  ;;  %vm806_vm7 = vcmask 277504  }
 0x2fc   :  { %v487_v22 = vmul.f32 %v446_v13, %v12142_v11 }
 0x2fd   :  { %v450_v14 = vmul.f32 0.5, %v449_v10  ;;  %v423_v15 = vpop.xlane.xlu0 %422  ;;  %11221 = vrsqrt.f32 %v436_v12  ;;  %vm483_vm4 = vweird.f32 %v436_v12 }
 0x2fe   :  { %v430_v16 = vmul.f32 %v423_v15, %v12082_v45  ;;  %v495_v31 = vmul.f32 %v11175_v23, %v487_v22 }
 0x2ff   :  { %v451_v17 = vsub.f32 1.5, %v450_v14 }
 0x300   :  { %v11220_v18 = vpop.eup %11219  ;;  %v435_v19 = vadd.f32 1e-05, %v430_v16  ;;  %v503_v39 = vadd.f32 %v11176_v32, %v495_v31 }
 0x301   :  { %v452_v24 = vmul.f32 %v11218_v4, %v451_v17  ;;  %v458_v25 = vmul.f32 %v11220_v18, %v434_v60  ;;  %vm464_vm11 = vweird.f32 %v11220_v18  ;;  %v543_v60 = vld [vmem:[%s11913_s6] sm:$0x7] }
 0x302   :  { %11223 = vrsqrt.f32 %v435_v19  ;;  %vm465_vm13 = vmor %vm463_vm12, %vm464_vm11  ;;  %vm473_vm15 = vweird.f32 %v435_v19  ;;  %v545_v6 = vperm.slane %v543_v60, 0  ;;  %v546_v13 = vperm.slane %v543_v60, 1 }
 0x303   :  { %v456_v26 = vsel %vm455_vm10, %v11218_v4, %v452_v24  ;;  %v459_v28 = vmul.f32 %v11220_v18, %v458_v25  ;;  %v11222_v29 = vpop.eup %11221  ;;  %vm15096_vm10 = vcmask 785408  }
 0x304   :  { %v488_v30 = vmul.f32 %v456_v26, %v12148_v1  ;;  %v478_v37 = vmul.f32 %v11222_v29, %v436_v12  ;;  %vm484_vm3 = vweird.f32 %v11222_v29 }
 0x305   :  { %v460_v33 = vmul.f32 0.5, %v459_v28  ;;  %vm485_vm5 = vmor %vm483_vm4, %vm484_vm3 }
 0x306   :  { %v496_v34 = vmul.f32 %v11175_v23, %v488_v30  ;;  %v479_v43 = vmul.f32 %v11222_v29, %v478_v37 }
 0x307   :  { %v461_v36 = vsub.f32 1.5, %v460_v33 }
 0x308   :  { %v11224_v38 = vpop.eup %11223  ;;  %v504_v11 = vadd.f32 %v11176_v32, %v496_v34  ;;  %v480_v47 = vmul.f32 0.5, %v479_v43 }
 0x309   :  { %v462_v40 = vmul.f32 %v11220_v18, %v461_v36  ;;  %v468_v41 = vmul.f32 %v11224_v38, %v435_v19  ;;  %vm474_vm14 = vweird.f32 %v11224_v38  ;;  %v547_v36 = vperm.slane %v543_v60, 2 }
 0x30a   :  { %v540_v42 = vpack.c.bf16 %v504_v11, %v503_v39  ;;  %vm475_vm1 = vmor %vm473_vm15, %vm474_vm14  ;;  %v481_v52 = vsub.f32 1.5, %v480_v47 }
 0x30b   :  { %v469_v44 = vmul.f32 %v11224_v38, %v468_v41  ;;  %v466_v1 = vsel %vm465_vm13, %v11220_v18, %v462_v40 }
 0x30c   :  { %687 = vmatmul.bf16.vlgmr.msrb.gmra.mxu1 %v540_v42  ;;  %710 = vmatmul.bf16.vlgmr.msra.gmra.mxu2 %v540_v42  ;;  %v489_v49 = vmul.f32 %v466_v1, %v12155_v20  ;;  %v482_v58 = vmul.f32 %v11222_v29, %v481_v52 }
 0x30d   :  { %v470_v46 = vmul.f32 0.5, %v469_v44  ;;  %733 = vmatmul.bf16.vlgmr.msra.gmra.mxu3 %v540_v42 }
 0x30e   :  { %v497_v54 = vmul.f32 %v11175_v23, %v489_v49  ;;  %v486_v63 = vsel %vm485_vm5, %v11222_v29, %v482_v58 }
 0x30f   :  { %v471_v48 = vsub.f32 1.5, %v470_v46  ;;  %v491_v20 = vmul.f32 %v486_v63, %v12158_v21 }
 0x310   :  { %v505_v59 = vadd.f32 %v11176_v32, %v497_v54 }
 0x311   :  { %v472_v50 = vmul.f32 %v11224_v38, %v471_v48  ;;  %v499_v0 = vmul.f32 %v11175_v23, %v491_v20 }
 0x313   :  { %v476_v53 = vsel %vm475_vm1, %v11224_v38, %v472_v50  ;;  %v507_v2 = vadd.f32 %v11176_v32, %v499_v0 }
 0x314   :  { %v490_v55 = vmul.f32 %v476_v53, %v12167_v27 }
 0x315   :  { %v542_v4 = vpack.c.bf16 %v507_v2, %v507_v2 }
 0x316   :  { %v498_v57 = vmul.f32 %v11175_v23, %v490_v55 }
 0x318   :  { %v506_v61 = vadd.f32 %v11176_v32, %v498_v57 }
 0x31a   :  { %v541_v62 = vpack.c.bf16 %v506_v61, %v505_v59 }
 0x31c   :  { %692 = vmatmul.bf16.gmra.mxu1 %v541_v62  ;;  %715 = vmatmul.bf16.gmra.mxu2 %v541_v62 }
 0x31d   :  { %738 = vmatmul.bf16.gmra.mxu3 %v541_v62 }
 0x32c   :  { %697 = vmatmul.bf16.gmra.mxu1 %v542_v4  ;;  %720 = vmatmul.bf16.gmra.mxu2 %v542_v4 }
 0x32d   :  { %743 = vmatmul.bf16.gmra.mxu3 %v542_v4 }
 0x389   :  { %v688_v27 = vpop.f32.mrf.mxu1 }
 0x38a   :  { %v689_v10 = vadd.f32 %v688_v27, %v545_v6 }
 0x38f   :  { %v711_v56 = vpop.f32.mrf.mxu2 }
 0x390   :  { %v734_v7 = vpop.f32.mrf.mxu3  ;;  %v712_v15 = vadd.f32 %v711_v56, %v546_v13 }
 0x391   :  { %v690_v9 = vpop.f32.mrf.mxu1  ;;  %v735_v55 = vadd.f32 %v734_v7, %v547_v36 }
 0x392   :  { %v691_v12 = vadd.f32 %v690_v9, %v545_v6 }
 0x394   :  { %v12232_v14 = vpack.c.bf16 %v691_v12, %v689_v10 }
 0x396   :  { %907 = vrot.lane.b32.xlu2 %v12232_v14, %s11835_s5 }
 0x397   :  { %v713_v21 = vpop.f32.mrf.mxu2 }
 0x398   :  { %v714_v16 = vadd.f32 %v713_v21, %v546_v13  ;;  %v736_v17 = vpop.f32.mrf.mxu3 }
 0x399   :  { %v693_v18 = vpop.f32.mrf.mxu1  ;;  %v737_v50 = vadd.f32 %v736_v17, %v547_v36 }
 0x39a   :  { %v751_v19 = vpack.c.bf16 %v714_v16, %v712_v15  ;;  %v694_v38 = vadd.f32 %v693_v18, %v545_v6 }
 0x39b   :  { %v12250_v54 = vpack.c.bf16 %v737_v50, %v735_v55  ;;  %v12322_v55 = vld [vmem:[%s11873_s25 + $0x20] sm:$0x3] }
 0x39c   :  { %916 = vrot.lane.b32.xlu1 %v751_v19, %s11835_s5  ;;  %v765_v58 = vsel %vm754_vm6, %v751_v19, 0 }
 0x39f   :  { %v716_v22 = vpop.f32.mrf.mxu2 }
 0x3a0   :  { %v739_v23 = vpop.f32.mrf.mxu3  ;;  %v717_v26 = vadd.f32 %v716_v22, %v546_v13 }
 0x3a1   :  { %v695_v24 = vpop.f32.mrf.mxu1  ;;  %v740_v48 = vadd.f32 %v739_v23, %v547_v36 }
 0x3a2   :  { %v696_v34 = vadd.f32 %v695_v24, %v545_v6 }
 0x3a4   :  { %v749_v42 = vpack.c.bf16 %v696_v34, %v694_v38 }
 0x3a7   :  { %v718_v25 = vpop.f32.mrf.mxu2 }
 0x3a8   :  { %v719_v28 = vadd.f32 %v718_v25, %v546_v13  ;;  %v741_v29 = vpop.f32.mrf.mxu3 }
 0x3a9   :  { %v698_v30 = vpop.f32.mrf.mxu1  ;;  %v742_v1 = vadd.f32 %v741_v29, %v547_v36 }
 0x3aa   :  { %v752_v31 = vpack.c.bf16 %v719_v28, %v717_v26  ;;  %v699_v32 = vadd.f32 %v698_v30, %v545_v6  ;;  %v12295_v30 = vld [vmem:[%s11873_s25] sm:$0xff] }
 0x3ab   :  { %v12247_v52 = vpack.c.bf16 %v742_v1, %v740_v48 }
 0x3ac   :  { %v750_v33 = vpack.c.bf16 %v699_v32, %v699_v32  ;;  %918 = vrot.lane.b32.xlu0 %v752_v31, %s11835_s5  ;;  %v768_v57 = vsel %vm754_vm6, %v752_v31, 0 }
 0x3ae   :  { %911 = vrot.lane.b32.xlu1 %v750_v33, %s11835_s5 }
 0x3af   :  { %v721_v37 = vpop.f32.mrf.mxu2 }
 0x3b0   :  { %v722_v39 = vadd.f32 %v721_v37, %v546_v13  ;;  %v744_v11 = vpop.f32.mrf.mxu3  ;;  %v12302_v37 = vld [vmem:[%s11873_s25 + $0x8] sm:$0xff] }
 0x3b1   :  { %v745_v40 = vadd.f32 %v744_v11, %v547_v36  ;;  %v700_v41 = vpop.f32.mrf.mxu1 }
 0x3b2   :  { %v753_v43 = vpack.c.bf16 %v722_v39, %v722_v39  ;;  %v12307_v41 = vld [vmem:[%s11873_s25 + $0x10] sm:$0xff] }
 0x3b3   :  { %v12239_v44 = vpack.c.bf16 %v745_v40, %v745_v40 }
 0x3b4   :  { %920 = vrot.lane.b32.xlu2 %v753_v43, %s11835_s5  ;;  %909 = vrot.lane.b32.xlu0 %v749_v42, %s11835_s5  ;;  %v771_v46 = vsel %vm754_vm6, %v753_v43, 0 }
 0x3b5   :  { %778 = vmatpush.bf16.xpose.msrb.mxu0 %v771_v46  ;;  %v879_v47 = vsel %vm226_vm0, %v12239_v44, 0 }
 0x3b6   :  { %886 = vmatpush.bf16.msra.mxu1 %v879_v47  ;;  %1247 = vrot.lane.b32.xlu1 %v751_v19, %s11836_s9  ;;  %v12317_v47 = vld [vmem:[%s11873_s25 + $0x18] sm:$0xff] }
 0x3b7   :  { %v723_v49 = vpop.f32.mrf.mxu2 }
 0x3b8   :  { %v746_v53 = vpop.f32.mrf.mxu3 }
 0x3ba   :  { %887 = vmatpush.bf16.msra.mxu1 %v12247_v52 }
 0x3bc   :  { %1241 = vrot.lane.b32.xlu2 %v12232_v14, %s11836_s9  ;;  %1249 = vrot.lane.b32.xlu0 %v752_v31, %s11836_s9 }
 0x3bd   :  { %779 = vmatpush.bf16.xpose.msrb.mxu0 %v768_v57 }
 0x3be   :  { %888 = vmatpush.bf16.msra.mxu1 %v12250_v54  ;;  %1083 = vrot.lane.b32.xlu1 %v751_v19, %s11837_s13 }
 0x3c4   :  { %1243 = vrot.lane.b32.xlu2 %v749_v42, %s11836_s9  ;;  %1085 = vrot.lane.b32.xlu0 %v752_v31, %s11837_s13 }
 0x3c5   :  { %780 = vmatpush.bf16.xpose.msrb.mxu0 %v765_v58 }
 0x3c6   :  { %1079 = vrot.lane.b32.xlu1 %v749_v42, %s11837_s13 }
 0x3cc   :  { %8706 = vmatmul.msk.bf16.vlgmr.msrb.gmra.mxu0 %vm754_vm6, %v12232_v14  ;;  %1081 = vrot.lane.b32.xlu2 %v750_v33, %s11837_s13 }
 0x3cd   :  { %1077 = vrot.lane.b32.xlu0 %v12232_v14, %s11837_s13 }
 0x3ce   :  { %1036 = vrot.lane.b32.xlu1 %v12247_v52, %s11835_s5 }
 0x3d4   :  { %1251 = vrot.lane.b32.xlu2 %v753_v43, %s11836_s9 }
 0x3d5   :  { %1245 = vrot.lane.b32.xlu0 %v750_v33, %s11836_s9 }
 0x3dc   :  { %1087 = vrot.lane.b32.xlu2 %v753_v43, %s11837_s13  ;;  %8707 = vmatmul.msk.bf16.gmra.mxu0 %vm754_vm6, %v749_v42 }
 0x3dd   :  { %1034 = vrot.lane.b32.xlu0 %v12250_v54, %s11835_s5 }
 0x3e4   :  { %1038 = vrot.lane.b32.xlu2 %v12239_v44, %s11835_s5 }
 0x3ec   :  { %8708 = vmatmul.msk.bf16.gmra.mxu0 %vm754_vm6, %v750_v33 }
 0x3f0   :  { %v908_v59 = vpop.permute.xlu2 %907 }
 0x40e   :  { %v921_v61 = vpop.permute.xlu2 %920  ;;  %v917_v20 = vpop.permute.xlu1 %916 }
 0x40f   :  { %v938_v62 = vsel %vm754_vm6, %v921_v61, 0  ;;  %v932_v56 = vsel %vm754_vm6, %v917_v20, 0 }
 0x410   :  { %945 = vmatpush.bf16.xpose.msrb.mxu2 %v938_v62 }
 0x416   :  { %v1242_v63 = vpop.permute.xlu2 %1241 }
 0x41e   :  { %v919_v0 = vpop.permute.xlu0 %918  ;;  %v12279_v2 = vpop.permute.xlu2 %1243 }
 0x41f   :  { %v935_v4 = vsel %vm754_vm6, %v919_v0, 0 }
 0x420   :  { %946 = vmatpush.bf16.xpose.msrb.mxu2 %v935_v4  ;;  %v912_v27 = vpop.permute.xlu1 %911 }
 0x426   :  { %v12282_v60 = vpop.permute.xlu2 %1081  ;;  %v910_v6 = vpop.permute.xlu0 %909 }
 0x428   :  { %947 = vmatpush.bf16.xpose.msrb.mxu2 %v932_v56  ;;  %v1248_v7 = vpop.permute.xlu1 %1247 }
 0x429   :  { %v1263_v24 = vsel %vm754_vm6, %v1248_v7, 0 }
 0x42e   :  { %v1252_v9 = vpop.permute.xlu2 %1251  ;;  %v1250_v10 = vpop.permute.xlu0 %1249 }
 0x42f   :  { %v1269_v12 = vsel %vm754_vm6, %v1252_v9, 0  ;;  %8712 = vmatmul.msk.bf16.vlgmr.msrb.gmra.mxu2 %vm754_vm6, %v908_v59  ;;  %v1266_v16 = vsel %vm754_vm6, %v1250_v10, 0 }
 0x430   :  { %v1084_v13 = vpop.permute.xlu1 %1083  ;;  %1276 = vmatpush.bf16.xpose.msra.mxu2 %v1269_v12 }
 0x431   :  { %v1099_v28 = vsel %vm754_vm6, %v1084_v13, 0 }
 0x436   :  { %v1088_v14 = vpop.permute.xlu2 %1087  ;;  %v1086_v21 = vpop.permute.xlu0 %1085 }
 0x437   :  { %v1105_v15 = vsel %vm754_vm6, %v1088_v14, 0  ;;  %v1102_v23 = vsel %vm754_vm6, %v1086_v21, 0 }
 0x438   :  { %1112 = vmatpush.bf16.xpose.msra.mxu0 %v1105_v15  ;;  %1277 = vmatpush.bf16.xpose.msra.mxu2 %v1266_v16  ;;  %v1080_v17 = vpop.permute.xlu1 %1079 }
 0x43e   :  { %v1039_v18 = vpop.permute.xlu2 %1038 }
 0x43f   :  { %v1078_v19 = vpop.permute.xlu0 %1077  ;;  %8713 = vmatmul.msk.bf16.gmra.mxu2 %vm754_vm6, %v910_v6  ;;  %v1052_v22 = vsel %vm226_vm0, %v1039_v18, 0 }
 0x440   :  { %1059 = vmatpush.bf16.msrb.mxu3 %v1052_v22  ;;  %1113 = vmatpush.bf16.xpose.msra.mxu0 %v1102_v23  ;;  %v1037_v25 = vpop.permute.xlu1 %1036 }
 0x441   :  { %1278 = vmatpush.bf16.xpose.msra.mxu2 %v1263_v24 }
 0x444   :  { %1060 = vmatpush.bf16.msrb.mxu3 %v1037_v25 }
 0x447   :  { %v1246_v26 = vpop.permute.xlu0 %1245 }
 0x448   :  { %1114 = vmatpush.bf16.xpose.msra.mxu0 %v1099_v28 }
 0x449   :  { %v782_v29 = vpop.f32.mrf.mxu0 }
 0x44a   :  { %v796_v31 = vmul.f32 0.17677669, %v782_v29 }
 0x44c   :  { %v801_v32 = vadd.f32 %v796_v31, %v12295_v30 }
 0x44e   :  { %v807_v33 = vsel %vm806_vm7, %v801_v32, -inf }
 0x44f   :  { %v1035_v34 = vpop.permute.xlu0 %1034  ;;  %808 = vmax.xlane.f32.xlu2 %v807_v33  ;;  %8714 = vmatmul.msk.bf16.gmra.mxu2 %vm754_vm6, %v912_v27 }
 0x450   :  { %1061 = vmatpush.bf16.msrb.mxu3 %v1035_v34  ;;  %8718 = vmatmul.msk.bf16.vlgmr.msra.gmra.mxu0 %vm754_vm6, %v1078_v19 }
 0x451   :  { %v784_v36 = vpop.f32.mrf.mxu0 }
 0x452   :  { %v797_v38 = vmul.f32 0.17677669, %v784_v36 }
 0x454   :  { %v802_v39 = vadd.f32 %v797_v38, %v12302_v37 }
 0x456   :  { %v810_v11 = vsel %vm806_vm7, %v802_v39, -inf }
 0x457   :  { %811 = vmax.xlane.f32.xlu1 %v810_v11 }
 0x459   :  { %v787_v40 = vpop.f32.mrf.mxu0 }
 0x45a   :  { %v798_v42 = vmul.f32 0.17677669, %v787_v40 }
 0x45c   :  { %v12310_v43 = vadd.f32 %v798_v42, %v12307_v41 }
 0x45e   :  { %v813_v1 = vsel %vm806_vm7, %v12310_v43, -inf }
 0x45f   :  { %8724 = vmatmul.msk.bf16.vlgmr.msra.gmra.mxu2 %vm754_vm6, %v1242_v63  ;;  %814 = vmax.xlane.f32.xlu1 %v813_v1 }
 0x460   :  { %8719 = vmatmul.msk.bf16.gmra.mxu0 %vm754_vm6, %v1080_v17 }
 0x461   :  { %v789_v46 = vpop.f32.mrf.mxu0 }
 0x462   :  { %v799_v48 = vmul.f32 0.17677669, %v789_v46 }
 0x464   :  { %v804_v49 = vadd.f32 %v799_v48, %v12317_v47 }
 0x466   :  { %v816_v50 = vsel %vm806_vm7, %v804_v49, -inf }
 0x467   :  { %817 = vmax.xlane.f32.xlu0 %v816_v50 }
 0x469   :  { %v792_v53 = vpop.f32.mrf.mxu0 }
 0x46a   :  { %v800_v57 = vmul.f32 0.17677669, %v792_v53 }
 0x46c   :  { %v12325_v58 = vadd.f32 %v800_v57, %v12322_v55 }
 0x46e   :  { %v820_v59 = vsel %vm819_vm8, %v12325_v58, -inf }
 0x46f   :  { %8725 = vmatmul.msk.bf16.gmra.mxu2 %vm754_vm6, %v12279_v2  ;;  %821 = vmax.xlane.f32.xlu1 %v820_v59 }
 0x470   :  { %8720 = vmatmul.msk.bf16.gmra.mxu0 %vm754_vm6, %v12282_v60 }
 0x471   :  { %v794_v61 = vpop.f32.mrf.mxu0 }
 0x47f   :  { %8726 = vmatmul.msk.bf16.gmra.mxu2 %vm754_vm6, %v1246_v26 }
 0x4b2   :  { %v949_v62 = vpop.f32.mrf.mxu2 }
 0x4b3   :  { %v963_v9 = vmul.f32 0.17677669, %v949_v62 }
 0x4b5   :  { %v12340_v21 = vadd.f32 %v963_v9, %v12295_v30 }
 0x4b7   :  { %v973_v22 = vsel %vm806_vm7, %v12340_v21, -inf }
 0x4ba   :  { %v951_v63 = vpop.f32.mrf.mxu2 }
 0x4bb   :  { %v964_v17 = vmul.f32 0.17677669, %v951_v63 }
 0x4bd   :  { %v12350_v31 = vadd.f32 %v964_v17, %v12302_v37 }
 0x4bf   :  { %v976_v38 = vsel %vm806_vm7, %v12350_v31, -inf }
 0x4c2   :  { %v954_v20 = vpop.f32.mrf.mxu2  ;;  %v809_v27 = vpop.xlane.xlu2 %808 }
 0x4c3   :  { %v823_v7 = vsub.f32 %v801_v32, %v809_v27  ;;  %v965_v50 = vmul.f32 0.17677669, %v954_v20 }
 0x4c5   :  { %v828_v60 = vmul.f32 1.442695, %v823_v7 }
 0x4c7   :  { %11225 = vpow2.f32 %v828_v60 }
 0x4ca   :  { %v956_v0 = vpop.f32.mrf.mxu2  ;;  %v812_v12 = vpop.xlane.xlu1 %811 }
 0x4cb   :  { %v824_v15 = vsub.f32 %v802_v39, %v812_v12  ;;  %v966_v62 = vmul.f32 0.17677669, %v956_v0 }
 0x4cd   :  { %v1116_v4 = vpop.f32.mrf.mxu0  ;;  %v830_v25 = vmul.f32 1.442695, %v824_v15  ;;  %v12352_v32 = vpop.eup %11225  ;;  %v12383_v20 = vadd.f32 %v966_v62, %v12317_v47 }
 0x4ce   :  { %v1130_v6 = vmul.f32 0.17677669, %v1116_v4  ;;  %v838_v36 = vsel %vm806_vm7, %v12352_v32, 0.0 }
 0x4cf   :  { %11227 = vpow2.f32 %v830_v25 }
 0x4d0   :  { %v12335_v56 = vadd.f32 %v1130_v6, %v12295_v30 }
 0x4d2   :  { %v959_v2 = vpop.f32.mrf.mxu2  ;;  %v1140_v10 = vsel %vm806_vm7, %v12335_v56, -inf  ;;  %v815_v42 = vpop.xlane.xlu1 %814 }
 0x4d3   :  { %1141 = vmax.xlane.f32.xlu1 %v1140_v10  ;;  %v967_v9 = vmul.f32 0.17677669, %v959_v2  ;;  %v982_v10 = vsel %vm806_vm7, %v12383_v20, -inf }
 0x4d5   :  { %v1118_v13 = vpop.f32.mrf.mxu0  ;;  %v12363_v40 = vpop.eup %11227 }
 0x4d6   :  { %v1131_v14 = vmul.f32 0.17677669, %v1118_v13  ;;  %v841_v59 = vsel %vm806_vm7, %v12363_v40, 0.0 }
 0x4d8   :  { %v12343_v16 = vadd.f32 %v1131_v14, %v12302_v37  ;;  %v12393_v14 = vadd.f32 %v967_v9, %v12322_v55 }
 0x4da   :  { %v961_v18 = vpop.f32.mrf.mxu2  ;;  %v818_v19 = vpop.xlane.xlu0 %817  ;;  %v1143_v23 = vsel %vm806_vm7, %v12343_v16, -inf  ;;  %v985_v2 = vsel %vm819_vm8, %v12393_v14, -inf }
 0x4db   :  { %v826_v24 = vsub.f32 %v804_v49, %v818_v19  ;;  %974 = vmax.xlane.f32.xlu1 %v973_v22  ;;  %1144 = vmax.xlane.f32.xlu0 %v1143_v23  ;;  %v825_v49 = vsub.f32 %v12310_v43, %v815_v42  ;;  %v12380_v43 = vadd.f32 %v965_v50, %v12307_v41 }
 0x4dd   :  { %v834_v26 = vmul.f32 1.442695, %v826_v24  ;;  %v1121_v28 = vpop.f32.mrf.mxu0  ;;  %v832_v63 = vmul.f32 1.442695, %v825_v49  ;;  %v979_v0 = vsel %vm806_vm7, %v12380_v43, -inf }
 0x4de   :  { %v1132_v29 = vmul.f32 0.17677669, %v1121_v28 }
 0x4df   :  { %11229 = vpow2.f32 %v834_v26 }
 0x4e0   :  { %v12355_v33 = vadd.f32 %v1132_v29, %v12307_v41  ;;  %11231 = vpow2.f32 %v832_v63 }
 0x4e2   :  { %v1280_v34 = vpop.f32.mrf.mxu2  ;;  %v1146_v39 = vsel %vm806_vm7, %v12355_v33, -inf  ;;  %v822_v27 = vpop.xlane.xlu1 %821 }
 0x4e3   :  { %839 = vadd.xlane.f32.xlu1 %v838_v36  ;;  %977 = vmax.xlane.f32.xlu0 %v976_v38  ;;  %v827_v6 = vsub.f32 %v12325_v58, %v822_v27  ;;  %v1294_v22 = vmul.f32 0.17677669, %v1280_v34 }
 0x4e4   :  { %1147 = vmax.xlane.f32.xlu2 %v1146_v39 }
 0x4e5   :  { %v1123_v11 = vpop.f32.mrf.mxu0  ;;  %v12365_v46 = vpop.eup %11229  ;;  %v836_v60 = vmul.f32 1.442695, %v827_v6  ;;  %v12411_v28 = vadd.f32 %v1294_v22, %v12295_v30 }
 0x4e6   :  { %v1133_v1 = vmul.f32 0.17677669, %v1123_v11  ;;  %v847_v57 = vsel %vm806_vm7, %v12365_v46, 0.0  ;;  %v12390_v13 = vpop.eup %11231 }
 0x4e7   :  { %11233 = vpow2.f32 %v836_v60  ;;  %v844_v58 = vsel %vm806_vm7, %v12390_v13, 0.0  ;;  %v1304_v34 = vsel %vm806_vm7, %v12411_v28, -inf }
 0x4e8   :  { %v12368_v48 = vadd.f32 %v1133_v1, %v12317_v47 }
 0x4ea   :  { %v1282_v53 = vpop.f32.mrf.mxu2  ;;  %v1149_v61 = vsel %vm806_vm7, %v12368_v48, -inf }
 0x4eb   :  { %848 = vadd.xlane.f32.xlu1 %v847_v57  ;;  %842 = vadd.xlane.f32.xlu0 %v841_v59  ;;  %v1295_v17 = vmul.f32 0.17677669, %v1282_v53 }
 0x4ec   :  { %1150 = vmax.xlane.f32.xlu2 %v1149_v61 }
 0x4ed   :  { %v12377_v4 = vpop.f32.mrf.mxu0  ;;  %v12399_v18 = vpop.eup %11233  ;;  %v12402_v19 = vadd.f32 %v1295_v17, %v12302_v37 }
 0x4ee   :  { %v850_v24 = vsel %vm819_vm8, %v12399_v18, 0.0 }
 0x4ef   :  { %v1307_v26 = vsel %vm806_vm7, %v12402_v19, -inf }
 0x4f2   :  { %v1285_v7 = vpop.f32.mrf.mxu2 }
 0x4f3   :  { %980 = vmax.xlane.f32.xlu0 %v979_v0  ;;  %v1296_v25 = vmul.f32 0.17677669, %v1285_v7 }
 0x4f4   :  { %983 = vmax.xlane.f32.xlu2 %v982_v10 }
 0x4f5   :  { %v1128_v12 = vpop.f32.mrf.mxu0  ;;  %v12414_v29 = vadd.f32 %v1296_v25, %v12307_v41 }
 0x4f7   :  { %v1310_v38 = vsel %vm806_vm7, %v12414_v29, -inf }
 0x4fa   :  { %v1287_v15 = vpop.f32.mrf.mxu2 }
 0x4fb   :  { %845 = vadd.xlane.f32.xlu0 %v844_v58  ;;  %v1297_v37 = vmul.f32 0.17677669, %v1287_v15 }
 0x4fc   :  { %986 = vmax.xlane.f32.xlu2 %v985_v2 }
 0x4fd   :  { %v12421_v39 = vadd.f32 %v1297_v37, %v12317_v47 }
 0x4ff   :  { %v1313_v30 = vsel %vm806_vm7, %v12421_v39, -inf }
 0x502   :  { %v12404_v23 = vpop.f32.mrf.mxu2 }
 0x503   :  { %851 = vadd.xlane.f32.xlu0 %v850_v24 }
 0x504   :  { %1308 = vmax.xlane.f32.xlu2 %v1307_v26 }
 0x50a   :  { %v1292_v36 = vpop.f32.mrf.mxu2 }
 0x50b   :  { %1305 = vmax.xlane.f32.xlu0 %v1304_v34 }
 0x50c   :  { %1311 = vmax.xlane.f32.xlu2 %v1310_v38 }
 0x513   :  { %1314 = vmax.xlane.f32.xlu0 %v1313_v30 }
 0x546   :  { %v1142_v11 = vpop.xlane.xlu1 %1141 }
 0x547   :  { %v1155_v50 = vsub.f32 %v12335_v56, %v1142_v11 }
 0x549   :  { %v1160_v59 = vmul.f32 1.442695, %v1155_v50 }
 0x54e   :  { %v975_v41 = vpop.xlane.xlu1 %974  ;;  %v1145_v42 = vpop.xlane.xlu0 %1144 }
 0x54f   :  { %v988_v1 = vsub.f32 %v12340_v21, %v975_v41  ;;  %v1156_v49 = vsub.f32 %v12343_v16, %v1145_v42 }
 0x551   :  { %v993_v53 = vmul.f32 1.442695, %v988_v1  ;;  %v1162_v57 = vmul.f32 1.442695, %v1156_v49 }
 0x553   :  { %11235 = vpow2.f32 %v993_v53 }
 0x554   :  { %11237 = vpow2.f32 %v1162_v57  ;;  %v1298_v57 = vmul.f32 0.17677669, %v12404_v23 }
 0x555   :  { %11239 = vpow2.f32 %v1160_v59 }
 0x556   :  { %v978_v47 = vpop.xlane.xlu0 %977  ;;  %v840_v16 = vpop.xlane.xlu1 %839 }
 0x557   :  { %v989_v61 = vsub.f32 %v12350_v31, %v978_v47  ;;  %v1148_v24 = vpop.xlane.xlu2 %1147 }
 0x558   :  { %v1157_v53 = vsub.f32 %v12355_v33, %v1148_v24 }
 0x559   :  { %v12429_v62 = vpop.eup %11235  ;;  %v995_v63 = vmul.f32 1.442695, %v989_v61 }
 0x55a   :  { %v12431_v27 = vpop.eup %11237  ;;  %v1003_v21 = vsel %vm806_vm7, %v12429_v62, 0.0  ;;  %v1164_v47 = vmul.f32 1.442695, %v1157_v53 }
 0x55b   :  { %11241 = vpow2.f32 %v995_v63  ;;  %1004 = vadd.xlane.f32.xlu1 %v1003_v21  ;;  %v1173_v56 = vsel %vm806_vm7, %v12431_v27, 0.0  ;;  %v12437_v7 = vpop.eup %11239 }
 0x55c   :  { %1174 = vadd.xlane.f32.xlu2 %v1173_v56  ;;  %11243 = vrcp.f32 %v840_v16  ;;  %v1170_v0 = vsel %vm806_vm7, %v12437_v7, 0.0 }
 0x55e   :  { %v843_v6 = vpop.xlane.xlu0 %842  ;;  %v849_v2 = vpop.xlane.xlu1 %848 }
 0x55f   :  { %11245 = vrcp.f32 %v843_v6  ;;  %v1151_v34 = vpop.xlane.xlu2 %1150 }
 0x560   :  { %11247 = vrcp.f32 %v849_v2 }
 0x561   :  { %v12439_v31 = vpop.eup %11241 }
 0x562   :  { %v1006_v9 = vsel %vm806_vm7, %v12439_v31, 0.0  ;;  %v11244_v10 = vpop.eup %11243 }
 0x563   :  { %1171 = vadd.xlane.f32.xlu1 %v1170_v0  ;;  %1007 = vadd.xlane.f32.xlu0 %v1006_v9  ;;  %v858_v15 = vmul.f32 %v11244_v10, %v12352_v32  ;;  %v1158_v0 = vsub.f32 %v12368_v48, %v1151_v34 }
 0x565   :  { %v11246_v60 = vpop.eup %11245 }
 0x566   :  { %v981_v12 = vpop.xlane.xlu0 %980  ;;  %v859_v58 = vmul.f32 %v11246_v60, %v12363_v40  ;;  %v11248_v25 = vpop.eup %11247  ;;  %v1166_v60 = vmul.f32 1.442695, %v1158_v0 }
 0x567   :  { %v861_v36 = vmul.f32 %v11248_v25, %v12365_v46  ;;  %v984_v11 = vpop.xlane.xlu2 %983  ;;  %v990_v50 = vsub.f32 %v12380_v43, %v981_v12 }
 0x568   :  { %v863_v17 = vpack.c.bf16 %v859_v58, %v858_v15 }
 0x56a   :  { %8709 = vmatmul.msk.bf16.vlgmr.msra.gmra.mxu1 %vm806_vm7, %v863_v17 }
 0x56e   :  { %v846_v22 = vpop.xlane.xlu0 %845 }
 0x56f   :  { %11249 = vrcp.f32 %v846_v22  ;;  %v987_v42 = vpop.xlane.xlu2 %986 }
 0x570   :  { %v992_v49 = vsub.f32 %v12393_v14, %v987_v42  ;;  %v12470_v14 = vadd.f32 %v1298_v57, %v12322_v55 }
 0x572   :  { %v1316_v23 = vsel %vm819_vm8, %v12470_v14, -inf }
 0x574   :  { %1364 = vrot.lane.b32.xlu2 %v12247_v52, %s11836_s9 }
 0x575   :  { %v11250_v26 = vpop.eup %11249 }
 0x576   :  { %v860_v37 = vmul.f32 %v11250_v26, %v12390_v13  ;;  %v852_v40 = vpop.xlane.xlu0 %851  ;;  %v991_v13 = vsub.f32 %v12383_v20, %v984_v11 }
 0x577   :  { %1366 = vrot.lane.b32.xlu0 %v12239_v44, %s11836_s9  ;;  %11251 = vrcp.f32 %v852_v40  ;;  %v1309_v2 = vpop.xlane.xlu2 %1308 }
 0x578   :  { %v864_v32 = vpack.c.bf16 %v861_v36, %v860_v37  ;;  %v999_v46 = vmul.f32 1.442695, %v991_v13  ;;  %v1320_v24 = vsub.f32 %v12402_v19, %v1309_v2 }
 0x57a   :  { %8710 = vmatmul.msk.bf16.gmra.mxu1 %vm806_vm7, %v864_v32  ;;  %11253 = vpow2.f32 %v999_v46  ;;  %v1326_v26 = vmul.f32 1.442695, %v1320_v24 }
 0x57c   :  { %1202 = vrot.lane.b32.xlu1 %v12239_v44, %s11837_s13  ;;  %v1001_v44 = vmul.f32 1.442695, %v992_v49 }
 0x57d   :  { %v11252_v38 = vpop.eup %11251 }
 0x57e   :  { %v862_v30 = vmul.f32 %v11252_v38, %v12399_v18  ;;  %v1306_v1 = vpop.xlane.xlu0 %1305  ;;  %v997_v18 = vmul.f32 1.442695, %v990_v50  ;;  %11255 = vpow2.f32 %v1001_v44 }
 0x57f   :  { %v1319_v20 = vsub.f32 %v12411_v28, %v1306_v1  ;;  %v1312_v36 = vpop.xlane.xlu2 %1311 }
 0x580   :  { %v865_v41 = vpack.c.bf16 %v862_v30, %v862_v30  ;;  %v12464_v59 = vpop.eup %11253  ;;  %11257 = vpow2.f32 %v997_v18 }
 0x581   :  { %v1012_v63 = vsel %vm806_vm7, %v12464_v59, 0.0  ;;  %11259 = vpow2.f32 %v1164_v47  ;;  %v1324_v43 = vmul.f32 1.442695, %v1319_v20  ;;  %v1321_v20 = vsub.f32 %v12414_v29, %v1312_v36 }
 0x583   :  { %11261 = vpow2.f32 %v1324_v43  ;;  %v1328_v43 = vmul.f32 1.442695, %v1321_v20 }
 0x584   :  { %v12475_v21 = vpop.eup %11255 }
 0x585   :  { %v1015_v56 = vsel %vm819_vm8, %v12475_v21, 0.0 }
 0x586   :  { %v1315_v61 = vpop.xlane.xlu0 %1314  ;;  %v12477_v16 = vpop.eup %11257 }
 0x587   :  { %v1322_v33 = vsub.f32 %v12421_v39, %v1315_v61  ;;  %v12481_v6 = vpop.eup %11259  ;;  %v1009_v39 = vsel %vm806_vm7, %v12477_v16, 0.0 }
 0x588   :  { %v1176_v9 = vsel %vm806_vm7, %v12481_v6, 0.0 }
 0x589   :  { %v1330_v28 = vmul.f32 1.442695, %v1322_v33  ;;  %v12488_v10 = vpop.eup %11261 }
 0x58a   :  { %8711 = vmatmul.msk.bf16.gmra.mxu1 %vm806_vm7, %v865_v41  ;;  %v1334_v15 = vsel %vm806_vm7, %v12488_v10, 0.0  ;;  %v1134_v41 = vmul.f32 0.17677669, %v12377_v4 }
 0x58b   :  { %11263 = vpow2.f32 %v1330_v28 }
 0x58c   :  { %11265 = vpow2.f32 %v1166_v60 }
 0x591   :  { %v12490_v12 = vpop.eup %11263 }
 0x592   :  { %v1343_v58 = vsel %vm806_vm7, %v12490_v12, 0.0  ;;  %v12496_v48 = vpop.eup %11265 }
 0x593   :  { %v1179_v17 = vsel %vm806_vm7, %v12496_v48, 0.0 }
 0x59d   :  { %1013 = vadd.xlane.f32.xlu2 %v1012_v63 }
 0x5a1   :  { %1317 = vmax.xlane.f32.xlu0 %v1316_v23 }
 0x5a5   :  { %1016 = vadd.xlane.f32.xlu2 %v1015_v56 }
 0x5a6   :  { %1010 = vadd.xlane.f32.xlu1 %v1009_v39 }
 0x5a9   :  { %1177 = vadd.xlane.f32.xlu0 %v1176_v9 }
 0x5ae   :  { %1335 = vadd.xlane.f32.xlu1 %v1334_v15 }
 0x5b1   :  { %1344 = vadd.xlane.f32.xlu0 %v1343_v58 }
 0x5b9   :  { %1180 = vadd.xlane.f32.xlu0 %v1179_v17 }
 0x5bd   :  { %1200 = vrot.lane.b32.xlu2 %v12247_v52, %s11837_s13 }
 0x5c7   :  { %1362 = vrot.lane.b32.xlu1 %v12250_v54, %s11836_s9 }
 0x5ce   :  { %v1005_v22 = vpop.xlane.xlu1 %1004 }
 0x5cf   :  { %11267 = vrcp.f32 %v1005_v22  ;;  %v1175_v30 = vpop.xlane.xlu2 %1174 }
 0x5d5   :  { %v11268_v37 = vpop.eup %11267 }
 0x5d6   :  { %v1008_v25 = vpop.xlane.xlu0 %1007  ;;  %v1023_v40 = vmul.f32 %v11268_v37, %v12429_v62  ;;  %v1172_v11 = vpop.xlane.xlu1 %1171 }
 0x5d7   :  { %11269 = vrcp.f32 %v1008_v25  ;;  %v1365_v42 = vpop.permute.xlu2 %1364 }
 0x5d8   :  { %11271 = vpow2.f32 %v1326_v26 }
 0x5dd   :  { %v11270_v32 = vpop.eup %11269 }
 0x5de   :  { %v1024_v34 = vmul.f32 %v11270_v32, %v12439_v31  ;;  %v12507_v38 = vpop.eup %11271  ;;  %v12517_v31 = vadd.f32 %v1134_v41, %v12322_v55 }
 0x5df   :  { %v1337_v19 = vsel %vm806_vm7, %v12507_v38, 0.0 }
 0x5e0   :  { %v1028_v52 = vpack.c.bf16 %v1024_v34, %v1023_v40  ;;  %v1152_v4 = vsel %vm819_vm8, %v12517_v31, -inf }
 0x5e2   :  { %8715 = vmatmul.msk.bf16.vlgmr.msrb.gmra.mxu3 %vm806_vm7, %v1028_v52 }
 0x5e6   :  { %1338 = vadd.xlane.f32.xlu2 %v1337_v19 }
 0x5e7   :  { %v12513_v13 = vpop.f32.mrf.mxu1 }
 0x5e9   :  { %v1367_v46 = vpop.permute.xlu0 %1366 }
 0x5ea   :  { %v1380_v62 = vsel %vm226_vm0, %v1367_v46, 0 }
 0x5eb   :  { %1387 = vmatpush.bf16.msra.mxu3 %v1380_v62 }
 0x5ee   :  { %v1203_v1 = vpop.permute.xlu1 %1202 }
 0x5ef   :  { %v1216_v49 = vsel %vm226_vm0, %v1203_v1, 0  ;;  %1388 = vmatpush.bf16.msra.mxu3 %v1365_v42  ;;  %v12520_v50 = vpop.f32.mrf.mxu1 }
 0x5f0   :  { %1223 = vmatpush.bf16.msrb.mxu1 %v1216_v49 }
 0x5f1   :  { %1153 = vmax.xlane.f32.xlu1 %v1152_v4 }
 0x5f7   :  { %v12524_v53 = vpop.f32.mrf.mxu1 }
 0x5fe   :  { %1198 = vrot.lane.b32.xlu2 %v12250_v54, %s11837_s13 }
 0x5ff   :  { %v12528_v44 = vpop.f32.mrf.mxu1 }
 0x607   :  { %v12530_v55 = vpop.f32.mrf.mxu1 }
 0x60f   :  { %v902_v57 = vpop.f32.mrf.mxu1 }
 0x610   :  { %v1014_v18 = vpop.xlane.xlu2 %1013 }
 0x611   :  { %11273 = vrcp.f32 %v1014_v18 }
 0x614   :  { %v1318_v47 = vpop.xlane.xlu0 %1317 }
 0x615   :  { %v1323_v61 = vsub.f32 %v12470_v14, %v1318_v47 }
 0x617   :  { %v1332_v63 = vmul.f32 1.442695, %v1323_v61  ;;  %v11274_v54 = vpop.eup %11273 }
 0x618   :  { %v1017_v33 = vpop.xlane.xlu2 %1016  ;;  %v1026_v14 = vmul.f32 %v11274_v54, %v12464_v59 }
 0x619   :  { %11275 = vpow2.f32 %v1332_v63  ;;  %v1011_v23 = vpop.xlane.xlu1 %1010 }
 0x61a   :  { %11277 = vrcp.f32 %v1011_v23 }
 0x61b   :  { %11279 = vpow2.f32 %v1328_v43 }
 0x61c   :  { %11281 = vrcp.f32 %v1017_v33 }
 0x61d   :  { %11283 = vrcp.f32 %v1172_v11 }
 0x61e   :  { %11285 = vrcp.f32 %v1175_v30 }
 0x61f   :  { %v12534_v28 = vpop.eup %11275 }
 0x620   :  { %v1201_v56 = vpop.permute.xlu2 %1200  ;;  %v1346_v39 = vsel %vm819_vm8, %v12534_v28, 0.0  ;;  %v11278_v0 = vpop.eup %11277 }
 0x621   :  { %1224 = vmatpush.bf16.msrb.mxu1 %v1201_v56  ;;  %1347 = vadd.xlane.f32.xlu1 %v1346_v39  ;;  %v1025_v29 = vmul.f32 %v11278_v0, %v12477_v16  ;;  %v11280_v9 = vpop.eup %11279  ;;  %v1336_v2 = vpop.xlane.xlu1 %1335 }
 0x622   :  { %v1340_v15 = vsel %vm806_vm7, %v11280_v9, 0.0  ;;  %v11282_v58 = vpop.eup %11281  ;;  %v1178_v16 = vpop.xlane.xlu0 %1177  ;;  %11287 = vrcp.f32 %v1336_v2 }
 0x623   :  { %v1029_v60 = vpack.c.bf16 %v1026_v14, %v1025_v29  ;;  %v1027_v17 = vmul.f32 %v11282_v58, %v12475_v21  ;;  %v11284_v26 = vpop.eup %11283 }
 0x624   :  { %v11286_v37 = vpop.eup %11285  ;;  %v1190_v32 = vmul.f32 %v11284_v26, %v12437_v7  ;;  %v10652_v26 = vld [vmem:[%s11918_s12 + $0x38] sm:$0xff] }
 0x625   :  { %8716 = vmatmul.msk.bf16.gmra.mxu3 %vm806_vm7, %v1029_v60  ;;  %v1030_v22 = vpack.c.bf16 %v1027_v17, %v1027_v17  ;;  %v1191_v21 = vmul.f32 %v11286_v37, %v12431_v27  ;;  %1549 = vmatpush.bf16.msrb.mxu0 %v10652_v26  ;;  %v10651_v37 = vld [vmem:[%s11918_s12 + $0x30] sm:$0xff] }
 0x627   :  { %1341 = vadd.xlane.f32.xlu2 %v1340_v15  ;;  %v1195_v11 = vpack.c.bf16 %v1191_v21, %v1190_v32  ;;  %v10650_v32 = vld [vmem:[%s11918_s12 + $0x28] sm:$0xff] }
 0x628   :  { %v11288_v36 = vpop.eup %11287 }
 0x629   :  { %v1354_v34 = vmul.f32 %v11288_v36, %v12488_v10  ;;  %1550 = vmatpush.bf16.msrb.mxu0 %v10651_v37 }
 0x62a   :  { %v1345_v59 = vpop.xlane.xlu0 %1344 }
 0x62d   :  { %1551 = vmatpush.bf16.msrb.mxu0 %v10650_v32 }
 0x632   :  { %v1181_v30 = vpop.xlane.xlu0 %1180 }
 0x635   :  { %8717 = vmatmul.msk.bf16.gmra.mxu3 %vm806_vm7, %v1030_v22 }
 0x639   :  { %v1363_v24 = vpop.permute.xlu1 %1362 }
 0x63a   :  { %1389 = vmatpush.bf16.msra.mxu3 %v1363_v24 }
 0x659   :  { %v1339_v25 = vpop.xlane.xlu2 %1338 }
 0x65a   :  { %11289 = vrcp.f32 %v1339_v25 }
 0x65b   :  { %11291 = vrcp.f32 %v1181_v30  ;;  %v10646_v30 = vld [vmem:[%s11918_s12 + $0x8] sm:$0xff] }
 0x65c   :  { %11293 = vrcp.f32 %v1178_v16 }
 0x660   :  { %v11290_v40 = vpop.eup %11289 }
 0x661   :  { %v1355_v52 = vmul.f32 %v11290_v40, %v12507_v38  ;;  %v1199_v19 = vpop.permute.xlu2 %1198  ;;  %v11292_v27 = vpop.eup %11291  ;;  %v10649_v40 = vld [vmem:[%s11918_s12 + $0x20] sm:$0xff] }
 0x662   :  { %1225 = vmatpush.bf16.msrb.mxu1 %v1199_v19  ;;  %v11294_v10 = vpop.eup %11293  ;;  %v1193_v4 = vmul.f32 %v11292_v27, %v12496_v48  ;;  %1552 = vmatpush.bf16.msrb.mxu0 %v10649_v40  ;;  %v10647_v19 = vld [vmem:[%s11918_s12 + $0x10] sm:$0xff] }
 0x663   :  { %v1359_v41 = vpack.c.bf16 %v1355_v52, %v1354_v34  ;;  %v1192_v18 = vmul.f32 %v11294_v10, %v12481_v6  ;;  %v10648_v52 = vld [vmem:[%s11918_s12 + $0x18] sm:$0xff] }
 0x664   :  { %v1154_v46 = vpop.xlane.xlu1 %1153 }
 0x665   :  { %8721 = vmatmul.msk.bf16.vlgmr.msrb.gmra.mxu1 %vm806_vm7, %v1195_v11  ;;  %8727 = vmatmul.msk.bf16.vlgmr.msra.gmra.mxu3 %vm806_vm7, %v1359_v41  ;;  %v1159_v62 = vsub.f32 %v12517_v31, %v1154_v46  ;;  %v1063_v7 = vpop.f32.mrf.mxu3  ;;  %v1196_v31 = vpack.c.bf16 %v1193_v4, %v1192_v18  ;;  %v10645_v46 = vld [vmem:[%s11918_s12] sm:$0xff] }
 0x666   :  { %1553 = vmatpush.bf16.msrb.mxu0 %v10648_v52 }
 0x667   :  { %v1168_v42 = vmul.f32 1.442695, %v1159_v62 }
 0x669   :  { %11295 = vpow2.f32 %v1168_v42 }
 0x66a   :  { %11297 = vrcp.f32 %v1345_v59  ;;  %1554 = vmatpush.bf16.msrb.mxu0 %v10647_v19 }
 0x66d   :  { %v1065_v38 = vpop.f32.mrf.mxu3 }
 0x66e   :  { %v11081_v49 = vpack.i.bf16 %v1065_v38, %v1063_v7  ;;  %1555 = vmatpush.bf16.msrb.mxu0 %v10646_v30 }
 0x66f   :  { %v11296_v1 = vpop.eup %11295 }
 0x670   :  { %v1182_v57 = vsel %vm819_vm8, %v11296_v1, 0.0  ;;  %11082 = vrot.lane.b32.xlu1 %v11081_v49, %s11836_s9  ;;  %v11298_v20 = vpop.eup %11297 }
 0x671   :  { %1183 = vadd.xlane.f32.xlu0 %v1182_v57  ;;  %v1357_v33 = vmul.f32 %v11298_v20, %v12490_v12 }
 0x672   :  { %1556 = vmatpush.bf16.msrb.mxu0 %v10645_v46 }
 0x675   :  { %8722 = vmatmul.msk.bf16.gmra.mxu1 %vm806_vm7, %v1196_v31 }
 0x694   :  { %v1348_v43 = vpop.xlane.xlu1 %1347 }
 0x69a   :  { %v1342_v47 = vpop.xlane.xlu2 %1341 }
 0x69b   :  { %11299 = vrcp.f32 %v1342_v47 }
 0x69c   :  { %11301 = vrcp.f32 %v1348_v43 }
 0x6a1   :  { %v11300_v61 = vpop.eup %11299 }
 0x6a2   :  { %v1356_v63 = vmul.f32 %v11300_v61, %v11280_v9  ;;  %v11302_v54 = vpop.eup %11301 }
 0x6a3   :  { %v1358_v6 = vmul.f32 %v11302_v54, %v12534_v28 }
 0x6a4   :  { %v1360_v48 = vpack.c.bf16 %v1357_v33, %v1356_v63 }
 0x6a5   :  { %v1361_v39 = vpack.c.bf16 %v1358_v6, %v1358_v6 }
 0x6a6   :  { %8728 = vmatmul.msk.bf16.gmra.mxu3 %vm806_vm7, %v1360_v48 }
 0x6a8   :  { %v1068_v23 = vpop.f32.mrf.mxu3 }
 0x6b0   :  { %v1070_v56 = vpop.f32.mrf.mxu3 }
 0x6b1   :  { %v11096_v16 = vpack.i.bf16 %v1070_v56, %v1068_v23 }
 0x6b6   :  { %8729 = vmatmul.msk.bf16.gmra.mxu3 %vm806_vm7, %v1361_v39 }
 0x6b8   :  { %v1073_v0 = vpop.f32.mrf.mxu3 }
 0x6c0   :  { %v1075_v29 = vpop.f32.mrf.mxu3 }
 0x6e2   :  { %v1227_v14 = vpop.f32.mrf.mxu1  ;;  %v11083_v62 = vpop.permute.xlu1 %11082 }
 0x6e3   :  { %v11085_v7 = vunpack.i.h.bf16 %v11083_v62  ;;  %v11084_v42 = vunpack.i.l.bf16 %v11083_v62 }
 0x6e4   :  { %v1184_v60 = vpop.xlane.xlu0 %1183 }
 0x6e5   :  { %11303 = vrcp.f32 %v1184_v60  ;;  %v1466_v49 = vsel %vm754_vm6, %v12520_v50, %v11085_v7  ;;  %v1465_v4 = vsel %vm754_vm6, %v12513_v13, %v11084_v42 }
 0x6e8   :  { %v1391_v9 = vpop.f32.mrf.mxu3 }
 0x6ea   :  { %v1229_v12 = vpop.f32.mrf.mxu1 }
 0x6eb   :  { %v11304_v15 = vpop.eup %11303  ;;  %v11086_v58 = vpack.i.bf16 %v1229_v12, %v1227_v14 }
 0x6ec   :  { %v1194_v17 = vmul.f32 %v11304_v15, %v11296_v1 }
 0x6ed   :  { %11087 = vrot.lane.b32.xlu0 %v11086_v58, %s11837_s13 }
 0x6ee   :  { %v1197_v2 = vpack.c.bf16 %v1194_v17, %v1194_v17 }
 0x6f0   :  { %v1393_v28 = vpop.f32.mrf.mxu3  ;;  %8723 = vmatmul.msk.bf16.gmra.mxu1 %vm806_vm7, %v1197_v2 }
 0x6f1   :  { %v11091_v22 = vpack.i.bf16 %v1393_v28, %v1391_v9 }
 0x6f2   :  { %v1232_v24 = vpop.f32.mrf.mxu1 }
 0x6f3   :  { %11092 = vrot.lane.b32.xlu2 %v11091_v22, %s11835_s5 }
 0x6f5   :  { %11097 = vrot.lane.b32.xlu0 %v11096_v16, %s11836_s9 }
 0x6fa   :  { %v1234_v59 = vpop.f32.mrf.mxu1 }
 0x6fb   :  { %v11101_v25 = vpack.i.bf16 %v1234_v59, %v1232_v24  ;;  %v11177_v24 = vld [vmem:[%s11923_s20] ss:$0 sm:$0xff] }
 0x6fd   :  { %11102 = vrot.lane.b32.xlu1 %v11101_v25, %s11837_s13  ;;  %1418 = vrot.lane.b32.xlu0 %v1073_v0, %s11836_s9 }
 0x729   :  { %v1396_v36 = vpop.f32.mrf.mxu3 }
 0x731   :  { %v1398_v21 = vpop.f32.mrf.mxu3 }
 0x732   :  { %v11106_v34 = vpack.i.bf16 %v1398_v21, %v1396_v36 }
 0x734   :  { %11107 = vrot.lane.b32.xlu2 %v11106_v34, %s11835_s5 }
 0x739   :  { %v1401_v11 = vpop.f32.mrf.mxu3 }
 0x73c   :  { %1458 = vrot.lane.b32.xlu2 %v1401_v11, %s11835_s5 }
 0x741   :  { %v1403_v41 = vpop.f32.mrf.mxu3 }
 0x74d   :  { %v11093_v27 = vpop.permute.xlu2 %11092 }
 0x74e   :  { %v11095_v57 = vunpack.i.h.bf16 %v11093_v27  ;;  %v11094_v18 = vunpack.i.l.bf16 %v11093_v27 }
 0x75f   :  { %v11088_v10 = vpop.permute.xlu0 %11087 }
 0x760   :  { %v11090_v38 = vunpack.i.h.bf16 %v11088_v10  ;;  %v11089_v1 = vunpack.i.l.bf16 %v11088_v10 }
 0x762   :  { %v1471_v31 = vsel %vm1470_vm9, %v1465_v4, %v11089_v1  ;;  %v1472_v47 = vsel %vm1470_vm9, %v1466_v49, %v11090_v38 }
 0x763   :  { %v1477_v20 = vsel %vm15096_vm10, %v1471_v31, %v11094_v18  ;;  %v1478_v61 = vsel %vm15096_vm10, %v1472_v47, %v11095_v57  ;;  %v8876_v47 = vld [vmem:[%s11938_s8 + $0xe0] sm:$0xf] }
 0x764   :  { %v1498_v63 = vpack.c.bf16 %v1478_v61, %v1477_v20  ;;  %v10683_v20 = vld [vmem:[%s11938_s8 + $0xec] sm:$0xf0]  ;;  %v10681_v61 = vld [vmem:[%s11938_s8 + $0xe4] sm:$0xf] }
 0x766   :  { %1557 = vmatmul.bf16.vlgmr.msrb.gmra.mxu0 %v1498_v63  ;;  %v8877_v63 = vor.u32 %v10683_v20, %v8876_v47  ;;  %v10668_v47 = vld [vmem:[%s11938_s8 + $0x74] sm:$0xf0] }
 0x767   :  { %v11098_v50 = vpop.permute.xlu0 %11097 }
 0x768   :  { %v11100_v23 = vunpack.i.h.bf16 %v11098_v50  ;;  %v11099_v13 = vunpack.i.l.bf16 %v11098_v50  ;;  %v10684_v50 = vld [vmem:[%s11938_s8 + $0xf4] sm:$0xf0]  ;;  %1911 = vmatpush.bf16.msra.mxu1 %v8877_v63  ;;  %v10666_v63 = vld [vmem:[%s11938_s8 + $0x6c] sm:$0xf] }
 0x76a   :  { %v1467_v29 = vsel %vm754_vm6, %v12524_v53, %v11099_v13  ;;  %v1468_v14 = vsel %vm754_vm6, %v12528_v44, %v11100_v23  ;;  %v10682_v13 = vld [vmem:[%s11938_s8 + $0xec] sm:$0xf] }
 0x76d   :  { %v1237_v33 = vpop.f32.mrf.mxu1 }
 0x76e   :  { %1438 = vrot.lane.b32.xlu1 %v1237_v33, %s11837_s13  ;;  %v8878_v33 = vld [vmem:[%s11938_s8 + $0xf0] sm:$0xf0] }
 0x76f   :  { %v11103_v48 = vpop.permute.xlu1 %11102  ;;  %v1419_v17 = vpop.permute.xlu0 %1418 }
 0x770   :  { %v11105_v54 = vunpack.i.h.bf16 %v11103_v48  ;;  %v11104_v6 = vunpack.i.l.bf16 %v11103_v48  ;;  %v1469_v2 = vsel %vm754_vm6, %v12530_v55, %v1419_v17  ;;  %v8881_v48 = vor.u32 %v10681_v61, %v8878_v33  ;;  %v8870_v17 = vld [vmem:[%s11938_s8 + $0xd8] sm:$0xf0] }
 0x771   :  { %v8822_v33 = vld [vmem:[%s11938_s8 + $0x78] sm:$0xf0] }
 0x772   :  { %v1473_v60 = vsel %vm1470_vm9, %v1467_v29, %v11104_v6  ;;  %v1474_v9 = vsel %vm1470_vm9, %v1468_v14, %v11105_v54  ;;  %v8886_v54 = vld [vmem:[%s11938_s8 + $0xf8] sm:$0xf0]  ;;  %1934 = vmatpush.bf16.msrb.mxu2 %v8881_v48  ;;  %v8862_v14 = vld [vmem:[%s11938_s8 + $0xd0] sm:$0xf0]  ;;  %v10663_v48 = vld [vmem:[%s11938_s8 + $0x4c] sm:$0xf0] }
 0x773   :  { %v8889_v6 = vor.u32 %v10682_v13, %v8886_v54  ;;  %v8798_v54 = vld [vmem:[%s11938_s8 + $0x50] sm:$0xf0] }
 0x775   :  { %v1239_v43 = vpop.f32.mrf.mxu1  ;;  %1980 = vmatpush.bf16.msra.mxu0 %v8889_v6  ;;  %v8804_v6 = vld [vmem:[%s11938_s8 + $0x48] sm:$0xf] }
 0x776   :  { %v8884_v43 = vld [vmem:[%s11938_s8 + $0xe8] sm:$0xf] }
 0x777   :  { %v8885_v23 = vor.u32 %v10684_v50, %v8884_v43  ;;  %v8825_v43 = vor.u32 %v10666_v63, %v8822_v33  ;;  %v8796_v50 = vld [vmem:[%s11938_s8 + $0x40] sm:$0xf] }
 0x778   :  { %v8797_v13 = vor.u32 %v10663_v48, %v8796_v50 }
 0x779   :  { %1957 = vmatpush.bf16.msrb.mxu3 %v8885_v23  ;;  %v10661_v23 = vld [vmem:[%s11938_s8 + $0x44] sm:$0xf] }
 0x78e   :  { %v11108_v56 = vpop.permute.xlu2 %11107 }
 0x78f   :  { %v11110_v39 = vunpack.i.h.bf16 %v11108_v56  ;;  %v11109_v0 = vunpack.i.l.bf16 %v11108_v56  ;;  %v8860_v56 = vld [vmem:[%s11938_s8 + $0xc0] sm:$0xf] }
 0x791   :  { %v1479_v12 = vsel %vm15096_vm10, %v1473_v60, %v11109_v0  ;;  %v1480_v15 = vsel %vm15096_vm10, %v1474_v9, %v11110_v39  ;;  %v10679_v39 = vld [vmem:[%s11938_s8 + $0xcc] sm:$0xf0]  ;;  %v10677_v0 = vld [vmem:[%s11938_s8 + $0xc4] sm:$0xf]  ;;  %v8868_v60 = vld [vmem:[%s11938_s8 + $0xc8] sm:$0xf] }
 0x792   :  { %v1499_v58 = vpack.c.bf16 %v1480_v15, %v1479_v12  ;;  %v8861_v29 = vor.u32 %v10679_v39, %v8860_v56  ;;  %v10680_v9 = vld [vmem:[%s11938_s8 + $0xd4] sm:$0xf0]  ;;  %v8865_v12 = vor.u32 %v10677_v0, %v8862_v14  ;;  %v8801_v39 = vor.u32 %v10661_v23, %v8798_v54  ;;  %v8806_v14 = vld [vmem:[%s11938_s8 + $0x58] sm:$0xf0] }
 0x793   :  { %v8869_v15 = vor.u32 %v10680_v9, %v8868_v60  ;;  %v10664_v56 = vld [vmem:[%s11938_s8 + $0x54] sm:$0xf0]  ;;  %v8780_v9 = vld [vmem:[%s11938_s8 + $0x20] sm:$0xf] }
 0x794   :  { %1562 = vmatmul.bf16.gmra.mxu0 %v1499_v58  ;;  %v10678_v58 = vld [vmem:[%s11938_s8 + $0xcc] sm:$0xf]  ;;  %1912 = vmatpush.bf16.msra.mxu1 %v8861_v29  ;;  %v8805_v0 = vor.u32 %v10664_v56, %v8804_v6  ;;  %v12718_v56 = vld [vmem:[%s15122_s17] ss:$0 sm:$0xff] }
 0x795   :  { %1935 = vmatpush.bf16.msrb.mxu2 %v8865_v12  ;;  %1958 = vmatpush.bf16.msrb.mxu3 %v8869_v15  ;;  %v10662_v29 = vld [vmem:[%s11938_s8 + $0x4c] sm:$0xf]  ;;  %v10659_v12 = vld [vmem:[%s11938_s8 + $0x2c] sm:$0xf0]  ;;  %v10657_v15 = vld [vmem:[%s11938_s8 + $0x24] sm:$0xf] }
 0x796   :  { %v1459_v22 = vpop.permute.xlu2 %1458  ;;  %v8809_v60 = vor.u32 %v10662_v29, %v8806_v14 }
 0x7e0   :  { %v1439_v28 = vpop.permute.xlu1 %1438 }
 0x7e1   :  { %v1475_v53 = vsel %vm1470_vm9, %v1469_v2, %v1439_v28  ;;  %v8873_v2 = vor.u32 %v10678_v58, %v8870_v17  ;;  %v8844_v28 = vld [vmem:[%s11938_s8 + $0xa0] sm:$0xf]  ;;  %v8781_v58 = vor.u32 %v10659_v12, %v8780_v9  ;;  %v8782_v17 = vld [vmem:[%s11938_s8 + $0x30] sm:$0xf0] }
 0x7e2   :  { %v1481_v44 = vsel %vm15096_vm10, %v1475_v53, %v1459_v22  ;;  %v10675_v22 = vld [vmem:[%s11938_s8 + $0xac] sm:$0xf0]  ;;  %v10673_v53 = vld [vmem:[%s11938_s8 + $0xa4] sm:$0xf] }
 0x7e3   :  { %v1558_v16 = vpop.f32.mrf.mxu0  ;;  %v1500_v59 = vpack.c.bf16 %v1481_v44, %v1481_v44  ;;  %1981 = vmatpush.bf16.msra.mxu0 %v8873_v2  ;;  %v8846_v44 = vld [vmem:[%s11938_s8 + $0xb0] sm:$0xf0]  ;;  %v8788_v2 = vld [vmem:[%s11938_s8 + $0x28] sm:$0xf] }
 0x7e4   :  { %v1572_v25 = vadd.f32 %v1558_v16, %v12116_v35  ;;  %v8852_v16 = vld [vmem:[%s11938_s8 + $0xa8] sm:$0xf] }
 0x7e5   :  { %1567 = vmatmul.bf16.gmra.mxu0 %v1500_v59  ;;  %v10676_v59 = vld [vmem:[%s11938_s8 + $0xb4] sm:$0xf0] }
 0x7e6   :  { %v12599_v26 = vadd.f32 %v11177_v24, %v1572_v25  ;;  %v8849_v25 = vor.u32 %v10673_v53, %v8846_v44  ;;  %v8785_v53 = vor.u32 %v10657_v15, %v8782_v17  ;;  %v10658_v44 = vld [vmem:[%s11938_s8 + $0x2c] sm:$0xf] }
 0x7e8   :  { %1588 = vadd.xlane.f32.xlu0 %v12599_v26  ;;  %1936 = vmatpush.bf16.msrb.mxu2 %v8849_v25 }
 0x7eb   :  { %v1560_v37 = vpop.f32.mrf.mxu0 }
 0x7ec   :  { %v1573_v36 = vadd.f32 %v1560_v37, %v12121_v51  ;;  %v8853_v37 = vor.u32 %v10676_v59, %v8852_v16  ;;  %v8790_v16 = vld [vmem:[%s11938_s8 + $0x38] sm:$0xf0]  ;;  %v8764_v59 = vld [vmem:[%s11938_s8] sm:$0xf] }
 0x7ee   :  { %v12603_v55 = vadd.f32 %v11177_v24, %v1573_v36  ;;  %v10674_v36 = vld [vmem:[%s11938_s8 + $0xac] sm:$0xf]  ;;  %1959 = vmatpush.bf16.msrb.mxu3 %v8853_v37  ;;  %v8793_v37 = vor.u32 %v10658_v44, %v8790_v16 }
 0x7f0   :  { %1590 = vadd.xlane.f32.xlu1 %v12603_v55 }
 0x811   :  { %v1563_v32 = vpop.f32.mrf.mxu0 }
 0x812   :  { %v1574_v40 = vadd.f32 %v1563_v32, %v12128_v3  ;;  %v8854_v32 = vld [vmem:[%s11938_s8 + $0xb8] sm:$0xf0] }
 0x814   :  { %v12607_v21 = vadd.f32 %v11177_v24, %v1574_v40  ;;  %v8857_v40 = vor.u32 %v10674_v36, %v8854_v32  ;;  %v10655_v36 = vld [vmem:[%s11938_s8 + $0xc] sm:$0xf0]  ;;  %v10653_v32 = vld [vmem:[%s11938_s8 + $0x4] sm:$0xf] }
 0x816   :  { %1592 = vadd.xlane.f32.xlu2 %v12607_v21  ;;  %1982 = vmatpush.bf16.msra.mxu0 %v8857_v40  ;;  %v8766_v40 = vld [vmem:[%s11938_s8 + $0x10] sm:$0xf0] }
 0x819   :  { %v1565_v35 = vpop.f32.mrf.mxu0 }
 0x81a   :  { %v1575_v34 = vadd.f32 %v1565_v35, %v12137_v8  ;;  %v8828_v35 = vld [vmem:[%s11938_s8 + $0x80] sm:$0xf] }
 0x81c   :  { %v12611_v52 = vadd.f32 %v11177_v24, %v1575_v34  ;;  %v10671_v34 = vld [vmem:[%s11938_s8 + $0x8c] sm:$0xf0] }
 0x81e   :  { %1594 = vadd.xlane.f32.xlu0 %v12611_v52 }
 0x85b   :  { %v1589_v19 = vpop.xlane.xlu0 %1588 }
 0x85c   :  { %v1599_v51 = vmul.f32 %v1589_v19, %v12082_v45  ;;  %v10669_v19 = vld [vmem:[%s11938_s8 + $0x84] sm:$0xf] }
 0x85e   :  { %v12616_v11 = vsub.f32 %v12599_v26, %v1599_v51  ;;  %v8829_v51 = vor.u32 %v10671_v34, %v8828_v35  ;;  %v8765_v35 = vor.u32 %v10655_v36, %v8764_v59  ;;  %v8769_v34 = vor.u32 %v10653_v32, %v8766_v40 }
 0x860   :  { %v1609_v3 = vmul.f32 %v12616_v11, %v12616_v11 }
 0x862   :  { %1614 = vadd.xlane.f32.xlu2 %v1609_v3  ;;  %v1568_v30 = vpop.f32.mrf.mxu0  ;;  %v8830_v3 = vld [vmem:[%s11938_s8 + $0x90] sm:$0xf0] }
 0x863   :  { %v1591_v41 = vpop.xlane.xlu1 %1590  ;;  %v1576_v46 = vadd.f32 %v1568_v30, %v12130_v5  ;;  %v8836_v30 = vld [vmem:[%s11938_s8 + $0x88] sm:$0xf] }
 0x864   :  { %v1600_v8 = vmul.f32 %v1591_v41, %v12082_v45  ;;  %v10672_v41 = vld [vmem:[%s11938_s8 + $0x94] sm:$0xf0] }
 0x865   :  { %v12622_v62 = vadd.f32 %v11177_v24, %v1576_v46  ;;  %v8845_v24 = vor.u32 %v10675_v22, %v8844_v28  ;;  %v8833_v46 = vor.u32 %v10669_v19, %v8830_v3  ;;  %v10660_v28 = vld [vmem:[%s11938_s8 + $0x34] sm:$0xf0]  ;;  %v8772_v19 = vld [vmem:[%s11938_s8 + $0x8] sm:$0xf]  ;;  %v10654_v3 = vld [vmem:[%s11938_s8 + $0xc] sm:$0xf] }
 0x866   :  { %v12625_v7 = vsub.f32 %v12603_v55, %v1600_v8  ;;  %v8837_v8 = vor.u32 %v10672_v41, %v8836_v30 }
 0x867   :  { %v1596_v42 = vsel %vm265_vm2, %v12622_v62, 0.0  ;;  %1913 = vmatpush.bf16.msra.mxu1 %v8845_v24  ;;  %1937 = vmatpush.bf16.msrb.mxu2 %v8833_v46  ;;  %v8789_v24 = vor.u32 %v10660_v28, %v8788_v2  ;;  %v8774_v46 = vld [vmem:[%s11938_s8 + $0x18] sm:$0xf0] }
 0x868   :  { %1597 = vadd.xlane.f32.xlu1 %v1596_v42  ;;  %v1610_v27 = vmul.f32 %v12625_v7, %v12625_v7  ;;  %v10670_v42 = vld [vmem:[%s11938_s8 + $0x8c] sm:$0xf]  ;;  %1960 = vmatpush.bf16.msrb.mxu3 %v8837_v8  ;;  %v8777_v8 = vor.u32 %v10654_v3, %v8774_v46 }
 0x86a   :  { %1616 = vadd.xlane.f32.xlu0 %v1610_v27  ;;  %v1570_v5 = vpop.f32.mrf.mxu0  ;;  %v8838_v27 = vld [vmem:[%s11938_s8 + $0x98] sm:$0xf0] }
 0x86b   :  { %1914 = vmatpush.bf16.msra.mxu1 %v8829_v51  ;;  %v8841_v5 = vor.u32 %v10670_v42, %v8838_v27  ;;  %v10656_v51 = vld [vmem:[%s11938_s8 + $0x14] sm:$0xf0] }
 0x86c   :  { %v8773_v41 = vor.u32 %v10656_v51, %v8772_v19 }
 0x86d   :  { %1983 = vmatpush.bf16.msra.mxu0 %v8841_v5 }
 0x871   :  { %1984 = vmatpush.bf16.msra.mxu0 %v8825_v43 }
 0x875   :  { %1985 = vmatpush.bf16.msra.mxu0 %v8809_v60  ;;  %v12723_v60 = vld [vmem:[%s15123_s21] ss:$0 sm:$0xff] }
 0x879   :  { %1986 = vmatpush.bf16.msra.mxu0 %v8793_v37 }
 0x87d   :  { %1987 = vmatpush.bf16.msra.mxu0 %v8777_v8 }
 0x889   :  { %v1593_v10 = vpop.xlane.xlu2 %1592 }
 0x88a   :  { %v1601_v38 = vmul.f32 %v1593_v10, %v12082_v45  ;;  %v8812_v10 = vld [vmem:[%s11938_s8 + $0x60] sm:$0xf] }
 0x88c   :  { %v12633_v1 = vsub.f32 %v12607_v21, %v1601_v38  ;;  %v10667_v38 = vld [vmem:[%s11938_s8 + $0x6c] sm:$0xf0] }
 0x88e   :  { %v1611_v49 = vmul.f32 %v12633_v1, %v12633_v1 }
 0x890   :  { %1618 = vadd.xlane.f32.xlu1 %v1611_v49  ;;  %v10665_v49 = vld [vmem:[%s11938_s8 + $0x64] sm:$0xf] }
 0x891   :  { %v1595_v4 = vpop.xlane.xlu0 %1594 }
 0x892   :  { %v1602_v57 = vmul.f32 %v1595_v4, %v12082_v45  ;;  %v8813_v4 = vor.u32 %v10667_v38, %v8812_v10 }
 0x894   :  { %v12639_v18 = vsub.f32 %v12611_v52, %v1602_v57  ;;  %v8814_v57 = vld [vmem:[%s11938_s8 + $0x70] sm:$0xf0]  ;;  %1915 = vmatpush.bf16.msra.mxu1 %v8813_v4 }
 0x895   :  { %v8817_v20 = vor.u32 %v10665_v49, %v8814_v57 }
 0x896   :  { %v1612_v31 = vmul.f32 %v12639_v18, %v12639_v18 }
 0x897   :  { %1938 = vmatpush.bf16.msrb.mxu2 %v8817_v20 }
 0x898   :  { %1620 = vadd.xlane.f32.xlu2 %v1612_v31  ;;  %v8820_v31 = vld [vmem:[%s11938_s8 + $0x68] sm:$0xf]  ;;  %1916 = vmatpush.bf16.msra.mxu1 %v8797_v13 }
 0x899   :  { %v8821_v61 = vor.u32 %v10668_v47, %v8820_v31 }
 0x89b   :  { %1961 = vmatpush.bf16.msrb.mxu3 %v8821_v61  ;;  %1939 = vmatpush.bf16.msrb.mxu2 %v8801_v39 }
 0x89c   :  { %1917 = vmatpush.bf16.msra.mxu1 %v8781_v58 }
 0x89f   :  { %1962 = vmatpush.bf16.msrb.mxu3 %v8805_v0  ;;  %1940 = vmatpush.bf16.msrb.mxu2 %v8785_v53 }
 0x8a0   :  { %1918 = vmatpush.bf16.msra.mxu1 %v8765_v35 }
 0x8a3   :  { %1963 = vmatpush.bf16.msrb.mxu3 %v8789_v24  ;;  %1941 = vmatpush.bf16.msrb.mxu2 %v8769_v34 }
 0x8a7   :  { %1964 = vmatpush.bf16.msrb.mxu3 %v8773_v41 }
 0x8d5   :  { %v1615_v22 = vpop.xlane.xlu2 %1614 }
 0x8d6   :  { %v1625_v25 = vmul.f32 %v1615_v22, %v12082_v45 }
 0x8d8   :  { %v1630_v30 = vadd.f32 1e-05, %v1625_v25 }
 0x8da   :  { %11305 = vrsqrt.f32 %v1630_v30  ;;  %vm1641_vm12 = vweird.f32 %v1630_v30 }
 0x8db   :  { %v1598_v42 = vpop.xlane.xlu1 %1597 }
 0x8dc   :  { %v1603_v27 = vmul.f32 %v1598_v42, %v12082_v45 }
 0x8dd   :  { %v1617_v5 = vpop.xlane.xlu0 %1616 }
 0x8de   :  { %v12710_v10 = vsub.f32 %v12622_v62, %v1603_v27  ;;  %v1626_v38 = vmul.f32 %v1617_v5, %v12082_v45 }
 0x8e0   :  { %v11306_v49 = vpop.eup %11305  ;;  %v1631_v4 = vadd.f32 1e-05, %v1626_v38  ;;  %v1613_v57 = vmul.f32 %v12710_v10, %v12710_v10 }
 0x8e1   :  { %v1636_v31 = vmul.f32 %v11306_v49, %v1630_v30  ;;  %vm1642_vm11 = vweird.f32 %v11306_v49 }
 0x8e2   :  { %11307 = vrsqrt.f32 %v1631_v4  ;;  %v1622_v47 = vsel %vm265_vm2, %v1613_v57, 0.0  ;;  %vm1643_vm13 = vmor %vm1641_vm12, %vm1642_vm11  ;;  %vm1651_vm15 = vweird.f32 %v1631_v4 }
 0x8e3   :  { %v1637_v20 = vmul.f32 %v11306_v49, %v1636_v31  ;;  %1623 = vadd.xlane.f32.xlu0 %v1622_v47 }
 0x8e5   :  { %v1638_v61 = vmul.f32 0.5, %v1637_v20 }
 0x8e7   :  { %v1639_v63 = vsub.f32 1.5, %v1638_v61 }
 0x8e8   :  { %v11308_v33 = vpop.eup %11307 }
 0x8e9   :  { %v1640_v43 = vmul.f32 %v11306_v49, %v1639_v63  ;;  %v1646_v50 = vmul.f32 %v11308_v33, %v1631_v4  ;;  %vm1652_vm14 = vweird.f32 %v11308_v33 }
 0x8ea   :  { %vm1653_vm1 = vmor %vm1651_vm15, %vm1652_vm14 }
 0x8eb   :  { %v1647_v48 = vmul.f32 %v11308_v33, %v1646_v50  ;;  %v1644_v23 = vsel %vm1643_vm13, %v11306_v49, %v1640_v43  ;;  %v1741_v50 = vld [vmem:[%s15124_s14] sm:$0xf] }
 0x8ec   :  { %v1685_v6 = vmul.f32 %v1644_v23, %v12616_v11  ;;  %v12743_v23 = vperm.slane %v1741_v50, 3 }
 0x8ed   :  { %v1648_v13 = vmul.f32 0.5, %v1647_v48  ;;  %v12741_v48 = vperm.slane %v1741_v50, 0 }
 0x8ee   :  { %v1693_v14 = vmul.f32 %v12718_v56, %v1685_v6 }
 0x8ef   :  { %v1649_v54 = vsub.f32 1.5, %v1648_v13  ;;  %v10692_v13 = vld [vmem:[%s15125_s1 + $0x38] sm:$0xff] }
 0x8f0   :  { %v1701_v12 = vadd.f32 %v12723_v60, %v1693_v14  ;;  %2691 = vmatpush.bf16.msrb.mxu1 %v10692_v13  ;;  %v10691_v14 = vld [vmem:[%s15125_s1 + $0x30] sm:$0xff]  ;;  %v10696_v13 = vld [vmem:[%s15125_s1 + $0x58] sm:$0xff] }
 0x8f1   :  { %v1650_v39 = vmul.f32 %v11308_v33, %v1649_v54  ;;  %v10716_v54 = vld [vmem:[%s15125_s1 + $0xf8] sm:$0xff] }
 0x8f2   :  { %2760 = vmatpush.bf16.msrb.mxu0 %v10716_v54  ;;  %v10704_v54 = vld [vmem:[%s15125_s1 + $0x98] sm:$0xff] }
 0x8f3   :  { %v1654_v0 = vsel %vm1653_vm1, %v11308_v33, %v1650_v39 }
 0x8f4   :  { %v1686_v29 = vmul.f32 %v1654_v0, %v12625_v7  ;;  %2692 = vmatpush.bf16.msrb.mxu1 %v10691_v14 }
 0x8f6   :  { %v1694_v9 = vmul.f32 %v12718_v56, %v1686_v29  ;;  %v12754_v29 = vperm.slane %v1741_v50, 1 }
 0x8f8   :  { %v1702_v15 = vadd.f32 %v12723_v60, %v1694_v9 }
 0x8fa   :  { %v1738_v58 = vpack.c.bf16 %v1702_v15, %v1701_v12  ;;  %v12759_v12 = vperm.slane %v1741_v50, 2 }
 0x8fc   :  { %1919 = vmatmul.bf16.vlgmr.msra.gmra.mxu1 %v1738_v58  ;;  %1942 = vmatmul.bf16.vlgmr.msrb.gmra.mxu2 %v1738_v58 }
 0x8fd   :  { %1965 = vmatmul.bf16.vlgmr.msrb.gmra.mxu3 %v1738_v58  ;;  %1988 = vmatmul.bf16.vlgmr.msra.gmra.mxu0 %v1738_v58  ;;  %v10700_v58 = vld [vmem:[%s15125_s1 + $0x78] sm:$0xff] }
 0x8fe   :  { %2714 = vmatpush.bf16.msra.mxu2 %v10700_v58 }
 0x903   :  { %v1619_v11 = vpop.xlane.xlu1 %1618 }
 0x904   :  { %v1627_v17 = vmul.f32 %v1619_v11, %v12082_v45  ;;  %v10708_v11 = vld [vmem:[%s15125_s1 + $0xb8] sm:$0xff] }
 0x905   :  { %2737 = vmatpush.bf16.msra.mxu3 %v10708_v11 }
 0x906   :  { %v1632_v2 = vadd.f32 1e-05, %v1627_v17 }
 0x908   :  { %11309 = vrsqrt.f32 %v1632_v2  ;;  %vm1661_vm4 = vweird.f32 %v1632_v2 }
 0x90b   :  { %v1621_v7 = vpop.xlane.xlu2 %1620 }
 0x90c   :  { %v1628_v28 = vmul.f32 %v1621_v7, %v12082_v45 }
 0x90e   :  { %v11310_v22 = vpop.eup %11309  ;;  %v1633_v53 = vadd.f32 1e-05, %v1628_v28 }
 0x90f   :  { %v1656_v24 = vmul.f32 %v11310_v22, %v1632_v2  ;;  %vm1662_vm3 = vweird.f32 %v11310_v22 }
 0x910   :  { %11311 = vrsqrt.f32 %v1633_v53  ;;  %vm1663_vm5 = vmor %vm1661_vm4, %vm1662_vm3  ;;  %vm1671_vm12 = vweird.f32 %v1633_v53 }
 0x911   :  { %v1657_v44 = vmul.f32 %v11310_v22, %v1656_v24 }
 0x913   :  { %v1658_v16 = vmul.f32 0.5, %v1657_v44 }
 0x915   :  { %v1659_v59 = vsub.f32 1.5, %v1658_v16 }
 0x916   :  { %v11312_v25 = vpop.eup %11311 }
 0x917   :  { %v1660_v37 = vmul.f32 %v11310_v22, %v1659_v59  ;;  %v1666_v36 = vmul.f32 %v11312_v25, %v1633_v53  ;;  %vm1672_vm11 = vweird.f32 %v11312_v25  ;;  %v10714_v53 = vld [vmem:[%s15125_s1 + $0xe8] sm:$0xff] }
 0x918   :  { %vm1673_vm13 = vmor %vm1671_vm12, %vm1672_vm11 }
 0x919   :  { %v1667_v32 = vmul.f32 %v11312_v25, %v1666_v36  ;;  %v1664_v40 = vsel %vm1663_vm5, %v11310_v22, %v1660_v37  ;;  %v10690_v22 = vld [vmem:[%s15125_s1 + $0x28] sm:$0xff]  ;;  %v10699_v37 = vld [vmem:[%s15125_s1 + $0x70] sm:$0xff] }
 0x91a   :  { %v1687_v19 = vmul.f32 %v1664_v40, %v12633_v1  ;;  %2693 = vmatpush.bf16.msrb.mxu1 %v10690_v22  ;;  %v10707_v36 = vld [vmem:[%s15125_s1 + $0xb0] sm:$0xff]  ;;  %2715 = vmatpush.bf16.msra.mxu2 %v10699_v37  ;;  %v10685_v37 = vld [vmem:[%s15125_s1] sm:$0xff] }
 0x91b   :  { %v1668_v35 = vmul.f32 0.5, %v1667_v32  ;;  %2738 = vmatpush.bf16.msra.mxu3 %v10707_v36  ;;  %v10695_v22 = vld [vmem:[%s15125_s1 + $0x50] sm:$0xff]  ;;  %v10709_v36 = vld [vmem:[%s15125_s1 + $0xc0] sm:$0xff] }
 0x91c   :  { %v1695_v41 = vmul.f32 %v12718_v56, %v1687_v19  ;;  %v10689_v19 = vld [vmem:[%s15125_s1 + $0x20] sm:$0xff] }
 0x91d   :  { %v1669_v34 = vsub.f32 1.5, %v1668_v35 }
 0x91e   :  { %v1703_v8 = vadd.f32 %v12723_v60, %v1695_v41  ;;  %2694 = vmatpush.bf16.msrb.mxu1 %v10689_v19 }
 0x91f   :  { %v1670_v51 = vmul.f32 %v11312_v25, %v1669_v34 }
 0x921   :  { %v1674_v3 = vsel %vm1673_vm13, %v11312_v25, %v1670_v51  ;;  %v10713_v51 = vld [vmem:[%s15125_s1 + $0xe0] sm:$0xff] }
 0x922   :  { %v1688_v30 = vmul.f32 %v1674_v3, %v12639_v18 }
 0x924   :  { %v1696_v46 = vmul.f32 %v12718_v56, %v1688_v30 }
 0x926   :  { %v1704_v42 = vadd.f32 %v12723_v60, %v1696_v46  ;;  %v10698_v46 = vld [vmem:[%s15125_s1 + $0x68] sm:$0xff] }
 0x927   :  { %2716 = vmatpush.bf16.msra.mxu2 %v10698_v46 }
 0x928   :  { %v1739_v27 = vpack.c.bf16 %v1704_v42, %v1703_v8  ;;  %v10706_v8 = vld [vmem:[%s15125_s1 + $0xa8] sm:$0xff] }
 0x929   :  { %2739 = vmatpush.bf16.msra.mxu3 %v10706_v8 }
 0x92a   :  { %1924 = vmatmul.bf16.gmra.mxu1 %v1739_v27  ;;  %1947 = vmatmul.bf16.gmra.mxu2 %v1739_v27 }
 0x92b   :  { %1970 = vmatmul.bf16.gmra.mxu3 %v1739_v27  ;;  %1993 = vmatmul.bf16.gmra.mxu0 %v1739_v27 }
 0x956   :  { %v1624_v1 = vpop.xlane.xlu0 %1623 }
 0x957   :  { %v1629_v5 = vmul.f32 %v1624_v1, %v12082_v45 }
 0x959   :  { %v1634_v38 = vadd.f32 1e-05, %v1629_v5 }
 0x95b   :  { %11313 = vrsqrt.f32 %v1634_v38  ;;  %vm1681_vm15 = vweird.f32 %v1634_v38 }
 0x961   :  { %v11314_v18 = vpop.eup %11313 }
 0x962   :  { %v1676_v49 = vmul.f32 %v11314_v18, %v1634_v38  ;;  %vm1682_vm14 = vweird.f32 %v11314_v18 }
 0x963   :  { %vm1683_vm1 = vmor %vm1681_vm15, %vm1682_vm14 }
 0x964   :  { %v1677_v4 = vmul.f32 %v11314_v18, %v1676_v49 }
 0x966   :  { %v1678_v57 = vmul.f32 0.5, %v1677_v4  ;;  %v10688_v4 = vld [vmem:[%s15125_s1 + $0x18] sm:$0xff] }
 0x967   :  { %2695 = vmatpush.bf16.msrb.mxu1 %v10688_v4 }
 0x968   :  { %v1679_v31 = vsub.f32 1.5, %v1678_v57  ;;  %v10712_v57 = vld [vmem:[%s15125_s1 + $0xd8] sm:$0xff] }
 0x96a   :  { %v1680_v47 = vmul.f32 %v11314_v18, %v1679_v31  ;;  %v10697_v31 = vld [vmem:[%s15125_s1 + $0x60] sm:$0xff] }
 0x96b   :  { %2717 = vmatpush.bf16.msra.mxu2 %v10697_v31 }
 0x96c   :  { %v1684_v20 = vsel %vm1683_vm1, %v11314_v18, %v1680_v47  ;;  %v10705_v47 = vld [vmem:[%s15125_s1 + $0xa0] sm:$0xff] }
 0x96d   :  { %v1689_v61 = vmul.f32 %v1684_v20, %v12710_v10  ;;  %2740 = vmatpush.bf16.msra.mxu3 %v10705_v47  ;;  %v10693_v47 = vld [vmem:[%s15125_s1 + $0x40] sm:$0xff] }
 0x96f   :  { %v1697_v63 = vmul.f32 %v12718_v56, %v1689_v61  ;;  %2718 = vmatpush.bf16.msra.mxu2 %v10696_v13 }
 0x971   :  { %v1705_v33 = vadd.f32 %v12723_v60, %v1697_v63  ;;  %v10715_v60 = vld [vmem:[%s15125_s1 + $0xf0] sm:$0xff]  ;;  %2741 = vmatpush.bf16.msra.mxu3 %v10704_v54 }
 0x972   :  { %2761 = vmatpush.bf16.msrb.mxu0 %v10715_v60  ;;  %v10687_v63 = vld [vmem:[%s15125_s1 + $0x10] sm:$0xff]  ;;  %v10686_v60 = vld [vmem:[%s15125_s1 + $0x8] sm:$0xff] }
 0x973   :  { %v1740_v43 = vpack.c.bf16 %v1705_v33, %v1705_v33  ;;  %v10711_v33 = vld [vmem:[%s15125_s1 + $0xd0] sm:$0xff]  ;;  %2696 = vmatpush.bf16.msrb.mxu1 %v10687_v63  ;;  %2719 = vmatpush.bf16.msra.mxu2 %v10695_v22 }
 0x975   :  { %1929 = vmatmul.bf16.gmra.mxu1 %v1740_v43  ;;  %1952 = vmatmul.bf16.gmra.mxu2 %v1740_v43 }
 0x976   :  { %1975 = vmatmul.bf16.gmra.mxu3 %v1740_v43  ;;  %1998 = vmatmul.bf16.gmra.mxu0 %v1740_v43 }
 0x977   :  { %2762 = vmatpush.bf16.msrb.mxu0 %v10714_v53  ;;  %2697 = vmatpush.bf16.msrb.mxu1 %v10686_v60 }
 0x979   :  { %v1920_v10 = vpop.f32.mrf.mxu1 }
 0x97a   :  { %v12748_v6 = vadd.f32 %v1920_v10, %v12741_v48  ;;  %v1989_v56 = vpop.f32.mrf.mxu0 }
 0x97b   :  { %v12751_v39 = vadd.f32 %v1989_v56, %v12743_v23  ;;  %2763 = vmatpush.bf16.msrb.mxu0 %v10713_v51  ;;  %2698 = vmatpush.bf16.msrb.mxu1 %v10685_v37 }
 0x97c   :  { %v8890_v0 = vmul.f32 -1.702, %v12748_v6 }
 0x97d   :  { %v8893_v9 = vmul.f32 -1.702, %v12751_v39 }
 0x97e   :  { %v2043_v15 = vmul.f32 1.442695, %v8890_v0 }
 0x97f   :  { %v2049_v17 = vmul.f32 1.442695, %v8893_v9  ;;  %v1943_v2 = vpop.f32.mrf.mxu2  ;;  %2764 = vmatpush.bf16.msrb.mxu0 %v10712_v57  ;;  %v10710_v9 = vld [vmem:[%s15125_s1 + $0xc8] sm:$0xff] }
 0x980   :  { %11315 = vpow2.f32 %v2043_v15  ;;  %v12764_v7 = vadd.f32 %v1943_v2, %v12754_v29  ;;  %v1966_v28 = vpop.f32.mrf.mxu3 }
 0x981   :  { %11317 = vpow2.f32 %v2049_v17  ;;  %v12769_v24 = vadd.f32 %v1966_v28, %v12759_v12  ;;  %v1922_v44 = vpop.f32.mrf.mxu1 }
 0x982   :  { %v8891_v16 = vmul.f32 -1.702, %v12764_v7  ;;  %v12773_v59 = vadd.f32 %v1922_v44, %v12741_v48  ;;  %v1991_v25 = vpop.f32.mrf.mxu0  ;;  %v10703_v44 = vld [vmem:[%s15125_s1 + $0x90] sm:$0xff] }
 0x983   :  { %v8892_v32 = vmul.f32 -1.702, %v12769_v24  ;;  %v12779_v40 = vadd.f32 %v1991_v25, %v12743_v23  ;;  %2765 = vmatpush.bf16.msrb.mxu0 %v10711_v33  ;;  %2742 = vmatpush.bf16.msra.mxu3 %v10703_v44 }
 0x984   :  { %v2045_v35 = vmul.f32 1.442695, %v8891_v16  ;;  %v8894_v34 = vmul.f32 -1.702, %v12773_v59 }
 0x985   :  { %v8897_v3 = vmul.f32 -1.702, %v12779_v40  ;;  %v2047_v18 = vmul.f32 1.442695, %v8892_v32 }
 0x986   :  { %v11316_v30 = vpop.eup %11315  ;;  %11319 = vpow2.f32 %v2045_v35  ;;  %v2051_v41 = vmul.f32 1.442695, %v8894_v34 }
 0x987   :  { %v11318_v42 = vpop.eup %11317  ;;  %v12787_v27 = vadd.f32 1.0, %v11316_v30  ;;  %v2057_v1 = vmul.f32 1.442695, %v8897_v3  ;;  %v1945_v5 = vpop.f32.mrf.mxu2  ;;  %2766 = vmatpush.bf16.msrb.mxu0 %v10710_v9  ;;  %v10694_v3 = vld [vmem:[%s15125_s1 + $0x48] sm:$0xff] }
 0x988   :  { %v12789_v38 = vadd.f32 1.0, %v11318_v42  ;;  %11321 = vpow2.f32 %v2051_v41  ;;  %v12792_v49 = vadd.f32 %v1945_v5, %v12754_v29  ;;  %v1968_v11 = vpop.f32.mrf.mxu3  ;;  %v10702_v30 = vld [vmem:[%s15125_s1 + $0x88] sm:$0xff]  ;;  %2720 = vmatpush.bf16.msra.mxu2 %v10694_v3 }
 0x989   :  { %11323 = vrcp.f32 %v12787_v27  ;;  %v12826_v25 = vadd.f32 %v1968_v11, %v12759_v12  ;;  %v2112_v19 = vand.u32 2147483647, %v12787_v27  ;;  %v2114_v51 = vand.u32 2147483648, %v12787_v27  ;;  %2743 = vmatpush.bf16.msra.mxu3 %v10702_v30 }
 0x98a   :  { %11325 = vrcp.f32 %v12789_v38  ;;  %v8895_v20 = vmul.f32 -1.702, %v12792_v49  ;;  %v2157_v41 = vand.u32 2147483647, %v12789_v38  ;;  %v2159_v46 = vand.u32 2147483648, %v12789_v38 }
 0x98b   :  { %11327 = vpow2.f32 %v2057_v1  ;;  %2767 = vmatpush.bf16.msrb.mxu0 %v10709_v36  ;;  %v8896_v1 = vmul.f32 -1.702, %v12826_v25  ;;  %vm2108_vm4 = vweird.f32 %v12787_v27  ;;  %vm12850_vm5 = vcmp.eq.f32.partialorder %v2112_v19, 8.507059e+37 }
 0x98c   :  { %v11320_v61 = vpop.eup %11319  ;;  %11329 = vpow2.f32 %v2047_v18  ;;  %v2053_v56 = vmul.f32 1.442695, %v8895_v20  ;;  %v2115_v31 = vor.u32 1.1754944e-38, %v2114_v51  ;;  %vm2153_vm11 = vweird.f32 %v12789_v38  ;;  %v10701_v20 = vld [vmem:[%s15125_s1 + $0x80] sm:$0xff]  ;;  %2721 = vmatpush.bf16.msra.mxu2 %v10693_v47 }
 0x98d   :  { %v12803_v43 = vadd.f32 1.0, %v11320_v61  ;;  %vm12857_vm12 = vcmp.eq.f32.partialorder %v2157_v41, 8.507059e+37  ;;  %v2160_v63 = vor.u32 1.1754944e-38, %v2159_v46  ;;  %2744 = vmatpush.bf16.msra.mxu3 %v10701_v20 }
 0x98e   :  { %v11322_v50 = vpop.eup %11321 }
 0x98f   :  { %v12807_v10 = vpop.eup %11323  ;;  %11331 = vrcp.f32 %v12803_v43  ;;  %v12818_v28 = vadd.f32 1.0, %v11322_v50  ;;  %vm2123_vm15 = vweird.f32 %v12803_v43 }
 0x990   :  { %v12810_v0 = vpop.eup %11325  ;;  %v2104_v14 = vmul.f32 %v12807_v10, %v12787_v27  ;;  %11333 = vpow2.f32 %v2053_v56  ;;  %vm2109_vm3 = vweird.f32 %v12807_v10 }
 0x991   :  { %v11328_v15 = vpop.eup %11327  ;;  %v2149_v58 = vmul.f32 %v12810_v0, %v12789_v38  ;;  %11335 = vrcp.f32 %v12818_v28  ;;  %vm12864_vm13 = vmor %vm2108_vm4, %vm2109_vm3  ;;  %vm2154_vm14 = vweird.f32 %v12810_v0  ;;  %vm2168_vm1 = vweird.f32 %v12818_v28 }
 0x992   :  { %v11330_v17 = vpop.eup %11329  ;;  %v2105_v2 = vsub.f32 1.0, %v2104_v14  ;;  %v12821_v53 = vadd.f32 1.0, %v11328_v15  ;;  %v2055_v14 = vmul.f32 1.442695, %v8896_v1  ;;  %v2174_v11 = vand.u32 2147483648, %v12818_v28  ;;  %vm12888_vm4 = vmor %vm2153_vm11, %vm2154_vm14 }
 0x993   :  { %v2150_v16 = vsub.f32 1.0, %v2149_v58  ;;  %v12833_v34 = vadd.f32 1.0, %v11330_v17  ;;  %v2172_v58 = vand.u32 2147483647, %v12818_v28  ;;  %v2127_v1 = vand.u32 2147483647, %v12803_v43 }
 0x994   :  { %v2106_v35 = vmul.f32 %v12807_v10, %v2105_v2  ;;  %11337 = vrcp.f32 %v12821_v53  ;;  %v2217_v36 = vand.u32 2147483647, %v12821_v53  ;;  %v2219_v38 = vand.u32 2147483648, %v12821_v53 }
 0x995   :  { %v12830_v32 = vpop.eup %11331  ;;  %v2151_v42 = vmul.f32 %v12810_v0, %v2150_v16  ;;  %11339 = vrcp.f32 %v12833_v34  ;;  %vm2173_vm10 = vcmp.eq.f32.partialorder %v2172_v58, 8.507059e+37  ;;  %v2175_v3 = vor.u32 1.1754944e-38, %v2174_v11 }
 0x996   :  { %v2119_v8 = vmul.f32 %v12830_v32, %v12803_v43  ;;  %v11334_v5 = vpop.eup %11333  ;;  %v2107_v18 = vadd.f32 %v12807_v10, %v2106_v35  ;;  %vm2124_vm3 = vweird.f32 %v12830_v32 }
 0x997   :  { %v11336_v4 = vpop.eup %11335  ;;  %v2152_v54 = vadd.f32 %v12810_v0, %v2151_v42  ;;  %v12870_v56 = vadd.f32 1.0, %v11334_v5 }
 0x998   :  { %v2120_v33 = vsub.f32 1.0, %v2119_v8  ;;  %v2164_v50 = vmul.f32 %v11336_v4, %v12818_v28  ;;  %v2111_v60 = vsel %vm12864_vm13, %v12807_v10, %v2107_v18  ;;  %vm2169_vm13 = vweird.f32 %v11336_v4 }
 0x999   :  { %11341 = vrcp.f32 %v12870_v56  ;;  %v2116_v16 = vsel %vm12850_vm5, %v2115_v31, %v2111_v60  ;;  %v2156_v37 = vsel %vm12888_vm4, %v12810_v0, %v2152_v54  ;;  %vm2170_vm14 = vmor %vm2168_vm1, %vm2169_vm13  ;;  %vm2213_vm5 = vweird.f32 %v12821_v53 }
 0x99a   :  { %v11338_v13 = vpop.eup %11337  ;;  %v2165_v9 = vsub.f32 1.0, %v2164_v50  ;;  %v2121_v2 = vmul.f32 %v12830_v32, %v2120_v33  ;;  %11343 = vpow2.f32 %v2055_v14  ;;  %v2161_v0 = vsel %vm12857_vm12, %v2160_v63, %v2156_v37  ;;  %vm12918_vm12 = vmor %vm2123_vm15, %vm2124_vm3 }
 0x99b   :  { %v2209_v15 = vmul.f32 %v11338_v13, %v12821_v53  ;;  %v12882_v17 = vpop.eup %11339  ;;  %vm2214_vm11 = vweird.f32 %v11338_v13  ;;  %v2403_v42 = vmul.f32 %v2116_v16, %v12748_v6  ;;  %v2220_v28 = vor.u32 1.1754944e-38, %v2219_v38 }
 0x99c   :  { %v2166_v22 = vmul.f32 %v11336_v4, %v2165_v9  ;;  %v2134_v51 = vmul.f32 %v12882_v17, %v12833_v34  ;;  %v2122_v30 = vadd.f32 %v12830_v32, %v2121_v2  ;;  %vm2215_vm4 = vmor %vm2213_vm5, %vm2214_vm11  ;;  %vm2218_vm1 = vcmp.eq.f32.partialorder %v2217_v36, 8.507059e+37 }
 0x99d   :  { %v2210_v44 = vsub.f32 1.0, %v2209_v15  ;;  %v2406_v31 = vmul.f32 %v2161_v0, %v12751_v39  ;;  %v2189_v27 = vand.u32 2147483648, %v12870_v56  ;;  %vm2128_vm15 = vcmp.eq.f32.partialorder %v2127_v1, 8.507059e+37 }
 0x99e   :  { %v2167_v35 = vadd.f32 %v11336_v4, %v2166_v22  ;;  %v2135_v47 = vsub.f32 1.0, %v2134_v51  ;;  %vm2183_vm3 = vweird.f32 %v12870_v56  ;;  %v2142_v38 = vand.u32 2147483647, %v12833_v34 }
 0x99f   :  { %v2211_v19 = vmul.f32 %v11338_v13, %v2210_v44  ;;  %v11342_v8 = vpop.eup %11341  ;;  %v2190_v22 = vor.u32 1.1754944e-38, %v2189_v27  ;;  %vm2138_vm5 = vweird.f32 %v12833_v34 }
 0x9a0   :  { %v2171_v41 = vsel %vm2170_vm14, %v11336_v4, %v2167_v35  ;;  %v2179_v53 = vmul.f32 %v11342_v8, %v12870_v56  ;;  %v2129_v4 = vand.u32 2147483648, %v12803_v43  ;;  %v11344_v61 = vpop.eup %11343  ;;  %v2136_v2 = vmul.f32 %v12882_v17, %v2135_v47 }
 0x9a1   :  { %v2212_v46 = vadd.f32 %v11338_v13, %v2211_v19  ;;  %v2176_v5 = vsel %vm2173_vm10, %v2175_v3, %v2171_v41  ;;  %v12929_v54 = vadd.f32 1.0, %v11344_v61  ;;  %vm2184_vm10 = vweird.f32 %v11342_v8 }
 0x9a2   :  { %v2407_v18 = vmul.f32 %v2176_v5, %v12773_v59  ;;  %v2126_v59 = vsel %vm12918_vm12, %v12830_v32, %v2122_v30  ;;  %v2180_v33 = vsub.f32 1.0, %v2179_v53  ;;  %vm2185_vm13 = vmor %vm2183_vm3, %vm2184_vm10  ;;  %vm2139_vm14 = vweird.f32 %v12882_v17 }
 0x9a3   :  { %v2216_v57 = vsel %vm2215_vm4, %v11338_v13, %v2212_v46  ;;  %v2187_v13 = vand.u32 2147483647, %v12870_v56  ;;  %11345 = vrcp.f32 %v12929_v54  ;;  %v2137_v46 = vadd.f32 %v12882_v17, %v2136_v2  ;;  %vm12967_vm4 = vmor %vm2138_vm5, %vm2139_vm14 }
 0x9a4   :  { %v2221_v20 = vsel %vm2218_vm1, %v2220_v28, %v2216_v57  ;;  %v2487_v63 = vpack.c.bf16 %v2407_v18, %v2403_v42  ;;  %v2181_v9 = vmul.f32 %v11342_v8, %v2180_v33  ;;  %v2144_v28 = vand.u32 2147483648, %v12833_v34 }
 0x9a5   :  { %v2410_v39 = vmul.f32 %v2221_v20, %v12779_v40  ;;  %v2130_v40 = vor.u32 1.1754944e-38, %v2129_v4  ;;  %vm2188_vm11 = vcmp.eq.f32.partialorder %v2187_v13, 8.507059e+37  ;;  %vm12971_vm1 = vcmp.eq.f32.partialorder %v2142_v38, 8.507059e+37 }
 0x9a6   :  { %2699 = vmatmul.bf16.vlgmr.msrb.gmra.mxu1 %v2487_v63  ;;  %v2182_v15 = vadd.f32 %v11342_v8, %v2181_v9  ;;  %v2141_v34 = vsel %vm12967_vm4, %v12882_v17, %v2137_v46  ;;  %v2204_v20 = vand.u32 2147483648, %v12929_v54  ;;  %v2202_v33 = vand.u32 2147483647, %v12929_v54 }
 0x9a7   :  { %v1925_v50 = vpop.f32.mrf.mxu1  ;;  %v2490_v60 = vpack.c.bf16 %v2410_v39, %v2406_v31  ;;  %v2131_v10 = vsel %vm2128_vm15, %v2130_v40, %v2126_v59  ;;  %v2145_v13 = vor.u32 1.1754944e-38, %v2144_v28  ;;  %vm2198_vm10 = vweird.f32 %v12929_v54 }
 0x9a8   :  { %v12932_v43 = vadd.f32 %v1925_v50, %v12741_v48  ;;  %v1994_v14 = vpop.f32.mrf.mxu0  ;;  %v2186_v44 = vsel %vm2185_vm13, %v11342_v8, %v2182_v15  ;;  %v2404_v51 = vmul.f32 %v2131_v10, %v12764_v7  ;;  %v2205_v40 = vor.u32 1.1754944e-38, %v2204_v20 }
 0x9a9   :  { %v12935_v32 = vadd.f32 %v1994_v14, %v12743_v23  ;;  %2768 = vmatmul.bf16.vlgmr.msrb.gmra.mxu0 %v2490_v60  ;;  %v2191_v56 = vsel %vm2188_vm11, %v2190_v22, %v2186_v44  ;;  %v11346_v41 = vpop.eup %11345  ;;  %v2146_v9 = vsel %vm12971_vm1, %v2145_v13, %v2141_v34  ;;  %vm2203_vm3 = vcmp.eq.f32.partialorder %v2202_v33, 8.507059e+37 }
 0x9aa   :  { %v8898_v58 = vmul.f32 -1.702, %v12932_v43  ;;  %v2408_v3 = vmul.f32 %v2191_v56, %v12792_v49  ;;  %v2194_v49 = vmul.f32 %v11346_v41, %v12929_v54  ;;  %vm2199_vm12 = vweird.f32 %v11346_v41 }
 0x9ab   :  { %v8901_v11 = vmul.f32 -1.702, %v12935_v32  ;;  %vm2200_vm15 = vmor %vm2198_vm10, %vm2199_vm12 }
 0x9ac   :  { %v2059_v16 = vmul.f32 1.442695, %v8898_v58  ;;  %v2488_v7 = vpack.c.bf16 %v2408_v3, %v2404_v51  ;;  %v2195_v4 = vsub.f32 1.0, %v2194_v49 }
 0x9ad   :  { %v2065_v37 = vmul.f32 1.442695, %v8901_v11  ;;  %v1948_v36 = vpop.f32.mrf.mxu2  ;;  %v2405_v11 = vmul.f32 %v2146_v9, %v12769_v24 }
 0x9ae   :  { %v12945_v35 = vadd.f32 %v1948_v36, %v12754_v29  ;;  %v1971_v19 = vpop.f32.mrf.mxu3  ;;  %11347 = vpow2.f32 %v2059_v16  ;;  %2722 = vmatmul.bf16.vlgmr.msra.gmra.mxu2 %v2488_v7  ;;  %v2196_v39 = vmul.f32 %v11346_v41, %v2195_v4 }
 0x9af   :  { %v12950_v0 = vadd.f32 %v1971_v19, %v12759_v12  ;;  %v1927_v30 = vpop.f32.mrf.mxu1  ;;  %11349 = vpow2.f32 %v2065_v37 }
 0x9b0   :  { %v8899_v8 = vmul.f32 -1.702, %v12945_v35  ;;  %v12955_v42 = vadd.f32 %v1927_v30, %v12741_v48  ;;  %v1996_v1 = vpop.f32.mrf.mxu0  ;;  %v2197_v14 = vadd.f32 %v11346_v41, %v2196_v39 }
 0x9b1   :  { %v8900_v5 = vmul.f32 -1.702, %v12950_v0  ;;  %v12963_v53 = vadd.f32 %v1996_v1, %v12743_v23 }
 0x9b2   :  { %v2061_v18 = vmul.f32 1.442695, %v8899_v8  ;;  %v8902_v57 = vmul.f32 -1.702, %v12955_v42  ;;  %v2201_v15 = vsel %vm2200_vm15, %v11346_v41, %v2197_v14 }
 0x9b3   :  { %v2063_v47 = vmul.f32 1.442695, %v8900_v5  ;;  %v8905_v59 = vmul.f32 -1.702, %v12963_v53  ;;  %v2206_v54 = vsel %vm2203_vm3, %v2205_v40, %v2201_v15 }
 0x9b4   :  { %v2067_v61 = vmul.f32 1.442695, %v8902_v57  ;;  %v11348_v63 = vpop.eup %11347  ;;  %11351 = vpow2.f32 %v2061_v18  ;;  %v2409_v10 = vmul.f32 %v2206_v54, %v12826_v25 }
 0x9b5   :  { %v11350_v50 = vpop.eup %11349  ;;  %v12982_v27 = vadd.f32 1.0, %v11348_v63  ;;  %11353 = vpow2.f32 %v2063_v47  ;;  %v2073_v60 = vmul.f32 1.442695, %v8905_v59  ;;  %v1950_v22 = vpop.f32.mrf.mxu2 }
 0x9b6   :  { %v12984_v17 = vadd.f32 1.0, %v11350_v50  ;;  %11355 = vpow2.f32 %v2067_v61  ;;  %v2489_v16 = vpack.c.bf16 %v2409_v10, %v2405_v11  ;;  %v1973_v37 = vpop.f32.mrf.mxu3  ;;  %v13001_v24 = vadd.f32 %v1950_v22, %v12754_v29 }
 0x9b7   :  { %11357 = vrcp.f32 %v12982_v27  ;;  %v13004_v25 = vadd.f32 %v1973_v37, %v12759_v12  ;;  %v2232_v5 = vand.u32 2147483647, %v12982_v27  ;;  %v2234_v28 = vand.u32 2147483648, %v12982_v27 }
 0x9b8   :  { %11359 = vrcp.f32 %v12984_v17  ;;  %2745 = vmatmul.bf16.vlgmr.msra.gmra.mxu3 %v2489_v16  ;;  %v8903_v1 = vmul.f32 -1.702, %v13001_v24  ;;  %vm2228_vm13 = vweird.f32 %v12982_v27  ;;  %vm2273_vm11 = vweird.f32 %v12984_v17 }
 0x9b9   :  { %11361 = vpow2.f32 %v2073_v60  ;;  %v8904_v7 = vmul.f32 -1.702, %v13004_v25  ;;  %v2277_v34 = vand.u32 2147483647, %v12984_v17  ;;  %vm13026_vm14 = vcmp.eq.f32.partialorder %v2232_v5, 8.507059e+37 }
 0x9ba   :  { %v11352_v58 = vpop.eup %11351  ;;  %v2069_v57 = vmul.f32 1.442695, %v8903_v1  ;;  %v2235_v61 = vor.u32 1.1754944e-38, %v2234_v28  ;;  %v2279_v59 = vand.u32 2147483648, %v12984_v17 }
 0x9bb   :  { %v11354_v2 = vpop.eup %11353  ;;  %v12994_v38 = vadd.f32 1.0, %v11352_v58  ;;  %v2071_v6 = vmul.f32 1.442695, %v8904_v7  ;;  %vm13039_vm1 = vcmp.eq.f32.partialorder %v2277_v34, 8.507059e+37 }
 0x9bc   :  { %v11356_v44 = vpop.eup %11355  ;;  %v13008_v30 = vadd.f32 1.0, %v11354_v2  ;;  %v2280_v11 = vor.u32 1.1754944e-38, %v2279_v59 }
 0x9bd   :  { %v12992_v36 = vpop.eup %11357  ;;  %v2095_v41 = vadd.f32 1.0, %v11356_v44  ;;  %11363 = vrcp.f32 %v12994_v38 }
 0x9be   :  { %v12996_v56 = vpop.eup %11359  ;;  %v2224_v19 = vmul.f32 %v12992_v36, %v12982_v27  ;;  %vm2229_vm5 = vweird.f32 %v12992_v36  ;;  %v2264_v58 = vand.u32 2147483648, %v13008_v30 }
 0x9bf   :  { %v11362_v51 = vpop.eup %11361  ;;  %v2269_v3 = vmul.f32 %v12996_v56, %v12984_v17  ;;  %11365 = vrcp.f32 %v2095_v41  ;;  %v2292_v50 = vand.u32 2147483647, %v2095_v41  ;;  %v2294_v9 = vand.u32 2147483648, %v2095_v41  ;;  %vm13046_vm12 = vmor %vm2228_vm13, %vm2229_vm5 }
 0x9c0   :  { %v13011_v46 = vadd.f32 1.0, %v11362_v51  ;;  %v2225_v8 = vsub.f32 1.0, %v2224_v19  ;;  %11367 = vrcp.f32 %v13008_v30  ;;  %vm2274_vm4 = vweird.f32 %v12996_v56 }
 0x9c1   :  { %v2270_v49 = vsub.f32 1.0, %v2269_v3  ;;  %vm2288_vm15 = vweird.f32 %v2095_v41  ;;  %vm13055_vm3 = vcmp.eq.f32.partialorder %v2292_v50, 8.507059e+37  ;;  %vm13061_vm13 = vmor %vm2273_vm11, %vm2274_vm4  ;;  %v2295_v51 = vor.u32 1.1754944e-38, %v2294_v9 }
 0x9c2   :  { %11369 = vrcp.f32 %v13011_v46  ;;  %v2226_v18 = vmul.f32 %v12992_v36, %v2225_v8  ;;  %v2339_v3 = vand.u32 2147483648, %v13011_v46  ;;  %v2337_v1 = vand.u32 2147483647, %v13011_v46 }
 0x9c3   :  { %v13020_v31 = vpop.eup %11363  ;;  %v2271_v47 = vmul.f32 %v12996_v56, %v2270_v49  ;;  %11371 = vpow2.f32 %v2069_v57  ;;  %vm2333_vm11 = vweird.f32 %v13011_v46  ;;  %v2247_v50 = vand.u32 2147483647, %v12994_v38 }
 0x9c4   :  { %v2227_v33 = vadd.f32 %v12992_v36, %v2226_v18  ;;  %v2239_v14 = vmul.f32 %v13020_v31, %v12994_v38  ;;  %11373 = vpow2.f32 %v2071_v6  ;;  %v2340_v34 = vor.u32 1.1754944e-38, %v2339_v3 }
 0x9c5   :  { %v11366_v4 = vpop.eup %11365  ;;  %v2272_v40 = vadd.f32 %v12996_v56, %v2271_v47  ;;  %v2265_v3 = vor.u32 1.1754944e-38, %v2264_v58 }
 0x9c6   :  { %v2284_v63 = vmul.f32 %v11366_v4, %v2095_v41  ;;  %v13031_v39 = vpop.eup %11367  ;;  %vm2289_vm10 = vweird.f32 %v11366_v4  ;;  %v2231_v22 = vsel %vm13046_vm12, %v12992_v36, %v2227_v33  ;;  %v2240_v37 = vsub.f32 1.0, %v2239_v14 }
 0x9c7   :  { %v2254_v10 = vmul.f32 %v13031_v39, %v13008_v30  ;;  %v2276_v36 = vsel %vm13061_vm13, %v12996_v56, %v2272_v40  ;;  %vm2290_vm5 = vmor %vm2288_vm15, %vm2289_vm10  ;;  %v2236_v7 = vsel %vm13026_vm14, %v2235_v61, %v2231_v22  ;;  %vm2338_vm14 = vcmp.eq.f32.partialorder %v2337_v1, 8.507059e+37 }
 0x9c8   :  { %v11370_v13 = vpop.eup %11369  ;;  %v2285_v60 = vsub.f32 1.0, %v2284_v63  ;;  %v2281_v6 = vsel %vm13039_vm1, %v2280_v11, %v2276_v36  ;;  %v2241_v61 = vmul.f32 %v13020_v31, %v2240_v37  ;;  %vm2244_vm1 = vweird.f32 %v13020_v31 }
 0x9c9   :  { %v2329_v54 = vmul.f32 %v11370_v13, %v13011_v46  ;;  %v11372_v8 = vpop.eup %11371  ;;  %vm2334_vm12 = vweird.f32 %v11370_v13  ;;  %v2255_v49 = vsub.f32 1.0, %v2254_v10  ;;  %v2414_v59 = vmul.f32 %v2281_v6, %v12935_v32 }
 0x9ca   :  { %v2286_v2 = vmul.f32 %v11366_v4, %v2285_v60  ;;  %v11374_v17 = vpop.eup %11373  ;;  %v13072_v28 = vadd.f32 1.0, %v11372_v8  ;;  %vm2335_vm4 = vmor %vm2333_vm11, %vm2334_vm12  ;;  %vm2243_vm10 = vweird.f32 %v12994_v38  ;;  %vm2258_vm15 = vweird.f32 %v13008_v30 }
 0x9cb   :  { %v2330_v27 = vsub.f32 1.0, %v2329_v54  ;;  %v13077_v56 = vadd.f32 1.0, %v11374_v17  ;;  %vm13099_vm13 = vmor %vm2243_vm10, %vm2244_vm1 }
 0x9cc   :  { %v2287_v19 = vadd.f32 %v11366_v4, %v2286_v2  ;;  %11375 = vrcp.f32 %v13072_v28  ;;  %v2309_v22 = vand.u32 2147483648, %v13072_v28  ;;  %v2307_v37 = vand.u32 2147483647, %v13072_v28 }
 0x9cd   :  { %v2331_v41 = vmul.f32 %v11370_v13, %v2330_v27  ;;  %11377 = vrcp.f32 %v13077_v56  ;;  %vm2303_vm1 = vweird.f32 %v13072_v28 }
 0x9ce   :  { %v2291_v5 = vsel %vm2290_vm5, %v11366_v4, %v2287_v19  ;;  %v2411_v4 = vmul.f32 %v2236_v7, %v12932_v43  ;;  %v2242_v43 = vadd.f32 %v13020_v31, %v2241_v61  ;;  %vm13103_vm5 = vcmp.eq.f32.partialorder %v2247_v50, 8.507059e+37 }
 0x9cf   :  { %v2296_v18 = vsel %vm13055_vm3, %v2295_v51, %v2291_v5  ;;  %v2332_v57 = vadd.f32 %v11370_v13, %v2331_v41  ;;  %vm2259_vm3 = vweird.f32 %v13031_v39  ;;  %v2324_v19 = vand.u32 2147483648, %v13077_v56 }
 0x9d0   :  { %v2415_v47 = vmul.f32 %v2296_v18, %v12955_v42  ;;  %v2256_v42 = vmul.f32 %v13031_v39, %v2255_v49  ;;  %v2246_v10 = vsel %vm13099_vm13, %v13020_v31, %v2242_v43  ;;  %vm13113_vm12 = vmor %vm2258_vm15, %vm2259_vm3  ;;  %v2322_v31 = vand.u32 2147483647, %v13077_v56 }
 0x9d1   :  { %v2336_v20 = vsel %vm2335_vm4, %v11370_v13, %v2332_v57  ;;  %v2249_v13 = vand.u32 2147483648, %v12994_v38  ;;  %v2262_v38 = vand.u32 2147483647, %v13008_v30  ;;  %v2310_v41 = vor.u32 1.1754944e-38, %v2309_v22 }
 0x9d2   :  { %v2341_v46 = vsel %vm2338_vm14, %v2340_v34, %v2336_v20  ;;  %v2491_v33 = vpack.c.bf16 %v2415_v47, %v2411_v4  ;;  %v11376_v60 = vpop.eup %11375  ;;  %vm2318_vm15 = vweird.f32 %v13077_v56  ;;  %vm2308_vm3 = vcmp.eq.f32.partialorder %v2307_v37, 8.507059e+37 }
 0x9d3   :  { %v2418_v63 = vmul.f32 %v2341_v46, %v12963_v53  ;;  %v11378_v9 = vpop.eup %11377  ;;  %v2299_v32 = vmul.f32 %v11376_v60, %v13072_v28  ;;  %v2257_v53 = vadd.f32 %v13031_v39, %v2256_v42  ;;  %v2250_v2 = vor.u32 1.1754944e-38, %v2249_v13 }
 0x9d4   :  { %2704 = vmatmul.bf16.gmra.mxu1 %v2491_v33  ;;  %v2314_v40 = vmul.f32 %v11378_v9, %v13077_v56  ;;  %vm2304_vm11 = vweird.f32 %v11376_v60  ;;  %vm2319_vm4 = vweird.f32 %v11378_v9  ;;  %vm2263_vm14 = vcmp.eq.f32.partialorder %v2262_v38, 8.507059e+37 }
 0x9d5   :  { %v2494_v14 = vpack.c.bf16 %v2418_v63, %v2414_v59  ;;  %v2300_v11 = vsub.f32 1.0, %v2299_v32  ;;  %v2261_v30 = vsel %vm13113_vm12, %v13031_v39, %v2257_v53  ;;  %v2251_v36 = vsel %vm13103_vm5, %v2250_v2, %v2246_v10  ;;  %vm2305_vm10 = vmor %vm2303_vm1, %vm2304_vm11 }
 0x9d6   :  { %v2315_v44 = vsub.f32 1.0, %v2314_v40  ;;  %v2266_v17 = vsel %vm2263_vm14, %v2265_v3, %v2261_v30  ;;  %vm2320_vm13 = vmor %vm2318_vm15, %vm2319_vm4  ;;  %v2325_v39 = vor.u32 1.1754944e-38, %v2324_v19  ;;  %vm2323_vm12 = vcmp.eq.f32.partialorder %v2322_v31, 8.507059e+37 }
 0x9d7   :  { %2773 = vmatmul.bf16.gmra.mxu0 %v2494_v14  ;;  %v2301_v16 = vmul.f32 %v11376_v60, %v2300_v11  ;;  %v2412_v18 = vmul.f32 %v2251_v36, %v12945_v35  ;;  %v2413_v6 = vmul.f32 %v2266_v17, %v12950_v0 }
 0x9d8   :  { %v2316_v51 = vmul.f32 %v11378_v9, %v2315_v44 }
 0x9d9   :  { %v2302_v8 = vadd.f32 %v11376_v60, %v2301_v16 }
 0x9da   :  { %v2317_v1 = vadd.f32 %v11378_v9, %v2316_v51 }
 0x9db   :  { %v2306_v7 = vsel %vm2305_vm10, %v11376_v60, %v2302_v8 }
 0x9dc   :  { %v2311_v49 = vsel %vm2308_vm3, %v2310_v41, %v2306_v7  ;;  %v2321_v5 = vsel %vm2320_vm13, %v11378_v9, %v2317_v1 }
 0x9dd   :  { %v2416_v28 = vmul.f32 %v2311_v49, %v13001_v24  ;;  %v2326_v57 = vsel %vm2323_vm12, %v2325_v39, %v2321_v5 }
 0x9de   :  { %v2417_v47 = vmul.f32 %v2326_v57, %v13004_v25 }
 0x9df   :  { %v2492_v34 = vpack.c.bf16 %v2416_v28, %v2412_v18 }
 0x9e0   :  { %v2493_v4 = vpack.c.bf16 %v2417_v47, %v2413_v6 }
 0x9e1   :  { %2727 = vmatmul.bf16.gmra.mxu2 %v2492_v34 }
 0x9e2   :  { %2750 = vmatmul.bf16.gmra.mxu3 %v2493_v4 }
 0x9f2   :  { %v1930_v56 = vpop.f32.mrf.mxu1 }
 0x9f3   :  { %v13132_v20 = vadd.f32 %v1930_v56, %v12741_v48  ;;  %v1999_v61 = vpop.f32.mrf.mxu0 }
 0x9f4   :  { %v13135_v46 = vadd.f32 %v1999_v61, %v12743_v23 }
 0x9f5   :  { %v8906_v35 = vmul.f32 -1.702, %v13132_v20 }
 0x9f6   :  { %v8909_v24 = vmul.f32 -1.702, %v13135_v46 }
 0x9f7   :  { %v2075_v59 = vmul.f32 1.442695, %v8906_v35 }
 0x9f8   :  { %v2081_v0 = vmul.f32 1.442695, %v8909_v24  ;;  %v1953_v63 = vpop.f32.mrf.mxu2 }
 0x9f9   :  { %11379 = vpow2.f32 %v2075_v59  ;;  %v13140_v25 = vadd.f32 %v1953_v63, %v12754_v29  ;;  %v1976_v33 = vpop.f32.mrf.mxu3 }
 0x9fa   :  { %11381 = vpow2.f32 %v2081_v0  ;;  %v13143_v48 = vadd.f32 %v1976_v33, %v12759_v12  ;;  %v1932_v42 = vpop.f32.mrf.mxu1 }
 0x9fb   :  { %v8907_v23 = vmul.f32 -1.702, %v13140_v25  ;;  %v2001_v50 = vpop.f32.mrf.mxu0 }
 0x9fc   :  { %v8908_v14 = vmul.f32 -1.702, %v13143_v48 }
 0x9fd   :  { %v2077_v60 = vmul.f32 1.442695, %v8907_v23 }
 0x9fe   :  { %v2079_v43 = vmul.f32 1.442695, %v8908_v14 }
 0x9ff   :  { %v11380_v13 = vpop.eup %11379  ;;  %11383 = vpow2.f32 %v2077_v60 }
 0xa00   :  { %v11382_v9 = vpop.eup %11381  ;;  %v2099_v32 = vadd.f32 1.0, %v11380_v13  ;;  %11385 = vpow2.f32 %v2079_v43  ;;  %v1955_v29 = vpop.f32.mrf.mxu2 }
 0xa01   :  { %v2102_v53 = vadd.f32 1.0, %v11382_v9  ;;  %v1978_v40 = vpop.f32.mrf.mxu3 }
 0xa02   :  { %11387 = vrcp.f32 %v2099_v32  ;;  %v2352_v44 = vand.u32 2147483647, %v2099_v32  ;;  %v2354_v27 = vand.u32 2147483648, %v2099_v32  ;;  %vm2348_vm11 = vweird.f32 %v2099_v32 }
 0xa03   :  { %11389 = vrcp.f32 %v2102_v53  ;;  %v2397_v37 = vand.u32 2147483647, %v2102_v53  ;;  %v2399_v19 = vand.u32 2147483648, %v2102_v53  ;;  %vm2393_vm4 = vweird.f32 %v2102_v53 }
 0xa04   :  { %vm2353_vm1 = vcmp.eq.f32.partialorder %v2352_v44, 8.507059e+37  ;;  %v2355_v36 = vor.u32 1.1754944e-38, %v2354_v27 }
 0xa05   :  { %v11384_v12 = vpop.eup %11383  ;;  %vm2398_vm15 = vcmp.eq.f32.partialorder %v2397_v37, 8.507059e+37  ;;  %v2400_v17 = vor.u32 1.1754944e-38, %v2399_v19 }
 0xa06   :  { %v11386_v15 = vpop.eup %11385  ;;  %v2100_v54 = vadd.f32 1.0, %v11384_v12 }
 0xa07   :  { %v13147_v38 = vadd.f32 1.0, %v11386_v15 }
 0xa08   :  { %v11388_v58 = vpop.eup %11387  ;;  %11391 = vrcp.f32 %v2100_v54  ;;  %v2367_v5 = vand.u32 2147483647, %v2100_v54  ;;  %v2369_v18 = vand.u32 2147483648, %v2100_v54 }
 0xa09   :  { %v11390_v11 = vpop.eup %11389  ;;  %v2344_v10 = vmul.f32 %v11388_v58, %v2099_v32  ;;  %11393 = vrcp.f32 %v13147_v38  ;;  %vm2349_vm5 = vweird.f32 %v11388_v58  ;;  %v2384_v47 = vand.u32 2147483648, %v13147_v38 }
 0xa0a   :  { %v2389_v2 = vmul.f32 %v11390_v11, %v2102_v53  ;;  %vm2394_vm14 = vweird.f32 %v11390_v11  ;;  %vm2350_vm10 = vmor %vm2348_vm11, %vm2349_vm5  ;;  %v2382_v24 = vand.u32 2147483647, %v13147_v38  ;;  %vm2363_vm5 = vweird.f32 %v2100_v54 }
 0xa0b   :  { %v2345_v22 = vsub.f32 1.0, %v2344_v10  ;;  %vm2395_vm3 = vmor %vm2393_vm4, %vm2394_vm14  ;;  %v2370_v33 = vor.u32 1.1754944e-38, %v2369_v18  ;;  %vm2378_vm4 = vweird.f32 %v13147_v38  ;;  %vm2368_vm14 = vcmp.eq.f32.partialorder %v2367_v5, 8.507059e+37 }
 0xa0c   :  { %v2390_v16 = vsub.f32 1.0, %v2389_v2 }
 0xa0d   :  { %v2346_v30 = vmul.f32 %v11388_v58, %v2345_v22 }
 0xa0e   :  { %v11392_v51 = vpop.eup %11391  ;;  %v2391_v31 = vmul.f32 %v11390_v11, %v2390_v16 }
 0xa0f   :  { %v11394_v3 = vpop.eup %11393  ;;  %v2347_v8 = vadd.f32 %v11388_v58, %v2346_v30  ;;  %v2359_v41 = vmul.f32 %v11392_v51, %v2100_v54  ;;  %vm2364_vm13 = vweird.f32 %v11392_v51 }
 0xa10   :  { %v2392_v1 = vadd.f32 %v11390_v11, %v2391_v31  ;;  %v2374_v7 = vmul.f32 %v11394_v3, %v13147_v38  ;;  %vm2379_vm12 = vweird.f32 %v11394_v3  ;;  %vm2365_vm11 = vmor %vm2363_vm5, %vm2364_vm13 }
 0xa11   :  { %v2351_v39 = vsel %vm2350_vm10, %v11388_v58, %v2347_v8  ;;  %v2360_v49 = vsub.f32 1.0, %v2359_v41  ;;  %vm2383_vm10 = vcmp.eq.f32.partialorder %v2382_v24, 8.507059e+37  ;;  %v11180_v58 = vld [vmem:[%s15156_s2] ss:$0 sm:$0xff] }
 0xa12   :  { %v2356_v28 = vsel %vm2353_vm1, %v2355_v36, %v2351_v39  ;;  %v2396_v57 = vsel %vm2395_vm3, %v11390_v11, %v2392_v1  ;;  %v2375_v6 = vsub.f32 1.0, %v2374_v7  ;;  %vm2380_vm1 = vmor %vm2378_vm4, %vm2379_vm12 }
 0xa13   :  { %v2419_v34 = vmul.f32 %v2356_v28, %v13132_v20  ;;  %v2401_v4 = vsel %vm2398_vm15, %v2400_v17, %v2396_v57  ;;  %v2361_v56 = vmul.f32 %v11392_v51, %v2360_v49  ;;  %v2385_v20 = vor.u32 1.1754944e-38, %v2384_v47 }
 0xa14   :  { %v2422_v61 = vmul.f32 %v2401_v4, %v13135_v46  ;;  %v2376_v35 = vmul.f32 %v11394_v3, %v2375_v6 }
 0xa15   :  { %v2495_v59 = vpack.c.bf16 %v2419_v34, %v2419_v34  ;;  %v2362_v0 = vadd.f32 %v11392_v51, %v2361_v56 }
 0xa16   :  { %v2498_v63 = vpack.c.bf16 %v2422_v61, %v2422_v61  ;;  %v2377_v42 = vadd.f32 %v11394_v3, %v2376_v35 }
 0xa17   :  { %v2366_v23 = vsel %vm2365_vm11, %v11392_v51, %v2362_v0  ;;  %2709 = vmatmul.bf16.gmra.mxu1 %v2495_v59 }
 0xa18   :  { %v2371_v50 = vsel %vm2368_vm14, %v2370_v33, %v2366_v23  ;;  %v2381_v46 = vsel %vm2380_vm1, %v11394_v3, %v2377_v42  ;;  %2778 = vmatmul.bf16.gmra.mxu0 %v2498_v63 }
 0xa19   :  { %v2420_v14 = vmul.f32 %v2371_v50, %v13140_v25  ;;  %v2386_v60 = vsel %vm2383_vm10, %v2385_v20, %v2381_v46 }
 0xa1a   :  { %v2421_v43 = vmul.f32 %v2386_v60, %v13143_v48 }
 0xa1b   :  { %v2496_v13 = vpack.c.bf16 %v2420_v14, %v2420_v14 }
 0xa1c   :  { %v2497_v9 = vpack.c.bf16 %v2421_v43, %v2421_v43 }
 0xa1d   :  { %2732 = vmatmul.bf16.gmra.mxu2 %v2496_v13 }
 0xa1e   :  { %2755 = vmatmul.bf16.gmra.mxu3 %v2497_v9 }
 0xa23   :  { %v2700_v29 = vpop.f32.mrf.mxu1 }
 0xa26   :  { %v2769_v40 = vpop.f32.mrf.mxu0 }
 0xa2b   :  { %v2702_v11 = vpop.f32.mrf.mxu1 }
 0xa2e   :  { %v2771_v44 = vpop.f32.mrf.mxu0 }
 0xa31   :  { %v2723_v32 = vpop.f32.mrf.mxu2 }
 0xa32   :  { %v2724_v53 = vadd.f32 %v2723_v32, %v2700_v29 }
 0xa39   :  { %v2725_v54 = vpop.f32.mrf.mxu2 }
 0xa3a   :  { %v2726_v25 = vadd.f32 %v2725_v54, %v2702_v11  ;;  %v10739_v54 = vld [vmem:[%s11908_s30 + $0x170] sm:$0xf0] }
 0xa3b   :  { %v2746_v12 = vpop.f32.mrf.mxu3 }
 0xa3c   :  { %v2747_v15 = vadd.f32 %v2746_v12, %v2724_v53 }
 0xa3e   :  { %v2770_v38 = vadd.f32 %v2769_v40, %v2747_v15  ;;  %v9159_v15 = vld [vmem:[%s11908_s30 + $0x168] sm:$0xf] }
 0xa3f   :  { %v9160_v11 = vor.u32 %v10739_v54, %v9159_v15  ;;  %v9107_v15 = vld [vmem:[%s11908_s30 + $0xf8] sm:$0xf]  ;;  %v10725_v54 = vld [vmem:[%s11908_s30 + $0x100] sm:$0xf0] }
 0xa40   :  { %v2783_v10 = vadd.f32 %v2770_v38, %v12599_v26  ;;  %v10738_v38 = vld [vmem:[%s11908_s30 + $0x16c] sm:$0xf] }
 0xa41   :  { %3092 = vmatpush.bf16.msra.mxu1 %v9160_v11  ;;  %v9087_v11 = vld [vmem:[%s11908_s30 + $0xd8] sm:$0xf] }
 0xa42   :  { %v13160_v2 = vadd.f32 %v11180_v58, %v2783_v10  ;;  %v9161_v10 = vld [vmem:[%s11908_s30 + $0x174] sm:$0xf0] }
 0xa43   :  { %v2748_v48 = vpop.f32.mrf.mxu3 }
 0xa44   :  { %v2749_v22 = vadd.f32 %v2748_v48, %v2726_v25  ;;  %2801 = vadd.xlane.f32.xlu1 %v13160_v2  ;;  %v9167_v25 = vld [vmem:[%s11908_s30 + $0x170] sm:$0xf]  ;;  %v10740_v48 = vld [vmem:[%s11908_s30 + $0x178] sm:$0xf0] }
 0xa46   :  { %v2772_v27 = vadd.f32 %v2771_v44, %v2749_v22  ;;  %v9164_v22 = vor.u32 %v10738_v38, %v9161_v10  ;;  %v9168_v44 = vor.u32 %v10740_v48, %v9167_v25  ;;  %v10721_v10 = vld [vmem:[%s11908_s30 + $0xe0] sm:$0xf0]  ;;  %v10720_v25 = vld [vmem:[%s11908_s30 + $0xdc] sm:$0xf] }
 0xa48   :  { %v2784_v16 = vadd.f32 %v2772_v27, %v12603_v55  ;;  %3115 = vmatpush.bf16.msrb.mxu2 %v9164_v22  ;;  %3138 = vmatpush.bf16.msrb.mxu3 %v9168_v44  ;;  %v9088_v22 = vor.u32 %v10721_v10, %v9087_v11  ;;  %v9089_v44 = vld [vmem:[%s11908_s30 + $0xe4] sm:$0xf0] }
 0xa4a   :  { %v13164_v37 = vadd.f32 %v11180_v58, %v2784_v16  ;;  %v9147_v16 = vld [vmem:[%s11908_s30 + $0x150] sm:$0xf] }
 0xa4c   :  { %2803 = vadd.xlane.f32.xlu2 %v13164_v37 }
 0xa51   :  { %v2705_v19 = vpop.f32.mrf.mxu1 }
 0xa54   :  { %v2774_v26 = vpop.f32.mrf.mxu0 }
 0xa59   :  { %v2707_v41 = vpop.f32.mrf.mxu1 }
 0xa5c   :  { %v2776_v49 = vpop.f32.mrf.mxu0 }
 0xa64   :  { %v2728_v30 = vpop.f32.mrf.mxu2 }
 0xa65   :  { %v2729_v51 = vadd.f32 %v2728_v30, %v2705_v19  ;;  %v2751_v31 = vpop.f32.mrf.mxu3  ;;  %v10736_v19 = vld [vmem:[%s11908_s30 + $0x158] sm:$0xf0]  ;;  %v10735_v30 = vld [vmem:[%s11908_s30 + $0x154] sm:$0xf] }
 0xa67   :  { %v2752_v3 = vadd.f32 %v2751_v31, %v2729_v51  ;;  %v9148_v31 = vor.u32 %v10736_v19, %v9147_v16  ;;  %v9095_v16 = vld [vmem:[%s11908_s30 + $0xe0] sm:$0xf]  ;;  %v10722_v19 = vld [vmem:[%s11908_s30 + $0xe8] sm:$0xf0] }
 0xa69   :  { %v2775_v8 = vadd.f32 %v2774_v26, %v2752_v3  ;;  %v9149_v26 = vld [vmem:[%s11908_s30 + $0x15c] sm:$0xf0]  ;;  %v9155_v3 = vld [vmem:[%s11908_s30 + $0x158] sm:$0xf]  ;;  %3093 = vmatpush.bf16.msra.mxu1 %v9148_v31  ;;  %v9096_v31 = vor.u32 %v10722_v19, %v9095_v16 }
 0xa6b   :  { %v2785_v36 = vadd.f32 %v2775_v8, %v12607_v21  ;;  %v10737_v8 = vld [vmem:[%s11908_s30 + $0x160] sm:$0xf0] }
 0xa6c   :  { %v2730_v1 = vpop.f32.mrf.mxu2 }
 0xa6d   :  { %v2731_v17 = vadd.f32 %v2730_v1, %v2707_v41  ;;  %v13168_v7 = vadd.f32 %v11180_v58, %v2785_v36  ;;  %v2753_v39 = vpop.f32.mrf.mxu3  ;;  %v9152_v36 = vor.u32 %v10735_v30, %v9149_v26  ;;  %v9156_v41 = vor.u32 %v10737_v8, %v9155_v3  ;;  %v9075_v26 = vld [vmem:[%s11908_s30 + $0xc0] sm:$0xf]  ;;  %v10718_v3 = vld [vmem:[%s11908_s30 + $0xc8] sm:$0xf0]  ;;  %v10717_v8 = vld [vmem:[%s11908_s30 + $0xc4] sm:$0xf] }
 0xa6f   :  { %v2754_v55 = vadd.f32 %v2753_v39, %v2731_v17  ;;  %2805 = vadd.xlane.f32.xlu0 %v13168_v7  ;;  %3116 = vmatpush.bf16.msrb.mxu2 %v9152_v36  ;;  %v9135_v17 = vld [vmem:[%s11908_s30 + $0x138] sm:$0xf]  ;;  %v10733_v39 = vld [vmem:[%s11908_s30 + $0x140] sm:$0xf0]  ;;  %v9076_v36 = vor.u32 %v10718_v3, %v9075_v26 }
 0xa70   :  { %3139 = vmatpush.bf16.msrb.mxu3 %v9156_v41  ;;  %v9077_v41 = vld [vmem:[%s11908_s30 + $0xcc] sm:$0xf0] }
 0xa71   :  { %v2777_v5 = vadd.f32 %v2776_v49, %v2754_v55  ;;  %v10732_v55 = vld [vmem:[%s11908_s30 + $0x13c] sm:$0xf]  ;;  %v9136_v49 = vor.u32 %v10733_v39, %v9135_v17  ;;  %v10719_v17 = vld [vmem:[%s11908_s30 + $0xd0] sm:$0xf0] }
 0xa73   :  { %v2786_v18 = vadd.f32 %v2777_v5, %v12611_v52  ;;  %v9137_v5 = vld [vmem:[%s11908_s30 + $0x144] sm:$0xf0]  ;;  %3094 = vmatpush.bf16.msra.mxu1 %v9136_v49 }
 0xa75   :  { %v13172_v28 = vadd.f32 %v11180_v58, %v2786_v18  ;;  %v9143_v18 = vld [vmem:[%s11908_s30 + $0x140] sm:$0xf] }
 0xa77   :  { %2807 = vadd.xlane.f32.xlu1 %v13172_v28 }
 0xa94   :  { %v2710_v57 = vpop.f32.mrf.mxu1 }
 0xa95   :  { %v2779_v6 = vpop.f32.mrf.mxu0 }
 0xa9c   :  { %v2712_v21 = vpop.f32.mrf.mxu1 }
 0xa9d   :  { %v2781_v47 = vpop.f32.mrf.mxu0 }
 0xa9e   :  { %v9123_v47 = vld [vmem:[%s11908_s30 + $0x120] sm:$0xf] }
 0xaa0   :  { %v2733_v34 = vpop.f32.mrf.mxu2 }
 0xaa1   :  { %v2734_v4 = vadd.f32 %v2733_v34, %v2710_v57  ;;  %v2756_v56 = vpop.f32.mrf.mxu3  ;;  %v10734_v57 = vld [vmem:[%s11908_s30 + $0x148] sm:$0xf0] }
 0xaa2   :  { %v9144_v21 = vor.u32 %v10734_v57, %v9143_v18  ;;  %v10730_v34 = vld [vmem:[%s11908_s30 + $0x128] sm:$0xf0] }
 0xaa3   :  { %v2757_v61 = vadd.f32 %v2756_v56, %v2734_v4  ;;  %v10729_v4 = vld [vmem:[%s11908_s30 + $0x124] sm:$0xf]  ;;  %v9124_v56 = vor.u32 %v10730_v34, %v9123_v47 }
 0xaa4   :  { %3140 = vmatpush.bf16.msrb.mxu3 %v9144_v21 }
 0xaa5   :  { %v2780_v35 = vadd.f32 %v2779_v6, %v2757_v61  ;;  %v9140_v6 = vor.u32 %v10732_v55, %v9137_v5  ;;  %v9125_v61 = vld [vmem:[%s11908_s30 + $0x12c] sm:$0xf0]  ;;  %3095 = vmatpush.bf16.msra.mxu1 %v9124_v56  ;;  %v9080_v55 = vor.u32 %v10717_v8, %v9077_v41 }
 0xaa7   :  { %v2787_v24 = vadd.f32 %v2780_v35, %v12622_v62  ;;  %3117 = vmatpush.bf16.msrb.mxu2 %v9140_v6  ;;  %v9131_v35 = vld [vmem:[%s11908_s30 + $0x128] sm:$0xf] }
 0xaa8   :  { %v2735_v59 = vpop.f32.mrf.mxu2 }
 0xaa9   :  { %v2758_v0 = vpop.f32.mrf.mxu3  ;;  %v13176_v63 = vadd.f32 %v11180_v58, %v2787_v24  ;;  %v10731_v24 = vld [vmem:[%s11908_s30 + $0x130] sm:$0xf0]  ;;  %v9128_v59 = vor.u32 %v10729_v4, %v9125_v61 }
 0xaaa   :  { %v9132_v0 = vor.u32 %v10731_v24, %v9131_v35 }
 0xaab   :  { %v2809_v52 = vsel %vm265_vm2, %v13176_v63, 0.0  ;;  %3118 = vmatpush.bf16.msrb.mxu2 %v9128_v59 }
 0xaac   :  { %2810 = vadd.xlane.f32.xlu2 %v2809_v52  ;;  %v9111_v52 = vld [vmem:[%s11908_s30 + $0x108] sm:$0xf]  ;;  %3141 = vmatpush.bf16.msrb.mxu3 %v9132_v0 }
 0xab7   :  { %v2802_v33 = vpop.xlane.xlu1 %2801 }
 0xab8   :  { %v2812_v42 = vmul.f32 %v2802_v33, %v12082_v45  ;;  %v10727_v33 = vld [vmem:[%s11908_s30 + $0x110] sm:$0xf0] }
 0xaba   :  { %v13182_v23 = vsub.f32 %v13160_v2, %v2812_v42  ;;  %v10726_v42 = vld [vmem:[%s11908_s30 + $0x10c] sm:$0xf] }
 0xabc   :  { %v2822_v20 = vmul.f32 %v13182_v23, %v13182_v23 }
 0xabe   :  { %2827 = vadd.xlane.f32.xlu0 %v2822_v20  ;;  %v9112_v20 = vor.u32 %v10727_v33, %v9111_v52  ;;  %v13262_v33 = vld [vmem:[%s11898_s19 + $0x1] ss:$0 sm:$0xff]  ;;  %s15196_s19 = sld [smem:[#allocation19_spill]] }
 0xabf   :  { %v2804_v50 = vpop.xlane.xlu2 %2803 }
 0xac0   :  { %v2813_v62 = vmul.f32 %v2804_v50, %v12082_v45  ;;  %v9113_v50 = vld [vmem:[%s11908_s30 + $0x114] sm:$0xf0]  ;;  %3096 = vmatpush.bf16.msra.mxu1 %v9112_v20 }
 0xac2   :  { %v13188_v46 = vsub.f32 %v13164_v37, %v2813_v62  ;;  %v9119_v62 = vld [vmem:[%s11908_s30 + $0x110] sm:$0xf] }
 0xac4   :  { %v2823_v14 = vmul.f32 %v13188_v46, %v13188_v46 }
 0xac6   :  { %2829 = vadd.xlane.f32.xlu1 %v2823_v14  ;;  %v10728_v14 = vld [vmem:[%s11908_s30 + $0x118] sm:$0xf0] }
 0xae2   :  { %v2806_v60 = vpop.xlane.xlu0 %2805 }
 0xae3   :  { %v2814_v43 = vmul.f32 %v2806_v60, %v12082_v45  ;;  %v9116_v60 = vor.u32 %v10726_v42, %v9113_v50 }
 0xae5   :  { %v13194_v13 = vsub.f32 %v13168_v7, %v2814_v43  ;;  %v9120_v43 = vor.u32 %v10728_v14, %v9119_v62  ;;  %3119 = vmatpush.bf16.msrb.mxu2 %v9116_v60  ;;  %v11182_v60 = vld [vmem:[%s11903_s24 + $0x1] ss:$0 sm:$0xff]  ;;  %s15197_s24 = sld [smem:[#allocation8_spill]] }
 0xae7   :  { %v2824_v9 = vmul.f32 %v13194_v13, %v13194_v13  ;;  %3142 = vmatpush.bf16.msrb.mxu3 %v9120_v43 }
 0xae9   :  { %2831 = vadd.xlane.f32.xlu2 %v2824_v9  ;;  %v9099_v9 = vld [vmem:[%s11908_s30 + $0xf0] sm:$0xf] }
 0xaea   :  { %v2808_v32 = vpop.xlane.xlu1 %2807 }
 0xaeb   :  { %v2815_v29 = vmul.f32 %v2808_v32, %v12082_v45  ;;  %v10724_v32 = vld [vmem:[%s11908_s30 + $0xf8] sm:$0xf0] }
 0xaed   :  { %v13200_v53 = vsub.f32 %v13172_v28, %v2815_v29  ;;  %v10723_v29 = vld [vmem:[%s11908_s30 + $0xf4] sm:$0xf] }
 0xaef   :  { %v2825_v40 = vmul.f32 %v13200_v53, %v13200_v53 }
 0xaf1   :  { %2833 = vadd.xlane.f32.xlu0 %v2825_v40  ;;  %v9100_v40 = vor.u32 %v10724_v32, %v9099_v9 }
 0xaf3   :  { %3097 = vmatpush.bf16.msra.mxu1 %v9100_v40 }
 0xaf7   :  { %3098 = vmatpush.bf16.msra.mxu1 %v9088_v22 }
 0xafb   :  { %3099 = vmatpush.bf16.msra.mxu1 %v9076_v36 }
 0xb1f   :  { %v2811_v12 = vpop.xlane.xlu2 %2810 }
 0xb20   :  { %v2816_v58 = vmul.f32 %v2811_v12, %v12082_v45  ;;  %v9101_v12 = vld [vmem:[%s11908_s30 + $0xfc] sm:$0xf0] }
 0xb21   :  { %v9104_v38 = vor.u32 %v10723_v29, %v9101_v12 }
 0xb22   :  { %v13212_v27 = vsub.f32 %v13176_v63, %v2816_v58  ;;  %v9108_v58 = vor.u32 %v10725_v54, %v9107_v15 }
 0xb23   :  { %3120 = vmatpush.bf16.msrb.mxu2 %v9104_v38 }
 0xb24   :  { %v2826_v51 = vmul.f32 %v13212_v27, %v13212_v27  ;;  %3143 = vmatpush.bf16.msrb.mxu3 %v9108_v58 }
 0xb26   :  { %v2835_v1 = vsel %vm265_vm2, %v2826_v51, 0.0  ;;  %v9092_v51 = vor.u32 %v10720_v25, %v9089_v44 }
 0xb27   :  { %2836 = vadd.xlane.f32.xlu1 %v2835_v1  ;;  %v9083_v1 = vld [vmem:[%s11908_s30 + $0xc8] sm:$0xf]  ;;  %s15198_s30 = sld [smem:[#allocation11_spill]] }
 0xb28   :  { %3121 = vmatpush.bf16.msrb.mxu2 %v9092_v51  ;;  %3144 = vmatpush.bf16.msrb.mxu3 %v9096_v31  ;;  %v9084_v49 = vor.u32 %v10719_v17, %v9083_v1 }
 0xb2c   :  { %3122 = vmatpush.bf16.msrb.mxu2 %v9080_v55  ;;  %3145 = vmatpush.bf16.msrb.mxu3 %v9084_v49 }
 0xb31   :  { %v2828_v48 = vpop.xlane.xlu0 %2827 }
 0xb32   :  { %v2838_v30 = vmul.f32 %v2828_v48, %v12082_v45 }
 0xb34   :  { %v2843_v39 = vadd.f32 1e-05, %v2838_v30 }
 0xb36   :  { %11395 = vrsqrt.f32 %v2843_v39  ;;  %vm2854_vm3 = vweird.f32 %v2843_v39 }
 0xb39   :  { %v2830_v5 = vpop.xlane.xlu1 %2829 }
 0xb3a   :  { %v2839_v18 = vmul.f32 %v2830_v5, %v12082_v45 }
 0xb3c   :  { %v11396_v57 = vpop.eup %11395  ;;  %v2844_v6 = vadd.f32 1e-05, %v2839_v18 }
 0xb3d   :  { %v2849_v21 = vmul.f32 %v11396_v57, %v2843_v39  ;;  %vm2855_vm15 = vweird.f32 %v11396_v57 }
 0xb3e   :  { %11397 = vrsqrt.f32 %v2844_v6  ;;  %vm2856_vm13 = vmor %vm2854_vm3, %vm2855_vm15  ;;  %vm2864_vm5 = vweird.f32 %v2844_v6 }
 0xb3f   :  { %v2850_v47 = vmul.f32 %v11396_v57, %v2849_v21 }
 0xb41   :  { %v2851_v34 = vmul.f32 0.5, %v2850_v47 }
 0xb43   :  { %v2852_v4 = vsub.f32 1.5, %v2851_v34 }
 0xb44   :  { %v11398_v56 = vpop.eup %11397 }
 0xb45   :  { %v2853_v61 = vmul.f32 %v11396_v57, %v2852_v4  ;;  %v2859_v35 = vmul.f32 %v11398_v56, %v2844_v6  ;;  %vm2865_vm12 = vweird.f32 %v11398_v56 }
 0xb46   :  { %vm2866_vm11 = vmor %vm2864_vm5, %vm2865_vm12 }
 0xb47   :  { %v2860_v24 = vmul.f32 %v11398_v56, %v2859_v35  ;;  %v2857_v59 = vsel %vm2856_vm13, %v11396_v57, %v2853_v61 }
 0xb48   :  { %v2898_v42 = vmul.f32 %v2857_v59, %v13182_v23 }
 0xb49   :  { %v2861_v0 = vmul.f32 0.5, %v2860_v24  ;;  %v9072_v24 = vld [vmem:[%s11913_s6 + $0x3] sm:$0x7]  ;;  %s15199_s6 = sld [smem:[#allocation25_spill]] }
 0xb4a   :  { %v2906_v62 = vmul.f32 %v13262_v33, %v2898_v42  ;;  %v2959_v59 = vperm.slane %v9072_v24, 1 }
 0xb4b   :  { %v2862_v52 = vsub.f32 1.5, %v2861_v0 }
 0xb4c   :  { %v2914_v9 = vadd.f32 %v11182_v60, %v2906_v62 }
 0xb4d   :  { %v2863_v20 = vmul.f32 %v11398_v56, %v2862_v52 }
 0xb4f   :  { %v2867_v50 = vsel %vm2866_vm11, %v11398_v56, %v2863_v20 }
 0xb50   :  { %v2899_v14 = vmul.f32 %v2867_v50, %v13188_v46 }
 0xb52   :  { %v2907_v43 = vmul.f32 %v13262_v33, %v2899_v14 }
 0xb54   :  { %v2915_v32 = vadd.f32 %v11182_v60, %v2907_v43 }
 0xb56   :  { %v2952_v29 = vpack.c.bf16 %v2915_v32, %v2914_v9  ;;  %v2958_v32 = vperm.slane %v9072_v24, 0 }
 0xb58   :  { %3100 = vmatmul.bf16.vlgmr.msra.gmra.mxu1 %v2952_v29  ;;  %3123 = vmatmul.bf16.vlgmr.msrb.gmra.mxu2 %v2952_v29 }
 0xb59   :  { %3146 = vmatmul.bf16.vlgmr.msrb.gmra.mxu3 %v2952_v29 }
 0xb5c   :  { %v2832_v40 = vpop.xlane.xlu2 %2831 }
 0xb5d   :  { %v2840_v23 = vmul.f32 %v2832_v40, %v12082_v45 }
 0xb5f   :  { %v2845_v12 = vadd.f32 1e-05, %v2840_v23 }
 0xb61   :  { %11399 = vrsqrt.f32 %v2845_v12  ;;  %vm2874_vm14 = vweird.f32 %v2845_v12 }
 0xb64   :  { %v2834_v15 = vpop.xlane.xlu0 %2833 }
 0xb65   :  { %v2841_v54 = vmul.f32 %v2834_v15, %v12082_v45 }
 0xb67   :  { %v11400_v38 = vpop.eup %11399  ;;  %v2846_v58 = vadd.f32 1e-05, %v2841_v54 }
 0xb68   :  { %v2869_v46 = vmul.f32 %v11400_v38, %v2845_v12  ;;  %vm2875_vm4 = vweird.f32 %v11400_v38 }
 0xb69   :  { %11401 = vrsqrt.f32 %v2846_v58  ;;  %vm2876_vm1 = vmor %vm2874_vm14, %vm2875_vm4  ;;  %vm2884_vm15 = vweird.f32 %v2846_v58 }
 0xb6a   :  { %v2870_v11 = vmul.f32 %v11400_v38, %v2869_v46 }
 0xb6c   :  { %v2871_v10 = vmul.f32 0.5, %v2870_v11 }
 0xb6e   :  { %v2872_v25 = vsub.f32 1.5, %v2871_v10 }
 0xb6f   :  { %v11402_v48 = vpop.eup %11401 }
 0xb70   :  { %v2873_v22 = vmul.f32 %v11400_v38, %v2872_v25  ;;  %v2879_v44 = vmul.f32 %v11402_v48, %v2846_v58  ;;  %vm2885_vm10 = vweird.f32 %v11402_v48  ;;  %v2960_v25 = vperm.slane %v9072_v24, 2 }
 0xb71   :  { %vm2886_vm3 = vmor %vm2884_vm15, %vm2885_vm10 }
 0xb72   :  { %v2880_v16 = vmul.f32 %v11402_v48, %v2879_v44  ;;  %v2877_v19 = vsel %vm2876_vm1, %v11400_v38, %v2873_v22 }
 0xb73   :  { %v2900_v31 = vmul.f32 %v2877_v19, %v13194_v13 }
 0xb74   :  { %v2881_v30 = vmul.f32 0.5, %v2880_v16 }
 0xb75   :  { %v2908_v36 = vmul.f32 %v13262_v33, %v2900_v31 }
 0xb76   :  { %v2882_v51 = vsub.f32 1.5, %v2881_v30 }
 0xb77   :  { %v2916_v1 = vadd.f32 %v11182_v60, %v2908_v36 }
 0xb78   :  { %v2883_v26 = vmul.f32 %v11402_v48, %v2882_v51 }
 0xb7a   :  { %v2887_v3 = vsel %vm2886_vm3, %v11402_v48, %v2883_v26 }
 0xb7b   :  { %v2901_v8 = vmul.f32 %v2887_v3, %v13200_v53 }
 0xb7d   :  { %v2909_v41 = vmul.f32 %v13262_v33, %v2901_v8 }
 0xb7f   :  { %v2917_v17 = vadd.f32 %v11182_v60, %v2909_v41 }
 0xb81   :  { %v2953_v39 = vpack.c.bf16 %v2917_v17, %v2916_v1 }
 0xb83   :  { %3105 = vmatmul.bf16.gmra.mxu1 %v2953_v39  ;;  %3128 = vmatmul.bf16.gmra.mxu2 %v2953_v39 }
 0xb84   :  { %3151 = vmatmul.bf16.gmra.mxu3 %v2953_v39 }
 0xb9a   :  { %v2837_v55 = vpop.xlane.xlu1 %2836 }
 0xb9b   :  { %v2842_v49 = vmul.f32 %v2837_v55, %v12082_v45 }
 0xb9d   :  { %v2847_v13 = vadd.f32 1e-05, %v2842_v49 }
 0xb9f   :  { %11403 = vrsqrt.f32 %v2847_v13  ;;  %vm2894_vm12 = vweird.f32 %v2847_v13 }
 0xba5   :  { %v11404_v5 = vpop.eup %11403 }
 0xba6   :  { %v2889_v18 = vmul.f32 %v11404_v5, %v2847_v13  ;;  %vm2895_vm13 = vweird.f32 %v11404_v5 }
 0xba7   :  { %vm2896_vm5 = vmor %vm2894_vm12, %vm2895_vm13 }
 0xba8   :  { %v2890_v57 = vmul.f32 %v11404_v5, %v2889_v18 }
 0xbaa   :  { %v2891_v53 = vmul.f32 0.5, %v2890_v57 }
 0xbac   :  { %v2892_v6 = vsub.f32 1.5, %v2891_v53 }
 0xbae   :  { %v2893_v21 = vmul.f32 %v11404_v5, %v2892_v6 }
 0xbb0   :  { %v2897_v47 = vsel %vm2896_vm5, %v11404_v5, %v2893_v21 }
 0xbb1   :  { %v2902_v34 = vmul.f32 %v2897_v47, %v13212_v27 }
 0xbb3   :  { %v2910_v4 = vmul.f32 %v13262_v33, %v2902_v34 }
 0xbb5   :  { %v2918_v56 = vadd.f32 %v11182_v60, %v2910_v4 }
 0xbb7   :  { %v2954_v61 = vpack.c.bf16 %v2918_v56, %v2918_v56 }
 0xbb9   :  { %3110 = vmatmul.bf16.gmra.mxu1 %v2954_v61  ;;  %3133 = vmatmul.bf16.gmra.mxu2 %v2954_v61 }
 0xbba   :  { %3156 = vmatmul.bf16.gmra.mxu3 %v2954_v61 }
 0xbd5   :  { %v3101_v27 = vpop.f32.mrf.mxu1 }
 0xbd6   :  { %v3102_v40 = vadd.f32 %v3101_v27, %v2958_v32 }
 0xbdb   :  { %v3124_v35 = vpop.f32.mrf.mxu2 }
 0xbdc   :  { %v3125_v52 = vadd.f32 %v3124_v35, %v2959_v59  ;;  %v3147_v60 = vpop.f32.mrf.mxu3 }
 0xbdd   :  { %v3103_v9 = vpop.f32.mrf.mxu1  ;;  %v3148_v51 = vadd.f32 %v3147_v60, %v2960_v25 }
 0xbde   :  { %v3104_v29 = vadd.f32 %v3103_v9, %v2958_v32 }
 0xbe0   :  { %v3161_v23 = vpack.c.bf16 %v3104_v29, %v3102_v40 }
 0xbe3   :  { %v3126_v0 = vpop.f32.mrf.mxu2 }
 0xbe4   :  { %v3127_v42 = vadd.f32 %v3126_v0, %v2959_v59  ;;  %v3149_v12 = vpop.f32.mrf.mxu3 }
 0xbe5   :  { %v3150_v22 = vadd.f32 %v3149_v12, %v2960_v25 }
 0xbe6   :  { %v13279_v20 = vpack.c.bf16 %v3127_v42, %v3125_v52 }
 0xbe7   :  { %v13291_v3 = vpack.c.bf16 %v3150_v22, %v3148_v51 }
 0xbe8   :  { %3326 = vrot.lane.b32.xlu1 %v13279_v20, %s11835_s5  ;;  %v3177_v57 = vsel %vm754_vm6, %v13279_v20, 0 }
 0xc00   :  { %v3106_v15 = vpop.f32.mrf.mxu1 }
 0xc01   :  { %v3107_v55 = vadd.f32 %v3106_v15, %v2958_v32 }
 0xc06   :  { %v3129_v50 = vpop.f32.mrf.mxu2 }
 0xc07   :  { %v3130_v33 = vadd.f32 %v3129_v50, %v2959_v59  ;;  %v3152_v54 = vpop.f32.mrf.mxu3 }
 0xc08   :  { %v3108_v38 = vpop.f32.mrf.mxu1  ;;  %v3153_v1 = vadd.f32 %v3152_v54, %v2960_v25 }
 0xc09   :  { %v3109_v17 = vadd.f32 %v3108_v38, %v2958_v32 }
 0xc0b   :  { %v3162_v5 = vpack.c.bf16 %v3109_v17, %v3107_v55  ;;  %v13357_v17 = vld [vmem:[%s11873_s25 + $0x18] sm:$0xff] }
 0xc0e   :  { %v3131_v62 = vpop.f32.mrf.mxu2 }
 0xc0f   :  { %v3132_v14 = vadd.f32 %v3131_v62, %v2959_v59  ;;  %v3154_v58 = vpop.f32.mrf.mxu3 }
 0xc10   :  { %v3155_v8 = vadd.f32 %v3154_v58, %v2960_v25  ;;  %v13340_v58 = vld [vmem:[%s11873_s25] sm:$0xff] }
 0xc11   :  { %v3165_v43 = vpack.c.bf16 %v3132_v14, %v3130_v33 }
 0xc12   :  { %v13300_v49 = vpack.c.bf16 %v3155_v8, %v3153_v1 }
 0xc13   :  { %3328 = vrot.lane.b32.xlu0 %v3165_v43, %s11835_s5  ;;  %3659 = vrot.lane.b32.xlu1 %v3165_v43, %s11836_s9  ;;  %v3180_v18 = vsel %vm754_vm6, %v3165_v43, 0 }
 0xc1b   :  { %3495 = vrot.lane.b32.xlu1 %v3165_v43, %s11837_s13  ;;  %3317 = vrot.lane.b32.xlu0 %v3161_v23, %s11835_s5 }
 0xc23   :  { %3487 = vrot.lane.b32.xlu1 %v3161_v23, %s11837_s13 }
 0xc36   :  { %v3111_v46 = vpop.f32.mrf.mxu1 }
 0xc37   :  { %v3112_v11 = vadd.f32 %v3111_v46, %v2958_v32 }
 0xc39   :  { %v3163_v10 = vpack.c.bf16 %v3112_v11, %v3112_v11 }
 0xc3b   :  { %3655 = vrot.lane.b32.xlu1 %v3163_v10, %s11836_s9 }
 0xc3c   :  { %v3134_v48 = vpop.f32.mrf.mxu2 }
 0xc3d   :  { %v3135_v44 = vadd.f32 %v3134_v48, %v2959_v59  ;;  %v3157_v16 = vpop.f32.mrf.mxu3 }
 0xc3e   :  { %v3158_v19 = vadd.f32 %v3157_v16, %v2960_v25  ;;  %v3113_v30 = vpop.f32.mrf.mxu1 }
 0xc3f   :  { %v3166_v31 = vpack.c.bf16 %v3135_v44, %v3135_v44  ;;  %v13345_v44 = vld [vmem:[%s11873_s25 + $0x8] sm:$0xff] }
 0xc40   :  { %v13289_v26 = vpack.c.bf16 %v3158_v19, %v3158_v19 }
 0xc41   :  { %3661 = vrot.lane.b32.xlu0 %v3166_v31, %s11836_s9  ;;  %3330 = vrot.lane.b32.xlu2 %v3166_v31, %s11835_s5  ;;  %v3183_v36 = vsel %vm754_vm6, %v3166_v31, 0 }
 0xc42   :  { %3190 = vmatpush.bf16.xpose.msra.mxu0 %v3183_v36  ;;  %v3289_v41 = vsel %vm226_vm0, %v13289_v26, 0 }
 0xc43   :  { %3296 = vmatpush.bf16.msrb.mxu1 %v3289_v41  ;;  %3444 = vrot.lane.b32.xlu1 %v13291_v3, %s11835_s5 }
 0xc44   :  { %v3136_v39 = vpop.f32.mrf.mxu2 }
 0xc45   :  { %v3159_v13 = vpop.f32.mrf.mxu3 }
 0xc47   :  { %3297 = vmatpush.bf16.msrb.mxu1 %v13300_v49 }
 0xc49   :  { %3497 = vrot.lane.b32.xlu0 %v3166_v31, %s11837_s13  ;;  %3319 = vrot.lane.b32.xlu2 %v3162_v5, %s11835_s5  ;;  %v13352_v31 = vld [vmem:[%s11873_s25 + $0x10] sm:$0xff] }
 0xc4a   :  { %3191 = vmatpush.bf16.xpose.msra.mxu0 %v3180_v18  ;;  %v13367_v18 = vld [vmem:[%s11873_s25 + $0x20] sm:$0x3]  ;;  %s15162_s25 = sld [smem:[#allocation17_spill]] }
 0xc4b   :  { %3298 = vmatpush.bf16.msrb.mxu1 %v13291_v3 }
 0xc51   :  { %3651 = vrot.lane.b32.xlu0 %v3161_v23, %s11836_s9  ;;  %3321 = vrot.lane.b32.xlu2 %v3163_v10, %s11835_s5 }
 0xc52   :  { %3192 = vmatpush.bf16.xpose.msra.mxu0 %v3177_v57 }
 0xc59   :  { %3653 = vrot.lane.b32.xlu0 %v3162_v5, %s11836_s9  ;;  %9169 = vmatmul.msk.bf16.vlgmr.msra.gmra.mxu0 %vm754_vm6, %v3161_v23 }
 0xc5a   :  { %3657 = vrot.lane.b32.xlu2 %v13279_v20, %s11836_s9  ;;  %v3327_v4 = vpop.permute.xlu1 %3326 }
 0xc5b   :  { %v3342_v35 = vsel %vm754_vm6, %v3327_v4, 0 }
 0xc61   :  { %3491 = vrot.lane.b32.xlu0 %v3163_v10, %s11837_s13 }
 0xc62   :  { %3493 = vrot.lane.b32.xlu2 %v13279_v20, %s11837_s13 }
 0xc69   :  { %9170 = vmatmul.msk.bf16.gmra.mxu0 %vm754_vm6, %v3162_v5  ;;  %3446 = vrot.lane.b32.xlu0 %v13300_v49, %s11835_s5 }
 0xc6a   :  { %3489 = vrot.lane.b32.xlu2 %v3162_v5, %s11837_s13 }
 0xc72   :  { %3448 = vrot.lane.b32.xlu2 %v13289_v26, %s11835_s5 }
 0xc79   :  { %9171 = vmatmul.msk.bf16.gmra.mxu0 %vm754_vm6, %v3163_v10 }
 0xc85   :  { %v3329_v21 = vpop.permute.xlu0 %3328  ;;  %v3660_v52 = vpop.permute.xlu1 %3659 }
 0xc86   :  { %v3345_v34 = vsel %vm754_vm6, %v3329_v21, 0  ;;  %v3676_v27 = vsel %vm754_vm6, %v3660_v52, 0 }
 0xc8d   :  { %v3318_v56 = vpop.permute.xlu0 %3317  ;;  %v3496_v62 = vpop.permute.xlu1 %3495 }
 0xc8e   :  { %v3512_v60 = vsel %vm754_vm6, %v3496_v62, 0 }
 0xc95   :  { %v3488_v40 = vpop.permute.xlu1 %3487 }
 0xc9b   :  { %v3331_v53 = vpop.permute.xlu2 %3330 }
 0xc9c   :  { %v3348_v6 = vsel %vm754_vm6, %v3331_v53, 0 }
 0xc9d   :  { %3355 = vmatpush.bf16.xpose.msra.mxu2 %v3348_v6 }
 0xca3   :  { %v3320_v47 = vpop.permute.xlu2 %3319 }
 0xca5   :  { %3356 = vmatpush.bf16.xpose.msra.mxu2 %v3345_v34 }
 0xcab   :  { %v3322_v61 = vpop.permute.xlu2 %3321 }
 0xcad   :  { %3357 = vmatpush.bf16.xpose.msra.mxu2 %v3342_v35  ;;  %v3656_v15 = vpop.permute.xlu1 %3655 }
 0xcb3   :  { %v3662_v24 = vpop.permute.xlu0 %3661 }
 0xcb4   :  { %v3679_v59 = vsel %vm754_vm6, %v3662_v24, 0  ;;  %v3658_v0 = vpop.permute.xlu2 %3657  ;;  %9175 = vmatmul.msk.bf16.vlgmr.msra.gmra.mxu2 %vm754_vm6, %v3318_v56 }
 0xcb5   :  { %3686 = vmatpush.bf16.xpose.msrb.mxu2 %v3679_v59  ;;  %v3673_v43 = vsel %vm754_vm6, %v3658_v0, 0  ;;  %v3445_v48 = vpop.permute.xlu1 %3444 }
 0xcbb   :  { %v3498_v42 = vpop.permute.xlu0 %3497 }
 0xcbc   :  { %v3515_v20 = vsel %vm754_vm6, %v3498_v42, 0  ;;  %v3494_v50 = vpop.permute.xlu2 %3493 }
 0xcbd   :  { %3522 = vmatpush.bf16.xpose.msrb.mxu0 %v3515_v20  ;;  %3687 = vmatpush.bf16.xpose.msrb.mxu2 %v3676_v27  ;;  %v3509_v29 = vsel %vm754_vm6, %v3494_v50, 0 }
 0xcc3   :  { %v3652_v33 = vpop.permute.xlu0 %3651 }
 0xcc4   :  { %v3490_v14 = vpop.permute.xlu2 %3489  ;;  %9176 = vmatmul.msk.bf16.gmra.mxu2 %vm754_vm6, %v3320_v47 }
 0xcc5   :  { %3523 = vmatpush.bf16.xpose.msrb.mxu0 %v3512_v60  ;;  %3688 = vmatpush.bf16.xpose.msrb.mxu2 %v3673_v43 }
 0xccb   :  { %v3654_v9 = vpop.permute.xlu0 %3653 }
 0xccc   :  { %v3449_v32 = vpop.permute.xlu2 %3448 }
 0xccd   :  { %v3462_v23 = vsel %vm226_vm0, %v3449_v32, 0  ;;  %3524 = vmatpush.bf16.xpose.msrb.mxu0 %v3509_v29 }
 0xcce   :  { %3469 = vmatpush.bf16.msra.mxu3 %v3462_v23 }
 0xcd3   :  { %v3492_v12 = vpop.permute.xlu0 %3491 }
 0xcd4   :  { %9177 = vmatmul.msk.bf16.gmra.mxu2 %vm754_vm6, %v3322_v61  ;;  %9181 = vmatmul.msk.bf16.vlgmr.msrb.gmra.mxu0 %vm754_vm6, %v3488_v40 }
 0xcd6   :  { %v3194_v54 = vpop.f32.mrf.mxu0 }
 0xcd7   :  { %v3208_v38 = vmul.f32 0.17677669, %v3194_v54 }
 0xcd9   :  { %v3213_v46 = vadd.f32 %v13340_v58, %v3208_v38 }
 0xcdb   :  { %v3447_v11 = vpop.permute.xlu0 %3446  ;;  %v3218_v10 = vsel %vm806_vm7, %v3213_v46, -inf }
 0xcdc   :  { %3219 = vmax.xlane.f32.xlu0 %v3218_v10  ;;  %3470 = vmatpush.bf16.msra.mxu3 %v3447_v11 }
 0xcde   :  { %v3196_v25 = vpop.f32.mrf.mxu0 }
 0xcdf   :  { %v3209_v22 = vmul.f32 0.17677669, %v3196_v25 }
 0xce0   :  { %3471 = vmatpush.bf16.msra.mxu3 %v3445_v48 }
 0xce1   :  { %v3214_v16 = vadd.f32 %v13345_v44, %v3209_v22 }
 0xce3   :  { %v3221_v19 = vsel %vm806_vm7, %v3214_v16, -inf }
 0xce4   :  { %3222 = vmax.xlane.f32.xlu2 %v3221_v19  ;;  %9182 = vmatmul.msk.bf16.gmra.mxu0 %vm754_vm6, %v3490_v14 }
 0xce5   :  { %9187 = vmatmul.msk.bf16.vlgmr.msrb.gmra.mxu2 %vm754_vm6, %v3652_v33 }
 0xce6   :  { %v3199_v30 = vpop.f32.mrf.mxu0 }
 0xce7   :  { %v3210_v51 = vmul.f32 0.17677669, %v3199_v30 }
 0xce9   :  { %v3215_v8 = vadd.f32 %v13352_v31, %v3210_v51 }
 0xceb   :  { %v3224_v36 = vsel %vm806_vm7, %v3215_v8, -inf }
 0xcec   :  { %3225 = vmax.xlane.f32.xlu0 %v3224_v36 }
 0xcee   :  { %v3201_v41 = vpop.f32.mrf.mxu0 }
 0xcef   :  { %v3211_v1 = vmul.f32 0.17677669, %v3201_v41 }
 0xcf1   :  { %v13360_v39 = vadd.f32 %v13357_v17, %v3211_v1 }
 0xcf3   :  { %v3227_v55 = vsel %vm806_vm7, %v13360_v39, -inf }
 0xcf4   :  { %3228 = vmax.xlane.f32.xlu1 %v3227_v55  ;;  %9183 = vmatmul.msk.bf16.gmra.mxu0 %vm754_vm6, %v3492_v12 }
 0xcf5   :  { %9188 = vmatmul.msk.bf16.gmra.mxu2 %vm754_vm6, %v3654_v9 }
 0xcf6   :  { %v3204_v13 = vpop.f32.mrf.mxu0 }
 0xcf7   :  { %v3212_v5 = vmul.f32 0.17677669, %v3204_v13 }
 0xcf9   :  { %v13370_v57 = vadd.f32 %v13367_v18, %v3212_v5 }
 0xcfb   :  { %v3230_v53 = vsel %vm819_vm8, %v13370_v57, -inf }
 0xcfc   :  { %3231 = vmax.xlane.f32.xlu0 %v3230_v53 }
 0xcfe   :  { %v3206_v6 = vpop.f32.mrf.mxu0 }
 0xd05   :  { %9189 = vmatmul.msk.bf16.gmra.mxu2 %vm754_vm6, %v3656_v15 }
 0xd37   :  { %v3359_v21 = vpop.f32.mrf.mxu2 }
 0xd38   :  { %v3373_v47 = vmul.f32 0.17677669, %v3359_v21 }
 0xd3a   :  { %v13376_v34 = vadd.f32 %v13340_v58, %v3373_v47 }
 0xd3c   :  { %v3383_v4 = vsel %vm806_vm7, %v13376_v34, -inf }
 0xd3d   :  { %3384 = vmax.xlane.f32.xlu2 %v3383_v4 }
 0xd3f   :  { %v3361_v56 = vpop.f32.mrf.mxu2 }
 0xd40   :  { %v3374_v32 = vmul.f32 0.17677669, %v3361_v56 }
 0xd42   :  { %v13395_v10 = vadd.f32 %v13345_v44, %v3374_v32 }
 0xd44   :  { %v3386_v48 = vsel %vm806_vm7, %v13395_v10, -inf }
 0xd47   :  { %v3364_v61 = vpop.f32.mrf.mxu2 }
 0xd48   :  { %v3375_v1 = vmul.f32 0.17677669, %v3364_v61 }
 0xd4f   :  { %v3220_v35 = vpop.xlane.xlu0 %3219  ;;  %v3366_v24 = vpop.f32.mrf.mxu2 }
 0xd50   :  { %v3233_v59 = vsub.f32 %v3213_v46, %v3220_v35  ;;  %v3376_v13 = vmul.f32 0.17677669, %v3366_v24 }
 0xd51   :  { %v3526_v0 = vpop.f32.mrf.mxu0 }
 0xd52   :  { %v3238_v52 = vmul.f32 1.442695, %v3233_v59  ;;  %v3540_v42 = vmul.f32 0.17677669, %v3526_v0  ;;  %v13424_v61 = vadd.f32 %v13357_v17, %v3376_v13 }
 0xd54   :  { %v13381_v20 = vadd.f32 %v13340_v58, %v3540_v42  ;;  %11405 = vpow2.f32 %v3238_v52  ;;  %v3392_v0 = vsel %vm806_vm7, %v13424_v61, -inf }
 0xd56   :  { %v3550_v50 = vsel %vm806_vm7, %v13381_v20, -inf }
 0xd57   :  { %v3369_v27 = vpop.f32.mrf.mxu2  ;;  %3551 = vmax.xlane.f32.xlu0 %v3550_v50  ;;  %v3223_v62 = vpop.xlane.xlu2 %3222 }
 0xd58   :  { %v3234_v43 = vsub.f32 %v3214_v16, %v3223_v62  ;;  %v3377_v24 = vmul.f32 0.17677669, %v3369_v27 }
 0xd59   :  { %v3528_v33 = vpop.f32.mrf.mxu0 }
 0xd5a   :  { %v3541_v14 = vmul.f32 0.17677669, %v3528_v33  ;;  %v13385_v60 = vpop.eup %11405  ;;  %v3240_v15 = vmul.f32 1.442695, %v3234_v43  ;;  %v13432_v62 = vadd.f32 %v13367_v18, %v3377_v24 }
 0xd5b   :  { %v3248_v29 = vsel %vm806_vm7, %v13385_v60, 0.0 }
 0xd5c   :  { %v13388_v9 = vadd.f32 %v13345_v44, %v3541_v14  ;;  %11407 = vpow2.f32 %v3240_v15 }
 0xd5e   :  { %v3553_v40 = vsel %vm806_vm7, %v13388_v9, -inf }
 0xd5f   :  { %v3226_v23 = vpop.xlane.xlu0 %3225  ;;  %v3371_v12 = vpop.f32.mrf.mxu2  ;;  %3249 = vadd.xlane.f32.xlu0 %v3248_v29  ;;  %3554 = vmax.xlane.f32.xlu1 %v3553_v40 }
 0xd60   :  { %v3235_v54 = vsub.f32 %v3215_v8, %v3226_v23 }
 0xd61   :  { %v3531_v38 = vpop.f32.mrf.mxu0 }
 0xd62   :  { %v3242_v46 = vmul.f32 1.442695, %v3235_v54  ;;  %v3542_v11 = vmul.f32 0.17677669, %v3531_v38  ;;  %v13404_v30 = vpop.eup %11407 }
 0xd63   :  { %v3251_v5 = vsel %vm806_vm7, %v13404_v30, 0.0 }
 0xd64   :  { %v13398_v25 = vadd.f32 %v13352_v31, %v3542_v11  ;;  %11409 = vpow2.f32 %v3242_v46 }
 0xd66   :  { %v3556_v22 = vsel %vm806_vm7, %v13398_v25, -inf }
 0xd67   :  { %3387 = vmax.xlane.f32.xlu1 %v3386_v48  ;;  %3557 = vmax.xlane.f32.xlu2 %v3556_v22  ;;  %v3229_v51 = vpop.xlane.xlu1 %3228 }
 0xd68   :  { %v3690_v16 = vpop.f32.mrf.mxu2  ;;  %v3236_v55 = vsub.f32 %v13360_v39, %v3229_v51  ;;  %v13421_v39 = vadd.f32 %v13352_v31, %v3375_v1 }
 0xd69   :  { %v3533_v19 = vpop.f32.mrf.mxu0  ;;  %v3704_v14 = vmul.f32 0.17677669, %v3690_v16 }
 0xd6a   :  { %v3543_v8 = vmul.f32 0.17677669, %v3533_v19  ;;  %v13406_v36 = vpop.eup %11409  ;;  %v3244_v47 = vmul.f32 1.442695, %v3236_v55  ;;  %v3389_v59 = vsel %vm806_vm7, %v13421_v39, -inf }
 0xd6b   :  { %v3254_v53 = vsel %vm806_vm7, %v13406_v36, 0.0  ;;  %v13441_v29 = vadd.f32 %v13340_v58, %v3704_v14 }
 0xd6c   :  { %v13409_v41 = vadd.f32 %v13357_v17, %v3543_v8  ;;  %11411 = vpow2.f32 %v3244_v47 }
 0xd6d   :  { %v3714_v38 = vsel %vm806_vm7, %v13441_v29, -inf }
 0xd6e   :  { %v3559_v6 = vsel %vm806_vm7, %v13409_v41, -inf }
 0xd6f   :  { %3252 = vadd.xlane.f32.xlu1 %v3251_v5  ;;  %3255 = vadd.xlane.f32.xlu2 %v3254_v53  ;;  %v3232_v56 = vpop.xlane.xlu0 %3231 }
 0xd70   :  { %v3692_v21 = vpop.f32.mrf.mxu2  ;;  %3560 = vmax.xlane.f32.xlu0 %v3559_v6  ;;  %v3237_v35 = vsub.f32 %v13370_v57, %v3232_v56  ;;  %v3395_v57 = vsel %vm819_vm8, %v13432_v62, -inf }
 0xd71   :  { %v13418_v4 = vpop.f32.mrf.mxu0  ;;  %v3705_v15 = vmul.f32 0.17677669, %v3692_v21 }
 0xd72   :  { %v3246_v42 = vmul.f32 1.442695, %v3237_v35  ;;  %v13434_v33 = vpop.eup %11411 }
 0xd73   :  { %v3257_v27 = vsel %vm806_vm7, %v13434_v33, 0.0  ;;  %v13455_v46 = vadd.f32 %v13345_v44, %v3705_v15 }
 0xd74   :  { %11413 = vpow2.f32 %v3246_v42 }
 0xd77   :  { %3390 = vmax.xlane.f32.xlu1 %v3389_v59  ;;  %3393 = vmax.xlane.f32.xlu2 %v3392_v0 }
 0xd78   :  { %v3695_v52 = vpop.f32.mrf.mxu2 }
 0xd79   :  { %v3538_v50 = vpop.f32.mrf.mxu0  ;;  %v3706_v11 = vmul.f32 0.17677669, %v3695_v52 }
 0xd7a   :  { %v13443_v40 = vpop.eup %11413 }
 0xd7b   :  { %v3260_v54 = vsel %vm819_vm8, %v13443_v40, 0.0  ;;  %v13460_v22 = vadd.f32 %v13352_v31, %v3706_v11 }
 0xd7d   :  { %v3720_v16 = vsel %vm806_vm7, %v13460_v22, -inf }
 0xd7f   :  { %3396 = vmax.xlane.f32.xlu2 %v3395_v57  ;;  %3258 = vadd.xlane.f32.xlu1 %v3257_v27 }
 0xd80   :  { %v3697_v43 = vpop.f32.mrf.mxu2 }
 0xd81   :  { %v3707_v32 = vmul.f32 0.17677669, %v3697_v43 }
 0xd83   :  { %v13446_v23 = vadd.f32 %v13357_v17, %v3707_v32  ;;  %v3717_v17 = vsel %vm806_vm7, %v13455_v46, -inf }
 0xd85   :  { %v3723_v12 = vsel %vm806_vm7, %v13446_v23, -inf }
 0xd86   :  { %3724 = vmax.xlane.f32.xlu0 %v3723_v12 }
 0xd87   :  { %3261 = vadd.xlane.f32.xlu2 %v3260_v54  ;;  %3715 = vmax.xlane.f32.xlu1 %v3714_v38 }
 0xd88   :  { %v3700_v58 = vpop.f32.mrf.mxu2 }
 0xd8f   :  { %3718 = vmax.xlane.f32.xlu2 %v3717_v17  ;;  %v3708_v17 = vmul.f32 0.17677669, %v3700_v58 }
 0xd90   :  { %v3702_v48 = vpop.f32.mrf.mxu2 }
 0xd97   :  { %3721 = vmax.xlane.f32.xlu2 %v3720_v16 }
 0xdb0   :  { %v3385_v19 = vpop.xlane.xlu2 %3384 }
 0xdb1   :  { %v3398_v51 = vsub.f32 %v13376_v34, %v3385_v19 }
 0xdb3   :  { %v3403_v8 = vmul.f32 1.442695, %v3398_v51 }
 0xdb5   :  { %11415 = vpow2.f32 %v3403_v8 }
 0xdbb   :  { %v13465_v44 = vpop.eup %11415 }
 0xdbc   :  { %v3413_v1 = vsel %vm806_vm7, %v13465_v44, 0.0 }
 0xdbd   :  { %3414 = vadd.xlane.f32.xlu0 %v3413_v1  ;;  %v13502_v1 = vadd.f32 %v13367_v18, %v3708_v17 }
 0xdbf   :  { %v3726_v58 = vsel %vm819_vm8, %v13502_v1, -inf }
 0xdca   :  { %v3552_v55 = vpop.xlane.xlu0 %3551 }
 0xdcb   :  { %v3565_v13 = vsub.f32 %v13381_v20, %v3552_v55 }
 0xdcd   :  { %v3570_v31 = vmul.f32 1.442695, %v3565_v13 }
 0xdcf   :  { %11417 = vpow2.f32 %v3570_v31 }
 0xdd2   :  { %v3555_v5 = vpop.xlane.xlu1 %3554  ;;  %v3250_v35 = vpop.xlane.xlu0 %3249 }
 0xdd5   :  { %v13470_v53 = vpop.eup %11417 }
 0xdd6   :  { %v3580_v6 = vsel %vm806_vm7, %v13470_v53, 0.0 }
 0xdd7   :  { %3581 = vadd.xlane.f32.xlu0 %v3580_v6 }
 0xdda   :  { %v13474_v34 = vpop.xlane.xlu2 %3557  ;;  %v3388_v21 = vpop.xlane.xlu1 %3387 }
 0xddb   :  { %v3399_v47 = vsub.f32 %v13395_v10, %v3388_v21 }
 0xddd   :  { %v3405_v56 = vmul.f32 1.442695, %v3399_v47 }
 0xddf   :  { %11419 = vpow2.f32 %v3405_v56 }
 0xde0   :  { %11421 = vrcp.f32 %v3250_v35 }
 0xde2   :  { %v3256_v24 = vpop.xlane.xlu2 %3255  ;;  %v3253_v20 = vpop.xlane.xlu1 %3252 }
 0xde3   :  { %11423 = vrcp.f32 %v3253_v20  ;;  %v3544_v20 = vmul.f32 0.17677669, %v13418_v4 }
 0xde5   :  { %v13477_v59 = vpop.eup %11419 }
 0xde6   :  { %v3416_v0 = vsel %vm806_vm7, %v13477_v59, 0.0  ;;  %v11422_v52 = vpop.eup %11421 }
 0xde7   :  { %3417 = vadd.xlane.f32.xlu1 %v3416_v0  ;;  %v3268_v57 = vmul.f32 %v11422_v52, %v13385_v60  ;;  %v13531_v52 = vadd.f32 %v13367_v18, %v3544_v20 }
 0xde9   :  { %v11424_v42 = vpop.eup %11423 }
 0xdea   :  { %v3394_v50 = vpop.xlane.xlu2 %3393  ;;  %v3391_v14 = vpop.xlane.xlu1 %3390  ;;  %v3269_v10 = vmul.f32 %v11424_v42, %v13404_v30 }
 0xdeb   :  { %v3401_v27 = vsub.f32 %v13424_v61, %v3394_v50  ;;  %v3400_v43 = vsub.f32 %v13421_v39, %v3391_v14  ;;  %3612 = vrot.lane.b32.xlu0 %v13289_v26, %s11837_s13  ;;  %v3566_v39 = vsub.f32 %v13388_v9, %v3555_v5  ;;  %v3561_v42 = vpop.xlane.xlu0 %3560 }
 0xdec   :  { %v3273_v32 = vpack.c.bf16 %v3269_v10, %v3268_v57  ;;  %v3568_v50 = vsub.f32 %v13409_v41, %v3561_v42  ;;  %v3562_v57 = vsel %vm819_vm8, %v13531_v52, -inf }
 0xded   :  { %v3409_v12 = vmul.f32 1.442695, %v3401_v27  ;;  %v3407_v15 = vmul.f32 1.442695, %v3400_v43  ;;  %v3572_v19 = vmul.f32 1.442695, %v3566_v39 }
 0xdee   :  { %9172 = vmatmul.msk.bf16.vlgmr.msrb.gmra.mxu1 %vm806_vm7, %v3273_v32 }
 0xdef   :  { %11425 = vpow2.f32 %v3409_v12 }
 0xdf0   :  { %11427 = vpow2.f32 %v3407_v15 }
 0xdf1   :  { %11429 = vrcp.f32 %v3256_v24 }
 0xdf2   :  { %v3259_v54 = vpop.xlane.xlu1 %3258  ;;  %v3397_v38 = vpop.xlane.xlu2 %3396 }
 0xdf3   :  { %11431 = vrcp.f32 %v3259_v54  ;;  %3772 = vrot.lane.b32.xlu0 %v13291_v3, %s11836_s9  ;;  %v3402_v5 = vsub.f32 %v13432_v62, %v3397_v38 }
 0xdf4   :  { %11433 = vpow2.f32 %v3572_v19 }
 0xdf5   :  { %v13490_v60 = vpop.eup %11425  ;;  %v3411_v21 = vmul.f32 1.442695, %v3402_v5 }
 0xdf6   :  { %v13492_v30 = vpop.eup %11427  ;;  %v3422_v61 = vsel %vm806_vm7, %v13490_v60, 0.0 }
 0xdf7   :  { %v11430_v11 = vpop.eup %11429  ;;  %3423 = vadd.xlane.f32.xlu2 %v3422_v61  ;;  %v3419_v48 = vsel %vm806_vm7, %v13492_v30, 0.0 }
 0xdf8   :  { %3420 = vadd.xlane.f32.xlu1 %v3419_v48  ;;  %v3270_v51 = vmul.f32 %v11430_v11, %v13406_v36 }
 0xdf9   :  { %v11432_v16 = vpop.eup %11431  ;;  %v3725_v27 = vpop.xlane.xlu0 %3724 }
 0xdfa   :  { %v3271_v8 = vmul.f32 %v11432_v16, %v13434_v33  ;;  %v3262_v55 = vpop.xlane.xlu2 %3261  ;;  %v13507_v13 = vpop.eup %11433 }
 0xdfb   :  { %11435 = vrcp.f32 %v3262_v55  ;;  %v3583_v36 = vsel %vm806_vm7, %v13507_v13, 0.0  ;;  %v3716_v14 = vpop.xlane.xlu1 %3715 }
 0xdfc   :  { %v3274_v9 = vpack.c.bf16 %v3271_v8, %v3270_v51  ;;  %11437 = vpow2.f32 %v3411_v21  ;;  %v3729_v10 = vsub.f32 %v13441_v29, %v3716_v14 }
 0xdfe   :  { %9173 = vmatmul.msk.bf16.gmra.mxu1 %vm806_vm7, %v3274_v9 }
 0xe00   :  { %3727 = vmax.xlane.f32.xlu1 %v3726_v58 }
 0xe01   :  { %v11436_v31 = vpop.eup %11435 }
 0xe02   :  { %v3272_v33 = vmul.f32 %v11436_v31, %v13443_v40  ;;  %v3719_v47 = vpop.xlane.xlu2 %3718  ;;  %v13517_v24 = vpop.eup %11437 }
 0xe03   :  { %v3730_v56 = vsub.f32 %v13455_v46, %v3719_v47  ;;  %v3425_v40 = vsel %vm819_vm8, %v13517_v24, 0.0  ;;  %v3567_v46 = vsub.f32 %v13398_v25, %v13474_v34  ;;  %v3576_v25 = vmul.f32 1.442695, %v3568_v50 }
 0xe04   :  { %v3275_v6 = vpack.c.bf16 %v3272_v33, %v3272_v33  ;;  %v3734_v34 = vmul.f32 1.442695, %v3729_v10 }
 0xe05   :  { %v3736_v35 = vmul.f32 1.442695, %v3730_v56  ;;  %v3574_v0 = vmul.f32 1.442695, %v3567_v46 }
 0xe07   :  { %11439 = vpow2.f32 %v3736_v35 }
 0xe08   :  { %3584 = vadd.xlane.f32.xlu1 %v3583_v36  ;;  %11441 = vpow2.f32 %v3574_v0 }
 0xe09   :  { %11443 = vpow2.f32 %v3576_v25 }
 0xe0a   :  { %11445 = vpow2.f32 %v3734_v34  ;;  %v3722_v12 = vpop.xlane.xlu2 %3721 }
 0xe0b   :  { %v3731_v15 = vsub.f32 %v13460_v22, %v3722_v12 }
 0xe0d   :  { %v13521_v62 = vpop.eup %11439  ;;  %v3738_v54 = vmul.f32 1.442695, %v3731_v15 }
 0xe0e   :  { %9174 = vmatmul.msk.bf16.gmra.mxu1 %vm806_vm7, %v3275_v6  ;;  %v13539_v4 = vpop.eup %11441 }
 0xe0f   :  { %3776 = vrot.lane.b32.xlu2 %v13289_v26, %s11836_s9  ;;  %v3747_v26 = vsel %vm806_vm7, %v13521_v62, 0.0  ;;  %v3586_v18 = vsel %vm806_vm7, %v13539_v4, 0.0  ;;  %v13543_v41 = vpop.eup %11443  ;;  %11447 = vpow2.f32 %v3738_v54 }
 0xe10   :  { %v13545_v43 = vpop.eup %11445  ;;  %v3589_v29 = vsel %vm806_vm7, %v13543_v41, 0.0 }
 0xe15   :  { %v13553_v17 = vpop.eup %11447 }
 0xe16   :  { %v3750_v19 = vsel %vm806_vm7, %v13553_v17, 0.0 }
 0xe1d   :  { %3426 = vadd.xlane.f32.xlu0 %v3425_v40 }
 0xe21   :  { %3774 = vrot.lane.b32.xlu1 %v13300_v49, %s11836_s9 }
 0xe25   :  { %3748 = vadd.xlane.f32.xlu0 %v3747_v26 }
 0xe30   :  { %v3415_v32 = vpop.xlane.xlu0 %3414 }
 0xe31   :  { %11449 = vrcp.f32 %v3415_v32 }
 0xe37   :  { %v11450_v48 = vpop.eup %11449 }
 0xe38   :  { %3563 = vmax.xlane.f32.xlu2 %v3562_v57  ;;  %v3433_v51 = vmul.f32 %v11450_v48, %v13465_v44 }
 0xe39   :  { %3610 = vrot.lane.b32.xlu0 %v13300_v49, %s11837_s13  ;;  %v3744_v49 = vsel %vm806_vm7, %v13545_v43, 0.0 }
 0xe40   :  { %3587 = vadd.xlane.f32.xlu2 %v3586_v18 }
 0xe48   :  { %3590 = vadd.xlane.f32.xlu2 %v3589_v29 }
 0xe4a   :  { %v3582_v38 = vpop.xlane.xlu0 %3581 }
 0xe4b   :  { %3745 = vadd.xlane.f32.xlu1 %v3744_v49 }
 0xe5a   :  { %v3418_v39 = vpop.xlane.xlu1 %3417 }
 0xe5b   :  { %11451 = vrcp.f32 %v3418_v39 }
 0xe5d   :  { %v3613_v61 = vpop.permute.xlu0 %3612 }
 0xe5e   :  { %v3626_v11 = vsel %vm226_vm0, %v3613_v61, 0 }
 0xe5f   :  { %3633 = vmatpush.bf16.msra.mxu1 %v3626_v11 }
 0xe61   :  { %v11452_v16 = vpop.eup %11451 }
 0xe62   :  { %v3434_v22 = vmul.f32 %v11452_v16, %v13477_v59 }
 0xe63   :  { %3751 = vadd.xlane.f32.xlu0 %v3750_v19 }
 0xe64   :  { %3608 = vrot.lane.b32.xlu1 %v13291_v3, %s11837_s13  ;;  %v3438_v8 = vpack.c.bf16 %v3434_v22, %v3433_v51 }
 0xe65   :  { %v3773_v14 = vpop.permute.xlu0 %3772 }
 0xe66   :  { %9178 = vmatmul.msk.bf16.vlgmr.msra.gmra.mxu3 %vm806_vm7, %v3438_v8 }
 0xe6a   :  { %v3424_v9 = vpop.xlane.xlu2 %3423 }
 0xe6b   :  { %11453 = vrcp.f32 %v3424_v9  ;;  %v3421_v55 = vpop.xlane.xlu1 %3420  ;;  %v13562_v58 = vpop.f32.mrf.mxu1 }
 0xe6c   :  { %11455 = vrcp.f32 %v3421_v55 }
 0xe71   :  { %v11454_v31 = vpop.eup %11453 }
 0xe72   :  { %v11456_v36 = vpop.eup %11455  ;;  %v3436_v33 = vmul.f32 %v11454_v31, %v13490_v60  ;;  %v3777_v44 = vpop.permute.xlu2 %3776  ;;  %v3732_v60 = vsub.f32 %v13446_v23, %v3725_v27 }
 0xe73   :  { %v3435_v59 = vmul.f32 %v11456_v36, %v13492_v30  ;;  %v3790_v5 = vsel %vm226_vm0, %v3777_v44, 0  ;;  %v3728_v6 = vpop.xlane.xlu1 %3727  ;;  %v13568_v21 = vpop.f32.mrf.mxu1 }
 0xe74   :  { %v3733_v3 = vsub.f32 %v13502_v1, %v3728_v6  ;;  %3797 = vmatpush.bf16.msrb.mxu3 %v3790_v5  ;;  %v3740_v46 = vmul.f32 1.442695, %v3732_v60 }
 0xe75   :  { %v3439_v47 = vpack.c.bf16 %v3436_v33, %v3435_v59 }
 0xe76   :  { %v3742_v56 = vmul.f32 1.442695, %v3733_v3 }
 0xe77   :  { %9179 = vmatmul.msk.bf16.gmra.mxu3 %vm806_vm7, %v3439_v47 }
 0xe78   :  { %11457 = vpow2.f32 %v3742_v56 }
 0xe79   :  { %11459 = vrcp.f32 %v3582_v38 }
 0xe7b   :  { %v3585_v35 = vpop.xlane.xlu1 %3584  ;;  %v13572_v40 = vpop.f32.mrf.mxu1 }
 0xe7c   :  { %11461 = vrcp.f32 %v3585_v35 }
 0xe7d   :  { %11463 = vpow2.f32 %v3740_v46 }
 0xe7e   :  { %v13574_v30 = vpop.eup %11457 }
 0xe7f   :  { %v3756_v1 = vsel %vm819_vm8, %v13574_v30, 0.0  ;;  %v11460_v26 = vpop.eup %11459 }
 0xe80   :  { %3757 = vadd.xlane.f32.xlu2 %v3756_v1  ;;  %v3600_v0 = vmul.f32 %v11460_v26, %v13470_v53 }
 0xe82   :  { %v11462_v20 = vpop.eup %11461 }
 0xe83   :  { %v3601_v42 = vmul.f32 %v11462_v20, %v13507_v13  ;;  %v13580_v50 = vpop.f32.mrf.mxu1  ;;  %v11464_v57 = vpop.eup %11463 }
 0xe84   :  { %v3753_v25 = vsel %vm806_vm7, %v11464_v57, 0.0 }
 0xe85   :  { %v3605_v23 = vpack.c.bf16 %v3601_v42, %v3600_v0 }
 0xe8b   :  { %v13582_v10 = vpop.f32.mrf.mxu1 }
 0xe8e   :  { %3754 = vadd.xlane.f32.xlu1 %v3753_v25 }
 0xe90   :  { %v3427_v34 = vpop.xlane.xlu0 %3426 }
 0xe91   :  { %11465 = vrcp.f32 %v3427_v34 }
 0xe93   :  { %v3775_v18 = vpop.permute.xlu1 %3774  ;;  %v3312_v27 = vpop.f32.mrf.mxu1 }
 0xe94   :  { %3798 = vmatpush.bf16.msrb.mxu3 %v3775_v18 }
 0xe97   :  { %v11466_v29 = vpop.eup %11465 }
 0xe98   :  { %v3437_v53 = vmul.f32 %v11466_v29, %v13517_v24  ;;  %3799 = vmatpush.bf16.msrb.mxu3 %v3773_v14  ;;  %v3749_v49 = vpop.xlane.xlu0 %3748 }
 0xe9a   :  { %v3440_v13 = vpack.c.bf16 %v3437_v53, %v3437_v53 }
 0xe9c   :  { %9180 = vmatmul.msk.bf16.gmra.mxu3 %vm806_vm7, %v3440_v13 }
 0xeab   :  { %v3611_v32 = vpop.permute.xlu0 %3610  ;;  %v3564_v12 = vpop.xlane.xlu2 %3563 }
 0xeac   :  { %v3569_v15 = vsub.f32 %v13531_v52, %v3564_v12  ;;  %3634 = vmatpush.bf16.msra.mxu1 %v3611_v32 }
 0xeae   :  { %v3578_v54 = vmul.f32 1.442695, %v3569_v15  ;;  %v10748_v15 = vld [vmem:[%s11918_s12 + $0x78] sm:$0xff] }
 0xeaf   :  { %3958 = vmatpush.bf16.msra.mxu0 %v10748_v15 }
 0xeb0   :  { %11467 = vpow2.f32 %v3578_v54  ;;  %v10747_v54 = vld [vmem:[%s11918_s12 + $0x70] sm:$0xff] }
 0xeb1   :  { %11469 = vrcp.f32 %v3749_v49 }
 0xeb3   :  { %v3588_v52 = vpop.xlane.xlu2 %3587  ;;  %3959 = vmatpush.bf16.msra.mxu0 %v10747_v54 }
 0xeb6   :  { %v11468_v38 = vpop.eup %11467 }
 0xeb7   :  { %v3592_v39 = vsel %vm819_vm8, %v11468_v38, 0.0  ;;  %v11470_v24 = vpop.eup %11469  ;;  %vm15157_vm8 = vcmask 785408  }
 0xeb8   :  { %3593 = vadd.xlane.f32.xlu2 %v3592_v39  ;;  %v3765_v48 = vmul.f32 %v11470_v24, %v13521_v62  ;;  %v10746_v39 = vld [vmem:[%s11918_s12 + $0x68] sm:$0xff]  ;;  %vm15158_vm11 = vmmov %vm15157_vm8 }
 0xeb9   :  { %3960 = vmatpush.bf16.msra.mxu0 %v10746_v39  ;;  %vm15159_vm4 = vmmov %vm15157_vm8 }
 0xeba   :  { %vm15160_vm14 = vmmov %vm15159_vm4 }
 0xebb   :  { %v3591_v22 = vpop.xlane.xlu2 %3590  ;;  %vm15161_vm1 = vmmov %vm15159_vm4 }
 0xebe   :  { %v3746_v61 = vpop.xlane.xlu1 %3745 }
 0xebf   :  { %11471 = vrcp.f32 %v3746_v61  ;;  %v10745_v61 = vld [vmem:[%s11918_s12 + $0x60] sm:$0xff] }
 0xec0   :  { %11473 = vrcp.f32 %v3591_v22  ;;  %3961 = vmatpush.bf16.msra.mxu0 %v10745_v61 }
 0xec1   :  { %11475 = vrcp.f32 %v3588_v52  ;;  %v10741_v52 = vld [vmem:[%s11918_s12 + $0x40] sm:$0xff] }
 0xec5   :  { %v11472_v11 = vpop.eup %11471 }
 0xec6   :  { %v3764_v16 = vmul.f32 %v11472_v11, %v13545_v43  ;;  %v11474_v8 = vpop.eup %11473  ;;  %v10744_v11 = vld [vmem:[%s11918_s12 + $0x58] sm:$0xff] }
 0xec7   :  { %v11476_v9 = vpop.eup %11475  ;;  %v3603_v55 = vmul.f32 %v11474_v8, %v13543_v41  ;;  %3962 = vmatpush.bf16.msra.mxu0 %v10744_v11 }
 0xec8   :  { %v3769_v19 = vpack.c.bf16 %v3765_v48, %v3764_v16  ;;  %v3602_v31 = vmul.f32 %v11476_v9, %v13539_v4  ;;  %v10743_v48 = vld [vmem:[%s11918_s12 + $0x50] sm:$0xff]  ;;  %v10742_v16 = vld [vmem:[%s11918_s12 + $0x48] sm:$0xff]  ;;  %s15200_s12 = sld [smem:[#allocation26_spill]] }
 0xeca   :  { %9190 = vmatmul.msk.bf16.vlgmr.msrb.gmra.mxu3 %vm806_vm7, %v3769_v19  ;;  %v3606_v62 = vpack.c.bf16 %v3603_v55, %v3602_v31 }
 0xecb   :  { %3963 = vmatpush.bf16.msra.mxu0 %v10743_v48 }
 0xecf   :  { %3964 = vmatpush.bf16.msra.mxu0 %v10742_v16 }
 0xed3   :  { %3965 = vmatpush.bf16.msra.mxu0 %v10741_v52 }
 0xed6   :  { %v3609_v51 = vpop.permute.xlu1 %3608  ;;  %v3752_v59 = vpop.xlane.xlu0 %3751 }
 0xed7   :  { %3635 = vmatpush.bf16.msra.mxu1 %v3609_v51  ;;  %11477 = vrcp.f32 %v3752_v59 }
 0xeda   :  { %9184 = vmatmul.msk.bf16.vlgmr.msra.gmra.mxu1 %vm806_vm7, %v3605_v23 }
 0xedd   :  { %v11478_v41 = vpop.eup %11477 }
 0xede   :  { %v3766_v4 = vmul.f32 %v11478_v41, %v13553_v17 }
 0xee9   :  { %v3473_v36 = vpop.f32.mrf.mxu3 }
 0xeea   :  { %9185 = vmatmul.msk.bf16.gmra.mxu1 %vm806_vm7, %v3606_v62 }
 0xef1   :  { %v3475_v43 = vpop.f32.mrf.mxu3 }
 0xef2   :  { %v11111_v33 = vpack.i.bf16 %v3475_v43, %v3473_v36 }
 0xef3   :  { %v3758_v35 = vpop.xlane.xlu2 %3757 }
 0xef4   :  { %11112 = vrot.lane.b32.xlu0 %v11111_v33, %s11836_s9 }
 0xefa   :  { %v3478_v44 = vpop.f32.mrf.mxu3 }
 0xf01   :  { %v3755_v5 = vpop.xlane.xlu1 %3754 }
 0xf02   :  { %11479 = vrcp.f32 %v3755_v5  ;;  %v3480_v6 = vpop.f32.mrf.mxu3 }
 0xf03   :  { %v11126_v3 = vpack.i.bf16 %v3480_v6, %v3478_v44  ;;  %11481 = vrcp.f32 %v3758_v35 }
 0xf05   :  { %11127 = vrot.lane.b32.xlu0 %v11126_v3, %s11836_s9 }
 0xf08   :  { %v11480_v47 = vpop.eup %11479 }
 0xf09   :  { %v3767_v56 = vmul.f32 %v11480_v47, %v11464_v57  ;;  %v11482_v1 = vpop.eup %11481 }
 0xf0a   :  { %v3768_v26 = vmul.f32 %v11482_v1, %v13574_v30 }
 0xf0b   :  { %v3770_v60 = vpack.c.bf16 %v3767_v56, %v3766_v4 }
 0xf0c   :  { %v3771_v46 = vpack.c.bf16 %v3768_v26, %v3768_v26 }
 0xf0d   :  { %9191 = vmatmul.msk.bf16.gmra.mxu3 %vm806_vm7, %v3770_v60 }
 0xf1d   :  { %9192 = vmatmul.msk.bf16.gmra.mxu3 %vm806_vm7, %v3771_v46 }
 0xf1f   :  { %v3483_v20 = vpop.f32.mrf.mxu3 }
 0xf27   :  { %v3485_v0 = vpop.f32.mrf.mxu3 }
 0xf2b   :  { %v3594_v42 = vpop.xlane.xlu2 %3593 }
 0xf2c   :  { %11483 = vrcp.f32 %v3594_v42 }
 0xf32   :  { %v11484_v23 = vpop.eup %11483 }
 0xf33   :  { %v3604_v14 = vmul.f32 %v11484_v23, %v11468_v38 }
 0xf35   :  { %v3607_v25 = vpack.c.bf16 %v3604_v14, %v3604_v14 }
 0xf37   :  { %9186 = vmatmul.msk.bf16.gmra.mxu1 %vm806_vm7, %v3607_v25 }
 0xf4d   :  { %v3801_v17 = vpop.f32.mrf.mxu3 }
 0xf55   :  { %v3803_v57 = vpop.f32.mrf.mxu3 }
 0xf56   :  { %v11121_v34 = vpack.i.bf16 %v3803_v57, %v3801_v17 }
 0xf57   :  { %v3637_v18 = vpop.f32.mrf.mxu1 }
 0xf58   :  { %11122 = vrot.lane.b32.xlu2 %v11121_v34, %s11835_s5 }
 0xf5f   :  { %v3639_v30 = vpop.f32.mrf.mxu1 }
 0xf60   :  { %v11116_v27 = vpack.i.bf16 %v3639_v30, %v3637_v18  ;;  %3828 = vrot.lane.b32.xlu2 %v3483_v20, %s11836_s9 }
 0xf62   :  { %11117 = vrot.lane.b32.xlu1 %v11116_v27, %s11837_s13 }
 0xf66   :  { %v11113_v22 = vpop.permute.xlu0 %11112 }
 0xf67   :  { %v3642_v29 = vpop.f32.mrf.mxu1  ;;  %v11115_v8 = vunpack.i.h.bf16 %v11113_v22  ;;  %v11114_v9 = vunpack.i.l.bf16 %v11113_v22 }
 0xf69   :  { %v3876_v43 = vsel %vm754_vm6, %v13568_v21, %v11115_v8  ;;  %v3875_v33 = vsel %vm754_vm6, %v13562_v58, %v11114_v9 }
 0xf6f   :  { %v3644_v53 = vpop.f32.mrf.mxu1 }
 0xf70   :  { %v11131_v13 = vpack.i.bf16 %v3644_v53, %v3642_v29  ;;  %v11183_v29 = vld [vmem:[%s11923_s20 + $0x1] ss:$0 sm:$0xff]  ;;  %s15201_s20 = sld [smem:[#allocation9_spill]] }
 0xf72   :  { %11132 = vrot.lane.b32.xlu0 %v11131_v13, %s11837_s13 }
 0xf77   :  { %v11128_v4 = vpop.permute.xlu0 %11127 }
 0xf78   :  { %v11130_v35 = vunpack.i.h.bf16 %v11128_v4  ;;  %v11129_v60 = vunpack.i.l.bf16 %v11128_v4  ;;  %v10779_v4 = vld [vmem:[%s11938_s8 + $0x1ec] sm:$0xf0] }
 0xf7a   :  { %v3878_v58 = vsel %vm754_vm6, %v13580_v50, %v11130_v35  ;;  %v3877_v46 = vsel %vm754_vm6, %v13572_v40, %v11129_v60  ;;  %v9393_v60 = vld [vmem:[%s11938_s8 + $0x1f0] sm:$0xf0] }
 0xf90   :  { %v3806_v49 = vpop.f32.mrf.mxu3 }
 0xf98   :  { %v3808_v32 = vpop.f32.mrf.mxu3 }
 0xf99   :  { %v11136_v12 = vpack.i.bf16 %v3808_v32, %v3806_v49 }
 0xf9b   :  { %11137 = vrot.lane.b32.xlu1 %v11136_v12, %s11835_s5 }
 0xfa0   :  { %v3811_v38 = vpop.f32.mrf.mxu3 }
 0xfa3   :  { %3868 = vrot.lane.b32.xlu1 %v3811_v38, %s11835_s5 }
 0xfa8   :  { %v3813_v24 = vpop.f32.mrf.mxu3 }
 0xfb2   :  { %v11123_v55 = vpop.permute.xlu2 %11122 }
 0xfb3   :  { %v11125_v44 = vunpack.i.h.bf16 %v11123_v55  ;;  %v11124_v59 = vunpack.i.l.bf16 %v11123_v55 }
 0xfb4   :  { %v3647_v19 = vpop.f32.mrf.mxu1 }
 0xfb5   :  { %3848 = vrot.lane.b32.xlu0 %v3647_v19, %s11837_s13 }
 0xfba   :  { %v3829_v57 = vpop.permute.xlu2 %3828 }
 0xfbb   :  { %v3879_v50 = vsel %vm754_vm6, %v13582_v10, %v3829_v57  ;;  %v9383_v57 = vld [vmem:[%s11938_s8 + $0x1c8] sm:$0xf] }
 0xfbc   :  { %v3649_v51 = vpop.f32.mrf.mxu1 }
 0xfd4   :  { %v11118_v31 = vpop.permute.xlu1 %11117 }
 0xfd5   :  { %v11120_v62 = vunpack.i.h.bf16 %v11118_v31  ;;  %v11119_v36 = vunpack.i.l.bf16 %v11118_v31 }
 0xfd7   :  { %v3881_v5 = vsel %vm1470_vm9, %v3876_v43, %v11120_v62  ;;  %v3880_v6 = vsel %vm1470_vm9, %v3875_v33, %v11119_v36 }
 0xfd8   :  { %v3886_v3 = vsel %vm15157_vm8, %v3881_v5, %v11125_v44  ;;  %v3885_v41 = vsel %vm15158_vm11, %v3880_v6, %v11124_v59 }
 0xfd9   :  { %v3907_v47 = vpack.c.bf16 %v3886_v3, %v3885_v41 }
 0xfdb   :  { %3966 = vmatmul.bf16.vlgmr.msra.gmra.mxu0 %v3907_v47  ;;  %v9391_v47 = vld [vmem:[%s11938_s8 + $0x1e0] sm:$0xf] }
 0xfdc   :  { %v9392_v35 = vor.u32 %v10779_v4, %v9391_v47  ;;  %v10761_v47 = vld [vmem:[%s11938_s8 + $0x164] sm:$0xf] }
 0xfde   :  { %4325 = vmatpush.bf16.msrb.mxu1 %v9392_v35  ;;  %v9335_v35 = vld [vmem:[%s11938_s8 + $0x168] sm:$0xf] }
 0xfe4   :  { %v11133_v56 = vpop.permute.xlu0 %11132 }
 0xfe5   :  { %v11135_v21 = vunpack.i.h.bf16 %v11133_v56  ;;  %v11134_v1 = vunpack.i.l.bf16 %v11133_v56  ;;  %v10777_v56 = vld [vmem:[%s11938_s8 + $0x1e4] sm:$0xf] }
 0xfe7   :  { %v3883_v42 = vsel %vm1470_vm9, %v3878_v58, %v11135_v21  ;;  %v3882_v23 = vsel %vm1470_vm9, %v3877_v46, %v11134_v1  ;;  %v9399_v21 = vld [vmem:[%s11938_s8 + $0x1e8] sm:$0xf]  ;;  %v10780_v1 = vld [vmem:[%s11938_s8 + $0x1f4] sm:$0xf0]  ;;  %v10778_v46 = vld [vmem:[%s11938_s8 + $0x1ec] sm:$0xf] }
 0xfe8   :  { %v9400_v58 = vor.u32 %v10780_v1, %v9399_v21 }
 0xfea   :  { %4371 = vmatpush.bf16.msra.mxu3 %v9400_v58  ;;  %v10762_v58 = vld [vmem:[%s11938_s8 + $0x16c] sm:$0xf] }
0x100d   :  { %v11138_v26 = vpop.permute.xlu1 %11137 }
0x100e   :  { %v11140_v20 = vunpack.i.h.bf16 %v11138_v26  ;;  %v11139_v0 = vunpack.i.l.bf16 %v11138_v26  ;;  %v9396_v26 = vor.u32 %v10777_v56, %v9393_v60  ;;  %v9329_v56 = vld [vmem:[%s11938_s8 + $0x170] sm:$0xf0]  ;;  %v10764_v60 = vld [vmem:[%s11938_s8 + $0x174] sm:$0xf0] }
0x100f   :  { %v9332_v1 = vor.u32 %v10761_v47, %v9329_v56 }
0x1010   :  { %v3887_v14 = vsel %vm15159_vm4, %v3882_v23, %v11139_v0  ;;  %v3888_v25 = vsel %vm15160_vm14, %v3883_v42, %v11140_v20  ;;  %v9401_v20 = vld [vmem:[%s11938_s8 + $0x1f8] sm:$0xf0]  ;;  %4348 = vmatpush.bf16.msra.mxu2 %v9396_v26  ;;  %v9375_v42 = vld [vmem:[%s11938_s8 + $0x1c0] sm:$0xf]  ;;  %v10775_v23 = vld [vmem:[%s11938_s8 + $0x1cc] sm:$0xf0]  ;;  %v9336_v26 = vor.u32 %v10764_v60, %v9335_v35 }
0x1011   :  { %v3908_v17 = vpack.c.bf16 %v3888_v25, %v3887_v14  ;;  %v9404_v0 = vor.u32 %v10778_v46, %v9401_v20  ;;  %v10773_v14 = vld [vmem:[%s11938_s8 + $0x1c4] sm:$0xf]  ;;  %v9376_v25 = vor.u32 %v10775_v23, %v9375_v42  ;;  %v9337_v46 = vld [vmem:[%s11938_s8 + $0x178] sm:$0xf0]  ;;  %v9311_v20 = vld [vmem:[%s11938_s8 + $0x140] sm:$0xf] }
0x1012   :  { %v9340_v42 = vor.u32 %v10762_v58, %v9337_v46  ;;  %v10759_v23 = vld [vmem:[%s11938_s8 + $0x14c] sm:$0xf0]  ;;  %v13774_v46 = vld [vmem:[%s15122_s17 + $0x1] ss:$0 sm:$0xff]  ;;  %s11776_s17 = scalar_lea.hbm %s12058_s4, 2 }
0x1013   :  { %3971 = vmatmul.bf16.gmra.mxu0 %v3908_v17  ;;  %v9377_v17 = vld [vmem:[%s11938_s8 + $0x1d0] sm:$0xf0]  ;;  %4326 = vmatpush.bf16.msrb.mxu1 %v9376_v25 }
0x1014   :  { %4394 = vmatpush.bf16.msrb.mxu0 %v9404_v0  ;;  %v9313_v25 = vld [vmem:[%s11938_s8 + $0x150] sm:$0xf0] }
0x1015   :  { %v3869_v18 = vpop.permute.xlu1 %3868 }
0x1027   :  { %v3849_v34 = vpop.permute.xlu0 %3848 }
0x1028   :  { %v3884_v40 = vsel %vm1470_vm9, %v3879_v50, %v3849_v34  ;;  %v10776_v50 = vld [vmem:[%s11938_s8 + $0x1d4] sm:$0xf0]  ;;  %v9380_v34 = vor.u32 %v10773_v14, %v9377_v17  ;;  %v10757_v14 = vld [vmem:[%s11938_s8 + $0x144] sm:$0xf]  ;;  %v9319_v17 = vld [vmem:[%s11938_s8 + $0x148] sm:$0xf] }
0x1029   :  { %v3889_v30 = vsel %vm15161_vm1, %v3884_v40, %v3869_v18  ;;  %v9384_v18 = vor.u32 %v10776_v50, %v9383_v57  ;;  %v10774_v40 = vld [vmem:[%s11938_s8 + $0x1cc] sm:$0xf]  ;;  %v10760_v57 = vld [vmem:[%s11938_s8 + $0x154] sm:$0xf0] }
0x102a   :  { %v3909_v27 = vpack.c.bf16 %v3889_v30, %v3889_v30  ;;  %v9385_v30 = vld [vmem:[%s11938_s8 + $0x1d8] sm:$0xf0]  ;;  %4349 = vmatpush.bf16.msra.mxu2 %v9380_v34  ;;  %v10758_v50 = vld [vmem:[%s11938_s8 + $0x14c] sm:$0xf] }
0x102b   :  { %4372 = vmatpush.bf16.msra.mxu3 %v9384_v18 }
0x102c   :  { %3976 = vmatmul.bf16.gmra.mxu0 %v3909_v27  ;;  %v9388_v27 = vor.u32 %v10774_v40, %v9385_v30  ;;  %v9312_v40 = vor.u32 %v10759_v23, %v9311_v20  ;;  %v9321_v30 = vld [vmem:[%s11938_s8 + $0x158] sm:$0xf0] }
0x102e   :  { %4395 = vmatpush.bf16.msrb.mxu0 %v9388_v27 }
0x1058   :  { %v3967_v53 = vpop.f32.mrf.mxu0 }
0x1059   :  { %v3981_v13 = vadd.f32 %v3967_v53, %v13160_v2  ;;  %v9359_v53 = vld [vmem:[%s11938_s8 + $0x1a0] sm:$0xf] }
0x105b   :  { %v13640_v49 = vadd.f32 %v11183_v29, %v3981_v13  ;;  %v10771_v13 = vld [vmem:[%s11938_s8 + $0x1ac] sm:$0xf0] }
0x105d   :  { %4000 = vadd.xlane.f32.xlu2 %v13640_v49 }
0x1060   :  { %v3969_v32 = vpop.f32.mrf.mxu0 }
0x1061   :  { %v3982_v12 = vadd.f32 %v3969_v32, %v13164_v37  ;;  %v10769_v32 = vld [vmem:[%s11938_s8 + $0x1a4] sm:$0xf] }
0x1063   :  { %v13644_v10 = vadd.f32 %v11183_v29, %v3982_v12 }
0x1065   :  { %4002 = vadd.xlane.f32.xlu0 %v13644_v10 }
0x1090   :  { %v3972_v15 = vpop.f32.mrf.mxu0 }
0x1091   :  { %v3983_v54 = vadd.f32 %v3972_v15, %v13168_v7  ;;  %v9360_v15 = vor.u32 %v10771_v13, %v9359_v53  ;;  %v9320_v53 = vor.u32 %v10760_v57, %v9319_v17  ;;  %v9295_v13 = vld [vmem:[%s11938_s8 + $0x120] sm:$0xf] }
0x1093   :  { %v13648_v38 = vadd.f32 %v11183_v29, %v3983_v54  ;;  %v9361_v54 = vld [vmem:[%s11938_s8 + $0x1b0] sm:$0xf0]  ;;  %4327 = vmatpush.bf16.msrb.mxu1 %v9360_v15  ;;  %v9324_v15 = vor.u32 %v10758_v50, %v9321_v30 }
0x1095   :  { %4004 = vadd.xlane.f32.xlu1 %v13648_v38 }
0x1098   :  { %v3974_v39 = vpop.f32.mrf.mxu0 }
0x1099   :  { %v3984_v2 = vadd.f32 %v3974_v39, %v13172_v28  ;;  %v9367_v39 = vld [vmem:[%s11938_s8 + $0x1a8] sm:$0xf] }
0x109b   :  { %v13652_v61 = vadd.f32 %v11183_v29, %v3984_v2  ;;  %v10772_v2 = vld [vmem:[%s11938_s8 + $0x1b4] sm:$0xf0] }
0x109d   :  { %4006 = vadd.xlane.f32.xlu2 %v13652_v61 }
0x10a9   :  { %v3977_v24 = vpop.f32.mrf.mxu0 }
0x10aa   :  { %v3985_v37 = vadd.f32 %v3977_v24, %v13176_v63  ;;  %v9364_v24 = vor.u32 %v10769_v32, %v9361_v54  ;;  %v10755_v32 = vld [vmem:[%s11938_s8 + $0x12c] sm:$0xf0]  ;;  %v9297_v54 = vld [vmem:[%s11938_s8 + $0x130] sm:$0xf0] }
0x10ac   :  { %v13656_v11 = vadd.f32 %v11183_v29, %v3985_v37  ;;  %v9368_v37 = vor.u32 %v10772_v2, %v9367_v39  ;;  %4350 = vmatpush.bf16.msra.mxu2 %v9364_v24  ;;  %v9303_v39 = vld [vmem:[%s11938_s8 + $0x128] sm:$0xf]  ;;  %v10756_v2 = vld [vmem:[%s11938_s8 + $0x134] sm:$0xf0] }
0x10ae   :  { %v4008_v48 = vsel %vm265_vm2, %v13656_v11, 0.0  ;;  %4373 = vmatpush.bf16.msra.mxu3 %v9368_v37  ;;  %v10754_v37 = vld [vmem:[%s11938_s8 + $0x12c] sm:$0xf] }
0x10af   :  { %4009 = vadd.xlane.f32.xlu0 %v4008_v48  ;;  %v10770_v48 = vld [vmem:[%s11938_s8 + $0x1ac] sm:$0xf] }
0x10b1   :  { %v3979_v7 = vpop.f32.mrf.mxu0 }
0x10b2   :  { %v9369_v7 = vld [vmem:[%s11938_s8 + $0x1b8] sm:$0xf0] }
0x10d0   :  { %v4001_v16 = vpop.xlane.xlu2 %4000 }
0x10d1   :  { %v4011_v19 = vmul.f32 %v4001_v16, %v12082_v45 }
0x10d3   :  { %v13662_v52 = vsub.f32 %v13640_v49, %v4011_v19  ;;  %v9372_v19 = vor.u32 %v10770_v48, %v9369_v7  ;;  %v9305_v48 = vld [vmem:[%s11938_s8 + $0x138] sm:$0xf0]  ;;  %v9296_v7 = vor.u32 %v10755_v32, %v9295_v13 }
0x10d5   :  { %v4021_v28 = vmul.f32 %v13662_v52, %v13662_v52  ;;  %4396 = vmatpush.bf16.msrb.mxu0 %v9372_v19  ;;  %v9279_v19 = vld [vmem:[%s11938_s8 + $0x100] sm:$0xf] }
0x10d7   :  { %4026 = vadd.xlane.f32.xlu1 %v4021_v28  ;;  %v9343_v28 = vld [vmem:[%s11938_s8 + $0x180] sm:$0xf] }
0x10d8   :  { %v4003_v51 = vpop.xlane.xlu0 %4002 }
0x10d9   :  { %v4012_v63 = vmul.f32 %v4003_v51, %v12082_v45  ;;  %v10767_v51 = vld [vmem:[%s11938_s8 + $0x18c] sm:$0xf0] }
0x10db   :  { %v13668_v22 = vsub.f32 %v13644_v10, %v4012_v63  ;;  %v9344_v63 = vor.u32 %v10767_v51, %v9343_v28  ;;  %v10751_v28 = vld [vmem:[%s11938_s8 + $0x10c] sm:$0xf0] }
0x10dd   :  { %v4022_v8 = vmul.f32 %v13668_v22, %v13668_v22  ;;  %4328 = vmatpush.bf16.msrb.mxu1 %v9344_v63 }
0x10df   :  { %4028 = vadd.xlane.f32.xlu2 %v4022_v8  ;;  %v10765_v8 = vld [vmem:[%s11938_s8 + $0x184] sm:$0xf] }
0x1108   :  { %v4005_v9 = vpop.xlane.xlu1 %4004 }
0x1109   :  { %v4013_v55 = vmul.f32 %v4005_v9, %v12082_v45  ;;  %v9345_v9 = vld [vmem:[%s11938_s8 + $0x190] sm:$0xf0] }
0x110b   :  { %v13674_v31 = vsub.f32 %v13648_v38, %v4013_v55  ;;  %v9351_v55 = vld [vmem:[%s11938_s8 + $0x188] sm:$0xf] }
0x110d   :  { %v4023_v62 = vmul.f32 %v13674_v31, %v13674_v31 }
0x110f   :  { %4030 = vadd.xlane.f32.xlu0 %v4023_v62  ;;  %v9348_v62 = vor.u32 %v10765_v8, %v9345_v9  ;;  %v9304_v8 = vor.u32 %v10756_v2, %v9303_v39  ;;  %v10749_v9 = vld [vmem:[%s11938_s8 + $0x104] sm:$0xf] }
0x1110   :  { %v4007_v36 = vpop.xlane.xlu2 %4006 }
0x1111   :  { %v4014_v43 = vmul.f32 %v4007_v36, %v12082_v45  ;;  %v10768_v36 = vld [vmem:[%s11938_s8 + $0x194] sm:$0xf0]  ;;  %4351 = vmatpush.bf16.msra.mxu2 %v9348_v62  ;;  %v9308_v62 = vor.u32 %v10754_v37, %v9305_v48 }
0x1113   :  { %v13680_v33 = vsub.f32 %v13652_v61, %v4014_v43  ;;  %v10766_v43 = vld [vmem:[%s11938_s8 + $0x18c] sm:$0xf] }
0x1115   :  { %v4024_v44 = vmul.f32 %v13680_v33, %v13680_v33  ;;  %4352 = vmatpush.bf16.msra.mxu2 %v9332_v1 }
0x1117   :  { %4032 = vadd.xlane.f32.xlu1 %v4024_v44  ;;  %v9353_v44 = vld [vmem:[%s11938_s8 + $0x198] sm:$0xf0] }
0x1122   :  { %v4010_v59 = vpop.xlane.xlu0 %4009 }
0x1123   :  { %v4015_v5 = vmul.f32 %v4010_v59, %v12082_v45  ;;  %v9352_v59 = vor.u32 %v10768_v36, %v9351_v55  ;;  %v9281_v55 = vld [vmem:[%s11938_s8 + $0x110] sm:$0xf0]  ;;  %v9287_v36 = vld [vmem:[%s11938_s8 + $0x108] sm:$0xf] }
0x1124   :  { %v9284_v47 = vor.u32 %v10749_v9, %v9281_v55 }
0x1125   :  { %v13686_v6 = vsub.f32 %v13656_v11, %v4015_v5  ;;  %v9356_v5 = vor.u32 %v10766_v43, %v9353_v44  ;;  %4374 = vmatpush.bf16.msra.mxu3 %v9352_v59  ;;  %v10752_v43 = vld [vmem:[%s11938_s8 + $0x114] sm:$0xf0]  ;;  %v10750_v59 = vld [vmem:[%s11938_s8 + $0x10c] sm:$0xf] }
0x1126   :  { %v9288_v35 = vor.u32 %v10752_v43, %v9287_v36 }
0x1127   :  { %v4025_v3 = vmul.f32 %v13686_v6, %v13686_v6  ;;  %4397 = vmatpush.bf16.msrb.mxu0 %v9356_v5  ;;  %v9289_v5 = vld [vmem:[%s11938_s8 + $0x118] sm:$0xf0] }
0x1128   :  { %v9292_v60 = vor.u32 %v10750_v59, %v9289_v5 }
0x1129   :  { %v4034_v41 = vsel %vm265_vm2, %v4025_v3, 0.0  ;;  %v9327_v3 = vld [vmem:[%s11938_s8 + $0x160] sm:$0xf]  ;;  %4375 = vmatpush.bf16.msra.mxu3 %v9336_v26 }
0x112a   :  { %4035 = vadd.xlane.f32.xlu2 %v4034_v41  ;;  %v10763_v41 = vld [vmem:[%s11938_s8 + $0x16c] sm:$0xf0] }
0x112b   :  { %v9328_v4 = vor.u32 %v10763_v41, %v9327_v3  ;;  %4398 = vmatpush.bf16.msrb.mxu0 %v9340_v42  ;;  %v9280_v41 = vor.u32 %v10751_v28, %v9279_v19  ;;  %v13779_v42 = vld [vmem:[%s15123_s21 + $0x1] ss:$0 sm:$0xff] }
0x112d   :  { %4329 = vmatpush.bf16.msrb.mxu1 %v9328_v4  ;;  %4376 = vmatpush.bf16.msra.mxu3 %v9320_v53 }
0x112f   :  { %4399 = vmatpush.bf16.msrb.mxu0 %v9324_v15 }
0x1131   :  { %4330 = vmatpush.bf16.msrb.mxu1 %v9312_v40  ;;  %4377 = vmatpush.bf16.msra.mxu3 %v9304_v8 }
0x1133   :  { %4400 = vmatpush.bf16.msrb.mxu0 %v9308_v62 }
0x1135   :  { %4331 = vmatpush.bf16.msrb.mxu1 %v9296_v7  ;;  %4378 = vmatpush.bf16.msra.mxu3 %v9288_v35 }
0x1137   :  { %4401 = vmatpush.bf16.msrb.mxu0 %v9292_v60  ;;  %v9276_v60 = vld [vmem:[%s15124_s14 + $0x4] sm:$0xf] }
0x1139   :  { %4332 = vmatpush.bf16.msrb.mxu1 %v9280_v41 }
0x114a   :  { %v4027_v29 = vpop.xlane.xlu1 %4026 }
0x114b   :  { %v4037_v12 = vmul.f32 %v4027_v29, %v12082_v45  ;;  %v9316_v29 = vor.u32 %v10757_v14, %v9313_v25 }
0x114d   :  { %v13716_v16 = vadd.f32 1e-05, %v4037_v12  ;;  %v10753_v12 = vld [vmem:[%s11938_s8 + $0x124] sm:$0xf]  ;;  %4353 = vmatpush.bf16.msra.mxu2 %v9316_v29  ;;  %s15187_s8 = sld [smem:[#allocation18_spill]] }
0x114e   :  { %v9300_v63 = vor.u32 %v10753_v12, %v9297_v54 }
0x114f   :  { %11485 = vrsqrt.f32 %v13716_v16  ;;  %vm4053_vm15 = vweird.f32 %v13716_v16 }
0x1151   :  { %4354 = vmatpush.bf16.msra.mxu2 %v9300_v63 }
0x1152   :  { %v4029_v21 = vpop.xlane.xlu2 %4028 }
0x1153   :  { %v4038_v0 = vmul.f32 %v4029_v21, %v12082_v45 }
0x1155   :  { %v13743_v34 = vpop.eup %11485  ;;  %v13745_v18 = vadd.f32 1e-05, %v4038_v0  ;;  %4355 = vmatpush.bf16.msra.mxu2 %v9284_v47 }
0x1156   :  { %v4048_v27 = vmul.f32 %v13743_v34, %v13716_v16  ;;  %vm4054_vm10 = vweird.f32 %v13743_v34 }
0x1157   :  { %11487 = vrsqrt.f32 %v13745_v18  ;;  %vm4055_vm3 = vmor %vm4053_vm15, %vm4054_vm10  ;;  %vm4063_vm12 = vweird.f32 %v13745_v18 }
0x1158   :  { %v4049_v24 = vmul.f32 %v13743_v34, %v4048_v27 }
0x115a   :  { %v4050_v51 = vmul.f32 0.5, %v4049_v24 }
0x115c   :  { %v4051_v44 = vsub.f32 1.5, %v4050_v51 }
0x115d   :  { %v11488_v3 = vpop.eup %11487 }
0x115e   :  { %v4052_v4 = vmul.f32 %v13743_v34, %v4051_v44  ;;  %v4058_v56 = vmul.f32 %v11488_v3, %v13745_v18  ;;  %vm4064_vm13 = vweird.f32 %v11488_v3 }
0x115f   :  { %vm4065_vm5 = vmor %vm4063_vm12, %vm4064_vm13 }
0x1160   :  { %v4059_v21 = vmul.f32 %v11488_v3, %v4058_v56  ;;  %v4056_v1 = vsel %vm4055_vm3, %v13743_v34, %v4052_v4 }
0x1161   :  { %v4097_v20 = vmul.f32 %v4056_v1, %v13662_v52  ;;  %v13801_v1 = vperm.slane %v9276_v60, 3 }
0x1162   :  { %v4060_v26 = vmul.f32 0.5, %v4059_v21  ;;  %v13799_v21 = vperm.slane %v9276_v60, 0 }
0x1163   :  { %v4105_v23 = vmul.f32 %v13774_v46, %v4097_v20 }
0x1164   :  { %v4061_v58 = vsub.f32 1.5, %v4060_v26  ;;  %v10788_v26 = vld [vmem:[%s15125_s1 + $0x138] sm:$0xff] }
0x1165   :  { %v4113_v17 = vadd.f32 %v13779_v42, %v4105_v23  ;;  %5106 = vmatpush.bf16.msra.mxu1 %v10788_v26  ;;  %v10787_v23 = vld [vmem:[%s15125_s1 + $0x130] sm:$0xff] }
0x1166   :  { %v4062_v0 = vmul.f32 %v11488_v3, %v4061_v58  ;;  %v10812_v58 = vld [vmem:[%s15125_s1 + $0x1f8] sm:$0xff] }
0x1167   :  { %5175 = vmatpush.bf16.msra.mxu0 %v10812_v58 }
0x1168   :  { %v4066_v16 = vsel %vm4065_vm5, %v11488_v3, %v4062_v0 }
0x1169   :  { %v4098_v14 = vmul.f32 %v4066_v16, %v13668_v22  ;;  %5107 = vmatpush.bf16.msra.mxu1 %v10787_v23 }
0x116b   :  { %v4106_v25 = vmul.f32 %v13774_v46, %v4098_v14  ;;  %v10811_v14 = vld [vmem:[%s15125_s1 + $0x1f0] sm:$0xff] }
0x116c   :  { %5176 = vmatpush.bf16.msra.mxu0 %v10811_v14 }
0x116d   :  { %v4114_v57 = vadd.f32 %v13779_v42, %v4106_v25 }
0x116f   :  { %v4151_v50 = vpack.c.bf16 %v4114_v57, %v4113_v17  ;;  %v13817_v17 = vperm.slane %v9276_v60, 2 }
0x1171   :  { %4333 = vmatmul.bf16.vlgmr.msrb.gmra.mxu1 %v4151_v50  ;;  %4356 = vmatmul.bf16.vlgmr.msra.gmra.mxu2 %v4151_v50 }
0x1172   :  { %4379 = vmatmul.bf16.vlgmr.msra.gmra.mxu3 %v4151_v50  ;;  %4402 = vmatmul.bf16.vlgmr.msrb.gmra.mxu0 %v4151_v50  ;;  %v10796_v50 = vld [vmem:[%s15125_s1 + $0x178] sm:$0xff] }
0x1173   :  { %5129 = vmatpush.bf16.msrb.mxu2 %v10796_v50  ;;  %v10806_v50 = vld [vmem:[%s15125_s1 + $0x1c8] sm:$0xff] }
0x1182   :  { %v4031_v52 = vpop.xlane.xlu0 %4030 }
0x1183   :  { %v4039_v34 = vmul.f32 %v4031_v52, %v12082_v45  ;;  %v10804_v52 = vld [vmem:[%s15125_s1 + $0x1b8] sm:$0xff] }
0x1184   :  { %5152 = vmatpush.bf16.msrb.mxu3 %v10804_v52 }
0x1185   :  { %v4044_v18 = vadd.f32 1e-05, %v4039_v34 }
0x1187   :  { %11489 = vrsqrt.f32 %v4044_v18  ;;  %vm4073_vm11 = vweird.f32 %v4044_v18 }
0x118a   :  { %v4033_v40 = vpop.xlane.xlu1 %4032 }
0x118b   :  { %v4040_v30 = vmul.f32 %v4033_v40, %v12082_v45  ;;  %v5365_v40 = vld [vmem:[%s15162_s25 + $0x8] sm:$0xff] }
0x118c   :  { %5372 = vperm.xlu1 %11142, %v5365_v40  }
0x118d   :  { %v11490_v22 = vpop.eup %11489  ;;  %v4045_v27 = vadd.f32 1e-05, %v4040_v30  ;;  %v5364_v30 = vld [vmem:[%s15162_s25] sm:$0xff] }
0x118e   :  { %v4068_v29 = vmul.f32 %v11490_v22, %v4044_v18  ;;  %vm4074_vm8 = vweird.f32 %v11490_v22  ;;  %5369 = vperm.xlu0 %11141, %v5364_v30  }
0x118f   :  { %11491 = vrsqrt.f32 %v4045_v27  ;;  %vm4075_vm4 = vmor %vm4073_vm11, %vm4074_vm8  ;;  %vm4083_vm1 = vweird.f32 %v4045_v27 }
0x1190   :  { %v4069_v53 = vmul.f32 %v11490_v22, %v4068_v29  ;;  %v10786_v29 = vld [vmem:[%s15125_s1 + $0x128] sm:$0xff] }
0x1191   :  { %5108 = vmatpush.bf16.msra.mxu1 %v10786_v29  ;;  %v10791_v29 = vld [vmem:[%s15125_s1 + $0x150] sm:$0xff] }
0x1192   :  { %v4070_v13 = vmul.f32 0.5, %v4069_v53  ;;  %v10810_v53 = vld [vmem:[%s15125_s1 + $0x1e8] sm:$0xff] }
0x1193   :  { %5177 = vmatpush.bf16.msra.mxu0 %v10810_v53 }
0x1194   :  { %v4071_v32 = vsub.f32 1.5, %v4070_v13 }
0x1195   :  { %v11492_v12 = vpop.eup %11491 }
0x1196   :  { %v4072_v15 = vmul.f32 %v11490_v22, %v4071_v32  ;;  %v4078_v54 = vmul.f32 %v11492_v12, %v4045_v27  ;;  %vm4084_vm14 = vweird.f32 %v11492_v12 }
0x1197   :  { %vm4085_vm10 = vmor %vm4083_vm1, %vm4084_vm14 }
0x1198   :  { %v4079_v39 = vmul.f32 %v11492_v12, %v4078_v54  ;;  %v4076_v2 = vsel %vm4075_vm4, %v11490_v22, %v4072_v15 }
0x1199   :  { %v4099_v48 = vmul.f32 %v4076_v2, %v13674_v31  ;;  %v10803_v2 = vld [vmem:[%s15125_s1 + $0x1b0] sm:$0xff] }
0x119a   :  { %v4080_v24 = vmul.f32 0.5, %v4079_v39  ;;  %v10795_v39 = vld [vmem:[%s15125_s1 + $0x170] sm:$0xff]  ;;  %5153 = vmatpush.bf16.msrb.mxu3 %v10803_v2  ;;  %v10805_v2 = vld [vmem:[%s15125_s1 + $0x1c0] sm:$0xff] }
0x119b   :  { %v4107_v9 = vmul.f32 %v13774_v46, %v4099_v48  ;;  %5130 = vmatpush.bf16.msrb.mxu2 %v10795_v39  ;;  %v10781_v39 = vld [vmem:[%s15125_s1 + $0x100] sm:$0xff] }
0x119c   :  { %v4081_v37 = vsub.f32 1.5, %v4080_v24 }
0x119d   :  { %v4036_v7 = vpop.xlane.xlu2 %4035  ;;  %v4115_v62 = vadd.f32 %v13779_v42, %v4107_v9  ;;  %v10794_v9 = vld [vmem:[%s15125_s1 + $0x168] sm:$0xff] }
0x119e   :  { %v4082_v19 = vmul.f32 %v11492_v12, %v4081_v37  ;;  %v4041_v28 = vmul.f32 %v4036_v7, %v12082_v45 }
0x119f   :  { %5131 = vmatpush.bf16.msrb.mxu2 %v10794_v9 }
0x11a0   :  { %v4086_v51 = vsel %vm4085_vm10, %v11492_v12, %v4082_v19  ;;  %v4046_v63 = vadd.f32 1e-05, %v4041_v28  ;;  %v10785_v19 = vld [vmem:[%s15125_s1 + $0x120] sm:$0xff] }
0x11a1   :  { %v4100_v8 = vmul.f32 %v4086_v51, %v13680_v33  ;;  %v10809_v28 = vld [vmem:[%s15125_s1 + $0x1e0] sm:$0xff]  ;;  %5109 = vmatpush.bf16.msra.mxu1 %v10785_v19 }
0x11a2   :  { %11493 = vrsqrt.f32 %v4046_v63  ;;  %vm4093_vm3 = vweird.f32 %v4046_v63  ;;  %5178 = vmatpush.bf16.msra.mxu0 %v10809_v28  ;;  %v10790_v28 = vld [vmem:[%s15125_s1 + $0x148] sm:$0xff] }
0x11a3   :  { %v4108_v55 = vmul.f32 %v13774_v46, %v4100_v8 }
0x11a5   :  { %v4116_v36 = vadd.f32 %v13779_v42, %v4108_v55  ;;  %v10802_v55 = vld [vmem:[%s15125_s1 + $0x1a8] sm:$0xff] }
0x11a6   :  { %5154 = vmatpush.bf16.msrb.mxu3 %v10802_v55 }
0x11a7   :  { %v4152_v31 = vpack.c.bf16 %v4116_v36, %v4115_v62 }
0x11a8   :  { %v11494_v43 = vpop.eup %11493 }
0x11a9   :  { %v4088_v44 = vmul.f32 %v11494_v43, %v4046_v63  ;;  %4338 = vmatmul.bf16.gmra.mxu1 %v4152_v31  ;;  %4361 = vmatmul.bf16.gmra.mxu2 %v4152_v31  ;;  %vm4094_vm15 = vweird.f32 %v11494_v43 }
0x11aa   :  { %4384 = vmatmul.bf16.gmra.mxu3 %v4152_v31  ;;  %4407 = vmatmul.bf16.gmra.mxu0 %v4152_v31  ;;  %vm4095_vm13 = vmor %vm4093_vm3, %vm4094_vm15 }
0x11ab   :  { %v4089_v59 = vmul.f32 %v11494_v43, %v4088_v44 }
0x11ad   :  { %v4090_v5 = vmul.f32 0.5, %v4089_v59 }
0x11af   :  { %v4091_v33 = vsub.f32 1.5, %v4090_v5 }
0x11b1   :  { %v4092_v3 = vmul.f32 %v11494_v43, %v4091_v33  ;;  %v10784_v33 = vld [vmem:[%s15125_s1 + $0x118] sm:$0xff] }
0x11b2   :  { %5110 = vmatpush.bf16.msra.mxu1 %v10784_v33 }
0x11b3   :  { %v4096_v41 = vsel %vm4095_vm13, %v11494_v43, %v4092_v3  ;;  %v10808_v3 = vld [vmem:[%s15125_s1 + $0x1d8] sm:$0xff] }
0x11b4   :  { %v4101_v47 = vmul.f32 %v4096_v41, %v13686_v6  ;;  %5179 = vmatpush.bf16.msra.mxu0 %v10808_v3  ;;  %v10793_v41 = vld [vmem:[%s15125_s1 + $0x160] sm:$0xff] }
0x11b5   :  { %5132 = vmatpush.bf16.msrb.mxu2 %v10793_v41  ;;  %v10789_v41 = vld [vmem:[%s15125_s1 + $0x140] sm:$0xff] }
0x11b6   :  { %v4109_v4 = vmul.f32 %v13774_v46, %v4101_v47  ;;  %v10801_v47 = vld [vmem:[%s15125_s1 + $0x1a0] sm:$0xff] }
0x11b7   :  { %5155 = vmatpush.bf16.msrb.mxu3 %v10801_v47  ;;  %v10797_v47 = vld [vmem:[%s15125_s1 + $0x180] sm:$0xff] }
0x11b8   :  { %v4117_v56 = vadd.f32 %v13779_v42, %v4109_v4  ;;  %v13812_v42 = vperm.slane %v9276_v60, 1  ;;  %v10807_v60 = vld [vmem:[%s15125_s1 + $0x1d0] sm:$0xff] }
0x11b9   :  { %5180 = vmatpush.bf16.msra.mxu0 %v10807_v60 }
0x11ba   :  { %v4153_v35 = vpack.c.bf16 %v4117_v56, %v4117_v56 }
0x11bc   :  { %4343 = vmatmul.bf16.gmra.mxu1 %v4153_v35  ;;  %4366 = vmatmul.bf16.gmra.mxu2 %v4153_v35 }
0x11bd   :  { %4389 = vmatmul.bf16.gmra.mxu3 %v4153_v35  ;;  %4412 = vmatmul.bf16.gmra.mxu0 %v4153_v35  ;;  %v10783_v35 = vld [vmem:[%s15125_s1 + $0x110] sm:$0xff] }
0x11be   :  { %5111 = vmatpush.bf16.msra.mxu1 %v10783_v35  ;;  %5181 = vmatpush.bf16.msra.mxu0 %v10806_v50 }
0x11c2   :  { %5182 = vmatpush.bf16.msra.mxu0 %v10805_v2 }
0x11ee   :  { %v4334_v6 = vpop.f32.mrf.mxu1 }
0x11ef   :  { %v13806_v46 = vadd.f32 %v4334_v6, %v13799_v21  ;;  %v4403_v20 = vpop.f32.mrf.mxu0  ;;  %v10792_v6 = vld [vmem:[%s15125_s1 + $0x158] sm:$0xff] }
0x11f0   :  { %v13809_v0 = vadd.f32 %v4403_v20, %v13801_v1  ;;  %v10800_v20 = vld [vmem:[%s15125_s1 + $0x198] sm:$0xff]  ;;  %5133 = vmatpush.bf16.msrb.mxu2 %v10792_v6 }
0x11f1   :  { %v9405_v16 = vmul.f32 -1.702, %v13806_v46  ;;  %5156 = vmatpush.bf16.msrb.mxu3 %v10800_v20 }
0x11f2   :  { %v9408_v25 = vmul.f32 -1.702, %v13809_v0 }
0x11f3   :  { %v4457_v57 = vmul.f32 1.442695, %v9405_v16 }
0x11f4   :  { %v4463_v34 = vmul.f32 1.442695, %v9408_v25  ;;  %v4357_v18 = vpop.f32.mrf.mxu2  ;;  %5134 = vmatpush.bf16.msrb.mxu2 %v10791_v29 }
0x11f5   :  { %11495 = vpow2.f32 %v4457_v57  ;;  %v13824_v22 = vadd.f32 %v4357_v18, %v13812_v42  ;;  %v4380_v27 = vpop.f32.mrf.mxu3  ;;  %v10782_v57 = vld [vmem:[%s15125_s1 + $0x108] sm:$0xff] }
0x11f6   :  { %11497 = vpow2.f32 %v4463_v34  ;;  %v13829_v13 = vadd.f32 %v4380_v27, %v13817_v17  ;;  %v4336_v32 = vpop.f32.mrf.mxu1  ;;  %5112 = vmatpush.bf16.msra.mxu1 %v10782_v57 }
0x11f7   :  { %v9406_v12 = vmul.f32 -1.702, %v13824_v22  ;;  %v13833_v15 = vadd.f32 %v4336_v32, %v13799_v21  ;;  %v4405_v54 = vpop.f32.mrf.mxu0  ;;  %v10799_v32 = vld [vmem:[%s15125_s1 + $0x190] sm:$0xff] }
0x11f8   :  { %v9407_v24 = vmul.f32 -1.702, %v13829_v13  ;;  %v13839_v37 = vadd.f32 %v4405_v54, %v13801_v1  ;;  %5157 = vmatpush.bf16.msrb.mxu3 %v10799_v32  ;;  %5135 = vmatpush.bf16.msrb.mxu2 %v10790_v28 }
0x11f9   :  { %v4459_v48 = vmul.f32 1.442695, %v9406_v12  ;;  %v9409_v7 = vmul.f32 -1.702, %v13833_v15 }
0x11fa   :  { %v9412_v51 = vmul.f32 -1.702, %v13839_v37  ;;  %v4461_v59 = vmul.f32 1.442695, %v9407_v24  ;;  %5113 = vmatpush.bf16.msra.mxu1 %v10781_v39 }
0x11fb   :  { %v11496_v63 = vpop.eup %11495  ;;  %11499 = vpow2.f32 %v4459_v48  ;;  %v4465_v8 = vmul.f32 1.442695, %v9409_v7 }
0x11fc   :  { %v11498_v62 = vpop.eup %11497  ;;  %v13847_v36 = vadd.f32 1.0, %v11496_v63  ;;  %v4471_v31 = vmul.f32 1.442695, %v9412_v51  ;;  %v4359_v43 = vpop.f32.mrf.mxu2  ;;  %v10798_v51 = vld [vmem:[%s15125_s1 + $0x188] sm:$0xff]  ;;  %5136 = vmatpush.bf16.msrb.mxu2 %v10789_v41 }
0x11fd   :  { %v13849_v44 = vadd.f32 1.0, %v11498_v62  ;;  %11501 = vpow2.f32 %v4465_v8  ;;  %v13852_v5 = vadd.f32 %v4359_v43, %v13812_v42  ;;  %v4382_v27 = vpop.f32.mrf.mxu3  ;;  %5158 = vmatpush.bf16.msrb.mxu3 %v10798_v51 }
0x11fe   :  { %11503 = vrcp.f32 %v13847_v36  ;;  %v13893_v7 = vadd.f32 %v4382_v27, %v13817_v17  ;;  %v4526_v19 = vand.u32 2147483647, %v13847_v36  ;;  %v4528_v63 = vand.u32 2147483648, %v13847_v36 }
0x11ff   :  { %11505 = vrcp.f32 %v13849_v44  ;;  %v9410_v4 = vmul.f32 -1.702, %v13852_v5  ;;  %v4571_v8 = vand.u32 2147483647, %v13849_v44  ;;  %v4573_v43 = vand.u32 2147483648, %v13849_v44 }
0x1200   :  { %11507 = vpow2.f32 %v4471_v31  ;;  %vm4522_vm5 = vweird.f32 %v13847_v36  ;;  %vm13910_vm8 = vcmp.eq.f32.partialorder %v4526_v19, 8.507059e+37  ;;  %vm4567_vm11 = vweird.f32 %v13849_v44 }
0x1201   :  { %v11500_v56 = vpop.eup %11499  ;;  %11509 = vpow2.f32 %v4461_v59  ;;  %v4467_v23 = vmul.f32 1.442695, %v9410_v4  ;;  %v9411_v59 = vmul.f32 -1.702, %v13893_v7  ;;  %vm13924_vm1 = vcmp.eq.f32.partialorder %v4571_v8, 8.507059e+37  ;;  %5159 = vmatpush.bf16.msrb.mxu3 %v10797_v47 }
0x1202   :  { %v13863_v26 = vadd.f32 1.0, %v11500_v56  ;;  %v4529_v56 = vor.u32 1.1754944e-38, %v4528_v63 }
0x1203   :  { %v11502_v58 = vpop.eup %11501 }
0x1204   :  { %v13867_v16 = vpop.eup %11503  ;;  %11511 = vrcp.f32 %v13863_v26  ;;  %v13878_v30 = vadd.f32 1.0, %v11502_v58 }
0x1205   :  { %v13870_v14 = vpop.eup %11505  ;;  %v4518_v25 = vmul.f32 %v13867_v16, %v13847_v36  ;;  %11513 = vpow2.f32 %v4467_v23  ;;  %vm4523_vm12 = vweird.f32 %v13867_v16 }
0x1206   :  { %v11508_v52 = vpop.eup %11507  ;;  %v4563_v34 = vmul.f32 %v13870_v14, %v13849_v44  ;;  %11515 = vrcp.f32 %v13878_v30  ;;  %vm13919_vm4 = vmor %vm4522_vm5, %vm4523_vm12  ;;  %vm4568_vm14 = vweird.f32 %v13870_v14  ;;  %vm4582_vm10 = vweird.f32 %v13878_v30 }
0x1207   :  { %v11510_v18 = vpop.eup %11509  ;;  %v4519_v40 = vsub.f32 1.0, %v4518_v25  ;;  %v13881_v53 = vadd.f32 1.0, %v11508_v52  ;;  %v4574_v25 = vor.u32 1.1754944e-38, %v4573_v43  ;;  %v4469_v52 = vmul.f32 1.442695, %v9411_v59  ;;  %vm13948_vm15 = vmor %vm4567_vm11, %vm4568_vm14 }
0x1208   :  { %v4564_v54 = vsub.f32 1.0, %v4563_v34  ;;  %v13890_v48 = vadd.f32 1.0, %v11510_v18  ;;  %v4586_v34 = vand.u32 2147483647, %v13878_v30  ;;  %v4588_v18 = vand.u32 2147483648, %v13878_v30 }
0x1209   :  { %v4520_v12 = vmul.f32 %v13867_v16, %v4519_v40  ;;  %11517 = vrcp.f32 %v13881_v53  ;;  %v4631_v39 = vand.u32 2147483647, %v13881_v53  ;;  %v4633_v2 = vand.u32 2147483648, %v13881_v53 }
0x120a   :  { %v13888_v24 = vpop.eup %11511  ;;  %v4565_v55 = vmul.f32 %v13870_v14, %v4564_v54  ;;  %11519 = vrcp.f32 %v13890_v48  ;;  %vm4627_vm11 = vweird.f32 %v13881_v53 }
0x120b   :  { %v4521_v9 = vadd.f32 %v13867_v16, %v4520_v12  ;;  %v4533_v62 = vmul.f32 %v13888_v24, %v13863_v26  ;;  %v11514_v31 = vpop.eup %11513  ;;  %vm4538_vm12 = vweird.f32 %v13888_v24  ;;  %v4634_v43 = vor.u32 1.1754944e-38, %v4633_v2 }
0x120c   :  { %v11516_v33 = vpop.eup %11515  ;;  %v4566_v6 = vadd.f32 %v13870_v14, %v4565_v55  ;;  %v13933_v23 = vadd.f32 1.0, %v11514_v31  ;;  %vm4632_vm14 = vcmp.eq.f32.partialorder %v4631_v39, 8.507059e+37 }
0x120d   :  { %v4578_v36 = vmul.f32 %v11516_v33, %v13878_v30  ;;  %v4525_v58 = vsel %vm13919_vm4, %v13867_v16, %v4521_v9  ;;  %v4534_v20 = vsub.f32 1.0, %v4533_v62  ;;  %vm4583_vm3 = vweird.f32 %v11516_v33 }
0x120e   :  { %11521 = vrcp.f32 %v13933_v23  ;;  %v4530_v40 = vsel %vm13910_vm8, %v4529_v56, %v4525_v58  ;;  %v4570_v12 = vsel %vm13948_vm15, %v13870_v14, %v4566_v6  ;;  %vm4584_vm5 = vmor %vm4582_vm10, %vm4583_vm3  ;;  %vm4587_vm8 = vcmp.eq.f32.partialorder %v4586_v34, 8.507059e+37 }
0x120f   :  { %v11518_v60 = vpop.eup %11517  ;;  %v4579_v57 = vsub.f32 1.0, %v4578_v36  ;;  %v4535_v54 = vmul.f32 %v13888_v24, %v4534_v20  ;;  %11523 = vpow2.f32 %v4469_v52  ;;  %v4589_v14 = vor.u32 1.1754944e-38, %v4588_v18 }
0x1210   :  { %v4623_v50 = vmul.f32 %v11518_v60, %v13881_v53  ;;  %v13940_v16 = vpop.eup %11519  ;;  %vm4628_vm13 = vweird.f32 %v11518_v60  ;;  %v4817_v51 = vmul.f32 %v4530_v40, %v13806_v46  ;;  %v4575_v55 = vsel %vm13924_vm1, %v4574_v25, %v4570_v12 }
0x1211   :  { %v4580_v29 = vmul.f32 %v11516_v33, %v4579_v57  ;;  %v4548_v44 = vmul.f32 %v13940_v16, %v13890_v48  ;;  %v4536_v62 = vadd.f32 %v13888_v24, %v4535_v54  ;;  %vm4629_vm4 = vmor %vm4627_vm11, %vm4628_vm13  ;;  %vm4537_vm10 = vweird.f32 %v13863_v26 }
0x1212   :  { %v4624_v32 = vsub.f32 1.0, %v4623_v50  ;;  %v4541_v53 = vand.u32 2147483647, %v13863_v26  ;;  %v4820_v47 = vmul.f32 %v4575_v55, %v13809_v0  ;;  %vm13977_vm1 = vmor %vm4537_vm10, %vm4538_vm12  ;;  %v4601_v20 = vand.u32 2147483647, %v13933_v23 }
0x1213   :  { %v4581_v19 = vadd.f32 %v11516_v33, %v4580_v29  ;;  %v4540_v36 = vsel %vm13977_vm1, %v13888_v24, %v4536_v62  ;;  %vm4597_vm13 = vweird.f32 %v13933_v23  ;;  %vm4552_vm11 = vweird.f32 %v13890_v48 }
0x1214   :  { %v4625_v28 = vmul.f32 %v11518_v60, %v4624_v32  ;;  %v11522_v9 = vpop.eup %11521  ;;  %vm4542_vm3 = vcmp.eq.f32.partialorder %v4541_v53, 8.507059e+37  ;;  %v4558_v54 = vand.u32 2147483648, %v13890_v48 }
0x1215   :  { %v4585_v63 = vsel %vm4584_vm5, %v11516_v33, %v4581_v19  ;;  %v4593_v46 = vmul.f32 %v11522_v9, %v13933_v23  ;;  %v4543_v33 = vand.u32 2147483648, %v13863_v26  ;;  %v11524_v41 = vpop.eup %11523  ;;  %v4603_v26 = vand.u32 2147483648, %v13933_v23 }
0x1216   :  { %v4626_v8 = vadd.f32 %v11518_v60, %v4625_v28  ;;  %v4590_v31 = vsel %vm4587_vm8, %v4589_v14, %v4585_v63  ;;  %v4503_v58 = vadd.f32 1.0, %v11524_v41  ;;  %vm4598_vm15 = vweird.f32 %v11522_v9 }
0x1217   :  { %v4821_v30 = vmul.f32 %v4590_v31, %v13833_v15  ;;  %v4594_v35 = vsub.f32 1.0, %v4593_v46  ;;  %v4544_v25 = vor.u32 1.1754944e-38, %v4543_v33  ;;  %vm4599_vm12 = vmor %vm4597_vm13, %vm4598_vm15  ;;  %v4604_v50 = vor.u32 1.1754944e-38, %v4603_v26 }
0x1218   :  { %v4630_v59 = vsel %vm4629_vm4, %v11518_v60, %v4626_v8  ;;  %v4549_v60 = vsub.f32 1.0, %v4548_v44  ;;  %11525 = vrcp.f32 %v4503_v58  ;;  %vm4602_vm5 = vcmp.eq.f32.partialorder %v4601_v20, 8.507059e+37 }
0x1219   :  { %v4635_v3 = vsel %vm4632_vm14, %v4634_v43, %v4630_v59  ;;  %v4902_v15 = vpack.c.bf16 %v4821_v30, %v4817_v51  ;;  %v4595_v0 = vmul.f32 %v11522_v9, %v4594_v35  ;;  %vm4553_vm8 = vweird.f32 %v13940_v16 }
0x121a   :  { %v4824_v56 = vmul.f32 %v4635_v3, %v13839_v37  ;;  %v4545_v37 = vsel %vm4542_vm3, %v4544_v25, %v4540_v36  ;;  %v4550_v24 = vmul.f32 %v13940_v16, %v4549_v60  ;;  %vm13998_vm4 = vmor %vm4552_vm11, %vm4553_vm8  ;;  %v4618_v14 = vand.u32 2147483648, %v4503_v58 }
0x121b   :  { %5114 = vmatmul.bf16.vlgmr.msra.gmra.mxu1 %v4902_v15  ;;  %v4596_v57 = vadd.f32 %v11522_v9, %v4595_v0  ;;  %v4818_v18 = vmul.f32 %v4545_v37, %v13824_v22  ;;  %v4616_v8 = vand.u32 2147483647, %v4503_v58  ;;  %v4559_v55 = vor.u32 1.1754944e-38, %v4558_v54 }
0x121c   :  { %v4905_v6 = vpack.c.bf16 %v4824_v56, %v4820_v47  ;;  %v4551_v29 = vadd.f32 %v13940_v16, %v4550_v24  ;;  %vm4612_vm1 = vweird.f32 %v4503_v58  ;;  %v4619_v59 = vor.u32 1.1754944e-38, %v4618_v14 }
0x121d   :  { %v4600_v52 = vsel %vm4599_vm12, %v11522_v9, %v4596_v57  ;;  %vm4617_vm3 = vcmp.eq.f32.partialorder %v4616_v8, 8.507059e+37 }
0x121e   :  { %5183 = vmatmul.bf16.vlgmr.msra.gmra.mxu0 %v4905_v6  ;;  %v4605_v34 = vsel %vm4602_vm5, %v4604_v50, %v4600_v52  ;;  %v11526_v27 = vpop.eup %11525  ;;  %v4555_v44 = vsel %vm13998_vm4, %v13940_v16, %v4551_v29 }
0x121f   :  { %v4822_v40 = vmul.f32 %v4605_v34, %v13852_v5  ;;  %v4608_v23 = vmul.f32 %v11526_v27, %v4503_v58  ;;  %v4556_v5 = vand.u32 2147483647, %v13890_v48  ;;  %vm4613_vm14 = vweird.f32 %v11526_v27 }
0x1220   :  { %vm4614_vm15 = vmor %vm4612_vm1, %vm4613_vm14 }
0x1221   :  { %v4903_v32 = vpack.c.bf16 %v4822_v40, %v4818_v18  ;;  %v4609_v19 = vsub.f32 1.0, %v4608_v23  ;;  %vm4557_vm10 = vcmp.eq.f32.partialorder %v4556_v5, 8.507059e+37 }
0x1222   :  { %v4560_v30 = vsel %vm4557_vm10, %v4559_v55, %v4555_v44 }
0x1223   :  { %5137 = vmatmul.bf16.vlgmr.msrb.gmra.mxu2 %v4903_v32  ;;  %v4610_v63 = vmul.f32 %v11526_v27, %v4609_v19  ;;  %v4819_v56 = vmul.f32 %v4560_v30, %v13829_v13 }
0x1225   :  { %v4611_v48 = vadd.f32 %v11526_v27, %v4610_v63 }
0x1226   :  { %v4339_v12 = vpop.f32.mrf.mxu1 }
0x1227   :  { %v13996_v39 = vadd.f32 %v4339_v12, %v13799_v21  ;;  %v4408_v2 = vpop.f32.mrf.mxu0  ;;  %v4615_v53 = vsel %vm4614_vm15, %v11526_v27, %v4611_v48 }
0x1228   :  { %v14004_v28 = vadd.f32 %v4408_v2, %v13801_v1  ;;  %v4620_v41 = vsel %vm4617_vm3, %v4619_v59, %v4615_v53 }
0x1229   :  { %v9413_v51 = vmul.f32 -1.702, %v13996_v39  ;;  %v4823_v35 = vmul.f32 %v4620_v41, %v13893_v7 }
0x122a   :  { %v9416_v9 = vmul.f32 -1.702, %v14004_v28 }
0x122b   :  { %v4473_v62 = vmul.f32 1.442695, %v9413_v51  ;;  %v4904_v6 = vpack.c.bf16 %v4823_v35, %v4819_v56 }
0x122c   :  { %v4479_v31 = vmul.f32 1.442695, %v9416_v9  ;;  %v4362_v43 = vpop.f32.mrf.mxu2 }
0x122d   :  { %11527 = vpow2.f32 %v4473_v62  ;;  %v14012_v16 = vadd.f32 %v4362_v43, %v13812_v42  ;;  %v4385_v46 = vpop.f32.mrf.mxu3  ;;  %5160 = vmatmul.bf16.vlgmr.msrb.gmra.mxu3 %v4904_v6  ;;  %v10823_v6 = vld [vmem:[%s15187_s8 + $0x10] sm:$0xff] }
0x122e   :  { %11529 = vpow2.f32 %v4479_v31  ;;  %v14015_v33 = vadd.f32 %v4385_v46, %v13817_v17  ;;  %v4341_v3 = vpop.f32.mrf.mxu1 }
0x122f   :  { %v9414_v47 = vmul.f32 -1.702, %v14012_v16  ;;  %v14019_v4 = vadd.f32 %v4341_v3, %v13799_v21  ;;  %v4410_v15 = vpop.f32.mrf.mxu0 }
0x1230   :  { %v9415_v36 = vmul.f32 -1.702, %v14015_v33  ;;  %v14025_v60 = vadd.f32 %v4410_v15, %v13801_v1 }
0x1231   :  { %v4475_v26 = vmul.f32 1.442695, %v9414_v47  ;;  %v9417_v58 = vmul.f32 -1.702, %v14019_v4 }
0x1232   :  { %v4477_v0 = vmul.f32 1.442695, %v9415_v36  ;;  %v9420_v20 = vmul.f32 -1.702, %v14025_v60 }
0x1233   :  { %v11528_v25 = vpop.eup %11527  ;;  %11531 = vpow2.f32 %v4475_v26  ;;  %v4481_v57 = vmul.f32 1.442695, %v9417_v58 }
0x1234   :  { %v11530_v37 = vpop.eup %11529  ;;  %v4505_v13 = vadd.f32 1.0, %v11528_v25  ;;  %11533 = vpow2.f32 %v4477_v0  ;;  %v4487_v7 = vmul.f32 1.442695, %v9420_v20  ;;  %v4364_v24 = vpop.f32.mrf.mxu2 }
0x1235   :  { %v4508_v50 = vadd.f32 1.0, %v11530_v37  ;;  %11535 = vpow2.f32 %v4481_v57  ;;  %v14030_v52 = vadd.f32 %v4364_v24, %v13812_v42  ;;  %v4387_v18 = vpop.f32.mrf.mxu3 }
0x1236   :  { %11537 = vrcp.f32 %v4505_v13  ;;  %v14052_v62 = vadd.f32 %v4387_v18, %v13817_v17  ;;  %v4646_v43 = vand.u32 2147483647, %v4505_v13  ;;  %v4648_v30 = vand.u32 2147483648, %v4505_v13 }
0x1237   :  { %11539 = vrcp.f32 %v4508_v50  ;;  %v9418_v34 = vmul.f32 -1.702, %v14030_v52  ;;  %v4691_v3 = vand.u32 2147483647, %v4508_v50  ;;  %v4693_v41 = vand.u32 2147483648, %v4508_v50 }
0x1238   :  { %11541 = vpow2.f32 %v4487_v7  ;;  %vm4642_vm5 = vweird.f32 %v4505_v13  ;;  %vm4687_vm8 = vweird.f32 %v4508_v50  ;;  %v9419_v26 = vmul.f32 -1.702, %v14052_v62 }
0x1239   :  { %v11532_v40 = vpop.eup %11531  ;;  %v4344_v27 = vpop.f32.mrf.mxu1  ;;  %v4483_v22 = vmul.f32 1.442695, %v9418_v34  ;;  %vm14075_vm4 = vcmp.eq.f32.partialorder %v4646_v43, 8.507059e+37  ;;  %v4649_v37 = vor.u32 1.1754944e-38, %v4648_v30  ;;  %vm14086_vm10 = vcmp.eq.f32.partialorder %v4691_v3, 8.507059e+37 }
0x123a   :  { %v11534_v29 = vpop.eup %11533  ;;  %v14033_v32 = vadd.f32 1.0, %v11532_v40  ;;  %v4413_v23 = vpop.f32.mrf.mxu0  ;;  %v4694_v24 = vor.u32 1.1754944e-38, %v4693_v41 }
0x123b   :  { %v11536_v12 = vpop.eup %11535  ;;  %v14035_v54 = vadd.f32 1.0, %v11534_v29 }
0x123c   :  { %v14037_v2 = vpop.eup %11537  ;;  %11543 = vrcp.f32 %v14033_v32  ;;  %v14045_v63 = vadd.f32 1.0, %v11536_v12  ;;  %v14101_v12 = vadd.f32 %v4413_v23, %v13801_v1 }
0x123d   :  { %v14040_v5 = vpop.eup %11539  ;;  %v4638_v19 = vmul.f32 %v14037_v2, %v4505_v13  ;;  %11545 = vrcp.f32 %v14035_v54  ;;  %vm4643_vm13 = vweird.f32 %v14037_v2 }
0x123e   :  { %v11542_v44 = vpop.eup %11541  ;;  %v4683_v14 = vmul.f32 %v14040_v5, %v4508_v50  ;;  %11547 = vpow2.f32 %v4483_v22  ;;  %vm4688_vm12 = vweird.f32 %v14040_v5  ;;  %vm14071_vm11 = vmor %vm4642_vm5, %vm4643_vm13  ;;  %v4706_v25 = vand.u32 2147483647, %v14045_v63 }
0x123f   :  { %v4639_v51 = vsub.f32 1.0, %v4638_v19  ;;  %v14047_v8 = vpop.f32.mrf.mxu2  ;;  %v14049_v55 = vadd.f32 1.0, %v11542_v44  ;;  %11549 = vrcp.f32 %v14045_v63  ;;  %vm14082_vm14 = vmor %vm4687_vm8, %vm4688_vm12  ;;  %v14091_v50 = vadd.f32 %v4344_v27, %v13799_v21 }
0x1240   :  { %v4684_v9 = vsub.f32 1.0, %v4683_v14  ;;  %v14054_v48 = vpop.f32.mrf.mxu3  ;;  %v4708_v29 = vand.u32 2147483648, %v14045_v63  ;;  %v4661_v19 = vand.u32 2147483647, %v14033_v32  ;;  %vm4702_vm1 = vweird.f32 %v14045_v63 }
0x1241   :  { %v4640_v31 = vmul.f32 %v14037_v2, %v4639_v51  ;;  %v4346_v59 = vpop.f32.mrf.mxu1  ;;  %11551 = vrcp.f32 %v14049_v55  ;;  %v4485_v27 = vmul.f32 1.442695, %v9419_v26  ;;  %vm14107_vm15 = vcmp.eq.f32.partialorder %v4706_v25, 8.507059e+37 }
0x1242   :  { %v14058_v46 = vpop.eup %11543  ;;  %v4685_v53 = vmul.f32 %v14040_v5, %v4684_v9  ;;  %v4415_v47 = vpop.f32.mrf.mxu0  ;;  %v4709_v30 = vor.u32 1.1754944e-38, %v4708_v29  ;;  %vm4747_vm3 = vweird.f32 %v14049_v55  ;;  %v4751_v59 = vand.u32 2147483647, %v14049_v55 }
0x1243   :  { %v14062_v15 = vpop.eup %11545  ;;  %v4641_v56 = vadd.f32 %v14037_v2, %v4640_v31  ;;  %v4653_v35 = vmul.f32 %v14058_v46, %v14033_v32  ;;  %vm4658_vm13 = vweird.f32 %v14058_v46  ;;  %v4753_v41 = vand.u32 2147483648, %v14049_v55 }
0x1244   :  { %v4686_v36 = vadd.f32 %v14040_v5, %v4685_v53  ;;  %v4668_v20 = vmul.f32 %v14062_v15, %v14035_v54  ;;  %v11548_v57 = vpop.eup %11547  ;;  %vm4657_vm5 = vweird.f32 %v14033_v32 }
0x1245   :  { %v4654_v0 = vsub.f32 1.0, %v4653_v35  ;;  %v11550_v34 = vpop.eup %11549  ;;  %v4645_v18 = vsel %vm14071_vm11, %v14037_v2, %v4641_v56  ;;  %v14111_v9 = vadd.f32 1.0, %v11548_v57  ;;  %v4754_v57 = vor.u32 1.1754944e-38, %v4753_v41 }
0x1246   :  { %v4690_v40 = vsel %vm14082_vm14, %v14040_v5, %v4686_v36  ;;  %v4698_v21 = vmul.f32 %v11550_v34, %v14045_v63  ;;  %v4669_v51 = vsub.f32 1.0, %v4668_v20  ;;  %v4650_v1 = vsel %vm14075_vm4, %v4649_v37, %v4645_v18 }
0x1247   :  { %v4369_v22 = vpop.f32.mrf.mxu2  ;;  %v11552_v14 = vpop.eup %11551  ;;  %v4655_v2 = vmul.f32 %v14058_v46, %v4654_v0  ;;  %v4695_v23 = vsel %vm14086_vm10, %v4694_v24, %v4690_v40  ;;  %11553 = vrcp.f32 %v14111_v9  ;;  %vm4703_vm12 = vweird.f32 %v11550_v34 }
0x1248   :  { %v4392_v44 = vpop.f32.mrf.mxu3  ;;  %v4699_v31 = vsub.f32 1.0, %v4698_v21  ;;  %v4743_v43 = vmul.f32 %v11552_v14, %v14049_v55  ;;  %v4825_v47 = vmul.f32 %v4650_v1, %v13996_v39  ;;  %v4828_v56 = vmul.f32 %v4695_v23, %v14004_v28  ;;  %vm4704_vm11 = vmor %vm4702_vm1, %vm4703_vm12 }
0x1249   :  { %v14126_v35 = vadd.f32 %v14058_v46, %v4655_v2  ;;  %v4670_v36 = vmul.f32 %v14062_v15, %v4669_v51  ;;  %vm4748_vm8 = vweird.f32 %v11552_v14  ;;  %11555 = vpow2.f32 %v4485_v27  ;;  %v10824_v51 = vld [vmem:[%s15187_s8 + $0x18] sm:$0xff]  ;;  %vm14167_vm1 = vmor %vm4657_vm5, %vm4658_vm13 }
0x124a   :  { %v4700_v53 = vmul.f32 %v11550_v34, %v4699_v31  ;;  %v4744_v3 = vsub.f32 1.0, %v4743_v43  ;;  %vm14132_vm4 = vcmp.eq.f32.partialorder %v4751_v59, 8.507059e+37  ;;  %v9421_v39 = vmul.f32 -1.702, %v14091_v50  ;;  %vm4749_vm14 = vmor %vm4747_vm3, %vm4748_vm8  ;;  %5420 = vmatpush.bf16.msra.mxu3 %v10824_v51 }
0x124b   :  { %v9424_v28 = vmul.f32 -1.702, %v14101_v12  ;;  %v14140_v0 = vadd.f32 %v14047_v8, %v13812_v42  ;;  %v14144_v37 = vadd.f32 %v14054_v48, %v13817_v17  ;;  %v4721_v17 = vand.u32 2147483647, %v14111_v9 }
0x124c   :  { %v4701_v26 = vadd.f32 %v11550_v34, %v4700_v53  ;;  %v4745_v58 = vmul.f32 %v11552_v14, %v4744_v3  ;;  %v4489_v7 = vmul.f32 1.442695, %v9421_v39  ;;  %v4723_v44 = vand.u32 2147483648, %v14111_v9 }
0x124d   :  { %v11554_v63 = vpop.eup %11553  ;;  %v4495_v24 = vmul.f32 1.442695, %v9424_v28  ;;  %v9422_v18 = vmul.f32 -1.702, %v14140_v0  ;;  %v9423_v55 = vmul.f32 -1.702, %v14144_v37  ;;  %v4671_v23 = vadd.f32 %v14062_v15, %v4670_v36 }
0x124e   :  { %v4705_v20 = vsel %vm4704_vm11, %v11550_v34, %v4701_v26  ;;  %v4746_v25 = vadd.f32 %v11552_v14, %v4745_v58  ;;  %v4713_v34 = vmul.f32 %v11554_v63, %v14111_v9  ;;  %11557 = vpow2.f32 %v4489_v7  ;;  %5421 = vmatpush.bf16.msra.mxu3 %v10823_v6 }
0x124f   :  { %v4710_v13 = vsel %vm14107_vm15, %v4709_v30, %v4705_v20  ;;  %v4491_v40 = vmul.f32 1.442695, %v9422_v18  ;;  %v11556_v29 = vpop.eup %11555  ;;  %11559 = vpow2.f32 %v4495_v24  ;;  %v4493_v2 = vmul.f32 1.442695, %v9423_v55 }
0x1250   :  { %v4829_v42 = vmul.f32 %v4710_v13, %v14019_v4  ;;  %v4750_v8 = vsel %vm4749_vm14, %v11552_v14, %v4746_v25  ;;  %v4714_v21 = vsub.f32 1.0, %v4713_v34  ;;  %v4663_v4 = vand.u32 2147483648, %v14033_v32  ;;  %v10821_v34 = vld [vmem:[%s15187_s8] sm:$0xff] }
0x1251   :  { %v4755_v48 = vsel %vm14132_vm4, %v4754_v57, %v4750_v8  ;;  %v14160_v14 = vadd.f32 1.0, %v11556_v29  ;;  %vm4718_vm10 = vweird.f32 %v11554_v63  ;;  %11561 = vpow2.f32 %v4491_v40  ;;  %v10822_v57 = vld [vmem:[%s15187_s8 + $0x8] sm:$0xff] }
0x1252   :  { %v4832_v22 = vmul.f32 %v4755_v48, %v14025_v60  ;;  %v4906_v27 = vpack.c.bf16 %v4829_v42, %v4825_v47  ;;  %v4715_v5 = vmul.f32 %v11554_v63, %v4714_v21  ;;  %vm4672_vm15 = vweird.f32 %v14035_v54  ;;  %5422 = vmatpush.bf16.msra.mxu3 %v10822_v57 }
0x1253   :  { %vm4673_vm3 = vweird.f32 %v14062_v15  ;;  %11563 = vrcp.f32 %v14160_v14  ;;  %v4660_v31 = vsel %vm14167_vm1, %v14058_v46, %v14126_v35  ;;  %vm4717_vm13 = vweird.f32 %v14111_v9 }
0x1254   :  { %5119 = vmatmul.bf16.gmra.mxu1 %v4906_v27  ;;  %v4909_v1 = vpack.c.bf16 %v4832_v22, %v4828_v56  ;;  %v4716_v43 = vadd.f32 %v11554_v63, %v4715_v5  ;;  %11565 = vpow2.f32 %v4493_v2  ;;  %v11558_v30 = vpop.eup %11557  ;;  %vm4662_vm12 = vcmp.eq.f32.partialorder %v4661_v19, 8.507059e+37  ;;  %vm4719_vm5 = vmor %vm4717_vm13, %vm4718_vm10 }
0x1255   :  { %v4664_v59 = vor.u32 1.1754944e-38, %v4663_v4  ;;  %v4678_v53 = vand.u32 2147483648, %v14035_v54  ;;  %v4724_v3 = vor.u32 1.1754944e-38, %v4723_v44  ;;  %v11560_v41 = vpop.eup %11559  ;;  %v4676_v47 = vand.u32 2147483647, %v14035_v54  ;;  %vm14191_vm11 = vmor %vm4672_vm15, %vm4673_vm3 }
0x1256   :  { %5188 = vmatmul.bf16.gmra.mxu0 %v4909_v1  ;;  %v4720_v46 = vsel %vm4719_vm5, %v11554_v63, %v4716_v43  ;;  %vm4722_vm8 = vcmp.eq.f32.partialorder %v4721_v17, 8.507059e+37  ;;  %v14185_v56 = vadd.f32 1.0, %v11558_v30  ;;  %v14195_v35 = vadd.f32 1.0, %v11560_v41  ;;  %5423 = vmatpush.bf16.msra.mxu3 %v10821_v34 }
0x1257   :  { %v4665_v9 = vsel %vm4662_vm12, %v4664_v59, %v4660_v31  ;;  %v4725_v19 = vsel %vm4722_vm8, %v4724_v3, %v4720_v46  ;;  %v11562_v36 = vpop.eup %11561  ;;  %v4675_v26 = vsel %vm14191_vm11, %v14062_v15, %v4671_v23  ;;  %v4679_v54 = vor.u32 1.1754944e-38, %v4678_v53 }
0x1258   :  { %v4830_v58 = vmul.f32 %v4725_v19, %v14030_v52  ;;  %11567 = vrcp.f32 %v14185_v56  ;;  %v4826_v20 = vmul.f32 %v4665_v9, %v14012_v16  ;;  %vm4677_vm4 = vcmp.eq.f32.partialorder %v4676_v47, 8.507059e+37 }
0x1259   :  { %v11564_v39 = vpop.eup %11563  ;;  %11569 = vrcp.f32 %v14195_v35  ;;  %v4680_v63 = vsel %vm4677_vm4, %v4679_v54, %v4675_v26  ;;  %v14207_v15 = vadd.f32 1.0, %v11562_v36  ;;  %v4736_v7 = vand.u32 2147483647, %v14160_v14 }
0x125a   :  { %v11566_v28 = vpop.eup %11565  ;;  %v4728_v25 = vmul.f32 %v11564_v39, %v14160_v14  ;;  %v4738_v24 = vand.u32 2147483648, %v14160_v14  ;;  %v4907_v18 = vpack.c.bf16 %v4830_v58, %v4826_v20  ;;  %vm4733_vm14 = vweird.f32 %v11564_v39 }
0x125b   :  { %v14209_v52 = vadd.f32 1.0, %v11566_v28  ;;  %11571 = vrcp.f32 %v14207_v15  ;;  %v4766_v8 = vand.u32 2147483647, %v14185_v56  ;;  %v4827_v48 = vmul.f32 %v4680_v63, %v14015_v33 }
0x125c   :  { %v4729_v13 = vsub.f32 1.0, %v4728_v25  ;;  %5142 = vmatmul.bf16.gmra.mxu2 %v4907_v18  ;;  %vm4732_vm10 = vweird.f32 %v14160_v14  ;;  %v4768_v55 = vand.u32 2147483648, %v14185_v56  ;;  %vm4737_vm1 = vcmp.eq.f32.partialorder %v4736_v7, 8.507059e+37 }
0x125d   :  { %11573 = vrcp.f32 %v14209_v52  ;;  %v4739_v22 = vor.u32 1.1754944e-38, %v4738_v24  ;;  %vm4734_vm15 = vmor %vm4732_vm10, %vm4733_vm14  ;;  %vm4762_vm3 = vweird.f32 %v14185_v56  ;;  %v4811_v4 = vand.u32 2147483647, %v14195_v35 }
0x125e   :  { %v11568_v16 = vpop.eup %11567  ;;  %v4730_v42 = vmul.f32 %v11564_v39, %v4729_v13  ;;  %v4813_v33 = vand.u32 2147483648, %v14195_v35  ;;  %vm14226_vm13 = vcmp.eq.f32.partialorder %v4766_v8, 8.507059e+37  ;;  %vm4807_vm12 = vweird.f32 %v14195_v35 }
0x125f   :  { %v11570_v17 = vpop.eup %11569  ;;  %v4758_v40 = vmul.f32 %v11568_v16, %v14185_v56  ;;  %vm4763_vm5 = vweird.f32 %v11568_v16  ;;  %v4769_v60 = vor.u32 1.1754944e-38, %v4768_v55  ;;  %vm14233_vm11 = vcmp.eq.f32.partialorder %v4811_v4, 8.507059e+37 }
0x1260   :  { %v4731_v29 = vadd.f32 %v11564_v39, %v4730_v42  ;;  %v4803_v21 = vmul.f32 %v11570_v17, %v14195_v35  ;;  %vm4808_vm8 = vweird.f32 %v11570_v17  ;;  %v4814_v3 = vor.u32 1.1754944e-38, %v4813_v33  ;;  %vm4764_vm4 = vmor %vm4762_vm3, %vm4763_vm5 }
0x1261   :  { %v4759_v27 = vsub.f32 1.0, %v4758_v40  ;;  %v11572_v51 = vpop.eup %11571  ;;  %v4781_v9 = vand.u32 2147483647, %v14207_v15  ;;  %vm4809_vm14 = vmor %vm4807_vm12, %vm4808_vm8  ;;  %v4783_v19 = vand.u32 2147483648, %v14207_v15  ;;  %v4798_v26 = vand.u32 2147483648, %v14209_v52  ;;  %v5370_v40 = vpop.permute.xlu0 %5369 }
0x1262   :  { %v4735_v44 = vsel %vm4734_vm15, %v11564_v39, %v4731_v29  ;;  %v4804_v2 = vsub.f32 1.0, %v4803_v21  ;;  %v4773_v30 = vmul.f32 %v11572_v51, %v14207_v15  ;;  %vm4778_vm10 = vweird.f32 %v11572_v51 }
0x1263   :  { %v4740_v5 = vsel %vm4737_vm1, %v4739_v22, %v4735_v44  ;;  %v4760_v1 = vmul.f32 %v11568_v16, %v4759_v27  ;;  %v11574_v23 = vpop.eup %11573  ;;  %vm4777_vm15 = vweird.f32 %v14207_v15  ;;  %v4796_v25 = vand.u32 2147483647, %v14209_v52 }
0x1264   :  { %v4831_v31 = vmul.f32 %v4740_v5, %v14052_v62  ;;  %v4805_v43 = vmul.f32 %v11570_v17, %v4804_v2  ;;  %v4788_v41 = vmul.f32 %v11574_v23, %v14209_v52  ;;  %v4774_v46 = vsub.f32 1.0, %v4773_v30  ;;  %vm4779_vm3 = vmor %vm4777_vm15, %vm4778_vm10 }
0x1265   :  { %v4761_v59 = vadd.f32 %v11568_v16, %v4760_v1  ;;  %vm4793_vm1 = vweird.f32 %v11574_v23  ;;  %v4784_v63 = vor.u32 1.1754944e-38, %v4783_v19  ;;  %vm4782_vm12 = vcmp.eq.f32.partialorder %v4781_v9, 8.507059e+37 }
0x1266   :  { %v4806_v47 = vadd.f32 %v11570_v17, %v4805_v43  ;;  %v4908_v62 = vpack.c.bf16 %v4831_v31, %v4827_v48  ;;  %v4789_v36 = vsub.f32 1.0, %v4788_v41  ;;  %v4775_v56 = vmul.f32 %v11572_v51, %v4774_v46  ;;  %v5373_v48 = vpop.permute.xlu1 %5372 }
0x1267   :  { %v4765_v32 = vsel %vm4764_vm4, %v11568_v16, %v4761_v59  ;;  %v4799_v16 = vor.u32 1.1754944e-38, %v4798_v26  ;;  %vm4797_vm8 = vcmp.eq.f32.partialorder %v4796_v25, 8.507059e+37  ;;  %v11838_v55 = vmov 0.0  }
0x1268   :  { %v4770_v58 = vsel %vm14226_vm13, %v4769_v60, %v4765_v32  ;;  %v4810_v6 = vsel %vm4809_vm14, %v11570_v17, %v4806_v47  ;;  %5165 = vmatmul.bf16.gmra.mxu3 %v4908_v62  ;;  %v4790_v28 = vmul.f32 %v11574_v23, %v4789_v36  ;;  %v4776_v20 = vadd.f32 %v11572_v51, %v4775_v56 }
0x1269   :  { %v4833_v39 = vmul.f32 %v4770_v58, %v14091_v50  ;;  %v4815_v54 = vsel %vm14233_vm11, %v4814_v3, %v4810_v6  ;;  %vm4792_vm13 = vweird.f32 %v14209_v52  ;;  %v5366_v17 = vlaneseq }
0x126a   :  { %v4836_v35 = vmul.f32 %v4815_v54, %v14101_v12  ;;  %v4791_v13 = vadd.f32 %v11574_v23, %v4790_v28  ;;  %v4780_v50 = vsel %vm4779_vm3, %v11572_v51, %v4776_v20  ;;  %vm4794_vm5 = vmor %vm4792_vm13, %vm4793_vm1 }
0x126b   :  { %v4910_v57 = vpack.c.bf16 %v4833_v39, %v4833_v39  ;;  %v4785_v24 = vsel %vm4782_vm12, %v4784_v63, %v4780_v50  ;;  %v5367_v52 = vand.u32 127, %v5366_v17  ;;  %vm5721_vm12 = vcmask 130048  }
0x126c   :  { %v4913_v7 = vpack.c.bf16 %v4836_v35, %v4836_v35  ;;  %v4795_v18 = vsel %vm4794_vm5, %v11574_v23, %v4791_v13  ;;  %v4834_v12 = vmul.f32 %v4785_v24, %v14140_v0  ;;  %vm15207_vm5 = vcmask 785408  }
0x126d   :  { %5124 = vmatmul.bf16.gmra.mxu1 %v4910_v57  ;;  %v4800_v15 = vsel %vm4797_vm8, %v4799_v16, %v4795_v18  ;;  %vm5375_vm11 = vcmp.eq.s32.totalorder %v5367_v52, %v5373_v48  ;;  %vm5374_vm4 = vcmp.eq.s32.totalorder %v5367_v52, %v5370_v40  ;;  %v11186_v57 = vld [vmem:[%s15156_s2 + $0x1] ss:$0 sm:$0xff]  ;;  %vm15208_vm8 = vmmov %vm15207_vm5 }
0x126e   :  { %5193 = vmatmul.bf16.gmra.mxu0 %v4913_v7  ;;  %v4911_v42 = vpack.c.bf16 %v4834_v12, %v4834_v12  ;;  %v4835_v8 = vmul.f32 %v4800_v15, %v14144_v37  ;;  %v5377_v29 = vsel %vm5375_vm11, 1.0, %v11838_v55  ;;  %v5376_v22 = vsel %vm5374_vm4, 1.0, %v11838_v55  ;;  %v5213_v40 = vld [vmem:[%s15197_s24] sm:$0x3] }
0x126f   :  { %v5386_v21 = vpack.c.bf16 %v5377_v29, %v5376_v22  ;;  %v5388_v29 = vld [vmem:[%s15196_s19 + $0x8] sm:$0xff] }
0x1270   :  { %5147 = vmatmul.bf16.gmra.mxu2 %v4911_v42  ;;  %v4912_v34 = vpack.c.bf16 %v4835_v8, %v4835_v8 }
0x1278   :  { %5170 = vmatmul.bf16.gmra.mxu3 %v4912_v34  ;;  %v5387_v34 = vld [vmem:[%s15196_s19] sm:$0xff] }
0x1288   :  { %9667 = vmatmul.msk.bf16.vlgmr.msra.gmra.mxu3 %vm1470_vm9, %v5386_v21 }
0x1298   :  { %v5115_v0 = vpop.f32.mrf.mxu1 }
0x129b   :  { %v5184_v27 = vpop.f32.mrf.mxu0 }
0x12a0   :  { %v5117_v4 = vpop.f32.mrf.mxu1 }
0x12a3   :  { %v5186_v33 = vpop.f32.mrf.mxu0 }
0x12a6   :  { %v5138_v37 = vpop.f32.mrf.mxu2 }
0x12a7   :  { %v5139_v36 = vadd.f32 %v5138_v37, %v5115_v0 }
0x12ae   :  { %v5140_v51 = vpop.f32.mrf.mxu2 }
0x12af   :  { %v5141_v32 = vadd.f32 %v5140_v51, %v5117_v4 }
0x12b0   :  { %v5161_v2 = vpop.f32.mrf.mxu3 }
0x12b1   :  { %v5162_v35 = vadd.f32 %v5161_v2, %v5139_v36  ;;  %v9732_v36 = vld [vmem:[#allocation2 + $0x84] sm:$0xf0] }
0x12b3   :  { %v5185_v50 = vadd.f32 %v5184_v27, %v5162_v35  ;;  %v9706_v35 = vld [vmem:[#allocation2 + $0x48] sm:$0xf] }
0x12b5   :  { %v5198_v8 = vadd.f32 %v5185_v50, %v13640_v49  ;;  %v10832_v50 = vld [vmem:[#allocation2 + $0x38] sm:$0xf0] }
0x12b7   :  { %v5208_v48 = vadd.f32 %v11186_v57, %v5198_v8  ;;  %v10828_v8 = vld [vmem:[#allocation2 + $0x1c] sm:$0xf] }
0x12b8   :  { %v5163_v23 = vpop.f32.mrf.mxu3 }
0x12b9   :  { %v5164_v56 = vadd.f32 %v5163_v23, %v5141_v32  ;;  %v10846_v23 = vld [vmem:[#allocation2 + $0xac] sm:$0xf]  ;;  %v10840_v32 = vld [vmem:[#allocation2 + $0x7c] sm:$0xf] }
0x12bb   :  { %v5187_v63 = vadd.f32 %v5186_v33, %v5164_v56  ;;  %v10837_v56 = vld [vmem:[#allocation2 + $0x64] sm:$0xf] }
0x12bd   :  { %v5199_v12 = vadd.f32 %v5187_v63, %v13644_v10  ;;  %v5214_v10 = vpack.c.bf16 %v5213_v40, %v5213_v40  ;;  %v9708_v63 = vld [vmem:[#allocation2 + $0x54] sm:$0xf0]  ;;  %v9670_v40 = vld [vmem:[#allocation2] sm:$0xf] }
0x12d1   :  { %v5120_v44 = vpop.f32.mrf.mxu1 }
0x12d3   :  { %v5189_v14 = vpop.f32.mrf.mxu0 }
0x12d9   :  { %v5122_v5 = vpop.f32.mrf.mxu1 }
0x12db   :  { %v5191_v1 = vpop.f32.mrf.mxu0 }
0x12df   :  { %v5143_v60 = vpop.f32.mrf.mxu2 }
0x12e0   :  { %v5144_v9 = vadd.f32 %v5143_v60, %v5120_v44  ;;  %v10847_v60 = vld [vmem:[#allocation2 + $0xb0] sm:$0xf0] }
0x12e7   :  { %v5145_v43 = vpop.f32.mrf.mxu2 }
0x12e8   :  { %v5146_v47 = vadd.f32 %v5145_v43, %v5122_v5  ;;  %v9756_v43 = vld [vmem:[#allocation2 + $0xb4] sm:$0xf0] }
0x12ea   :  { %v5125_v31 = vpop.f32.mrf.mxu1 }
0x12eb   :  { %v5166_v30 = vpop.f32.mrf.mxu3  ;;  %v5194_v59 = vpop.f32.mrf.mxu0 }
0x12ec   :  { %v5167_v26 = vadd.f32 %v5166_v30, %v5144_v9  ;;  %v9759_v30 = vor.u32 %v10846_v23, %v9756_v43  ;;  %v9730_v9 = vld [vmem:[#allocation2 + $0x78] sm:$0xf] }
0x12ee   :  { %v5190_v20 = vadd.f32 %v5189_v14, %v5167_v26  ;;  %v9735_v26 = vor.u32 %v10840_v32, %v9732_v36  ;;  %v11187_v36 = vld [vmem:[%s15199_s6] ss:$0 sm:$0xff] }
0x12f0   :  { %v5200_v24 = vadd.f32 %v5190_v20, %v13648_v38  ;;  %v10835_v20 = vld [vmem:[#allocation2 + $0x50] sm:$0xf0] }
0x12f2   :  { %v5127_v53 = vpop.f32.mrf.mxu1 }
0x12f3   :  { %v5168_v3 = vpop.f32.mrf.mxu3  ;;  %v5196_v41 = vpop.f32.mrf.mxu0  ;;  %v10844_v53 = vld [vmem:[#allocation2 + $0x98] sm:$0xf0] }
0x12f4   :  { %v5148_v46 = vpop.f32.mrf.mxu2  ;;  %v5169_v19 = vadd.f32 %v5168_v3, %v5146_v47  ;;  %v10843_v3 = vld [vmem:[#allocation2 + $0x94] sm:$0xf]  ;;  %v9744_v47 = vld [vmem:[#allocation2 + $0x9c] sm:$0xf0] }
0x12f5   :  { %v5149_v62 = vadd.f32 %v5148_v46, %v5125_v31  ;;  %v9747_v46 = vor.u32 %v10843_v3, %v9744_v47  ;;  %v10817_v3 = vld [vmem:[%s15198_s30 + $0x20] sm:$0xff] }
0x12f6   :  { %v5192_v39 = vadd.f32 %v5191_v1, %v5169_v19  ;;  %v9754_v1 = vld [vmem:[#allocation2 + $0xa8] sm:$0xf] }
0x12f7   :  { %v9755_v31 = vor.u32 %v10847_v60, %v9754_v1 }
0x12f8   :  { %v5201_v13 = vadd.f32 %v5192_v39, %v13652_v61  ;;  %v5209_v61 = vadd.f32 %v11186_v57, %v5199_v12 }
0x12f9   :  { %5653 = vmatpush.bf16.msrb.mxu0 %v9755_v31  ;;  %v10818_v31 = vld [vmem:[%s15198_s30 + $0x28] sm:$0xff] }
0x12fa   :  { %v5211_v15 = vadd.f32 %v11186_v57, %v5201_v13  ;;  %v5215_v55 = vpack.c.bf16 %v5209_v61, %v5208_v48 }
0x12fb   :  { %v5171_v58 = vpop.f32.mrf.mxu3 }
0x12fc   :  { %v5172_v6 = vadd.f32 %v5171_v58, %v5149_v62  ;;  %v5150_v54 = vpop.f32.mrf.mxu2  ;;  %v10841_v62 = vld [vmem:[#allocation2 + $0x80] sm:$0xf0]  ;;  %v9718_v58 = vld [vmem:[#allocation2 + $0x60] sm:$0xf] }
0x12fd   :  { %v9731_v19 = vor.u32 %v10841_v62, %v9730_v9  ;;  %v9720_v54 = vld [vmem:[#allocation2 + $0x6c] sm:$0xf0] }
0x12fe   :  { %v5195_v28 = vadd.f32 %v5194_v59, %v5172_v6  ;;  %v9742_v59 = vld [vmem:[#allocation2 + $0x90] sm:$0xf]  ;;  %v10838_v6 = vld [vmem:[#allocation2 + $0x68] sm:$0xf0] }
0x12ff   :  { %v9743_v41 = vor.u32 %v10844_v53, %v9742_v59  ;;  %v9719_v39 = vor.u32 %v10838_v6, %v9718_v58 }
0x1300   :  { %v5202_v25 = vadd.f32 %v5195_v28, %v13656_v11  ;;  %v5210_v11 = vadd.f32 %v11186_v57, %v5200_v24  ;;  %v9723_v28 = vor.u32 %v10837_v56, %v9720_v54  ;;  %v10831_v24 = vld [vmem:[#allocation2 + $0x34] sm:$0xf]  ;;  %v11188_v56 = vld [vmem:[%s15200_s12] ss:$0 sm:$0xff] }
0x1301   :  { %5654 = vmatpush.bf16.msrb.mxu0 %v9743_v41 }
0x1302   :  { %v5212_v7 = vadd.f32 %v11186_v57, %v5202_v25  ;;  %v5216_v17 = vpack.c.bf16 %v5211_v15, %v5210_v11  ;;  %v10834_v25 = vld [vmem:[#allocation2 + $0x4c] sm:$0xf]  ;;  %v9707_v57 = vor.u32 %v10835_v20, %v9706_v35  ;;  %v9682_v15 = vld [vmem:[#allocation2 + $0x18] sm:$0xf] }
0x1303   :  { %v5173_v18 = vpop.f32.mrf.mxu3  ;;  %v9711_v13 = vor.u32 %v10834_v25, %v9708_v63  ;;  %v10814_v63 = vld [vmem:[%s15198_s30 + $0x8] sm:$0xff] }
0x1304   :  { %v5217_v16 = vpack.c.bf16 %v5212_v7, %v5212_v7  ;;  %v9694_v7 = vld [vmem:[#allocation2 + $0x30] sm:$0xf] }
0x1305   :  { %5655 = vmatpush.bf16.msrb.mxu0 %v9731_v19  ;;  %v9695_v18 = vor.u32 %v10832_v50, %v9694_v7  ;;  %v9762_v7 = vld [vmem:[#allocation2 + $0xb0] sm:$0xf]  ;;  %v10848_v50 = vld [vmem:[#allocation2 + $0xb8] sm:$0xf0] }
0x1306   :  { %v5222_v42 = vsel %vm226_vm0, %v5217_v16, 0  ;;  %v9696_v16 = vld [vmem:[#allocation2 + $0x3c] sm:$0xf0] }
0x1307   :  { %5229 = vmatpush.bf16.msrb.mxu1 %v5222_v42  ;;  %v9699_v12 = vor.u32 %v10831_v24, %v9696_v16  ;;  %v10829_v42 = vld [vmem:[#allocation2 + $0x20] sm:$0xf0]  ;;  %v9763_v24 = vor.u32 %v10848_v50, %v9762_v7 }
0x1309   :  { %5656 = vmatpush.bf16.msrb.mxu0 %v9719_v39 }
0x130b   :  { %v5425_v52 = vpop.f32.mrf.mxu3  ;;  %5230 = vmatpush.bf16.msrb.mxu1 %v5216_v17  ;;  %v9684_v17 = vld [vmem:[#allocation2 + $0x24] sm:$0xf0] }
0x130c   :  { %v14266_v38 = vadd.f32 %v5425_v52, %v5387_v34  ;;  %v9683_v34 = vor.u32 %v10829_v42, %v9682_v15  ;;  %v9687_v52 = vor.u32 %v10828_v8, %v9684_v17  ;;  %v10842_v15 = vld [vmem:[#allocation2 + $0x88] sm:$0xf0]  ;;  %v9726_v42 = vld [vmem:[#allocation2 + $0x68] sm:$0xf] }
0x130d   :  { %5657 = vmatpush.bf16.msrb.mxu0 %v9707_v57  ;;  %v10815_v57 = vld [vmem:[%s15198_s30 + $0x10] sm:$0xff] }
0x130e   :  { %5434 = vadd.xlane.f32.xlu2 %v14266_v38 }
0x130f   :  { %5231 = vmatpush.bf16.msrb.mxu1 %v5215_v55  ;;  %v10826_v55 = vld [vmem:[#allocation2 + $0x8] sm:$0xf0] }
0x1311   :  { %5658 = vmatpush.bf16.msrb.mxu0 %v9695_v18  ;;  %v10845_v18 = vld [vmem:[#allocation2 + $0xa0] sm:$0xf0] }
0x1312   :  { %9618 = vmatmul.msk.bf16.vlgmr.msrb.gmra.mxu1 %vm806_vm7, %v5214_v10  ;;  %v9671_v10 = vor.u32 %v10826_v55, %v9670_v40  ;;  %v9702_v55 = vld [vmem:[#allocation2 + $0x38] sm:$0xf] }
0x1313   :  { %v5427_v49 = vpop.f32.mrf.mxu3  ;;  %5667 = vmatpush.bf16.msra.mxu1 %v9759_v30 }
0x1314   :  { %v14271_v22 = vadd.f32 %v5427_v49, %v5388_v29  ;;  %v10825_v29 = vld [vmem:[#allocation2 + $0x4] sm:$0xf]  ;;  %v9672_v49 = vld [vmem:[#allocation2 + $0xc] sm:$0xf0] }
0x1315   :  { %5659 = vmatpush.bf16.msrb.mxu0 %v9683_v34 }
0x1316   :  { %5436 = vadd.xlane.f32.xlu2 %v14271_v22 }
0x1317   :  { %5668 = vmatpush.bf16.msra.mxu1 %v9747_v46 }
0x1319   :  { %5660 = vmatpush.bf16.msrb.mxu0 %v9671_v10  ;;  %v10833_v10 = vld [vmem:[#allocation2 + $0x40] sm:$0xf0] }
0x131b   :  { %5669 = vmatpush.bf16.msra.mxu1 %v9735_v26 }
0x131f   :  { %5670 = vmatpush.bf16.msra.mxu1 %v9723_v28 }
0x1323   :  { %5671 = vmatpush.bf16.msra.mxu1 %v9711_v13  ;;  %v10813_v13 = vld [vmem:[%s15198_s30] sm:$0xff] }
0x1327   :  { %5672 = vmatpush.bf16.msra.mxu1 %v9699_v12  ;;  %v9738_v12 = vld [vmem:[#allocation2 + $0x80] sm:$0xf] }
0x1328   :  { %v9739_v8 = vor.u32 %v10842_v15, %v9738_v12 }
0x132b   :  { %5673 = vmatpush.bf16.msra.mxu1 %v9687_v52  ;;  %v9714_v52 = vld [vmem:[#allocation2 + $0x50] sm:$0xf] }
0x1381   :  { %v5435_v21 = vpop.xlane.xlu2 %5434 }
0x1382   :  { %v5438_v0 = vmul.f32 %v5435_v21, %v12082_v45  ;;  %v9675_v21 = vor.u32 %v10825_v29, %v9672_v49  ;;  %v9703_v49 = vor.u32 %v10833_v10, %v9702_v55 }
0x1384   :  { %v14276_v27 = vsub.f32 %v14266_v38, %v5438_v0  ;;  %5674 = vmatpush.bf16.msra.mxu1 %v9675_v21  ;;  %v10820_v0 = vld [vmem:[%s15198_s30 + $0x38] sm:$0xff]  ;;  %v9690_v21 = vld [vmem:[#allocation2 + $0x20] sm:$0xf] }
0x1385   :  { %5334 = vmatpush.bf16.msra.mxu2 %v10820_v0  ;;  %v10830_v0 = vld [vmem:[#allocation2 + $0x28] sm:$0xf0] }
0x1386   :  { %v5442_v4 = vmul.f32 %v14276_v27, %v14276_v27 }
0x1388   :  { %5444 = vadd.xlane.f32.xlu2 %v5442_v4 }
0x1389   :  { %v5437_v33 = vpop.xlane.xlu2 %5436 }
0x138a   :  { %v5439_v37 = vmul.f32 %v5437_v33, %v12082_v45 }
0x138c   :  { %v14282_v44 = vsub.f32 %v14271_v22, %v5439_v37 }
0x138e   :  { %v5443_v14 = vmul.f32 %v14282_v44, %v14282_v44 }
0x138f   :  { %v14286_v2 = vpop.f32.mrf.mxu1 }
0x1390   :  { %5446 = vadd.xlane.f32.xlu2 %v5443_v14  ;;  %v5239_v51 = vsel %vm265_vm2, %v14286_v2, 0.0  ;;  %v10819_v14 = vld [vmem:[%s15198_s30 + $0x30] sm:$0xff] }
0x1391   :  { %5240 = vadd.xlane.f32.xlu1 %v5239_v51  ;;  %5335 = vmatpush.bf16.msra.mxu2 %v10819_v14  ;;  %v9678_v14 = vld [vmem:[#allocation2 + $0x8] sm:$0xf] }
0x1395   :  { %5336 = vmatpush.bf16.msra.mxu2 %v10818_v31 }
0x1397   :  { %v5235_v5 = vpop.f32.mrf.mxu1 }
0x1399   :  { %5337 = vmatpush.bf16.msra.mxu2 %v10817_v3  ;;  %v11190_v3 = vld [vmem:[%s15202_s7] ss:$0 sm:$0xff] }
0x13fb   :  { %v5445_v11 = vpop.xlane.xlu2 %5444 }
0x13fc   :  { %v5448_v61 = vmul.f32 %v5445_v11, %v12082_v45  ;;  %v10839_v11 = vld [vmem:[#allocation2 + $0x70] sm:$0xf0] }
0x13fd   :  { %v9727_v34 = vor.u32 %v10839_v11, %v9726_v42 }
0x13fe   :  { %v5450_v48 = vadd.f32 1e-05, %v5448_v61 }
0x1400   :  { %11575 = vrsqrt.f32 %v5450_v48  ;;  %vm5458_vm7 = vweird.f32 %v5450_v48 }
0x1403   :  { %v5447_v4 = vpop.xlane.xlu2 %5446 }
0x1404   :  { %v5449_v33 = vmul.f32 %v5447_v4, %v12082_v45  ;;  %v5241_v37 = vpop.xlane.xlu1 %5240  ;;  %v9691_v4 = vor.u32 %v10830_v0, %v9690_v21 }
0x1405   :  { %v5242_v51 = vmul.f32 %v5241_v37, %v12082_v45 }
0x1406   :  { %v11576_v5 = vpop.eup %11575  ;;  %v5451_v1 = vadd.f32 1e-05, %v5449_v33 }
0x1407   :  { %v5453_v60 = vmul.f32 %v11576_v5, %v5450_v48  ;;  %v14296_v23 = vsub.f32 %v14286_v2, %v5242_v51  ;;  %vm5459_vm0 = vweird.f32 %v11576_v5  ;;  %v10836_v48 = vld [vmem:[#allocation2 + $0x58] sm:$0xf0]  ;;  %v10827_v51 = vld [vmem:[#allocation2 + $0x10] sm:$0xf0] }
0x1408   :  { %11577 = vrsqrt.f32 %v5451_v1  ;;  %vm5460_vm14 = vmor %vm5458_vm7, %vm5459_vm0  ;;  %v9715_v40 = vor.u32 %v10836_v48, %v9714_v52  ;;  %v5431_v48 = vld [vmem:[%s15204_s11 + $0x8] sm:$0xff] }
0x1409   :  { %v5454_v43 = vmul.f32 %v11576_v5, %v5453_v60  ;;  %v5244_v30 = vmul.f32 %v14296_v23, %v14296_v23 }
0x140b   :  { %v5455_v59 = vmul.f32 0.5, %v5454_v43  ;;  %v5245_v53 = vsel %vm265_vm2, %v5244_v30, 0.0  ;;  %vm5468_vm2 = vweird.f32 %v5451_v1  ;;  %v11189_v30 = vld [vmem:[%s15201_s20] ss:$0 sm:$0xff] }
0x140c   :  { %5246 = vadd.xlane.f32.xlu2 %v5245_v53 }
0x140d   :  { %v5456_v41 = vsub.f32 1.5, %v5455_v59 }
0x140e   :  { %v11578_v47 = vpop.eup %11577 }
0x140f   :  { %v5457_v46 = vmul.f32 %v11576_v5, %v5456_v41  ;;  %v5463_v2 = vmul.f32 %v11578_v47, %v5451_v1  ;;  %vm5469_vm10 = vweird.f32 %v11578_v47  ;;  %v9679_v1 = vor.u32 %v10827_v51, %v9678_v14 }
0x1410   :  { %vm5470_vm1 = vmor %vm5468_vm2, %vm5469_vm10 }
0x1411   :  { %v5464_v9 = vmul.f32 %v11578_v47, %v5463_v2  ;;  %v5461_v62 = vsel %vm5460_vm14, %v11576_v5, %v5457_v46 }
0x1412   :  { %v5472_v26 = vmul.f32 %v5461_v62, %v14276_v27  ;;  %v10816_v27 = vld [vmem:[%s15198_s30 + $0x18] sm:$0xff] }
0x1413   :  { %v5465_v32 = vmul.f32 0.5, %v5464_v9  ;;  %5338 = vmatpush.bf16.msra.mxu2 %v10816_v27  ;;  %v5517_v9 = vld [vmem:[%s15203_s10] sm:$0x7] }
0x1414   :  { %v5477_v39 = vmul.f32 %v11187_v36, %v5472_v26 }
0x1415   :  { %v5466_v19 = vsub.f32 1.5, %v5465_v32  ;;  %v5520_v32 = vperm.slane %v5517_v9, 1 }
0x1416   :  { %v5482_v35 = vadd.f32 %v11188_v56, %v5477_v39 }
0x1417   :  { %v5467_v58 = vmul.f32 %v11578_v47, %v5466_v19  ;;  %5339 = vmatpush.bf16.msra.mxu2 %v10815_v57 }
0x1419   :  { %v5471_v6 = vsel %vm5470_vm1, %v11578_v47, %v5467_v58 }
0x141a   :  { %v5473_v54 = vmul.f32 %v5471_v6, %v14282_v44  ;;  %v9750_v44 = vld [vmem:[#allocation2 + $0x98] sm:$0xf] }
0x141b   :  { %5340 = vmatpush.bf16.msra.mxu2 %v10814_v63  ;;  %v9751_v16 = vor.u32 %v10845_v18, %v9750_v44 }
0x141c   :  { %v5478_v28 = vmul.f32 %v11187_v36, %v5473_v54 }
0x141e   :  { %v5483_v20 = vadd.f32 %v11188_v56, %v5478_v28  ;;  %v5519_v56 = vperm.slane %v5517_v9, 0 }
0x141f   :  { %5341 = vmatpush.bf16.msra.mxu2 %v10813_v13 }
0x1420   :  { %v14307_v25 = vpack.c.bf16 %v5483_v20, %v5482_v35 }
0x1422   :  { %5661 = vmatmul.bf16.vlgmr.msrb.gmra.mxu0 %v14307_v25  ;;  %5675 = vmatmul.bf16.vlgmr.msra.gmra.mxu1 %v14307_v25 }
0x1423   :  { %5681 = vmatpush.bf16.msrb.mxu2 %v9763_v24  ;;  %v5521_v24 = vperm.slane %v5517_v9, 2 }
0x1427   :  { %5682 = vmatpush.bf16.msrb.mxu2 %v9751_v16  ;;  %v5430_v16 = vld [vmem:[%s15204_s11] sm:$0xff] }
0x142b   :  { %5683 = vmatpush.bf16.msrb.mxu2 %v9739_v8 }
0x142f   :  { %5684 = vmatpush.bf16.msrb.mxu2 %v9727_v34 }
0x1433   :  { %5685 = vmatpush.bf16.msrb.mxu2 %v9715_v40 }
0x1437   :  { %5686 = vmatpush.bf16.msrb.mxu2 %v9703_v49 }
0x143b   :  { %5687 = vmatpush.bf16.msrb.mxu2 %v9691_v4 }
0x143f   :  { %5688 = vmatpush.bf16.msrb.mxu2 %v9679_v1 }
0x147f   :  { %v5247_v17 = vpop.xlane.xlu2 %5246 }
0x1480   :  { %v5248_v61 = vmul.f32 %v5247_v17, %v12082_v45 }
0x1482   :  { %v5249_v29 = vadd.f32 1e-05, %v5248_v61 }
0x1484   :  { %11579 = vrsqrt.f32 %v5249_v29  ;;  %vm5256_vm3 = vweird.f32 %v5249_v29 }
0x148a   :  { %v11580_v33 = vpop.eup %11579 }
0x148b   :  { %v5251_v37 = vmul.f32 %v11580_v33, %v5249_v29  ;;  %vm5257_vm15 = vweird.f32 %v11580_v33 }
0x148c   :  { %vm5258_vm13 = vmor %vm5256_vm3, %vm5257_vm15 }
0x148d   :  { %v5252_v5 = vmul.f32 %v11580_v33, %v5251_v37 }
0x148f   :  { %v5253_v60 = vmul.f32 0.5, %v5252_v5 }
0x1491   :  { %v5254_v31 = vsub.f32 1.5, %v5253_v60 }
0x1493   :  { %v5255_v43 = vmul.f32 %v11580_v33, %v5254_v31 }
0x1495   :  { %v5259_v59 = vsel %vm5258_vm13, %v11580_v33, %v5255_v43 }
0x1496   :  { %v5260_v53 = vmul.f32 %v5259_v59, %v14296_v23 }
0x1498   :  { %v5264_v41 = vmul.f32 %v11189_v30, %v5260_v53 }
0x149a   :  { %v5268_v47 = vadd.f32 %v11190_v3, %v5264_v41 }
0x149c   :  { %v5285_v46 = vpack.c.bf16 %v5268_v47, %v5268_v47 }
0x149e   :  { %5342 = vmatmul.bf16.vlgmr.msra.gmra.mxu2 %v5285_v46 }
0x149f   :  { %v5676_v2 = vpop.f32.mrf.mxu1  ;;  %v5662_v62 = vpop.f32.mrf.mxu0 }
0x14a0   :  { %v5677_v36 = vadd.f32 %v5676_v2, %v5520_v32  ;;  %v5663_v54 = vadd.f32 %v5662_v62, %v5519_v56 }
0x14a7   :  { %v5678_v19 = vpop.f32.mrf.mxu1  ;;  %v5664_v6 = vpop.f32.mrf.mxu0 }
0x14a8   :  { %v5679_v26 = vadd.f32 %v5678_v19, %v5520_v32  ;;  %v5665_v39 = vadd.f32 %v5664_v6, %v5519_v56 }
0x14aa   :  { %v5696_v58 = vpack.c.bf16 %v5679_v26, %v5677_v36  ;;  %v5695_v28 = vpack.c.bf16 %v5665_v39, %v5663_v54 }
0x14ac   :  { %5839 = vrot.lane.b32.xlu2 %v5696_v58, %s11837_s13  ;;  %5767 = vrot.lane.b32.xlu0 %v5696_v58, %s11835_s5  ;;  %v5701_v23 = vsel %vm754_vm6, %v5696_v58, 0 }
0x14ad   :  { %5710 = vmatpush.bf16.xpose.msrb.mxu3 %v5701_v23 }
0x14ae   :  { %5689 = vmatmul.bf16.vlgmr.msrb.gmra.mxu2 %v14307_v25 }
0x14b4   :  { %5908 = vrot.lane.b32.xlu2 %v5695_v28, %s11836_s9  ;;  %5764 = vrot.lane.b32.xlu0 %v5695_v28, %s11835_s5 }
0x14b5   :  { %9764 = vmatmul.msk.bf16.vlgmr.msrb.gmra.mxu3 %vm754_vm6, %v5695_v28 }
0x14bc   :  { %5837 = vrot.lane.b32.xlu0 %v5695_v28, %s11837_s13 }
0x14c4   :  { %5910 = vrot.lane.b32.xlu0 %v5696_v58, %s11836_s9 }
0x1506   :  { %v5840_v35 = vpop.permute.xlu2 %5839 }
0x1507   :  { %v5845_v20 = vsel %vm754_vm6, %v5840_v35, 0 }
0x1508   :  { %5854 = vmatpush.bf16.xpose.msra.mxu2 %v5845_v20 }
0x150e   :  { %v5909_v52 = vpop.permute.xlu2 %5908 }
0x151e   :  { %v5768_v27 = vpop.permute.xlu0 %5767 }
0x151f   :  { %v5773_v25 = vsel %vm754_vm6, %v5768_v27, 0 }
0x1520   :  { %5782 = vmatpush.bf16.xpose.msra.mxu0 %v5773_v25 }
0x1521   :  { %v14331_v57 = vpop.f32.mrf.mxu2 }
0x1526   :  { %v5765_v63 = vpop.permute.xlu0 %5764 }
0x1527   :  { %9766 = vmatmul.msk.bf16.vlgmr.msra.gmra.mxu0 %vm754_vm6, %v5765_v63 }
0x1529   :  { %v5345_v13 = vpop.f32.mrf.mxu2 }
0x152e   :  { %v5838_v7 = vpop.permute.xlu0 %5837 }
0x152f   :  { %9768 = vmatmul.msk.bf16.vlgmr.msra.gmra.mxu2 %vm754_vm6, %v5838_v7 }
0x1531   :  { %v5690_v50 = vpop.f32.mrf.mxu2 }
0x1532   :  { %v5691_v8 = vadd.f32 %v5690_v50, %v5521_v24 }
0x1536   :  { %v5911_v44 = vpop.permute.xlu0 %5910 }
0x1537   :  { %v5916_v18 = vsel %vm754_vm6, %v5911_v44, 0 }
0x1538   :  { %v5712_v12 = vpop.f32.mrf.mxu3  ;;  %5925 = vmatpush.bf16.xpose.msrb.mxu0 %v5916_v18 }
0x1539   :  { %v5717_v15 = vmul.f32 0.17677669, %v5712_v12  ;;  %v5692_v42 = vpop.f32.mrf.mxu2 }
0x153a   :  { %v5693_v11 = vadd.f32 %v5692_v42, %v5521_v24 }
0x153b   :  { %v5719_v34 = vadd.f32 %v5717_v15, %v5430_v16 }
0x153c   :  { %v14337_v17 = vpack.c.bf16 %v5693_v11, %v5691_v8 }
0x153d   :  { %v5722_v61 = vsel %vm5721_vm12, %v5719_v34, -inf }
0x153e   :  { %5723 = vmax.xlane.f32.xlu1 %v5722_v61  ;;  %5756 = vmatpush.bf16.msra.mxu3 %v14337_v17 }
0x153f   :  { %9770 = vmatmul.msk.bf16.vlgmr.msrb.gmra.mxu0 %vm754_vm6, %v5909_v52 }
0x1540   :  { %v5714_v40 = vpop.f32.mrf.mxu3 }
0x1541   :  { %v5718_v55 = vmul.f32 0.17677669, %v5714_v40 }
0x1543   :  { %v5720_v10 = vadd.f32 %v5718_v55, %v5431_v48 }
0x1545   :  { %v5725_v29 = vsel %vm5721_vm12, %v5720_v10, -inf }
0x1546   :  { %5726 = vmax.xlane.f32.xlu0 %v5725_v29 }
0x155a   :  { %5817 = vrot.lane.b32.xlu0 %v14337_v17, %s11835_s5 }
0x15a4   :  { %v5784_v49 = vpop.f32.mrf.mxu0 }
0x15a5   :  { %v5789_v21 = vmul.f32 0.17677669, %v5784_v49 }
0x15a7   :  { %v5791_v0 = vadd.f32 %v5789_v21, %v5430_v16 }
0x15a9   :  { %v5793_v4 = vsel %vm5721_vm12, %v5791_v0, -inf }
0x15aa   :  { %5794 = vmax.xlane.f32.xlu2 %v5793_v4 }
0x15ac   :  { %v5786_v5 = vpop.f32.mrf.mxu0 }
0x15ad   :  { %v5790_v31 = vmul.f32 0.17677669, %v5786_v5 }
0x15af   :  { %v5792_v53 = vadd.f32 %v5790_v31, %v5431_v48 }
0x15b1   :  { %v5724_v33 = vpop.xlane.xlu1 %5723  ;;  %v5796_v9 = vsel %vm5721_vm12, %v5792_v53, -inf }
0x15b2   :  { %v5728_v37 = vsub.f32 %v5719_v34, %v5724_v33  ;;  %v5856_v14 = vpop.f32.mrf.mxu2 }
0x15b3   :  { %v5861_v51 = vmul.f32 0.17677669, %v5856_v14 }
0x15b4   :  { %v5730_v1 = vmul.f32 1.442695, %v5728_v37 }
0x15b5   :  { %v5863_v60 = vadd.f32 %v5861_v51, %v5430_v16 }
0x15b6   :  { %11581 = vpow2.f32 %v5730_v1 }
0x15b7   :  { %v5865_v43 = vsel %vm5721_vm12, %v5863_v60, -inf }
0x15b8   :  { %5866 = vmax.xlane.f32.xlu1 %v5865_v43 }
0x15b9   :  { %v5727_v30 = vpop.xlane.xlu0 %5726 }
0x15ba   :  { %v5729_v59 = vsub.f32 %v5720_v10, %v5727_v30  ;;  %v5858_v47 = vpop.f32.mrf.mxu2 }
0x15bb   :  { %v5862_v2 = vmul.f32 0.17677669, %v5858_v47 }
0x15bc   :  { %v11582_v3 = vpop.eup %11581  ;;  %v5732_v41 = vmul.f32 1.442695, %v5729_v59  ;;  %v5927_v62 = vpop.f32.mrf.mxu0 }
0x15bd   :  { %v5734_v46 = vsel %vm5721_vm12, %v11582_v3, 0.0  ;;  %v5864_v32 = vadd.f32 %v5862_v2, %v5431_v48  ;;  %v5932_v26 = vmul.f32 0.17677669, %v5927_v62 }
0x15be   :  { %11583 = vpow2.f32 %v5732_v41  ;;  %5735 = vadd.xlane.f32.xlu2 %v5734_v46 }
0x15bf   :  { %v5868_v58 = vsel %vm5721_vm12, %v5864_v32, -inf  ;;  %v5934_v6 = vadd.f32 %v5932_v26, %v5430_v16 }
0x15c0   :  { %5797 = vmax.xlane.f32.xlu1 %v5796_v9 }
0x15c1   :  { %v5936_v54 = vsel %vm5721_vm12, %v5934_v6, -inf }
0x15c4   :  { %v11584_v19 = vpop.eup %11583  ;;  %v5929_v56 = vpop.f32.mrf.mxu0 }
0x15c5   :  { %v5737_v36 = vsel %vm5721_vm12, %v11584_v19, 0.0  ;;  %v5933_v39 = vmul.f32 0.17677669, %v5929_v56 }
0x15c6   :  { %5738 = vadd.xlane.f32.xlu0 %v5737_v36 }
0x15c7   :  { %v5935_v28 = vadd.f32 %v5933_v39, %v5431_v48 }
0x15c8   :  { %5869 = vmax.xlane.f32.xlu1 %v5868_v58 }
0x15c9   :  { %v5939_v35 = vsel %vm5721_vm12, %v5935_v28, -inf }
0x15cc   :  { %v5818_v23 = vpop.permute.xlu0 %5817 }
0x15cd   :  { %5830 = vmatpush.bf16.msrb.mxu1 %v5818_v23 }
0x15d0   :  { %5937 = vmax.xlane.f32.xlu1 %v5936_v54 }
0x15d8   :  { %5940 = vmax.xlane.f32.xlu1 %v5939_v35 }
0x15da   :  { %5959 = vrot.lane.b32.xlu0 %v14337_v17, %s11836_s9 }
0x161d   :  { %v5795_v20 = vpop.xlane.xlu2 %5794 }
0x161e   :  { %v5799_v27 = vsub.f32 %v5791_v0, %v5795_v20 }
0x1620   :  { %v5801_v25 = vmul.f32 1.442695, %v5799_v27 }
0x1622   :  { %11585 = vpow2.f32 %v5801_v25 }
0x1628   :  { %v11586_v63 = vpop.eup %11585 }
0x1629   :  { %v5805_v13 = vsel %vm5721_vm12, %v11586_v63, 0.0 }
0x162a   :  { %5806 = vadd.xlane.f32.xlu1 %v5805_v13 }
0x162b   :  { %v5867_v7 = vpop.xlane.xlu1 %5866 }
0x162c   :  { %v5871_v50 = vsub.f32 %v5863_v60, %v5867_v7 }
0x162e   :  { %v5873_v24 = vmul.f32 1.442695, %v5871_v50 }
0x1630   :  { %11587 = vpow2.f32 %v5873_v24 }
0x1631   :  { %v5736_v18 = vpop.xlane.xlu2 %5735 }
0x1632   :  { %11589 = vrcp.f32 %v5736_v18 }
0x1633   :  { %v5798_v44 = vpop.xlane.xlu1 %5797 }
0x1634   :  { %v5800_v16 = vsub.f32 %v5792_v53, %v5798_v44 }
0x1636   :  { %v14357_v12 = vpop.eup %11587  ;;  %v5803_v15 = vmul.f32 1.442695, %v5800_v16 }
0x1637   :  { %v5877_v42 = vsel %vm5721_vm12, %v14357_v12, 0.0 }
0x1638   :  { %11591 = vpow2.f32 %v5803_v15  ;;  %5878 = vadd.xlane.f32.xlu1 %v5877_v42  ;;  %v11590_v61 = vpop.eup %11589  ;;  %v10855_v15 = vld [vmem:[%s15205_s15 + $0x30] sm:$0xff]  ;;  %v10854_v42 = vld [vmem:[%s15205_s15 + $0x28] sm:$0xff] }
0x1639   :  { %v5739_v8 = vpop.xlane.xlu0 %5738  ;;  %v5742_v10 = vmul.f32 %v11590_v61, %v11582_v3  ;;  %v10850_v61 = vld [vmem:[%s15205_s15 + $0x8] sm:$0xff] }
0x163a   :  { %11593 = vrcp.f32 %v5739_v8  ;;  %v10853_v8 = vld [vmem:[%s15205_s15 + $0x20] sm:$0xff] }
0x163b   :  { %v5870_v11 = vpop.xlane.xlu1 %5869 }
0x163c   :  { %v5872_v34 = vsub.f32 %v5864_v32, %v5870_v11  ;;  %v10852_v11 = vld [vmem:[%s15205_s15 + $0x18] sm:$0xff] }
0x163e   :  { %v11592_v52 = vpop.eup %11591  ;;  %v5875_v48 = vmul.f32 1.442695, %v5872_v34  ;;  %v10851_v34 = vld [vmem:[%s15205_s15 + $0x10] sm:$0xff] }
0x163f   :  { %v5808_v40 = vsel %vm5721_vm12, %v11592_v52, 0.0 }
0x1640   :  { %v11594_v55 = vpop.eup %11593  ;;  %11595 = vpow2.f32 %v5875_v48  ;;  %5809 = vadd.xlane.f32.xlu2 %v5808_v40 }
0x1641   :  { %v5743_v29 = vmul.f32 %v11594_v55, %v11584_v19 }
0x1643   :  { %v5744_v49 = vpack.c.bf16 %v5743_v29, %v5742_v10  ;;  %v5938_v21 = vpop.xlane.xlu1 %5937 }
0x1644   :  { %v5942_v0 = vsub.f32 %v5934_v6, %v5938_v21 }
0x1645   :  { %9765 = vmatmul.msk.bf16.vlgmr.msra.gmra.mxu3 %vm5721_vm12, %v5744_v49 }
0x1646   :  { %v11596_v4 = vpop.eup %11595  ;;  %v5944_v33 = vmul.f32 1.442695, %v5942_v0 }
0x1647   :  { %v5880_v37 = vsel %vm5721_vm12, %v11596_v4, 0.0 }
0x1648   :  { %11597 = vpow2.f32 %v5944_v33  ;;  %5881 = vadd.xlane.f32.xlu2 %v5880_v37 }
0x164b   :  { %v5941_v14 = vpop.xlane.xlu1 %5940 }
0x164c   :  { %v5943_v51 = vsub.f32 %v5935_v28, %v5941_v14  ;;  %v5960_v5 = vpop.permute.xlu0 %5959 }
0x164d   :  { %5972 = vmatpush.bf16.msra.mxu1 %v5960_v5 }
0x164e   :  { %v11598_v1 = vpop.eup %11597  ;;  %v5946_v60 = vmul.f32 1.442695, %v5943_v51 }
0x164f   :  { %v5948_v31 = vsel %vm5721_vm12, %v11598_v1, 0.0 }
0x1650   :  { %11599 = vpow2.f32 %v5946_v60  ;;  %5949 = vadd.xlane.f32.xlu1 %v5948_v31  ;;  %v11191_v31 = vld [vmem:[%s15206_s16] ss:$0 sm:$0xff] }
0x1656   :  { %v11600_v43 = vpop.eup %11599 }
0x1657   :  { %v5951_v30 = vsel %vm5721_vm12, %v11600_v43, 0.0 }
0x1658   :  { %5952 = vadd.xlane.f32.xlu2 %v5951_v30 }
0x1669   :  { %5888 = vrot.lane.b32.xlu1 %v14337_v17, %s11837_s13 }
0x169d   :  { %v5807_v59 = vpop.xlane.xlu1 %5806 }
0x169e   :  { %11601 = vrcp.f32 %v5807_v59 }
0x16a4   :  { %v11602_v3 = vpop.eup %11601 }
0x16a5   :  { %v5813_v47 = vmul.f32 %v11602_v3, %v11586_v63 }
0x16ab   :  { %v5879_v9 = vpop.xlane.xlu1 %5878 }
0x16b3   :  { %v5810_v53 = vpop.xlane.xlu2 %5809 }
0x16b4   :  { %11603 = vrcp.f32 %v5810_v53 }
0x16ba   :  { %v11604_v41 = vpop.eup %11603 }
0x16bb   :  { %v5814_v46 = vmul.f32 %v11604_v41, %v11592_v52  ;;  %v5882_v62 = vpop.xlane.xlu2 %5881  ;;  %v10849_v52 = vld [vmem:[%s15205_s15] sm:$0xff] }
0x16bd   :  { %v5815_v2 = vpack.c.bf16 %v5814_v46, %v5813_v47 }
0x16bf   :  { %9767 = vmatmul.msk.bf16.vlgmr.msrb.gmra.mxu1 %vm5721_vm12, %v5815_v2 }
0x16c3   :  { %v5950_v32 = vpop.xlane.xlu1 %5949 }
0x16c4   :  { %11605 = vrcp.f32 %v5950_v32 }
0x16c8   :  { %v5758_v63 = vpop.f32.mrf.mxu3 }
0x16ca   :  { %v11606_v36 = vpop.eup %11605 }
0x16cb   :  { %v5953_v19 = vpop.xlane.xlu2 %5952  ;;  %v5956_v26 = vmul.f32 %v11606_v36, %v11598_v1  ;;  %v10887_v36 = vld [vmem:[%s15209_s18 + $0xec] sm:$0xf0] }
0x16cc   :  { %11607 = vrcp.f32 %v5953_v19  ;;  %v9918_v19 = vld [vmem:[%s15209_s18 + $0xe0] sm:$0xf] }
0x16cd   :  { %11609 = vrcp.f32 %v5882_v62 }
0x16ce   :  { %11611 = vrcp.f32 %v5879_v9 }
0x16d0   :  { %v5760_v13 = vpop.f32.mrf.mxu3 }
0x16d2   :  { %v11608_v17 = vpop.eup %11607 }
0x16d3   :  { %v5957_v58 = vmul.f32 %v11608_v17, %v11600_v43  ;;  %v11610_v56 = vpop.eup %11609  ;;  %v10885_v17 = vld [vmem:[%s15209_s18 + $0xe4] sm:$0xf] }
0x16d4   :  { %v11612_v23 = vpop.eup %11611  ;;  %v5886_v39 = vmul.f32 %v11610_v56, %v11596_v4  ;;  %v10888_v56 = vld [vmem:[%s15209_s18 + $0xf4] sm:$0xf0] }
0x16d5   :  { %v5958_v6 = vpack.c.bf16 %v5957_v58, %v5956_v26  ;;  %v5885_v54 = vmul.f32 %v11612_v23, %v14357_v12  ;;  %v10856_v12 = vld [vmem:[%s15205_s15 + $0x38] sm:$0xff]  ;;  %v9919_v26 = vor.u32 %v10887_v36, %v9918_v19  ;;  %v9920_v58 = vld [vmem:[%s15209_s18 + $0xf0] sm:$0xf0] }
0x16d6   :  { %6074 = vmatpush.bf16.msrb.mxu2 %v10856_v12  ;;  %v9923_v23 = vor.u32 %v10885_v17, %v9920_v58  ;;  %v9864_v19 = vld [vmem:[%s15209_s18 + $0x78] sm:$0xf0]  ;;  %v9838_v17 = vld [vmem:[%s15209_s18 + $0x40] sm:$0xf]  ;;  %v10865_v58 = vld [vmem:[%s15209_s18 + $0x44] sm:$0xf] }
0x16d7   :  { %9771 = vmatmul.msk.bf16.vlgmr.msra.gmra.mxu1 %vm5721_vm12, %v5958_v6  ;;  %v5887_v35 = vpack.c.bf16 %v5886_v39, %v5885_v54  ;;  %v9926_v6 = vld [vmem:[%s15209_s18 + $0xe8] sm:$0xf]  ;;  %v10886_v54 = vld [vmem:[%s15209_s18 + $0xec] sm:$0xf] }
0x16d8   :  { %v9927_v39 = vor.u32 %v10888_v56, %v9926_v6  ;;  %6365 = vmatpush.bf16.msra.mxu0 %v9923_v23  ;;  %v9840_v56 = vld [vmem:[%s15209_s18 + $0x50] sm:$0xf0]  ;;  %v9846_v23 = vld [vmem:[%s15209_s18 + $0x48] sm:$0xf] }
0x16da   :  { %6075 = vmatpush.bf16.msrb.mxu2 %v10855_v15  ;;  %6379 = vmatpush.bf16.msrb.mxu1 %v9927_v39  ;;  %v9886_v15 = vld [vmem:[%s15209_s18 + $0xa0] sm:$0xf]  ;;  %v10868_v39 = vld [vmem:[%s15209_s18 + $0x54] sm:$0xf0] }
0x16db   :  { %v5889_v28 = vpop.permute.xlu1 %5888 }
0x16dc   :  { %5901 = vmatpush.bf16.msrb.mxu3 %v5889_v28  ;;  %v9928_v28 = vld [vmem:[%s15209_s18 + $0xf8] sm:$0xf0] }
0x16de   :  { %6076 = vmatpush.bf16.msrb.mxu2 %v10854_v42  ;;  %v10879_v42 = vld [vmem:[%s15209_s18 + $0xac] sm:$0xf0] }
0x16df   :  { %9769 = vmatmul.msk.bf16.vlgmr.msrb.gmra.mxu3 %vm5721_vm12, %v5887_v35  ;;  %v9931_v35 = vor.u32 %v10886_v54, %v9928_v28  ;;  %v9843_v54 = vor.u32 %v10865_v58, %v9840_v56  ;;  %v9847_v28 = vor.u32 %v10868_v39, %v9846_v23 }
0x16e0   :  { %6351 = vmatpush.bf16.msra.mxu3 %v9919_v26  ;;  %v10867_v26 = vld [vmem:[%s15209_s18 + $0x4c] sm:$0xf0] }
0x16e1   :  { %v9839_v6 = vor.u32 %v10867_v26, %v9838_v17  ;;  %v11193_v17 = vld [vmem:[%s15211_s23] ss:$0 sm:$0xff] }
0x16e2   :  { %6077 = vmatpush.bf16.msrb.mxu2 %v10853_v8  ;;  %v10877_v8 = vld [vmem:[%s15209_s18 + $0xa4] sm:$0xf] }
0x16e6   :  { %6078 = vmatpush.bf16.msrb.mxu2 %v10852_v11  ;;  %v9887_v11 = vor.u32 %v10879_v42, %v9886_v15  ;;  %v10862_v42 = vld [vmem:[%s15209_s18 + $0x2c] sm:$0xf] }
0x16ea   :  { %6079 = vmatpush.bf16.msrb.mxu2 %v10851_v34  ;;  %v9888_v34 = vld [vmem:[%s15209_s18 + $0xb0] sm:$0xf0] }
0x16ee   :  { %6080 = vmatpush.bf16.msrb.mxu2 %v10850_v61  ;;  %v9894_v61 = vld [vmem:[%s15209_s18 + $0xa8] sm:$0xf] }
0x16f2   :  { %6081 = vmatpush.bf16.msrb.mxu2 %v10849_v52  ;;  %v10880_v52 = vld [vmem:[%s15209_s18 + $0xb4] sm:$0xf0] }
0x16f6   :  { %6393 = vmatpush.bf16.msra.mxu2 %v9931_v35  ;;  %v10866_v35 = vld [vmem:[%s15209_s18 + $0x4c] sm:$0xf] }
0x173c   :  { %v5832_v20 = vpop.f32.mrf.mxu1 }
0x1744   :  { %v5834_v27 = vpop.f32.mrf.mxu1 }
0x1745   :  { %v11143_v25 = vpack.i.bf16 %v5834_v27, %v5832_v20  ;;  %v9902_v20 = vld [vmem:[%s15209_s18 + $0xc0] sm:$0xf]  ;;  %v10883_v27 = vld [vmem:[%s15209_s18 + $0xcc] sm:$0xf0] }
0x1747   :  { %11144 = vrot.lane.b32.xlu2 %v11143_v25, %s11836_s9  ;;  %v10881_v25 = vld [vmem:[%s15209_s18 + $0xc4] sm:$0xf] }
0x1754   :  { %v5974_v50 = vpop.f32.mrf.mxu1 }
0x175c   :  { %v5976_v18 = vpop.f32.mrf.mxu1 }
0x175d   :  { %v11153_v16 = vpack.i.bf16 %v5976_v18, %v5974_v50  ;;  %v10884_v50 = vld [vmem:[%s15209_s18 + $0xd4] sm:$0xf0]  ;;  %v10882_v18 = vld [vmem:[%s15209_s18 + $0xcc] sm:$0xf] }
0x1762   :  { %v5903_v7 = vpop.f32.mrf.mxu3 }
0x176a   :  { %v5905_v24 = vpop.f32.mrf.mxu3 }
0x176b   :  { %v11148_v44 = vpack.i.bf16 %v5905_v24, %v5903_v7  ;;  %v9910_v7 = vld [vmem:[%s15209_s18 + $0xc8] sm:$0xf] }
0x176d   :  { %11149 = vrot.lane.b32.xlu0 %v11148_v44, %s11837_s13  ;;  %v9911_v44 = vor.u32 %v10884_v50, %v9910_v7 }
0x176f   :  { %6380 = vmatpush.bf16.msrb.mxu1 %v9911_v44  ;;  %v9830_v44 = vld [vmem:[%s15209_s18 + $0x28] sm:$0xf] }
0x1775   :  { %11154 = vrot.lane.b32.xlu0 %v11153_v16, %s11835_s5  ;;  %v9912_v16 = vld [vmem:[%s15209_s18 + $0xd8] sm:$0xf0] }
0x1776   :  { %v9915_v12 = vor.u32 %v10882_v18, %v9912_v16  ;;  %v10864_v18 = vld [vmem:[%s15209_s18 + $0x34] sm:$0xf0] }
0x1777   :  { %v9831_v15 = vor.u32 %v10864_v18, %v9830_v44 }
0x1778   :  { %6394 = vmatpush.bf16.msra.mxu2 %v9915_v12 }
0x17a1   :  { %v11145_v40 = vpop.permute.xlu2 %11144 }
0x17a2   :  { %v11147_v55 = vunpack.i.h.bf16 %v11145_v40  ;;  %v11146_v10 = vunpack.i.l.bf16 %v11145_v40  ;;  %v9895_v40 = vor.u32 %v10880_v52, %v9894_v61  ;;  %v9806_v61 = vld [vmem:[%s15209_s18] sm:$0xf]  ;;  %v10859_v52 = vld [vmem:[%s15209_s18 + $0xc] sm:$0xf0] }
0x17a4   :  { %v6003_v0 = vsel %vm754_vm6, %v5758_v63, %v11146_v10  ;;  %v6004_v4 = vsel %vm754_vm6, %v5760_v13, %v11147_v55  ;;  %v9903_v63 = vor.u32 %v10883_v27, %v9902_v20  ;;  %v9904_v13 = vld [vmem:[%s15209_s18 + $0xd0] sm:$0xf0]  ;;  %v10878_v55 = vld [vmem:[%s15209_s18 + $0xac] sm:$0xf]  ;;  %v9896_v10 = vld [vmem:[%s15209_s18 + $0xb8] sm:$0xf0]  ;;  %6381 = vmatpush.bf16.msrb.mxu1 %v9895_v40 }
0x17a5   :  { %v9907_v24 = vor.u32 %v10881_v25, %v9904_v13  ;;  %v9848_v20 = vld [vmem:[%s15209_s18 + $0x58] sm:$0xf0]  ;;  %v9822_v25 = vld [vmem:[%s15209_s18 + $0x20] sm:$0xf]  ;;  %v10861_v13 = vld [vmem:[%s15209_s18 + $0x24] sm:$0xf] }
0x17a6   :  { %6352 = vmatpush.bf16.msra.mxu3 %v9903_v63  ;;  %v9851_v27 = vor.u32 %v10866_v35, %v9848_v20  ;;  %v10863_v63 = vld [vmem:[%s15209_s18 + $0x2c] sm:$0xf0]  ;;  %v10857_v40 = vld [vmem:[%s15209_s18 + $0x4] sm:$0xf]  ;;  %v10904_v35 = vld [vmem:[%s12048_s27 + $0x78] sm:$0xff] }
0x17a7   :  { %6366 = vmatpush.bf16.msra.mxu0 %v9907_v24  ;;  %v9823_v50 = vor.u32 %v10863_v63, %v9822_v25  ;;  %v9824_v24 = vld [vmem:[%s15209_s18 + $0x30] sm:$0xf0]  ;;  %v10912_v20 = vld [vmem:[%s12048_s27 + $0xb8] sm:$0xff] }
0x17a8   :  { %v9827_v12 = vor.u32 %v10861_v13, %v9824_v24  ;;  %v10911_v24 = vld [vmem:[%s12048_s27 + $0xb0] sm:$0xff] }
0x17aa   :  { %6353 = vmatpush.bf16.msra.mxu3 %v9887_v11 }
0x17df   :  { %v11150_v48 = vpop.permute.xlu0 %11149 }
0x17e0   :  { %v11152_v29 = vunpack.i.h.bf16 %v11150_v48  ;;  %v11151_v49 = vunpack.i.l.bf16 %v11150_v48  ;;  %v9891_v48 = vor.u32 %v10877_v8, %v9888_v34  ;;  %v9832_v8 = vld [vmem:[%s15209_s18 + $0x38] sm:$0xf0] }
0x17e1   :  { %v9835_v11 = vor.u32 %v10862_v42, %v9832_v8 }
0x17e2   :  { %v6006_v14 = vsel %vm1470_vm9, %v6004_v4, %v11152_v29  ;;  %v6005_v51 = vsel %vm1470_vm9, %v6003_v0, %v11151_v49  ;;  %v9899_v29 = vor.u32 %v10878_v55, %v9896_v10  ;;  %6367 = vmatpush.bf16.msra.mxu0 %v9891_v48  ;;  %v9870_v49 = vld [vmem:[%s15209_s18 + $0x80] sm:$0xf]  ;;  %v10873_v0 = vld [vmem:[%s15209_s18 + $0x84] sm:$0xf]  ;;  %v9807_v48 = vor.u32 %v10859_v52, %v9806_v61  ;;  %v9808_v55 = vld [vmem:[%s15209_s18 + $0x10] sm:$0xf0] }
0x17e3   :  { %v9814_v10 = vld [vmem:[%s15209_s18 + $0x8] sm:$0xf] }
0x17e4   :  { %6395 = vmatpush.bf16.msra.mxu2 %v9899_v29  ;;  %v9811_v29 = vor.u32 %v10857_v40, %v9808_v55  ;;  %v10902_v61 = vld [vmem:[%s12048_s27 + $0x68] sm:$0xff] }
0x17e5   :  { %v10910_v52 = vld [vmem:[%s12048_s27 + $0xa8] sm:$0xff] }
0x17e7   :  { %v11155_v21 = vpop.permute.xlu0 %11154 }
0x17e8   :  { %v11157_v33 = vunpack.i.h.bf16 %v11155_v21  ;;  %v11156_v37 = vunpack.i.l.bf16 %v11155_v21  ;;  %v10875_v21 = vld [vmem:[%s15209_s18 + $0x8c] sm:$0xf0] }
0x17e9   :  { %v9871_v4 = vor.u32 %v10875_v21, %v9870_v49  ;;  %v10860_v49 = vld [vmem:[%s15209_s18 + $0x14] sm:$0xf0]  ;;  %v10858_v21 = vld [vmem:[%s15209_s18 + $0xc] sm:$0xf] }
0x17ea   :  { %v6007_v5 = vsel %vm15207_vm5, %v6005_v51, %v11156_v37  ;;  %v6008_v1 = vsel %vm15208_vm8, %v6006_v14, %v11157_v33  ;;  %v9872_v33 = vld [vmem:[%s15209_s18 + $0x90] sm:$0xf0]  ;;  %v9878_v37 = vld [vmem:[%s15209_s18 + $0x88] sm:$0xf]  ;;  %v10876_v14 = vld [vmem:[%s15209_s18 + $0x94] sm:$0xf0] }
0x17eb   :  { %v6025_v60 = vpack.c.bf16 %v6008_v1, %v6007_v5  ;;  %v9875_v51 = vor.u32 %v10873_v0, %v9872_v33  ;;  %v9879_v5 = vor.u32 %v10876_v14, %v9878_v37  ;;  %v10874_v1 = vld [vmem:[%s15209_s18 + $0x8c] sm:$0xf]  ;;  %6354 = vmatpush.bf16.msra.mxu3 %v9871_v4  ;;  %v9816_v0 = vld [vmem:[%s15209_s18 + $0x18] sm:$0xf0]  ;;  %v9815_v4 = vor.u32 %v10860_v49, %v9814_v10  ;;  %v10895_v49 = vld [vmem:[%s12048_s27 + $0x30] sm:$0xff] }
0x17ec   :  { %v9819_v33 = vor.u32 %v10858_v21, %v9816_v0  ;;  %v10919_v21 = vld [vmem:[%s12048_s27 + $0xf0] sm:$0xff] }
0x17ed   :  { %6082 = vmatmul.bf16.vlgmr.msrb.gmra.mxu2 %v6025_v60  ;;  %v9880_v60 = vld [vmem:[%s15209_s18 + $0x98] sm:$0xf0]  ;;  %6368 = vmatpush.bf16.msra.mxu0 %v9875_v51 }
0x17ee   :  { %6382 = vmatpush.bf16.msrb.mxu1 %v9879_v5 }
0x1870   :  { %v6083_v43 = vpop.f32.mrf.mxu2 }
0x1871   :  { %v6088_v30 = vadd.f32 %v6083_v43, %v14266_v38  ;;  %v9854_v43 = vld [vmem:[%s15209_s18 + $0x60] sm:$0xf] }
0x1873   :  { %v14391_v59 = vadd.f32 %v11191_v31, %v6088_v30  ;;  %v10871_v30 = vld [vmem:[%s15209_s18 + $0x6c] sm:$0xf0] }
0x1875   :  { %6098 = vadd.xlane.f32.xlu1 %v14391_v59 }
0x1878   :  { %v6085_v53 = vpop.f32.mrf.mxu2 }
0x1879   :  { %v6089_v3 = vadd.f32 %v6085_v53, %v14271_v22  ;;  %v10869_v53 = vld [vmem:[%s15209_s18 + $0x64] sm:$0xf] }
0x187b   :  { %v14395_v41 = vadd.f32 %v11191_v31, %v6089_v3  ;;  %v9883_v31 = vor.u32 %v10874_v1, %v9880_v60  ;;  %v9855_v3 = vor.u32 %v10871_v30, %v9854_v43 }
0x187d   :  { %6100 = vadd.xlane.f32.xlu0 %v14395_v41  ;;  %6396 = vmatpush.bf16.msra.mxu2 %v9883_v31 }
0x187e   :  { %6355 = vmatpush.bf16.msra.mxu3 %v9855_v3 }
0x1882   :  { %6356 = vmatpush.bf16.msra.mxu3 %v9839_v6 }
0x1886   :  { %6357 = vmatpush.bf16.msra.mxu3 %v9823_v50  ;;  %v10903_v50 = vld [vmem:[%s12048_s27 + $0x70] sm:$0xff] }
0x188a   :  { %6358 = vmatpush.bf16.msra.mxu3 %v9807_v48 }
0x18e8   :  { %v6099_v47 = vpop.xlane.xlu1 %6098 }
0x18e9   :  { %v6102_v38 = vmul.f32 %v6099_v47, %v12082_v45  ;;  %v9856_v47 = vld [vmem:[%s15209_s18 + $0x70] sm:$0xf0] }
0x18eb   :  { %v14400_v46 = vsub.f32 %v14391_v59, %v6102_v38  ;;  %v9862_v38 = vld [vmem:[%s15209_s18 + $0x68] sm:$0xf] }
0x18ed   :  { %v6106_v2 = vmul.f32 %v14400_v46, %v14400_v46 }
0x18ef   :  { %6108 = vadd.xlane.f32.xlu2 %v6106_v2  ;;  %v10872_v2 = vld [vmem:[%s15209_s18 + $0x74] sm:$0xf0] }
0x18f0   :  { %v6101_v22 = vpop.xlane.xlu0 %6100 }
0x18f1   :  { %v6103_v9 = vmul.f32 %v6101_v22, %v12082_v45  ;;  %v9859_v22 = vor.u32 %v10869_v53, %v9856_v47 }
0x18f3   :  { %v14406_v62 = vsub.f32 %v14395_v41, %v6103_v9  ;;  %v9863_v9 = vor.u32 %v10872_v2, %v9862_v38  ;;  %6369 = vmatpush.bf16.msra.mxu0 %v9859_v22 }
0x18f5   :  { %v6107_v32 = vmul.f32 %v14406_v62, %v14406_v62  ;;  %6383 = vmatpush.bf16.msrb.mxu1 %v9863_v9  ;;  %v11192_v9 = vld [vmem:[%s15210_s22] ss:$0 sm:$0xff] }
0x18f7   :  { %6110 = vadd.xlane.f32.xlu1 %v6107_v32  ;;  %v10870_v32 = vld [vmem:[%s15209_s18 + $0x6c] sm:$0xf]  ;;  %6370 = vmatpush.bf16.msra.mxu0 %v9843_v54 }
0x18f8   :  { %v9867_v36 = vor.u32 %v10870_v32, %v9864_v19 }
0x18f9   :  { %6384 = vmatpush.bf16.msrb.mxu1 %v9847_v28 }
0x18fa   :  { %6397 = vmatpush.bf16.msra.mxu2 %v9867_v36 }
0x18fb   :  { %6371 = vmatpush.bf16.msra.mxu0 %v9827_v12  ;;  %v10896_v12 = vld [vmem:[%s12048_s27 + $0x38] sm:$0xff] }
0x18fc   :  { %6835 = vmatpush.bf16.msrb.mxu3 %v10896_v12 }
0x18fd   :  { %6385 = vmatpush.bf16.msrb.mxu1 %v9831_v15  ;;  %v10920_v15 = vld [vmem:[%s12048_s27 + $0xf8] sm:$0xff] }
0x18fe   :  { %6398 = vmatpush.bf16.msra.mxu2 %v9851_v27 }
0x18ff   :  { %6372 = vmatpush.bf16.msra.mxu0 %v9811_v29 }
0x1900   :  { %6836 = vmatpush.bf16.msrb.mxu3 %v10895_v49 }
0x1901   :  { %6386 = vmatpush.bf16.msrb.mxu1 %v9815_v4 }
0x1902   :  { %6399 = vmatpush.bf16.msra.mxu2 %v9835_v11 }
0x1903   :  { %6849 = vmatpush.bf16.msrb.mxu0 %v10904_v35 }
0x1905   :  { %6863 = vmatpush.bf16.msra.mxu1 %v10912_v20 }
0x1906   :  { %6400 = vmatpush.bf16.msra.mxu2 %v9819_v33 }
0x1907   :  { %6850 = vmatpush.bf16.msrb.mxu0 %v10903_v50 }
0x1909   :  { %6864 = vmatpush.bf16.msra.mxu1 %v10911_v24 }
0x190a   :  { %6877 = vmatpush.bf16.msrb.mxu2 %v10920_v15  ;;  %v10891_v15 = vld [vmem:[%s12048_s27 + $0x10] sm:$0xff] }
0x190b   :  { %6851 = vmatpush.bf16.msrb.mxu0 %v10902_v61 }
0x190d   :  { %6865 = vmatpush.bf16.msra.mxu1 %v10910_v52  ;;  %v10897_v52 = vld [vmem:[%s12048_s27 + $0x40] sm:$0xff] }
0x190e   :  { %6878 = vmatpush.bf16.msrb.mxu2 %v10919_v21 }
0x1962   :  { %v6109_v7 = vpop.xlane.xlu2 %6108 }
0x1963   :  { %v6112_v16 = vmul.f32 %v6109_v7, %v12082_v45 }
0x1965   :  { %v6114_v34 = vadd.f32 1e-05, %v6112_v16 }
0x1967   :  { %11613 = vrsqrt.f32 %v6114_v34  ;;  %vm6122_vm4 = vweird.f32 %v6114_v34 }
0x196a   :  { %v6111_v37 = vpop.xlane.xlu1 %6110 }
0x196b   :  { %v6113_v14 = vmul.f32 %v6111_v37, %v12082_v45 }
0x196d   :  { %v11614_v51 = vpop.eup %11613  ;;  %v6115_v5 = vadd.f32 1e-05, %v6113_v14  ;;  %v10901_v14 = vld [vmem:[%s12048_s27 + $0x60] sm:$0xff] }
0x196e   :  { %v6117_v1 = vmul.f32 %v11614_v51, %v6114_v34  ;;  %vm6123_vm11 = vweird.f32 %v11614_v51  ;;  %6852 = vmatpush.bf16.msrb.mxu0 %v10901_v14 }
0x196f   :  { %11615 = vrsqrt.f32 %v6115_v5  ;;  %vm6124_vm0 = vmor %vm6122_vm4, %vm6123_vm11  ;;  %vm6132_vm14 = vweird.f32 %v6115_v5 }
0x1970   :  { %v6118_v60 = vmul.f32 %v11614_v51, %v6117_v1 }
0x1972   :  { %v6119_v31 = vmul.f32 0.5, %v6118_v60 }
0x1974   :  { %v6120_v43 = vsub.f32 1.5, %v6119_v31  ;;  %v10894_v31 = vld [vmem:[%s12048_s27 + $0x28] sm:$0xff] }
0x1975   :  { %v11616_v30 = vpop.eup %11615  ;;  %6837 = vmatpush.bf16.msrb.mxu3 %v10894_v31 }
0x1976   :  { %v6121_v53 = vmul.f32 %v11614_v51, %v6120_v43  ;;  %v6127_v3 = vmul.f32 %v11616_v30, %v6115_v5  ;;  %vm6133_vm7 = vweird.f32 %v11616_v30  ;;  %v10918_v43 = vld [vmem:[%s12048_s27 + $0xe8] sm:$0xff] }
0x1977   :  { %vm6134_vm10 = vmor %vm6132_vm14, %vm6133_vm7  ;;  %6879 = vmatpush.bf16.msrb.mxu2 %v10918_v43 }
0x1978   :  { %v6128_v47 = vmul.f32 %v11616_v30, %v6127_v3  ;;  %v6125_v38 = vsel %vm6124_vm0, %v11614_v51, %v6121_v53  ;;  %v10909_v51 = vld [vmem:[%s12048_s27 + $0xa0] sm:$0xff] }
0x1979   :  { %v6136_v32 = vmul.f32 %v6125_v38, %v14400_v46  ;;  %v14481_v46 = vld [vmem:[%s12043_s3] sm:$0xf]  ;;  %6866 = vmatpush.bf16.msra.mxu1 %v10909_v51 }
0x197a   :  { %v6129_v2 = vmul.f32 0.5, %v6128_v47  ;;  %v6184_v54 = vperm.slane %v14481_v46, 1  ;;  %v6185_v28 = vperm.slane %v14481_v46, 2  ;;  %v6183_v7 = vperm.slane %v14481_v46, 0 }
0x197b   :  { %v6141_v26 = vmul.f32 %v11192_v9, %v6136_v32  ;;  %v6186_v18 = vperm.slane %v14481_v46, 3  ;;  %v10908_v32 = vld [vmem:[%s12048_s27 + $0x98] sm:$0xff] }
0x197c   :  { %v6130_v22 = vsub.f32 1.5, %v6129_v2 }
0x197d   :  { %v6146_v56 = vadd.f32 %v11193_v17, %v6141_v26  ;;  %6867 = vmatpush.bf16.msra.mxu1 %v10908_v32 }
0x197e   :  { %v6131_v19 = vmul.f32 %v11616_v30, %v6130_v22 }
0x1980   :  { %v6135_v36 = vsel %vm6134_vm10, %v11616_v30, %v6131_v19  ;;  %v10893_v19 = vld [vmem:[%s12048_s27 + $0x20] sm:$0xff] }
0x1981   :  { %v6137_v58 = vmul.f32 %v6135_v36, %v14406_v62  ;;  %v10917_v36 = vld [vmem:[%s12048_s27 + $0xe0] sm:$0xff]  ;;  %6838 = vmatpush.bf16.msrb.mxu3 %v10893_v19 }
0x1982   :  { %6880 = vmatpush.bf16.msrb.mxu2 %v10917_v36 }
0x1983   :  { %v6142_v6 = vmul.f32 %v11192_v9, %v6137_v58  ;;  %v10900_v9 = vld [vmem:[%s12048_s27 + $0x58] sm:$0xff]  ;;  %v10899_v58 = vld [vmem:[%s12048_s27 + $0x50] sm:$0xff] }
0x1984   :  { %6853 = vmatpush.bf16.msrb.mxu0 %v10900_v9 }
0x1985   :  { %v6147_v23 = vadd.f32 %v11193_v17, %v6142_v6  ;;  %v10907_v6 = vld [vmem:[%s12048_s27 + $0x90] sm:$0xff] }
0x1986   :  { %6868 = vmatpush.bf16.msra.mxu1 %v10907_v6 }
0x1987   :  { %v6180_v39 = vpack.c.bf16 %v6147_v23, %v6146_v56 }
0x1988   :  { %6854 = vmatpush.bf16.msrb.mxu0 %v10899_v58 }
0x1989   :  { %6359 = vmatmul.bf16.vlgmr.msra.gmra.mxu3 %v6180_v39  ;;  %6373 = vmatmul.bf16.vlgmr.msra.gmra.mxu0 %v6180_v39 }
0x198a   :  { %6387 = vmatmul.bf16.vlgmr.msrb.gmra.mxu1 %v6180_v39  ;;  %6401 = vmatmul.bf16.vlgmr.msra.gmra.mxu2 %v6180_v39  ;;  %v10892_v39 = vld [vmem:[%s12048_s27 + $0x18] sm:$0xff] }
0x198b   :  { %6839 = vmatpush.bf16.msrb.mxu3 %v10892_v39 }
0x198f   :  { %6840 = vmatpush.bf16.msrb.mxu3 %v10891_v15 }
0x1a06   :  { %v6374_v62 = vpop.f32.mrf.mxu0 }
0x1a07   :  { %v14487_v27 = vadd.f32 %v6374_v62, %v6184_v54  ;;  %v6388_v25 = vpop.f32.mrf.mxu1 }
0x1a08   :  { %v14489_v63 = vadd.f32 %v6388_v25, %v6185_v28  ;;  %v10898_v25 = vld [vmem:[%s12048_s27 + $0x48] sm:$0xff] }
0x1a09   :  { %v9933_v13 = vmul.f32 -1.702, %v14487_v27  ;;  %6855 = vmatpush.bf16.msrb.mxu0 %v10898_v25 }
0x1a0a   :  { %v9934_v44 = vmul.f32 -1.702, %v14489_v63 }
0x1a0b   :  { %v6425_v16 = vmul.f32 1.442695, %v9933_v13  ;;  %v10906_v13 = vld [vmem:[%s12048_s27 + $0x88] sm:$0xff] }
0x1a0c   :  { %v6427_v42 = vmul.f32 1.442695, %v9934_v44  ;;  %v6360_v8 = vpop.f32.mrf.mxu3  ;;  %6869 = vmatpush.bf16.msra.mxu1 %v10906_v13 }
0x1a0d   :  { %11617 = vpow2.f32 %v6425_v16  ;;  %v14499_v11 = vadd.f32 %v6360_v8, %v6183_v7  ;;  %v6402_v34 = vpop.f32.mrf.mxu2  ;;  %v10915_v8 = vld [vmem:[%s12048_s27 + $0xd0] sm:$0xff]  ;;  %6856 = vmatpush.bf16.msrb.mxu0 %v10897_v52 }
0x1a0e   :  { %11619 = vpow2.f32 %v6427_v42  ;;  %v14505_v48 = vadd.f32 %v6402_v34, %v6186_v18  ;;  %v6376_v40 = vpop.f32.mrf.mxu0 }
0x1a0f   :  { %v9932_v55 = vmul.f32 -1.702, %v14499_v11  ;;  %v14508_v10 = vadd.f32 %v6376_v40, %v6184_v54  ;;  %v6390_v29 = vpop.f32.mrf.mxu1  ;;  %v10916_v54 = vld [vmem:[%s12048_s27 + $0xd8] sm:$0xff]  ;;  %v10905_v40 = vld [vmem:[%s12048_s27 + $0x80] sm:$0xff] }
0x1a10   :  { %v9935_v0 = vmul.f32 -1.702, %v14505_v48  ;;  %v14513_v4 = vadd.f32 %v6390_v29, %v6185_v28  ;;  %6881 = vmatpush.bf16.msrb.mxu2 %v10916_v54  ;;  %6870 = vmatpush.bf16.msra.mxu1 %v10905_v40 }
0x1a11   :  { %v6423_v33 = vmul.f32 1.442695, %v9932_v55  ;;  %v9937_v37 = vmul.f32 -1.702, %v14508_v10 }
0x1a12   :  { %v9938_v5 = vmul.f32 -1.702, %v14513_v4  ;;  %v6429_v2 = vmul.f32 1.442695, %v9935_v0  ;;  %v10890_v0 = vld [vmem:[%s12048_s27 + $0x8] sm:$0xff] }
0x1a13   :  { %v11618_v1 = vpop.eup %11617  ;;  %11621 = vpow2.f32 %v6423_v33  ;;  %v6433_v60 = vmul.f32 1.442695, %v9937_v37  ;;  %v10914_v33 = vld [vmem:[%s12048_s27 + $0xc8] sm:$0xff]  ;;  %6841 = vmatpush.bf16.msrb.mxu3 %v10890_v0 }
0x1a14   :  { %v11620_v30 = vpop.eup %11619  ;;  %v14521_v53 = vadd.f32 1.0, %v11618_v1  ;;  %v6435_v3 = vmul.f32 1.442695, %v9938_v5  ;;  %v6362_v47 = vpop.f32.mrf.mxu3  ;;  %6882 = vmatpush.bf16.msrb.mxu2 %v10915_v8 }
0x1a15   :  { %v14523_v38 = vadd.f32 1.0, %v11620_v30  ;;  %11623 = vpow2.f32 %v6433_v60  ;;  %v14525_v22 = vadd.f32 %v6362_v47, %v6183_v7  ;;  %v6404_v12 = vpop.f32.mrf.mxu2  ;;  %v10889_v30 = vld [vmem:[%s12048_s27] sm:$0xff] }
0x1a16   :  { %11625 = vrcp.f32 %v14521_v53  ;;  %v14567_v49 = vadd.f32 %v6404_v12, %v6186_v18  ;;  %v6471_v21 = vand.u32 2147483647, %v14521_v53  ;;  %v6473_v37 = vand.u32 2147483648, %v14521_v53 }
0x1a17   :  { %11627 = vrcp.f32 %v14523_v38  ;;  %v9936_v17 = vmul.f32 -1.702, %v14525_v22  ;;  %v6486_v14 = vand.u32 2147483647, %v14523_v38  ;;  %v6488_v1 = vand.u32 2147483648, %v14523_v38  ;;  %6842 = vmatpush.bf16.msrb.mxu3 %v10889_v30 }
0x1a18   :  { %11629 = vpow2.f32 %v6435_v3  ;;  %v9939_v60 = vmul.f32 -1.702, %v14567_v49  ;;  %6883 = vmatpush.bf16.msrb.mxu2 %v10914_v33  ;;  %vm6467_vm1 = vweird.f32 %v14521_v53  ;;  %vm14584_vm15 = vcmp.eq.f32.partialorder %v6471_v21, 8.507059e+37  ;;  %v10913_v3 = vld [vmem:[%s12048_s27 + $0xc0] sm:$0xff] }
0x1a19   :  { %v11622_v26 = vpop.eup %11621  ;;  %11631 = vpow2.f32 %v6429_v2  ;;  %v6431_v35 = vmul.f32 1.442695, %v9936_v17  ;;  %vm6482_vm3 = vweird.f32 %v14523_v38  ;;  %v6474_v2 = vor.u32 1.1754944e-38, %v6473_v37 }
0x1a1a   :  { %v14536_v56 = vadd.f32 1.0, %v11622_v26  ;;  %vm14598_vm8 = vcmp.eq.f32.partialorder %v6486_v14, 8.507059e+37  ;;  %v6489_v58 = vor.u32 1.1754944e-38, %v6488_v1  ;;  %v6437_v39 = vmul.f32 1.442695, %v9939_v60 }
0x1a1b   :  { %v11624_v23 = vpop.eup %11623 }
0x1a1c   :  { %v14540_v28 = vpop.eup %11625  ;;  %11633 = vrcp.f32 %v14536_v56  ;;  %v14551_v16 = vadd.f32 1.0, %v11624_v23  ;;  %6884 = vmatpush.bf16.msrb.mxu2 %v10913_v3 }
0x1a1d   :  { %v14543_v20 = vpop.eup %11627  ;;  %v6463_v62 = vmul.f32 %v14540_v28, %v14521_v53  ;;  %11635 = vpow2.f32 %v6431_v35  ;;  %vm6468_vm2 = vweird.f32 %v14540_v28 }
0x1a1e   :  { %v11630_v7 = vpop.eup %11629  ;;  %v6478_v50 = vmul.f32 %v14543_v20, %v14523_v38  ;;  %11637 = vrcp.f32 %v14551_v16  ;;  %vm14593_vm13 = vmor %vm6467_vm1, %vm6468_vm2  ;;  %vm6483_vm5 = vweird.f32 %v14543_v20  ;;  %vm6527_vm11 = vweird.f32 %v14551_v16 }
0x1a1f   :  { %v11632_v24 = vpop.eup %11631  ;;  %v6464_v44 = vsub.f32 1.0, %v6463_v62  ;;  %v14554_v42 = vadd.f32 1.0, %v11630_v7  ;;  %v6531_v54 = vand.u32 2147483647, %v14551_v16  ;;  %v6533_v35 = vand.u32 2147483648, %v14551_v16  ;;  %vm14622_vm4 = vmor %vm6482_vm3, %vm6483_vm5 }
0x1a20   :  { %v6479_v61 = vsub.f32 1.0, %v6478_v50  ;;  %v14563_v29 = vadd.f32 1.0, %v11632_v24 }
0x1a21   :  { %v6465_v34 = vmul.f32 %v14540_v28, %v6464_v44  ;;  %11639 = vrcp.f32 %v14554_v42  ;;  %v6546_v44 = vand.u32 2147483647, %v14554_v42  ;;  %v6548_v12 = vand.u32 2147483648, %v14554_v42 }
0x1a22   :  { %v14561_v55 = vpop.eup %11633  ;;  %v6480_v46 = vmul.f32 %v14543_v20, %v6479_v61  ;;  %11641 = vrcp.f32 %v14563_v29  ;;  %vm6532_vm2 = vcmp.eq.f32.partialorder %v6531_v54, 8.507059e+37  ;;  %vm6542_vm1 = vweird.f32 %v14554_v42 }
0x1a23   :  { %v6466_v51 = vadd.f32 %v14540_v28, %v6465_v34  ;;  %v6448_v18 = vmul.f32 %v14561_v55, %v14536_v56  ;;  %v11636_v5 = vpop.eup %11635  ;;  %vm6453_vm14 = vweird.f32 %v14561_v55  ;;  %v6549_v37 = vor.u32 1.1754944e-38, %v6548_v12 }
0x1a24   :  { %v11638_v31 = vpop.eup %11637  ;;  %v6481_v36 = vadd.f32 %v14543_v20, %v6480_v46  ;;  %v14607_v26 = vadd.f32 1.0, %v11636_v5  ;;  %vm6547_vm3 = vcmp.eq.f32.partialorder %v6546_v44, 8.507059e+37  ;;  %v6503_v54 = vand.u32 2147483648, %v14563_v29 }
0x1a25   :  { %v6523_v53 = vmul.f32 %v11638_v31, %v14551_v16  ;;  %v6470_v19 = vsel %vm14593_vm13, %v14540_v28, %v6466_v51  ;;  %v6449_v17 = vsub.f32 1.0, %v6448_v18  ;;  %vm6528_vm0 = vweird.f32 %v11638_v31 }
0x1a26   :  { %11643 = vrcp.f32 %v14607_v26  ;;  %v6475_v62 = vsel %vm14584_vm15, %v6474_v2, %v6470_v19  ;;  %v6485_v50 = vsel %vm14622_vm4, %v14543_v20, %v6481_v36  ;;  %vm6529_vm10 = vmor %vm6527_vm11, %vm6528_vm0  ;;  %v6534_v20 = vor.u32 1.1754944e-38, %v6533_v35 }
0x1a27   :  { %v11640_v32 = vpop.eup %11639  ;;  %v6524_v6 = vsub.f32 1.0, %v6523_v53  ;;  %v6450_v24 = vmul.f32 %v14561_v55, %v6449_v17  ;;  %11645 = vpow2.f32 %v6437_v39  ;;  %v6568_v34 = vmul.f32 %v6475_v62, %v14487_v27 }
0x1a28   :  { %v6538_v23 = vmul.f32 %v11640_v32, %v14554_v42  ;;  %v14614_v28 = vpop.eup %11641  ;;  %vm6543_vm7 = vweird.f32 %v11640_v32  ;;  %v6490_v21 = vsel %vm14598_vm8, %v6489_v58, %v6485_v50  ;;  %vm6452_vm13 = vweird.f32 %v14536_v56 }
0x1a29   :  { %v6525_v13 = vmul.f32 %v11638_v31, %v6524_v6  ;;  %v6493_v38 = vmul.f32 %v14614_v28, %v14563_v29  ;;  %v6451_v0 = vadd.f32 %v14561_v55, %v6450_v24  ;;  %vm6544_vm15 = vmor %vm6542_vm1, %vm6543_vm7  ;;  %v6456_v42 = vand.u32 2147483647, %v14536_v56 }
0x1a2a   :  { %v6539_v7 = vsub.f32 1.0, %v6538_v23  ;;  %v6458_v51 = vand.u32 2147483648, %v14536_v56  ;;  %v6569_v5 = vmul.f32 %v6490_v21, %v14489_v63  ;;  %vm14651_vm5 = vmor %vm6452_vm13, %vm6453_vm14  ;;  %v6518_v56 = vand.u32 2147483648, %v14607_v26 }
0x1a2b   :  { %v6526_v15 = vadd.f32 %v11638_v31, %v6525_v13  ;;  %v6455_v43 = vsel %vm14651_vm5, %v14561_v55, %v6451_v0  ;;  %v6494_v30 = vsub.f32 1.0, %v6493_v38  ;;  %v6516_v2 = vand.u32 2147483647, %v14607_v26 }
0x1a2c   :  { %v6540_v8 = vmul.f32 %v11640_v32, %v6539_v7  ;;  %v11644_v40 = vpop.eup %11643  ;;  %v6459_v9 = vor.u32 1.1754944e-38, %v6458_v51  ;;  %vm6457_vm11 = vcmp.eq.f32.partialorder %v6456_v42, 8.507059e+37  ;;  %vm6512_vm4 = vweird.f32 %v14607_v26 }
0x1a2d   :  { %v6530_v61 = vsel %vm6529_vm10, %v11638_v31, %v6526_v15  ;;  %v6508_v27 = vmul.f32 %v11644_v40, %v14607_v26  ;;  %v11646_v18 = vpop.eup %11645  ;;  %vm6513_vm8 = vweird.f32 %v11644_v40  ;;  %v6519_v55 = vor.u32 1.1754944e-38, %v6518_v56  ;;  %v10943_v56 = vld [vmem:[#allocation2 + $0x170] sm:$0xf0] }
0x1a2e   :  { %v6541_v52 = vadd.f32 %v11640_v32, %v6540_v8  ;;  %v6535_v33 = vsel %vm6532_vm2, %v6534_v20, %v6530_v61  ;;  %v6446_v3 = vadd.f32 1.0, %v11646_v18  ;;  %vm6514_vm0 = vmor %vm6512_vm4, %vm6513_vm8  ;;  %vm6517_vm7 = vcmp.eq.f32.partialorder %v6516_v2, 8.507059e+37  ;;  %v10165_v2 = vld [vmem:[#allocation2 + $0x170] sm:$0xf] }
0x1a2f   :  { %v6572_v16 = vmul.f32 %v6535_v33, %v14508_v10  ;;  %v6509_v31 = vsub.f32 1.0, %v6508_v27  ;;  %vm6498_vm14 = vweird.f32 %v14614_v28  ;;  %vm6497_vm10 = vweird.f32 %v14563_v29 }
0x1a30   :  { %v6545_v14 = vsel %vm6544_vm15, %v11640_v32, %v6541_v52  ;;  %11647 = vrcp.f32 %v6446_v3  ;;  %v6495_v32 = vmul.f32 %v14614_v28, %v6494_v30  ;;  %v6501_v35 = vand.u32 2147483647, %v14563_v29  ;;  %vm6499_vm2 = vmor %vm6497_vm10, %vm6498_vm14  ;;  %v10157_v30 = vld [vmem:[#allocation2 + $0x168] sm:$0xf] }
0x1a31   :  { %v6550_v46 = vsel %vm6547_vm3, %v6549_v37, %v6545_v14  ;;  %v6640_v10 = vpack.c.bf16 %v6572_v16, %v6568_v34  ;;  %v6510_v63 = vmul.f32 %v11644_v40, %v6509_v31  ;;  %v6563_v25 = vand.u32 2147483648, %v6446_v3  ;;  %v11194_v16 = vld [vmem:[%s12053_s29] ss:$0 sm:$0xff] }
0x1a32   :  { %v6573_v60 = vmul.f32 %v6550_v46, %v14513_v4  ;;  %v6460_v4 = vsel %vm6457_vm11, %v6459_v9, %v6455_v43  ;;  %v6496_v23 = vadd.f32 %v14614_v28, %v6495_v32  ;;  %v6561_v13 = vand.u32 2147483647, %v6446_v3  ;;  %v10944_v9 = vld [vmem:[#allocation2 + $0x178] sm:$0xf0] }
0x1a33   :  { %6857 = vmatmul.bf16.vlgmr.msrb.gmra.mxu0 %v6640_v10  ;;  %v6511_v53 = vadd.f32 %v11644_v40, %v6510_v63  ;;  %v6567_v17 = vmul.f32 %v6460_v4, %v14499_v11  ;;  %v6504_v7 = vor.u32 1.1754944e-38, %v6503_v54  ;;  %vm6502_vm15 = vcmp.eq.f32.partialorder %v6501_v35, 8.507059e+37  ;;  %v10159_v63 = vld [vmem:[#allocation2 + $0x174] sm:$0xf0]  ;;  %v10940_v32 = vld [vmem:[#allocation2 + $0x158] sm:$0xf0] }
0x1a34   :  { %v6641_v47 = vpack.c.bf16 %v6573_v60, %v6569_v5  ;;  %v6500_v11 = vsel %vm6499_vm2, %v14614_v28, %v6496_v23  ;;  %vm6557_vm3 = vweird.f32 %v6446_v3  ;;  %v6564_v44 = vor.u32 1.1754944e-38, %v6563_v25  ;;  %v10937_v54 = vld [vmem:[#allocation2 + $0x140] sm:$0xf0]  ;;  %v10936_v35 = vld [vmem:[#allocation2 + $0x13c] sm:$0xf] }
0x1a35   :  { %v6515_v19 = vsel %vm6514_vm0, %v11644_v40, %v6511_v53  ;;  %v6505_v24 = vsel %vm6502_vm15, %v6504_v7, %v6500_v11  ;;  %vm6562_vm5 = vcmp.eq.f32.partialorder %v6561_v13, 8.507059e+37  ;;  %v10166_v4 = vor.u32 %v10944_v9, %v10165_v2  ;;  %v10135_v25 = vld [vmem:[#allocation2 + $0x144] sm:$0xf0]  ;;  %v10141_v11 = vld [vmem:[#allocation2 + $0x140] sm:$0xf] }
0x1a36   :  { %6871 = vmatmul.bf16.vlgmr.msra.gmra.mxu1 %v6641_v47  ;;  %v6520_v36 = vsel %vm6517_vm7, %v6519_v55, %v6515_v19  ;;  %v11648_v6 = vpop.eup %11647  ;;  %v6570_v15 = vmul.f32 %v6505_v24, %v14505_v48  ;;  %v10158_v47 = vor.u32 %v10943_v56, %v10157_v30  ;;  %v10145_v55 = vld [vmem:[#allocation2 + $0x150] sm:$0xf]  ;;  %v10939_v19 = vld [vmem:[#allocation2 + $0x154] sm:$0xf]  ;;  %v10138_v13 = vor.u32 %v10936_v35, %v10135_v25  ;;  %v10934_v24 = vld [vmem:[#allocation2 + $0x128] sm:$0xf0] }
0x1a37   :  { %v6571_v58 = vmul.f32 %v6520_v36, %v14525_v22  ;;  %v6553_v26 = vmul.f32 %v11648_v6, %v6446_v3  ;;  %vm6558_vm1 = vweird.f32 %v11648_v6  ;;  %v10942_v3 = vld [vmem:[#allocation2 + $0x16c] sm:$0xf]  ;;  %7152 = vmatpush.bf16.msrb.mxu1 %v10166_v4  ;;  %v10146_v36 = vor.u32 %v10940_v32, %v10145_v55  ;;  %v10924_v30 = vld [vmem:[#allocation2 + $0xdc] sm:$0xf]  ;;  %v10073_v4 = vld [vmem:[#allocation2 + $0xc0] sm:$0xf] }
0x1a38   :  { %vm6559_vm13 = vmor %vm6557_vm3, %vm6558_vm1  ;;  %v10162_v53 = vor.u32 %v10942_v3, %v10159_v63  ;;  %7124 = vmatpush.bf16.msra.mxu3 %v10158_v47  ;;  %v10087_v3 = vld [vmem:[#allocation2 + $0xe4] sm:$0xf0]  ;;  %v10093_v47 = vld [vmem:[#allocation2 + $0xe0] sm:$0xf]  ;;  %vm15222_vm10 = vcmask 785408  }
0x1a39   :  { %v6639_v39 = vpack.c.bf16 %v6571_v58, %v6567_v17  ;;  %v6554_v62 = vsub.f32 1.0, %v6553_v26  ;;  %v10147_v17 = vld [vmem:[#allocation2 + $0x15c] sm:$0xf0]  ;;  %v10153_v58 = vld [vmem:[#allocation2 + $0x158] sm:$0xf]  ;;  %v10090_v9 = vor.u32 %v10924_v30, %v10087_v3  ;;  %vm15223_vm2 = vmmov %vm15222_vm10 }
0x1a3a   :  { %7138 = vmatpush.bf16.msra.mxu0 %v10162_v53  ;;  %v10150_v23 = vor.u32 %v10939_v19, %v10147_v17  ;;  %v10133_v26 = vld [vmem:[#allocation2 + $0x138] sm:$0xf]  ;;  %v10926_v63 = vld [vmem:[#allocation2 + $0xe8] sm:$0xf0]  ;;  %v10921_v19 = vld [vmem:[#allocation2 + $0xc4] sm:$0xf] }
0x1a3b   :  { %6843 = vmatmul.bf16.vlgmr.msrb.gmra.mxu3 %v6639_v39  ;;  %v6555_v22 = vmul.f32 %v11648_v6, %v6554_v62  ;;  %v10134_v62 = vor.u32 %v10937_v54, %v10133_v26  ;;  %v10094_v53 = vor.u32 %v10926_v63, %v10093_v47  ;;  %v10922_v55 = vld [vmem:[#allocation2 + $0xc8] sm:$0xf0]  ;;  %v10081_v17 = vld [vmem:[#allocation2 + $0xc8] sm:$0xf] }
0x1a3c   :  { %7125 = vmatpush.bf16.msra.mxu3 %v10146_v36  ;;  %v10074_v32 = vor.u32 %v10922_v55, %v10073_v4  ;;  %v10075_v36 = vld [vmem:[#allocation2 + $0xcc] sm:$0xf0] }
0x1a3d   :  { %v6556_v50 = vadd.f32 %v11648_v6, %v6555_v22  ;;  %v10938_v22 = vld [vmem:[#allocation2 + $0x148] sm:$0xf0] }
0x1a3e   :  { %7139 = vmatpush.bf16.msra.mxu0 %v10150_v23  ;;  %v10142_v7 = vor.u32 %v10938_v22, %v10141_v11 }
0x1a3f   :  { %v6560_v12 = vsel %vm6559_vm13, %v11648_v6, %v6556_v50  ;;  %v10941_v6 = vld [vmem:[#allocation2 + $0x160] sm:$0xf0]  ;;  %v10121_v50 = vld [vmem:[#allocation2 + $0x120] sm:$0xf] }
0x1a40   :  { %v6565_v29 = vsel %vm6562_vm5, %v6564_v44, %v6560_v12  ;;  %v10154_v39 = vor.u32 %v10941_v6, %v10153_v58  ;;  %7126 = vmatpush.bf16.msra.mxu3 %v10134_v62  ;;  %v10933_v44 = vld [vmem:[#allocation2 + $0x124] sm:$0xf]  ;;  %v10122_v12 = vor.u32 %v10934_v24, %v10121_v50  ;;  %v10078_v58 = vor.u32 %v10921_v19, %v10075_v36  ;;  %v10923_v6 = vld [vmem:[#allocation2 + $0xd0] sm:$0xf0] }
0x1a41   :  { %v6574_v8 = vmul.f32 %v6565_v29, %v14567_v49  ;;  %v10123_v29 = vld [vmem:[#allocation2 + $0x12c] sm:$0xf0]  ;;  %v10082_v23 = vor.u32 %v10923_v6, %v10081_v17 }
0x1a42   :  { %7153 = vmatpush.bf16.msrb.mxu1 %v10154_v39  ;;  %7140 = vmatpush.bf16.msra.mxu0 %v10138_v13 }
0x1a43   :  { %v6642_v38 = vpack.c.bf16 %v6574_v8, %v6570_v15  ;;  %v10129_v15 = vld [vmem:[#allocation2 + $0x128] sm:$0xf]  ;;  %v10935_v8 = vld [vmem:[#allocation2 + $0x130] sm:$0xf0] }
0x1a44   :  { %7127 = vmatpush.bf16.msra.mxu3 %v10122_v12 }
0x1a45   :  { %6885 = vmatmul.bf16.vlgmr.msrb.gmra.mxu2 %v6642_v38  ;;  %v10126_v38 = vor.u32 %v10933_v44, %v10123_v29 }
0x1a46   :  { %7154 = vmatpush.bf16.msrb.mxu1 %v10142_v7 }
0x1a47   :  { %7141 = vmatpush.bf16.msra.mxu0 %v10126_v38 }
0x1ab0   :  { %v6858_v20 = vpop.f32.mrf.mxu0 }
0x1ab3   :  { %v6872_v61 = vpop.f32.mrf.mxu1 }
0x1ab8   :  { %v6860_v21 = vpop.f32.mrf.mxu0 }
0x1abb   :  { %v6874_v27 = vpop.f32.mrf.mxu1 }
0x1abe   :  { %v6844_v28 = vpop.f32.mrf.mxu3 }
0x1abf   :  { %v6859_v34 = vadd.f32 %v6858_v20, %v6844_v28  ;;  %v10130_v28 = vor.u32 %v10935_v8, %v10129_v15  ;;  %v10109_v20 = vld [vmem:[#allocation2 + $0x108] sm:$0xf]  ;;  %v11195_v15 = vld [vmem:[%s15199_s6 + $0x1] ss:$0 sm:$0xff] }
0x1ac1   :  { %v6873_v52 = vadd.f32 %v6872_v61, %v6859_v34  ;;  %7155 = vmatpush.bf16.msrb.mxu1 %v10130_v28  ;;  %v10931_v34 = vld [vmem:[#allocation2 + $0x110] sm:$0xf0]  ;;  %v10930_v61 = vld [vmem:[#allocation2 + $0x10c] sm:$0xf] }
0x1ac6   :  { %v6846_v40 = vpop.f32.mrf.mxu3 }
0x1ac7   :  { %v6861_v37 = vadd.f32 %v6860_v21, %v6846_v40  ;;  %v10111_v40 = vld [vmem:[#allocation2 + $0x114] sm:$0xf0]  ;;  %v10117_v21 = vld [vmem:[#allocation2 + $0x110] sm:$0xf] }
0x1ac8   :  { %v6886_v0 = vpop.f32.mrf.mxu2 }
0x1ac9   :  { %v6887_v33 = vadd.f32 %v6886_v0, %v6873_v52  ;;  %v6875_v42 = vadd.f32 %v6874_v27, %v6861_v37  ;;  %v10110_v52 = vor.u32 %v10931_v34, %v10109_v20  ;;  %v10932_v0 = vld [vmem:[#allocation2 + $0x118] sm:$0xf0]  ;;  %v10927_v27 = vld [vmem:[#allocation2 + $0xf4] sm:$0xf]  ;;  %v11196_v20 = vld [vmem:[%s15200_s12 + $0x1] ss:$0 sm:$0xff] }
0x1aca   :  { %v10118_v37 = vor.u32 %v10932_v0, %v10117_v21 }
0x1acb   :  { %v6891_v14 = vadd.f32 %v6887_v33, %v14391_v59  ;;  %v10114_v33 = vor.u32 %v10930_v61, %v10111_v40  ;;  %7128 = vmatpush.bf16.msra.mxu3 %v10110_v52 }
0x1acc   :  { %7156 = vmatpush.bf16.msrb.mxu1 %v10118_v37 }
0x1acd   :  { %v14675_v48 = vadd.f32 %v11194_v16, %v6891_v14  ;;  %7142 = vmatpush.bf16.msra.mxu0 %v10114_v33  ;;  %v10928_v14 = vld [vmem:[#allocation2 + $0xf8] sm:$0xf0] }
0x1acf   :  { %6903 = vadd.xlane.f32.xlu0 %v14675_v48 }
0x1ad0   :  { %v6888_v49 = vpop.f32.mrf.mxu2 }
0x1ad1   :  { %v6889_v51 = vadd.f32 %v6888_v49, %v6875_v42  ;;  %v10099_v49 = vld [vmem:[#allocation2 + $0xfc] sm:$0xf0] }
0x1ad3   :  { %v6892_v46 = vadd.f32 %v6889_v51, %v14395_v41  ;;  %v10105_v51 = vld [vmem:[#allocation2 + $0xf8] sm:$0xf] }
0x1ad5   :  { %v14679_v18 = vadd.f32 %v11194_v16, %v6892_v46  ;;  %v10097_v16 = vld [vmem:[#allocation2 + $0xf0] sm:$0xf]  ;;  %v10929_v46 = vld [vmem:[#allocation2 + $0x100] sm:$0xf0] }
0x1ad6   :  { %v10098_v42 = vor.u32 %v10928_v14, %v10097_v16  ;;  %v10070_v16 = vld [vmem:[%s15203_s10 + $0x3] sm:$0x7] }
0x1ad7   :  { %6905 = vadd.xlane.f32.xlu2 %v14679_v18  ;;  %v6992_v14 = vperm.slane %v10070_v16, 2 }
0x1ad8   :  { %7129 = vmatpush.bf16.msra.mxu3 %v10098_v42 }
0x1b42   :  { %v6904_v5 = vpop.xlane.xlu0 %6903 }
0x1b43   :  { %v6907_v1 = vmul.f32 %v6904_v5, %v12082_v45  ;;  %v10102_v5 = vor.u32 %v10927_v27, %v10099_v49 }
0x1b45   :  { %v14684_v10 = vsub.f32 %v14675_v48, %v6907_v1  ;;  %v10106_v1 = vor.u32 %v10929_v46, %v10105_v51  ;;  %7143 = vmatpush.bf16.msra.mxu0 %v10102_v5 }
0x1b47   :  { %v6911_v59 = vmul.f32 %v14684_v10, %v14684_v10  ;;  %7157 = vmatpush.bf16.msrb.mxu1 %v10106_v1 }
0x1b49   :  { %6913 = vadd.xlane.f32.xlu1 %v6911_v59  ;;  %7144 = vmatpush.bf16.msra.mxu0 %v10090_v9 }
0x1b4a   :  { %v6906_v60 = vpop.xlane.xlu2 %6905 }
0x1b4b   :  { %v6908_v31 = vmul.f32 %v6906_v60, %v12082_v45  ;;  %7158 = vmatpush.bf16.msrb.mxu1 %v10094_v53 }
0x1b4d   :  { %v14690_v43 = vsub.f32 %v14679_v18, %v6908_v31  ;;  %v10085_v31 = vld [vmem:[#allocation2 + $0xd8] sm:$0xf]  ;;  %7145 = vmatpush.bf16.msra.mxu0 %v10078_v58  ;;  %v11734_v58 = vld [vmem:[%s15204_s11] sm:$0xff] }
0x1b4f   :  { %v6912_v41 = vmul.f32 %v14690_v43, %v14690_v43  ;;  %7159 = vmatpush.bf16.msrb.mxu1 %v10082_v23 }
0x1b51   :  { %6915 = vadd.xlane.f32.xlu0 %v6912_v41  ;;  %v10925_v41 = vld [vmem:[#allocation2 + $0xe0] sm:$0xf0] }
0x1b52   :  { %v10086_v56 = vor.u32 %v10925_v41, %v10085_v31 }
0x1b54   :  { %7130 = vmatpush.bf16.msra.mxu3 %v10086_v56 }
0x1b58   :  { %7131 = vmatpush.bf16.msra.mxu3 %v10074_v32 }
0x1bbc   :  { %v6914_v59 = vpop.xlane.xlu1 %6913 }
0x1bbd   :  { %v6917_v60 = vmul.f32 %v6914_v59, %v12082_v45 }
0x1bbf   :  { %v6919_v2 = vadd.f32 1e-05, %v6917_v60 }
0x1bc1   :  { %11649 = vrsqrt.f32 %v6919_v2  ;;  %vm6927_vm11 = vweird.f32 %v6919_v2 }
0x1bc4   :  { %v6916_v39 = vpop.xlane.xlu0 %6915 }
0x1bc5   :  { %v6918_v26 = vmul.f32 %v6916_v39, %v12082_v45 }
0x1bc7   :  { %v11650_v54 = vpop.eup %11649  ;;  %v6920_v35 = vadd.f32 1e-05, %v6918_v26 }
0x1bc8   :  { %v6922_v62 = vmul.f32 %v11650_v54, %v6919_v2  ;;  %vm6928_vm8 = vweird.f32 %v11650_v54 }
0x1bc9   :  { %11651 = vrsqrt.f32 %v6920_v35  ;;  %vm6929_vm4 = vmor %vm6927_vm11, %vm6928_vm8  ;;  %vm6937_vm7 = vweird.f32 %v6920_v35 }
0x1bca   :  { %v6923_v25 = vmul.f32 %v11650_v54, %v6922_v62 }
0x1bcc   :  { %v6924_v11 = vmul.f32 0.5, %v6923_v25 }
0x1bce   :  { %v6925_v22 = vsub.f32 1.5, %v6924_v11 }
0x1bcf   :  { %v11652_v13 = vpop.eup %11651 }
0x1bd0   :  { %v6926_v7 = vmul.f32 %v11650_v54, %v6925_v22  ;;  %v6932_v50 = vmul.f32 %v11652_v13, %v6920_v35  ;;  %vm6938_vm0 = vweird.f32 %v11652_v13 }
0x1bd1   :  { %vm6939_vm14 = vmor %vm6937_vm7, %vm6938_vm0 }
0x1bd2   :  { %v6933_v24 = vmul.f32 %v11652_v13, %v6932_v50  ;;  %v6930_v44 = vsel %vm6929_vm4, %v11650_v54, %v6926_v7  ;;  %v11735_v54 = vld [vmem:[%s15204_s11 + $0x8] sm:$0xff] }
0x1bd3   :  { %v6941_v8 = vmul.f32 %v6930_v44, %v14684_v10  ;;  %v6991_v10 = vperm.slane %v10070_v16, 1 }
0x1bd4   :  { %v6934_v12 = vmul.f32 0.5, %v6933_v24 }
0x1bd5   :  { %v6946_v34 = vmul.f32 %v11195_v15, %v6941_v8 }
0x1bd6   :  { %v6935_v29 = vsub.f32 1.5, %v6934_v12 }
0x1bd7   :  { %v6951_v40 = vadd.f32 %v11196_v20, %v6946_v34 }
0x1bd8   :  { %v6936_v38 = vmul.f32 %v11652_v13, %v6935_v29 }
0x1bda   :  { %v6940_v28 = vsel %vm6939_vm14, %v11652_v13, %v6936_v38 }
0x1bdb   :  { %v6942_v61 = vmul.f32 %v6940_v28, %v14690_v43  ;;  %v6990_v43 = vperm.slane %v10070_v16, 0 }
0x1bdd   :  { %v6947_v52 = vmul.f32 %v11195_v15, %v6942_v61 }
0x1bdf   :  { %v6952_v21 = vadd.f32 %v11196_v20, %v6947_v52 }
0x1be1   :  { %v6986_v0 = vpack.c.bf16 %v6952_v21, %v6951_v40 }
0x1be3   :  { %7132 = vmatmul.bf16.vlgmr.msra.gmra.mxu3 %v6986_v0  ;;  %7146 = vmatmul.bf16.vlgmr.msra.gmra.mxu0 %v6986_v0 }
0x1be4   :  { %7160 = vmatmul.bf16.vlgmr.msrb.gmra.mxu1 %v6986_v0 }
0x1c60   :  { %v7147_v33 = vpop.f32.mrf.mxu0 }
0x1c61   :  { %v7161_v37 = vpop.f32.mrf.mxu1  ;;  %v7148_v49 = vadd.f32 %v7147_v33, %v6991_v10 }
0x1c62   :  { %v7162_v5 = vadd.f32 %v7161_v37, %v6992_v14 }
0x1c66   :  { %v7133_v27 = vpop.f32.mrf.mxu3 }
0x1c67   :  { %v7134_v30 = vadd.f32 %v7133_v27, %v6990_v43 }
0x1c68   :  { %v7149_v42 = vpop.f32.mrf.mxu0 }
0x1c69   :  { %v7150_v51 = vadd.f32 %v7149_v42, %v6991_v10  ;;  %v7163_v46 = vpop.f32.mrf.mxu1 }
0x1c6a   :  { %v7164_v1 = vadd.f32 %v7163_v46, %v6992_v14 }
0x1c6b   :  { %v7167_v59 = vpack.c.bf16 %v7150_v51, %v7148_v49 }
0x1c6c   :  { %v14701_v60 = vpack.c.bf16 %v7164_v1, %v7162_v5 }
0x1c6d   :  { %7309 = vrot.lane.b32.xlu1 %v7167_v59, %s11837_s13  ;;  %7237 = vrot.lane.b32.xlu2 %v7167_v59, %s11835_s5  ;;  %v7172_v31 = vsel %vm754_vm6, %v7167_v59, 0 }
0x1c6e   :  { %7226 = vmatpush.bf16.msrb.mxu3 %v14701_v60  ;;  %v7135_v41 = vpop.f32.mrf.mxu3  ;;  %7181 = vmatpush.bf16.xpose.msra.mxu2 %v7172_v31 }
0x1c6f   :  { %v7136_v56 = vadd.f32 %v7135_v41, %v6990_v43 }
0x1c71   :  { %v7166_v3 = vpack.c.bf16 %v7136_v56, %v7134_v30 }
0x1c73   :  { %7234 = vrot.lane.b32.xlu0 %v7166_v3, %s11835_s5 }
0x1c75   :  { %7378 = vrot.lane.b32.xlu1 %v7166_v3, %s11836_s9  ;;  %7307 = vrot.lane.b32.xlu2 %v7166_v3, %s11837_s13 }
0x1c76   :  { %10167 = vmatmul.msk.bf16.vlgmr.msra.gmra.mxu2 %vm754_vm6, %v7166_v3 }
0x1c7b   :  { %7380 = vrot.lane.b32.xlu0 %v7167_v59, %s11836_s9 }
0x1cc7   :  { %v7238_v47 = vpop.permute.xlu2 %7237 }
0x1cc8   :  { %v7243_v63 = vsel %vm754_vm6, %v7238_v47, 0 }
0x1cc9   :  { %7252 = vmatpush.bf16.xpose.msrb.mxu0 %v7243_v63 }
0x1ccf   :  { %v7308_v4 = vpop.permute.xlu2 %7307 }
0x1cdf   :  { %v7310_v2 = vpop.permute.xlu1 %7309 }
0x1ce0   :  { %v7315_v9 = vsel %vm754_vm6, %v7310_v2, 0 }
0x1ce1   :  { %7324 = vmatpush.bf16.xpose.msrb.mxu2 %v7315_v9 }
0x1ce5   :  { %v7235_v53 = vpop.permute.xlu0 %7234 }
0x1ce6   :  { %10169 = vmatmul.msk.bf16.vlgmr.msrb.gmra.mxu0 %vm754_vm6, %v7235_v53 }
0x1ce7   :  { %v7379_v19 = vpop.permute.xlu1 %7378 }
0x1ce8   :  { %10171 = vmatmul.msk.bf16.vlgmr.msrb.gmra.mxu2 %vm754_vm6, %v7308_v4 }
0x1ced   :  { %v7381_v55 = vpop.permute.xlu0 %7380 }
0x1cee   :  { %v7386_v32 = vsel %vm754_vm6, %v7381_v55, 0 }
0x1cef   :  { %7395 = vmatpush.bf16.xpose.msra.mxu0 %v7386_v32 }
0x1cf6   :  { %10173 = vmatmul.msk.bf16.vlgmr.msra.gmra.mxu0 %vm754_vm6, %v7379_v19 }
0x1cf9   :  { %v7183_v36 = vpop.f32.mrf.mxu2 }
0x1cfa   :  { %v7188_v17 = vmul.f32 0.17677669, %v7183_v36 }
0x1cfc   :  { %v7190_v6 = vadd.f32 %v11734_v58, %v7188_v17 }
0x1cfe   :  { %v7192_v23 = vsel %vm5721_vm12, %v7190_v6, -inf }
0x1cff   :  { %7193 = vmax.xlane.f32.xlu2 %v7192_v23 }
0x1d01   :  { %v7185_v39 = vpop.f32.mrf.mxu2 }
0x1d02   :  { %v7189_v26 = vmul.f32 0.17677669, %v7185_v39 }
0x1d04   :  { %v7191_v35 = vadd.f32 %v11735_v54, %v7189_v26 }
0x1d06   :  { %v7195_v62 = vsel %vm5721_vm12, %v7191_v35, -inf }
0x1d07   :  { %7196 = vmax.xlane.f32.xlu0 %v7195_v62 }
0x1d63   :  { %v7254_v25 = vpop.f32.mrf.mxu0 }
0x1d64   :  { %v7259_v11 = vmul.f32 0.17677669, %v7254_v25 }
0x1d66   :  { %v7261_v22 = vadd.f32 %v11734_v58, %v7259_v11 }
0x1d68   :  { %v7263_v13 = vsel %vm5721_vm12, %v7261_v22, -inf }
0x1d69   :  { %7264 = vmax.xlane.f32.xlu1 %v7263_v13 }
0x1d6b   :  { %v7256_v7 = vpop.f32.mrf.mxu0  ;;  %v7326_v50 = vpop.f32.mrf.mxu2 }
0x1d6c   :  { %v7260_v24 = vmul.f32 0.17677669, %v7256_v7  ;;  %v7331_v44 = vmul.f32 0.17677669, %v7326_v50 }
0x1d6e   :  { %v7262_v12 = vadd.f32 %v11735_v54, %v7260_v24  ;;  %v7333_v29 = vadd.f32 %v11734_v58, %v7331_v44 }
0x1d70   :  { %v7266_v15 = vsel %vm5721_vm12, %v7262_v12, -inf  ;;  %v7335_v8 = vsel %vm5721_vm12, %v7333_v29, -inf }
0x1d71   :  { %7267 = vmax.xlane.f32.xlu2 %v7266_v15  ;;  %7336 = vmax.xlane.f32.xlu0 %v7335_v8 }
0x1d72   :  { %v7194_v38 = vpop.xlane.xlu2 %7193 }
0x1d73   :  { %v7198_v28 = vsub.f32 %v7190_v6, %v7194_v38  ;;  %v7328_v20 = vpop.f32.mrf.mxu2  ;;  %v7397_v34 = vpop.f32.mrf.mxu0 }
0x1d74   :  { %v7332_v61 = vmul.f32 0.17677669, %v7328_v20  ;;  %v7402_v52 = vmul.f32 0.17677669, %v7397_v34 }
0x1d75   :  { %v7200_v40 = vmul.f32 1.442695, %v7198_v28 }
0x1d76   :  { %v7334_v21 = vadd.f32 %v11735_v54, %v7332_v61  ;;  %v7404_v0 = vadd.f32 %v11734_v58, %v7402_v52 }
0x1d77   :  { %11653 = vpow2.f32 %v7200_v40 }
0x1d78   :  { %v7406_v33 = vsel %vm5721_vm12, %v7404_v0, -inf  ;;  %v7338_v37 = vsel %vm5721_vm12, %v7334_v21, -inf }
0x1d79   :  { %7407 = vmax.xlane.f32.xlu2 %v7406_v33  ;;  %7339 = vmax.xlane.f32.xlu1 %v7338_v37 }
0x1d7a   :  { %v7197_v16 = vpop.xlane.xlu0 %7196 }
0x1d7b   :  { %v7199_v10 = vsub.f32 %v7191_v35, %v7197_v16  ;;  %v7399_v14 = vpop.f32.mrf.mxu0 }
0x1d7c   :  { %v7403_v27 = vmul.f32 0.17677669, %v7399_v14 }
0x1d7d   :  { %v11654_v42 = vpop.eup %11653  ;;  %v7202_v49 = vmul.f32 1.442695, %v7199_v10 }
0x1d7e   :  { %v7405_v51 = vadd.f32 %v11735_v54, %v7403_v27  ;;  %v7204_v46 = vsel %vm5721_vm12, %v11654_v42, 0.0 }
0x1d7f   :  { %11655 = vpow2.f32 %v7202_v49 }
0x1d80   :  { %v7409_v5 = vsel %vm5721_vm12, %v7405_v51, -inf }
0x1d81   :  { %7205 = vadd.xlane.f32.xlu1 %v7204_v46  ;;  %7410 = vmax.xlane.f32.xlu0 %v7409_v5 }
0x1d85   :  { %v11656_v1 = vpop.eup %11655 }
0x1d86   :  { %v7207_v43 = vsel %vm5721_vm12, %v11656_v1, 0.0 }
0x1d87   :  { %7208 = vadd.xlane.f32.xlu2 %v7207_v43 }
0x1d9f   :  { %7287 = vrot.lane.b32.xlu2 %v14701_v60, %s11835_s5 }
0x1ddc   :  { %v7265_v59 = vpop.xlane.xlu1 %7264 }
0x1ddd   :  { %v7269_v31 = vsub.f32 %v7261_v22, %v7265_v59 }
0x1ddf   :  { %v7271_v41 = vmul.f32 1.442695, %v7269_v31 }
0x1de1   :  { %11657 = vpow2.f32 %v7271_v41 }
0x1de4   :  { %v7268_v30 = vpop.xlane.xlu2 %7267  ;;  %v7337_v56 = vpop.xlane.xlu0 %7336 }
0x1de5   :  { %v7270_v3 = vsub.f32 %v7262_v12, %v7268_v30  ;;  %v7341_v47 = vsub.f32 %v7333_v29, %v7337_v56 }
0x1de7   :  { %v11658_v63 = vpop.eup %11657  ;;  %v7273_v2 = vmul.f32 1.442695, %v7270_v3  ;;  %v7343_v9 = vmul.f32 1.442695, %v7341_v47 }
0x1de8   :  { %v7275_v53 = vsel %vm5721_vm12, %v11658_v63, 0.0 }
0x1de9   :  { %11659 = vpow2.f32 %v7273_v2  ;;  %7276 = vadd.xlane.f32.xlu0 %v7275_v53 }
0x1dea   :  { %11661 = vpow2.f32 %v7343_v9 }
0x1dec   :  { %v7408_v4 = vpop.xlane.xlu2 %7407  ;;  %v7340_v55 = vpop.xlane.xlu1 %7339 }
0x1ded   :  { %v7412_v32 = vsub.f32 %v7404_v0, %v7408_v4  ;;  %v7342_v19 = vsub.f32 %v7334_v21, %v7340_v55  ;;  %v10952_v55 = vld [vmem:[%s15205_s15 + $0x78] sm:$0xff] }
0x1dee   :  { %7545 = vmatpush.bf16.msra.mxu2 %v10952_v55 }
0x1def   :  { %v11660_v36 = vpop.eup %11659  ;;  %v7414_v17 = vmul.f32 1.442695, %v7412_v32  ;;  %v7345_v58 = vmul.f32 1.442695, %v7342_v19  ;;  %v10951_v32 = vld [vmem:[%s15205_s15 + $0x70] sm:$0xff]  ;;  %v10950_v19 = vld [vmem:[%s15205_s15 + $0x68] sm:$0xff] }
0x1df0   :  { %v11662_v6 = vpop.eup %11661  ;;  %v7278_v23 = vsel %vm5721_vm12, %v11660_v36, 0.0 }
0x1df1   :  { %11663 = vpow2.f32 %v7414_v17  ;;  %7279 = vadd.xlane.f32.xlu1 %v7278_v23  ;;  %v7347_v39 = vsel %vm5721_vm12, %v11662_v6, 0.0  ;;  %v10948_v17 = vld [vmem:[%s15205_s15 + $0x58] sm:$0xff]  ;;  %v10945_v23 = vld [vmem:[%s15205_s15 + $0x40] sm:$0xff] }
0x1df2   :  { %11665 = vpow2.f32 %v7345_v58  ;;  %7348 = vadd.xlane.f32.xlu0 %v7347_v39  ;;  %7546 = vmatpush.bf16.msra.mxu2 %v10951_v32  ;;  %v10947_v58 = vld [vmem:[%s15205_s15 + $0x50] sm:$0xff]  ;;  %v10341_v32 = vld [vmem:[%s15209_s18 + $0x1a0] sm:$0xf] }
0x1df4   :  { %v7411_v26 = vpop.xlane.xlu0 %7410  ;;  %v7206_v54 = vpop.xlane.xlu1 %7205 }
0x1df5   :  { %v7413_v35 = vsub.f32 %v7405_v51, %v7411_v26  ;;  %11667 = vrcp.f32 %v7206_v54 }
0x1df6   :  { %7547 = vmatpush.bf16.msra.mxu2 %v10950_v19  ;;  %v10975_v19 = vld [vmem:[%s15209_s18 + $0x1ac] sm:$0xf0] }
0x1df7   :  { %v11664_v62 = vpop.eup %11663  ;;  %v7416_v25 = vmul.f32 1.442695, %v7413_v35 }
0x1df8   :  { %v11666_v11 = vpop.eup %11665  ;;  %v7418_v22 = vsel %vm5721_vm12, %v11664_v62, 0.0 }
0x1df9   :  { %11669 = vpow2.f32 %v7416_v25  ;;  %v7350_v13 = vsel %vm5721_vm12, %v11666_v11, 0.0 }
0x1dfa   :  { %7351 = vadd.xlane.f32.xlu1 %v7350_v13  ;;  %v7209_v7 = vpop.xlane.xlu2 %7208  ;;  %7419 = vadd.xlane.f32.xlu0 %v7418_v22 }
0x1dfb   :  { %11671 = vrcp.f32 %v7209_v7  ;;  %v11668_v50 = vpop.eup %11667 }
0x1dfc   :  { %v7212_v29 = vmul.f32 %v11668_v50, %v11654_v42 }
0x1dff   :  { %v11670_v24 = vpop.eup %11669 }
0x1e00   :  { %v7421_v44 = vsel %vm5721_vm12, %v11670_v24, 0.0 }
0x1e01   :  { %v11672_v12 = vpop.eup %11671 }
0x1e02   :  { %v7213_v15 = vmul.f32 %v11672_v12, %v11656_v1  ;;  %v7288_v8 = vpop.permute.xlu2 %7287  ;;  %7422 = vadd.xlane.f32.xlu1 %v7421_v44 }
0x1e03   :  { %7300 = vmatpush.bf16.msra.mxu1 %v7288_v8  ;;  %v11197_v8 = vld [vmem:[%s15206_s16 + $0x1] ss:$0 sm:$0xff] }
0x1e04   :  { %v7214_v38 = vpack.c.bf16 %v7213_v15, %v7212_v29 }
0x1e06   :  { %10168 = vmatmul.msk.bf16.vlgmr.msrb.gmra.mxu3 %vm5721_vm12, %v7214_v38 }
0x1e0e   :  { %7358 = vrot.lane.b32.xlu0 %v14701_v60, %s11837_s13 }
0x1e1b   :  { %7429 = vrot.lane.b32.xlu1 %v14701_v60, %s11836_s9 }
0x1e5c   :  { %v7277_v28 = vpop.xlane.xlu0 %7276 }
0x1e5d   :  { %11673 = vrcp.f32 %v7277_v28 }
0x1e63   :  { %v11674_v34 = vpop.eup %11673 }
0x1e64   :  { %v7280_v20 = vpop.xlane.xlu1 %7279  ;;  %v7283_v52 = vmul.f32 %v11674_v34, %v11658_v63 }
0x1e65   :  { %11675 = vrcp.f32 %v7280_v20  ;;  %v7349_v0 = vpop.xlane.xlu0 %7348 }
0x1e6b   :  { %v11676_v61 = vpop.eup %11675 }
0x1e6c   :  { %v7284_v40 = vmul.f32 %v11676_v61, %v11660_v36  ;;  %v10949_v36 = vld [vmem:[%s15205_s15 + $0x60] sm:$0xff] }
0x1e6d   :  { %v7352_v33 = vpop.xlane.xlu1 %7351  ;;  %v7420_v37 = vpop.xlane.xlu0 %7419  ;;  %7548 = vmatpush.bf16.msra.mxu2 %v10949_v36  ;;  %v10973_v36 = vld [vmem:[%s15209_s18 + $0x1a4] sm:$0xf] }
0x1e6e   :  { %v7285_v21 = vpack.c.bf16 %v7284_v40, %v7283_v52  ;;  %11677 = vrcp.f32 %v7352_v33 }
0x1e6f   :  { %11679 = vrcp.f32 %v7349_v0 }
0x1e70   :  { %10170 = vmatmul.msk.bf16.vlgmr.msra.gmra.mxu1 %vm5721_vm12, %v7285_v21 }
0x1e71   :  { %7549 = vmatpush.bf16.msra.mxu2 %v10948_v17  ;;  %v10342_v17 = vor.u32 %v10975_v19, %v10341_v32  ;;  %v10958_v19 = vld [vmem:[%s15209_s18 + $0x12c] sm:$0xf] }
0x1e74   :  { %v11678_v16 = vpop.eup %11677 }
0x1e75   :  { %v11680_v10 = vpop.eup %11679  ;;  %v7356_v14 = vmul.f32 %v11678_v16, %v11666_v11  ;;  %v7423_v60 = vpop.xlane.xlu1 %7422  ;;  %7550 = vmatpush.bf16.msra.mxu2 %v10947_v58  ;;  %v10343_v58 = vld [vmem:[%s15209_s18 + $0x1b0] sm:$0xf0] }
0x1e76   :  { %v7355_v27 = vmul.f32 %v11680_v10, %v11662_v6  ;;  %11681 = vrcp.f32 %v7423_v60  ;;  %v10946_v6 = vld [vmem:[%s15205_s15 + $0x48] sm:$0xff]  ;;  %v10373_v10 = vld [vmem:[%s15209_s18 + $0x1e0] sm:$0xf]  ;;  %v10981_v60 = vld [vmem:[%s15209_s18 + $0x1e4] sm:$0xf] }
0x1e77   :  { %11683 = vrcp.f32 %v7420_v37 }
0x1e78   :  { %v7357_v49 = vpack.c.bf16 %v7356_v14, %v7355_v27  ;;  %v10983_v14 = vld [vmem:[%s15209_s18 + $0x1ec] sm:$0xf0] }
0x1e79   :  { %7551 = vmatpush.bf16.msra.mxu2 %v10946_v6  ;;  %v10374_v27 = vor.u32 %v10983_v14, %v10373_v10  ;;  %v10349_v6 = vld [vmem:[%s15209_s18 + $0x1a8] sm:$0xf]  ;;  %v10319_v10 = vld [vmem:[%s15209_s18 + $0x178] sm:$0xf0] }
0x1e7c   :  { %v11682_v51 = vpop.eup %11681 }
0x1e7d   :  { %v11684_v46 = vpop.eup %11683  ;;  %v7427_v5 = vmul.f32 %v11682_v51, %v11670_v24  ;;  %7552 = vmatpush.bf16.msra.mxu2 %v10945_v23  ;;  %v10984_v51 = vld [vmem:[%s15209_s18 + $0x1f4] sm:$0xf0] }
0x1e7e   :  { %v7426_v1 = vmul.f32 %v11684_v46, %v11664_v62  ;;  %v10976_v23 = vld [vmem:[%s15209_s18 + $0x1b4] sm:$0xf0] }
0x1e80   :  { %v7359_v42 = vpop.permute.xlu0 %7358  ;;  %v7428_v59 = vpack.c.bf16 %v7427_v5, %v7426_v1  ;;  %v10982_v1 = vld [vmem:[%s15209_s18 + $0x1ec] sm:$0xf] }
0x1e81   :  { %7371 = vmatpush.bf16.msra.mxu3 %v7359_v42  ;;  %v10375_v42 = vld [vmem:[%s15209_s18 + $0x1f0] sm:$0xf0] }
0x1e82   :  { %v10378_v46 = vor.u32 %v10981_v60, %v10375_v42  ;;  %v10293_v60 = vld [vmem:[%s15209_s18 + $0x140] sm:$0xf]  ;;  %v10961_v42 = vld [vmem:[%s15209_s18 + $0x144] sm:$0xf] }
0x1e84   :  { %10172 = vmatmul.msk.bf16.vlgmr.msra.gmra.mxu3 %vm5721_vm12, %v7357_v49  ;;  %v10381_v49 = vld [vmem:[%s15209_s18 + $0x1e8] sm:$0xf]  ;;  %7841 = vmatpush.bf16.msrb.mxu0 %v10378_v46 }
0x1e85   :  { %v10382_v5 = vor.u32 %v10984_v51, %v10381_v49  ;;  %7827 = vmatpush.bf16.msrb.mxu3 %v10374_v27  ;;  %v10963_v27 = vld [vmem:[%s15209_s18 + $0x14c] sm:$0xf0]  ;;  %v10295_v51 = vld [vmem:[%s15209_s18 + $0x150] sm:$0xf0]  ;;  %v10301_v46 = vld [vmem:[%s15209_s18 + $0x148] sm:$0xf] }
0x1e86   :  { %v10294_v49 = vor.u32 %v10963_v27, %v10293_v60  ;;  %v11199_v60 = vld [vmem:[%s15211_s23 + $0x1] ss:$0 sm:$0xff] }
0x1e89   :  { %v7228_v41 = vpop.f32.mrf.mxu3 }
0x1e8d   :  { %v7430_v43 = vpop.permute.xlu1 %7429 }
0x1e8e   :  { %7442 = vmatpush.bf16.msrb.mxu1 %v7430_v43  ;;  %v10383_v43 = vld [vmem:[%s15209_s18 + $0x1f8] sm:$0xf0] }
0x1e91   :  { %10174 = vmatmul.msk.bf16.vlgmr.msrb.gmra.mxu1 %vm5721_vm12, %v7428_v59  ;;  %v7230_v3 = vpop.f32.mrf.mxu3  ;;  %v10386_v59 = vor.u32 %v10982_v1, %v10383_v43  ;;  %v10298_v1 = vor.u32 %v10961_v42, %v10295_v51 }
0x1e92   :  { %7855 = vmatpush.bf16.msra.mxu1 %v10382_v5  ;;  %v10964_v5 = vld [vmem:[%s15209_s18 + $0x154] sm:$0xf0] }
0x1e93   :  { %7869 = vmatpush.bf16.msrb.mxu2 %v10386_v59  ;;  %v10302_v43 = vor.u32 %v10964_v5, %v10301_v46  ;;  %v10962_v59 = vld [vmem:[%s15209_s18 + $0x14c] sm:$0xf] }
0x1eed   :  { %v7302_v31 = vpop.f32.mrf.mxu1 }
0x1ef5   :  { %v7304_v30 = vpop.f32.mrf.mxu1 }
0x1ef6   :  { %v11158_v56 = vpack.i.bf16 %v7304_v30, %v7302_v31  ;;  %v10357_v31 = vld [vmem:[%s15209_s18 + $0x1c0] sm:$0xf]  ;;  %v10977_v30 = vld [vmem:[%s15209_s18 + $0x1c4] sm:$0xf] }
0x1ef8   :  { %11159 = vrot.lane.b32.xlu2 %v11158_v56, %s11836_s9 }
0x1f07   :  { %v7373_v47 = vpop.f32.mrf.mxu3 }
0x1f0e   :  { %v7444_v63 = vpop.f32.mrf.mxu1 }
0x1f0f   :  { %v7375_v2 = vpop.f32.mrf.mxu3 }
0x1f10   :  { %v11163_v9 = vpack.i.bf16 %v7375_v2, %v7373_v47  ;;  %v10365_v47 = vld [vmem:[%s15209_s18 + $0x1c8] sm:$0xf] }
0x1f12   :  { %11164 = vrot.lane.b32.xlu2 %v11163_v9, %s11837_s13 }
0x1f16   :  { %v7446_v53 = vpop.f32.mrf.mxu1 }
0x1f17   :  { %v11168_v4 = vpack.i.bf16 %v7446_v53, %v7444_v63  ;;  %v10980_v63 = vld [vmem:[%s15209_s18 + $0x1d4] sm:$0xf0]  ;;  %v10978_v53 = vld [vmem:[%s15209_s18 + $0x1cc] sm:$0xf] }
0x1f18   :  { %v10366_v9 = vor.u32 %v10980_v63, %v10365_v47  ;;  %v10957_v47 = vld [vmem:[%s15209_s18 + $0x124] sm:$0xf] }
0x1f19   :  { %11169 = vrot.lane.b32.xlu0 %v11168_v4, %s11835_s5  ;;  %v10367_v4 = vld [vmem:[%s15209_s18 + $0x1d8] sm:$0xf0]  ;;  %s8555_s5 = sshll.u32 %s12058_s4, 4  ;;  %s8556_s5 = int_to_ptr.hbm [resolvable:$true] %s8555_s5 }
0x1f1a   :  { %v10370_v55 = vor.u32 %v10978_v53, %v10367_v4  ;;  %7856 = vmatpush.bf16.msra.mxu1 %v10366_v9  ;;  %v10279_v9 = vld [vmem:[%s15209_s18 + $0x130] sm:$0xf0]  ;;  %v10285_v53 = vld [vmem:[%s15209_s18 + $0x128] sm:$0xf]  ;;  %v10960_v4 = vld [vmem:[%s15209_s18 + $0x134] sm:$0xf0] }
0x1f1b   :  { %v10286_v32 = vor.u32 %v10960_v4, %v10285_v53  ;;  %s11772_s9 = sshra.s32 %s8556_s5, 4  ;;  %s11773_s9 = int_to_ptr.hbm [resolvable:$true] %s11772_s9 }
0x1f1c   :  { %7870 = vmatpush.bf16.msrb.mxu2 %v10370_v55  ;;  %v10282_v55 = vor.u32 %v10957_v47, %v10279_v9  ;;  %p11777_p6 = scmp.lt.s32.totalorder %s11773_s9, %s12058_s4 }
0x1f52   :  { %v11160_v39 = vpop.permute.xlu2 %11159 }
0x1f53   :  { %v11162_v54 = vunpack.i.h.bf16 %v11160_v39  ;;  %v11161_v35 = vunpack.i.l.bf16 %v11160_v39  ;;  %v10346_v39 = vor.u32 %v10973_v36, %v10343_v58  ;;  %v10287_v36 = vld [vmem:[%s15209_s18 + $0x138] sm:$0xf0] }
0x1f54   :  { %v10290_v58 = vor.u32 %v10958_v19, %v10287_v36 }
0x1f55   :  { %v7474_v22 = vsel %vm754_vm6, %v7230_v3, %v11162_v54  ;;  %v7473_v13 = vsel %vm754_vm6, %v7228_v41, %v11161_v35  ;;  %v10979_v41 = vld [vmem:[%s15209_s18 + $0x1cc] sm:$0xf0]  ;;  %v10359_v3 = vld [vmem:[%s15209_s18 + $0x1d0] sm:$0xf0]  ;;  %v10974_v54 = vld [vmem:[%s15209_s18 + $0x1ac] sm:$0xf] }
0x1f56   :  { %v10358_v56 = vor.u32 %v10979_v41, %v10357_v31  ;;  %v10362_v2 = vor.u32 %v10977_v30, %v10359_v3  ;;  %v10351_v35 = vld [vmem:[%s15209_s18 + $0x1b8] sm:$0xf0]  ;;  %v10959_v3 = vld [vmem:[%s15209_s18 + $0x12c] sm:$0xf0] }
0x1f57   :  { %v10303_v31 = vld [vmem:[%s15209_s18 + $0x158] sm:$0xf0] }
0x1f58   :  { %7828 = vmatpush.bf16.msrb.mxu3 %v10358_v56  ;;  %7842 = vmatpush.bf16.msrb.mxu0 %v10362_v2  ;;  %v10306_v41 = vor.u32 %v10962_v59, %v10303_v31  ;;  %v10277_v56 = vld [vmem:[%s15209_s18 + $0x120] sm:$0xf]  ;;  %v11000_v59 = vld [vmem:[%s12048_s27 + $0x178] sm:$0xff] }
0x1f59   :  { %v10278_v2 = vor.u32 %v10959_v3, %v10277_v56  ;;  %v11008_v31 = vld [vmem:[%s12048_s27 + $0x1b8] sm:$0xff] }
0x1f5c   :  { %7829 = vmatpush.bf16.msrb.mxu3 %v10342_v17  ;;  %7843 = vmatpush.bf16.msrb.mxu0 %v10346_v39 }
0x1f6c   :  { %v11165_v26 = vpop.permute.xlu2 %11164 }
0x1f6d   :  { %v11167_v62 = vunpack.i.h.bf16 %v11165_v26  ;;  %v11166_v25 = vunpack.i.l.bf16 %v11165_v26  ;;  %v10350_v26 = vor.u32 %v10976_v23, %v10349_v6  ;;  %v10261_v6 = vld [vmem:[%s15209_s18 + $0x100] sm:$0xf]  ;;  %v10955_v23 = vld [vmem:[%s15209_s18 + $0x10c] sm:$0xf0] }
0x1f6e   :  { %v10262_v39 = vor.u32 %v10955_v23, %v10261_v6  ;;  %v10998_v6 = vld [vmem:[%s12048_s27 + $0x168] sm:$0xff] }
0x1f6f   :  { %v7476_v24 = vsel %vm1470_vm9, %v7474_v22, %v11167_v62  ;;  %v7475_v44 = vsel %vm1470_vm9, %v7473_v13, %v11166_v25  ;;  %v10354_v62 = vor.u32 %v10974_v54, %v10351_v35  ;;  %7857 = vmatpush.bf16.msra.mxu1 %v10350_v26  ;;  %v10325_v25 = vld [vmem:[%s15209_s18 + $0x180] sm:$0xf]  ;;  %v10969_v22 = vld [vmem:[%s15209_s18 + $0x184] sm:$0xf]  ;;  %v10263_v54 = vld [vmem:[%s15209_s18 + $0x110] sm:$0xf0] }
0x1f70   :  { %v10953_v26 = vld [vmem:[%s15209_s18 + $0x104] sm:$0xf]  ;;  %v10269_v35 = vld [vmem:[%s15209_s18 + $0x108] sm:$0xf] }
0x1f71   :  { %7871 = vmatpush.bf16.msrb.mxu2 %v10354_v62  ;;  %v10266_v62 = vor.u32 %v10953_v26, %v10263_v54  ;;  %v11006_v23 = vld [vmem:[%s12048_s27 + $0x1a8] sm:$0xff] }
0x1f8b   :  { %v11170_v11 = vpop.permute.xlu0 %11169 }
0x1f8c   :  { %v11172_v7 = vunpack.i.h.bf16 %v11170_v11  ;;  %v11171_v50 = vunpack.i.l.bf16 %v11170_v11  ;;  %v10971_v11 = vld [vmem:[%s15209_s18 + $0x18c] sm:$0xf0] }
0x1f8d   :  { %v10326_v13 = vor.u32 %v10971_v11, %v10325_v25  ;;  %v10956_v25 = vld [vmem:[%s15209_s18 + $0x114] sm:$0xf0]  ;;  %v10954_v11 = vld [vmem:[%s15209_s18 + $0x10c] sm:$0xf] }
0x1f8e   :  { %v7478_v12 = vsel %vm15222_vm10, %v7476_v24, %v11172_v7  ;;  %v7477_v29 = vsel %vm15223_vm2, %v7475_v44, %v11171_v50  ;;  %v10327_v7 = vld [vmem:[%s15209_s18 + $0x190] sm:$0xf0]  ;;  %v10333_v50 = vld [vmem:[%s15209_s18 + $0x188] sm:$0xf]  ;;  %v10972_v24 = vld [vmem:[%s15209_s18 + $0x194] sm:$0xf0] }
0x1f8f   :  { %v7496_v15 = vpack.c.bf16 %v7478_v12, %v7477_v29  ;;  %v10330_v44 = vor.u32 %v10969_v22, %v10327_v7  ;;  %v10334_v12 = vor.u32 %v10972_v24, %v10333_v50  ;;  %v10970_v29 = vld [vmem:[%s15209_s18 + $0x18c] sm:$0xf]  ;;  %7830 = vmatpush.bf16.msrb.mxu3 %v10326_v13  ;;  %v10271_v22 = vld [vmem:[%s15209_s18 + $0x118] sm:$0xf0]  ;;  %v10270_v13 = vor.u32 %v10956_v25, %v10269_v35  ;;  %v10991_v25 = vld [vmem:[%s12048_s27 + $0x130] sm:$0xff] }
0x1f90   :  { %v10274_v7 = vor.u32 %v10954_v11, %v10271_v22  ;;  %v11015_v11 = vld [vmem:[%s12048_s27 + $0x1f0] sm:$0xff] }
0x1f91   :  { %7553 = vmatmul.bf16.vlgmr.msra.gmra.mxu2 %v7496_v15  ;;  %v10335_v15 = vld [vmem:[%s15209_s18 + $0x198] sm:$0xf0]  ;;  %7844 = vmatpush.bf16.msrb.mxu0 %v10330_v44 }
0x1f92   :  { %7858 = vmatpush.bf16.msra.mxu1 %v10334_v12 }
0x2014   :  { %v7554_v38 = vpop.f32.mrf.mxu2 }
0x2015   :  { %v7559_v28 = vadd.f32 %v7554_v38, %v14675_v48  ;;  %v10309_v38 = vld [vmem:[%s15209_s18 + $0x160] sm:$0xf] }
0x2017   :  { %v14765_v20 = vadd.f32 %v11197_v8, %v7559_v28  ;;  %v10967_v28 = vld [vmem:[%s15209_s18 + $0x16c] sm:$0xf0] }
0x2019   :  { %7572 = vadd.xlane.f32.xlu2 %v14765_v20 }
0x201c   :  { %v7556_v34 = vpop.f32.mrf.mxu2 }
0x201d   :  { %v7560_v61 = vadd.f32 %v7556_v34, %v14679_v18  ;;  %v10965_v34 = vld [vmem:[%s15209_s18 + $0x164] sm:$0xf] }
0x201f   :  { %v14769_v52 = vadd.f32 %v11197_v8, %v7560_v61  ;;  %v10338_v8 = vor.u32 %v10970_v29, %v10335_v15  ;;  %v10310_v61 = vor.u32 %v10967_v28, %v10309_v38 }
0x2021   :  { %7574 = vadd.xlane.f32.xlu0 %v14769_v52  ;;  %7872 = vmatpush.bf16.msrb.mxu2 %v10338_v8 }
0x2022   :  { %7831 = vmatpush.bf16.msrb.mxu3 %v10310_v61 }
0x2026   :  { %7832 = vmatpush.bf16.msrb.mxu3 %v10294_v49 }
0x202a   :  { %7833 = vmatpush.bf16.msrb.mxu3 %v10278_v2  ;;  %v11007_v2 = vld [vmem:[%s12048_s27 + $0x1b0] sm:$0xff] }
0x202e   :  { %7834 = vmatpush.bf16.msrb.mxu3 %v10262_v39 }
0x208c   :  { %v7573_v40 = vpop.xlane.xlu2 %7572 }
0x208d   :  { %v7576_v48 = vmul.f32 %v7573_v40, %v12082_v45  ;;  %v10311_v40 = vld [vmem:[%s15209_s18 + $0x170] sm:$0xf0] }
0x208f   :  { %v14774_v21 = vsub.f32 %v14765_v20, %v7576_v48  ;;  %v10317_v48 = vld [vmem:[%s15209_s18 + $0x168] sm:$0xf] }
0x2091   :  { %v7580_v0 = vmul.f32 %v14774_v21, %v14774_v21 }
0x2093   :  { %7582 = vadd.xlane.f32.xlu1 %v7580_v0  ;;  %v10968_v0 = vld [vmem:[%s15209_s18 + $0x174] sm:$0xf0] }
0x2094   :  { %v7575_v18 = vpop.xlane.xlu0 %7574 }
0x2095   :  { %v7577_v33 = vmul.f32 %v7575_v18, %v12082_v45  ;;  %v10314_v18 = vor.u32 %v10965_v34, %v10311_v40 }
0x2097   :  { %v14780_v37 = vsub.f32 %v14769_v52, %v7577_v33  ;;  %v10318_v33 = vor.u32 %v10968_v0, %v10317_v48  ;;  %7845 = vmatpush.bf16.msrb.mxu0 %v10314_v18 }
0x2099   :  { %v7581_v16 = vmul.f32 %v14780_v37, %v14780_v37  ;;  %7859 = vmatpush.bf16.msra.mxu1 %v10318_v33  ;;  %v11198_v33 = vld [vmem:[%s15210_s22 + $0x1] ss:$0 sm:$0xff] }
0x209b   :  { %7584 = vadd.xlane.f32.xlu2 %v7581_v16  ;;  %v10966_v16 = vld [vmem:[%s15209_s18 + $0x16c] sm:$0xf]  ;;  %7846 = vmatpush.bf16.msrb.mxu0 %v10298_v1 }
0x209c   :  { %v10322_v14 = vor.u32 %v10966_v16, %v10319_v10 }
0x209d   :  { %7860 = vmatpush.bf16.msra.mxu1 %v10302_v43 }
0x209e   :  { %7873 = vmatpush.bf16.msrb.mxu2 %v10322_v14 }
0x209f   :  { %7847 = vmatpush.bf16.msrb.mxu0 %v10282_v55  ;;  %v10992_v55 = vld [vmem:[%s12048_s27 + $0x138] sm:$0xff] }
0x20a0   :  { %8312 = vmatpush.bf16.msra.mxu3 %v10992_v55 }
0x20a1   :  { %7861 = vmatpush.bf16.msra.mxu1 %v10286_v32  ;;  %v11016_v32 = vld [vmem:[%s12048_s27 + $0x1f8] sm:$0xff] }
0x20a2   :  { %7874 = vmatpush.bf16.msrb.mxu2 %v10306_v41 }
0x20a3   :  { %7848 = vmatpush.bf16.msrb.mxu0 %v10266_v62 }
0x20a4   :  { %8313 = vmatpush.bf16.msra.mxu3 %v10991_v25 }
0x20a5   :  { %7862 = vmatpush.bf16.msra.mxu1 %v10270_v13 }
0x20a6   :  { %7875 = vmatpush.bf16.msrb.mxu2 %v10290_v58 }
0x20a7   :  { %8326 = vmatpush.bf16.msra.mxu0 %v11000_v59 }
0x20a9   :  { %8340 = vmatpush.bf16.msrb.mxu1 %v11008_v31 }
0x20aa   :  { %7876 = vmatpush.bf16.msrb.mxu2 %v10274_v7 }
0x20ad   :  { %8341 = vmatpush.bf16.msrb.mxu1 %v11007_v2 }
0x20ae   :  { %8354 = vmatpush.bf16.msra.mxu2 %v11016_v32  ;;  %v10987_v32 = vld [vmem:[%s12048_s27 + $0x110] sm:$0xff] }
0x20b1   :  { %8342 = vmatpush.bf16.msrb.mxu1 %v11006_v23  ;;  %v10993_v23 = vld [vmem:[%s12048_s27 + $0x140] sm:$0xff] }
0x20b2   :  { %8355 = vmatpush.bf16.msra.mxu2 %v11015_v11 }
0x2106   :  { %v7583_v30 = vpop.xlane.xlu1 %7582 }
0x2107   :  { %v7586_v63 = vmul.f32 %v7583_v30, %v12082_v45 }
0x2109   :  { %v7588_v17 = vadd.f32 1e-05, %v7586_v63  ;;  %v10999_v63 = vld [vmem:[%s12048_s27 + $0x170] sm:$0xff] }
0x210a   :  { %8327 = vmatpush.bf16.msra.mxu0 %v10999_v63 }
0x210b   :  { %11685 = vrsqrt.f32 %v7588_v17  ;;  %vm7596_vm1 = vweird.f32 %v7588_v17 }
0x210e   :  { %v7585_v50 = vpop.xlane.xlu2 %7584  ;;  %8328 = vmatpush.bf16.msra.mxu0 %v10998_v6 }
0x210f   :  { %v7587_v24 = vmul.f32 %v7585_v50, %v12082_v45 }
0x2111   :  { %v11686_v44 = vpop.eup %11685  ;;  %v7589_v12 = vadd.f32 1e-05, %v7587_v24  ;;  %v10997_v24 = vld [vmem:[%s12048_s27 + $0x160] sm:$0xff] }
0x2112   :  { %v7591_v29 = vmul.f32 %v11686_v44, %v7588_v17  ;;  %vm7597_vm6 = vweird.f32 %v11686_v44  ;;  %8329 = vmatpush.bf16.msra.mxu0 %v10997_v24 }
0x2113   :  { %11687 = vrsqrt.f32 %v7589_v12  ;;  %vm7598_vm15 = vmor %vm7596_vm1, %vm7597_vm6  ;;  %vm7606_vm13 = vweird.f32 %v7589_v12 }
0x2114   :  { %v7592_v15 = vmul.f32 %v11686_v44, %v7591_v29 }
0x2116   :  { %v7593_v8 = vmul.f32 0.5, %v7592_v15 }
0x2118   :  { %v7594_v38 = vsub.f32 1.5, %v7593_v8  ;;  %v10990_v8 = vld [vmem:[%s12048_s27 + $0x128] sm:$0xff] }
0x2119   :  { %v11688_v28 = vpop.eup %11687  ;;  %8314 = vmatpush.bf16.msra.mxu3 %v10990_v8 }
0x211a   :  { %v7595_v34 = vmul.f32 %v11686_v44, %v7594_v38  ;;  %v7601_v61 = vmul.f32 %v11688_v28, %v7589_v12  ;;  %vm7607_vm3 = vweird.f32 %v11688_v28  ;;  %v11014_v38 = vld [vmem:[%s12048_s27 + $0x1e8] sm:$0xff] }
0x211b   :  { %vm7608_vm5 = vmor %vm7606_vm13, %vm7607_vm3  ;;  %8356 = vmatpush.bf16.msra.mxu2 %v11014_v38 }
0x211c   :  { %v7602_v40 = vmul.f32 %v11688_v28, %v7601_v61  ;;  %v7599_v48 = vsel %vm7598_vm15, %v11686_v44, %v7595_v34  ;;  %v11005_v44 = vld [vmem:[%s12048_s27 + $0x1a0] sm:$0xff] }
0x211d   :  { %v7610_v16 = vmul.f32 %v7599_v48, %v14774_v21  ;;  %v14855_v21 = vld [vmem:[%s12043_s3 + $0x4] sm:$0xf]  ;;  %8343 = vmatpush.bf16.msrb.mxu1 %v11005_v44  ;;  %s15234_s3 = sld [smem:[#allocation24_spill]] }
0x211e   :  { %v7603_v0 = vmul.f32 0.5, %v7602_v40  ;;  %v7660_v1 = vperm.slane %v14855_v21, 1  ;;  %v7661_v43 = vperm.slane %v14855_v21, 2  ;;  %v7659_v47 = vperm.slane %v14855_v21, 0 }
0x211f   :  { %v7615_v27 = vmul.f32 %v11198_v33, %v7610_v16  ;;  %v7662_v53 = vperm.slane %v14855_v21, 3  ;;  %v11004_v16 = vld [vmem:[%s12048_s27 + $0x198] sm:$0xff] }
0x2120   :  { %v7604_v18 = vsub.f32 1.5, %v7603_v0 }
0x2121   :  { %v7620_v51 = vadd.f32 %v11199_v60, %v7615_v27  ;;  %8344 = vmatpush.bf16.msrb.mxu1 %v11004_v16 }
0x2122   :  { %v7605_v10 = vmul.f32 %v11688_v28, %v7604_v18 }
0x2124   :  { %v7609_v14 = vsel %vm7608_vm5, %v11688_v28, %v7605_v10  ;;  %v10989_v10 = vld [vmem:[%s12048_s27 + $0x120] sm:$0xff] }
0x2125   :  { %v7611_v42 = vmul.f32 %v7609_v14, %v14780_v37  ;;  %v11013_v14 = vld [vmem:[%s12048_s27 + $0x1e0] sm:$0xff]  ;;  %8315 = vmatpush.bf16.msra.mxu3 %v10989_v10 }
0x2126   :  { %8357 = vmatpush.bf16.msra.mxu2 %v11013_v14 }
0x2127   :  { %v7616_v49 = vmul.f32 %v11198_v33, %v7611_v42  ;;  %v10996_v33 = vld [vmem:[%s12048_s27 + $0x158] sm:$0xff]  ;;  %v10995_v42 = vld [vmem:[%s12048_s27 + $0x150] sm:$0xff] }
0x2128   :  { %8330 = vmatpush.bf16.msra.mxu0 %v10996_v33 }
0x2129   :  { %v7621_v46 = vadd.f32 %v11199_v60, %v7616_v49  ;;  %v11003_v49 = vld [vmem:[%s12048_s27 + $0x190] sm:$0xff] }
0x212a   :  { %8345 = vmatpush.bf16.msrb.mxu1 %v11003_v49 }
0x212b   :  { %v7655_v5 = vpack.c.bf16 %v7621_v46, %v7620_v51 }
0x212c   :  { %8331 = vmatpush.bf16.msra.mxu0 %v10995_v42 }
0x212d   :  { %7835 = vmatmul.bf16.vlgmr.msrb.gmra.mxu3 %v7655_v5  ;;  %7849 = vmatmul.bf16.vlgmr.msrb.gmra.mxu0 %v7655_v5 }
0x212e   :  { %7863 = vmatmul.bf16.vlgmr.msra.gmra.mxu1 %v7655_v5  ;;  %7877 = vmatmul.bf16.vlgmr.msrb.gmra.mxu2 %v7655_v5  ;;  %v10988_v5 = vld [vmem:[%s12048_s27 + $0x118] sm:$0xff] }
0x212f   :  { %8316 = vmatpush.bf16.msra.mxu3 %v10988_v5 }
0x2133   :  { %8317 = vmatpush.bf16.msra.mxu3 %v10987_v32 }
0x21aa   :  { %v7850_v37 = vpop.f32.mrf.mxu0 }
0x21ab   :  { %v14861_v41 = vadd.f32 %v7850_v37, %v7660_v1  ;;  %v7864_v30 = vpop.f32.mrf.mxu1 }
0x21ac   :  { %v14863_v56 = vadd.f32 %v7864_v30, %v7661_v43  ;;  %v10994_v30 = vld [vmem:[%s12048_s27 + $0x148] sm:$0xff] }
0x21ad   :  { %v10388_v3 = vmul.f32 -1.702, %v14861_v41  ;;  %8332 = vmatpush.bf16.msra.mxu0 %v10994_v30 }
0x21ae   :  { %v10389_v9 = vmul.f32 -1.702, %v14863_v56 }
0x21af   :  { %v7901_v4 = vmul.f32 1.442695, %v10388_v3  ;;  %v11002_v3 = vld [vmem:[%s12048_s27 + $0x188] sm:$0xff] }
0x21b0   :  { %v7903_v19 = vmul.f32 1.442695, %v10389_v9  ;;  %v7836_v36 = vpop.f32.mrf.mxu3  ;;  %8346 = vmatpush.bf16.msrb.mxu1 %v11002_v3 }
0x21b1   :  { %11689 = vpow2.f32 %v7901_v4  ;;  %v14873_v17 = vadd.f32 %v7836_v36, %v7659_v47  ;;  %v7878_v58 = vpop.f32.mrf.mxu2  ;;  %v11011_v36 = vld [vmem:[%s12048_s27 + $0x1d0] sm:$0xff]  ;;  %8333 = vmatpush.bf16.msra.mxu0 %v10993_v23 }
0x21b2   :  { %11691 = vpow2.f32 %v7903_v19  ;;  %v14879_v39 = vadd.f32 %v7878_v58, %v7662_v53  ;;  %v7852_v26 = vpop.f32.mrf.mxu0 }
0x21b3   :  { %v10387_v54 = vmul.f32 -1.702, %v14873_v17  ;;  %v14882_v35 = vadd.f32 %v7852_v26, %v7660_v1  ;;  %v7866_v62 = vpop.f32.mrf.mxu1  ;;  %v11012_v1 = vld [vmem:[%s12048_s27 + $0x1d8] sm:$0xff]  ;;  %v11001_v26 = vld [vmem:[%s12048_s27 + $0x180] sm:$0xff] }
0x21b4   :  { %v10390_v22 = vmul.f32 -1.702, %v14879_v39  ;;  %v14887_v13 = vadd.f32 %v7866_v62, %v7661_v43  ;;  %8358 = vmatpush.bf16.msra.mxu2 %v11012_v1  ;;  %8347 = vmatpush.bf16.msrb.mxu1 %v11001_v26 }
0x21b5   :  { %v7899_v7 = vmul.f32 1.442695, %v10387_v54  ;;  %v10392_v50 = vmul.f32 -1.702, %v14882_v35 }
0x21b6   :  { %v10393_v12 = vmul.f32 -1.702, %v14887_v13  ;;  %v7905_v0 = vmul.f32 1.442695, %v10390_v22  ;;  %v10986_v22 = vld [vmem:[%s12048_s27 + $0x108] sm:$0xff] }
0x21b7   :  { %v11690_v29 = vpop.eup %11689  ;;  %11693 = vpow2.f32 %v7899_v7  ;;  %v7909_v15 = vmul.f32 1.442695, %v10392_v50  ;;  %v11010_v7 = vld [vmem:[%s12048_s27 + $0x1c8] sm:$0xff]  ;;  %8318 = vmatpush.bf16.msra.mxu3 %v10986_v22 }
0x21b8   :  { %v11692_v28 = vpop.eup %11691  ;;  %v14895_v34 = vadd.f32 1.0, %v11690_v29  ;;  %v7911_v61 = vmul.f32 1.442695, %v10393_v12  ;;  %v7838_v40 = vpop.f32.mrf.mxu3  ;;  %8359 = vmatpush.bf16.msra.mxu2 %v11011_v36 }
0x21b9   :  { %v14897_v48 = vadd.f32 1.0, %v11692_v28  ;;  %11695 = vpow2.f32 %v7909_v15  ;;  %v14899_v18 = vadd.f32 %v7838_v40, %v7659_v47  ;;  %v7880_v55 = vpop.f32.mrf.mxu2  ;;  %v10985_v28 = vld [vmem:[%s12048_s27 + $0x100] sm:$0xff] }
0x21ba   :  { %11697 = vrcp.f32 %v14895_v34  ;;  %v14941_v25 = vadd.f32 %v7880_v55, %v7662_v53  ;;  %v7947_v11 = vand.u32 2147483647, %v14895_v34  ;;  %v7949_v50 = vand.u32 2147483648, %v14895_v34 }
0x21bb   :  { %11699 = vrcp.f32 %v14897_v48  ;;  %v10391_v60 = vmul.f32 -1.702, %v14899_v18  ;;  %v7962_v24 = vand.u32 2147483647, %v14897_v48  ;;  %v7964_v29 = vand.u32 2147483648, %v14897_v48  ;;  %8319 = vmatpush.bf16.msra.mxu3 %v10985_v28 }
0x21bc   :  { %11701 = vpow2.f32 %v7911_v61  ;;  %v10394_v15 = vmul.f32 -1.702, %v14941_v25  ;;  %8360 = vmatpush.bf16.msra.mxu2 %v11010_v7  ;;  %vm7943_vm11 = vweird.f32 %v14895_v34  ;;  %vm14958_vm4 = vcmp.eq.f32.partialorder %v7947_v11, 8.507059e+37  ;;  %v11009_v61 = vld [vmem:[%s12048_s27 + $0x1c0] sm:$0xff]  ;;  %s15236_s27 = sld [smem:[#allocation23_spill]] }
0x21bd   :  { %v11694_v27 = vpop.eup %11693  ;;  %11703 = vpow2.f32 %v7905_v0  ;;  %v7907_v59 = vmul.f32 1.442695, %v10391_v60  ;;  %vm7958_vm0 = vweird.f32 %v14897_v48  ;;  %v7950_v0 = vor.u32 1.1754944e-38, %v7949_v50 }
0x21be   :  { %v14910_v51 = vadd.f32 1.0, %v11694_v27  ;;  %vm14972_vm10 = vcmp.eq.f32.partialorder %v7962_v24, 8.507059e+37  ;;  %v7965_v42 = vor.u32 1.1754944e-38, %v7964_v29  ;;  %v7913_v5 = vmul.f32 1.442695, %v10394_v15 }
0x21bf   :  { %v11696_v46 = vpop.eup %11695 }
0x21c0   :  { %v14914_v43 = vpop.eup %11697  ;;  %11705 = vrcp.f32 %v14910_v51  ;;  %v14925_v4 = vadd.f32 1.0, %v11696_v46  ;;  %8361 = vmatpush.bf16.msra.mxu2 %v11009_v61 }
0x21c1   :  { %v14917_v31 = vpop.eup %11699  ;;  %v7939_v37 = vmul.f32 %v14914_v43, %v14895_v34  ;;  %11707 = vpow2.f32 %v7907_v59  ;;  %vm7944_vm8 = vweird.f32 %v14914_v43 }
0x21c2   :  { %v11702_v47 = vpop.eup %11701  ;;  %v7954_v63 = vmul.f32 %v14917_v31, %v14897_v48  ;;  %11709 = vrcp.f32 %v14925_v4  ;;  %vm14967_vm7 = vmor %vm7943_vm11, %vm7944_vm8  ;;  %vm7959_vm14 = vweird.f32 %v14917_v31  ;;  %vm8003_vm2 = vweird.f32 %v14925_v4 }
0x21c3   :  { %v11704_v2 = vpop.eup %11703  ;;  %v7940_v9 = vsub.f32 1.0, %v7939_v37  ;;  %v14928_v19 = vadd.f32 1.0, %v11702_v47  ;;  %v8007_v1 = vand.u32 2147483647, %v14925_v4  ;;  %v8009_v59 = vand.u32 2147483648, %v14925_v4  ;;  %vm14996_vm6 = vmor %vm7958_vm0, %vm7959_vm14 }
0x21c4   :  { %v7955_v6 = vsub.f32 1.0, %v7954_v63  ;;  %v14937_v62 = vadd.f32 1.0, %v11704_v2  ;;  %vm7928_vm0 = vweird.f32 %v14910_v51 }
0x21c5   :  { %v7941_v58 = vmul.f32 %v14914_v43, %v7940_v9  ;;  %11711 = vrcp.f32 %v14928_v19  ;;  %v8022_v9 = vand.u32 2147483647, %v14928_v19  ;;  %v8024_v55 = vand.u32 2147483648, %v14928_v19 }
0x21c6   :  { %v14935_v54 = vpop.eup %11705  ;;  %v7956_v21 = vmul.f32 %v14917_v31, %v7955_v6  ;;  %11713 = vrcp.f32 %v14937_v62  ;;  %vm8008_vm5 = vcmp.eq.f32.partialorder %v8007_v1, 8.507059e+37  ;;  %vm8018_vm8 = vweird.f32 %v14928_v19 }
0x21c7   :  { %v7942_v44 = vadd.f32 %v14914_v43, %v7941_v58  ;;  %v7924_v53 = vmul.f32 %v14935_v54, %v14910_v51  ;;  %v11708_v12 = vpop.eup %11707  ;;  %vm7929_vm3 = vweird.f32 %v14935_v54  ;;  %v8025_v50 = vor.u32 1.1754944e-38, %v8024_v55 }
0x21c8   :  { %v11710_v8 = vpop.eup %11709  ;;  %v7957_v14 = vadd.f32 %v14917_v31, %v7956_v21  ;;  %v14981_v27 = vadd.f32 1.0, %v11708_v12  ;;  %v7979_v1 = vand.u32 2147483648, %v14937_v62 }
0x21c9   :  { %v7999_v34 = vmul.f32 %v11710_v8, %v14925_v4  ;;  %v7946_v10 = vsel %vm14967_vm7, %v14914_v43, %v7942_v44  ;;  %v7925_v60 = vsub.f32 1.0, %v7924_v53  ;;  %vm8004_vm1 = vweird.f32 %v11710_v8  ;;  %vm15025_vm7 = vmor %vm7928_vm0, %vm7929_vm3 }
0x21ca   :  { %11715 = vrcp.f32 %v14981_v27  ;;  %v7951_v37 = vsel %vm14958_vm4, %v7950_v0, %v7946_v10  ;;  %v7961_v63 = vsel %vm14996_vm6, %v14917_v31, %v7957_v14  ;;  %vm8005_vm13 = vmor %vm8003_vm2, %vm8004_vm1  ;;  %v8010_v31 = vor.u32 1.1754944e-38, %v8009_v59 }
0x21cb   :  { %v11712_v16 = vpop.eup %11711  ;;  %v8000_v49 = vsub.f32 1.0, %v7999_v34  ;;  %v7926_v2 = vmul.f32 %v14935_v54, %v7925_v60  ;;  %11717 = vpow2.f32 %v7913_v5  ;;  %v8044_v58 = vmul.f32 %v7951_v37, %v14861_v41 }
0x21cc   :  { %v8014_v46 = vmul.f32 %v11712_v16, %v14928_v19  ;;  %v14988_v43 = vpop.eup %11713  ;;  %vm8019_vm15 = vweird.f32 %v11712_v16  ;;  %v7966_v11 = vsel %vm14972_vm10, %v7965_v42, %v7961_v63  ;;  %vm8023_vm4 = vcmp.eq.f32.partialorder %v8022_v9, 8.507059e+37 }
0x21cd   :  { %v8001_v3 = vmul.f32 %v11710_v8, %v8000_v49  ;;  %v7969_v48 = vmul.f32 %v14988_v43, %v14937_v62  ;;  %v7927_v22 = vadd.f32 %v14935_v54, %v7926_v2  ;;  %vm8020_vm11 = vmor %vm8018_vm8, %vm8019_vm15  ;;  %v7932_v19 = vand.u32 2147483647, %v14910_v51 }
0x21ce   :  { %v8015_v47 = vsub.f32 1.0, %v8014_v46  ;;  %v7934_v44 = vand.u32 2147483648, %v14910_v51  ;;  %v8045_v12 = vmul.f32 %v7966_v11, %v14863_v56  ;;  %v7994_v51 = vand.u32 2147483648, %v14981_v27 }
0x21cf   :  { %v8002_v32 = vadd.f32 %v11710_v8, %v8001_v3  ;;  %v7931_v38 = vsel %vm15025_vm7, %v14935_v54, %v7927_v22  ;;  %v7970_v28 = vsub.f32 1.0, %v7969_v48  ;;  %v7992_v0 = vand.u32 2147483647, %v14981_v27 }
0x21d0   :  { %v8016_v36 = vmul.f32 %v11712_v16, %v8015_v47  ;;  %v11716_v26 = vpop.eup %11715  ;;  %v7935_v33 = vor.u32 1.1754944e-38, %v7934_v44  ;;  %vm7933_vm10 = vcmp.eq.f32.partialorder %v7932_v19, 8.507059e+37  ;;  %vm7988_vm2 = vweird.f32 %v14981_v27 }
0x21d1   :  { %v8006_v6 = vsel %vm8005_vm13, %v11710_v8, %v8002_v32  ;;  %v7984_v41 = vmul.f32 %v11716_v26, %v14981_v27  ;;  %v11718_v53 = vpop.eup %11717  ;;  %vm7989_vm14 = vweird.f32 %v11716_v26  ;;  %v7995_v54 = vor.u32 1.1754944e-38, %v7994_v51 }
0x21d2   :  { %v8017_v23 = vadd.f32 %v11712_v16, %v8016_v36  ;;  %v8011_v7 = vsel %vm8008_vm5, %v8010_v31, %v8006_v6  ;;  %v7922_v61 = vadd.f32 1.0, %v11718_v53  ;;  %vm7990_vm6 = vmor %vm7988_vm2, %vm7989_vm14  ;;  %vm7993_vm1 = vcmp.eq.f32.partialorder %v7992_v0, 8.507059e+37 }
0x21d3   :  { %v8048_v4 = vmul.f32 %v8011_v7, %v14882_v35  ;;  %v7985_v8 = vsub.f32 1.0, %v7984_v41  ;;  %vm7974_vm15 = vweird.f32 %v14988_v43  ;;  %vm7973_vm3 = vweird.f32 %v14937_v62 }
0x21d4   :  { %v8021_v24 = vsel %vm8020_vm11, %v11712_v16, %v8017_v23  ;;  %11719 = vrcp.f32 %v7922_v61  ;;  %v7971_v16 = vmul.f32 %v14988_v43, %v7970_v28  ;;  %v7977_v59 = vand.u32 2147483647, %v14937_v62  ;;  %vm7975_vm13 = vmor %vm7973_vm3, %vm7974_vm15 }
0x21d5   :  { %v8026_v21 = vsel %vm8023_vm4, %v8025_v50, %v8021_v24  ;;  %v8117_v35 = vpack.c.bf16 %v8048_v4, %v8044_v58  ;;  %v7986_v56 = vmul.f32 %v11716_v26, %v7985_v8  ;;  %v8039_v30 = vand.u32 2147483648, %v7922_v61  ;;  %v11200_v4 = vld [vmem:[%s12053_s29 + $0x1] ss:$0 sm:$0xff]  ;;  %s15235_s29 = sld [smem:[#allocation22_spill]] }
0x21d6   :  { %v8049_v15 = vmul.f32 %v8026_v21, %v14887_v13  ;;  %v7936_v13 = vsel %vm7933_vm10, %v7935_v33, %v7931_v38  ;;  %v7972_v46 = vadd.f32 %v14988_v43, %v7971_v16  ;;  %v8037_v3 = vand.u32 2147483647, %v7922_v61 }
0x21d7   :  { %8334 = vmatmul.bf16.vlgmr.msra.gmra.mxu0 %v8117_v35  ;;  %v7987_v34 = vadd.f32 %v11716_v26, %v7986_v56  ;;  %v8043_v60 = vmul.f32 %v7936_v13, %v14873_v17  ;;  %v7980_v47 = vor.u32 1.1754944e-38, %v7979_v1  ;;  %vm7978_vm8 = vcmp.eq.f32.partialorder %v7977_v59, 8.507059e+37 }
0x21d8   :  { %v8118_v40 = vpack.c.bf16 %v8049_v15, %v8045_v12  ;;  %v7976_v17 = vsel %vm7975_vm13, %v14988_v43, %v7972_v46  ;;  %vm8033_vm11 = vweird.f32 %v7922_v61  ;;  %v8040_v9 = vor.u32 1.1754944e-38, %v8039_v30  ;;  %v11020_v30 = vld [vmem:[%s15234_s3 + $0x18] sm:$0xff] }
0x21d9   :  { %v7991_v10 = vsel %vm7990_vm6, %v11716_v26, %v7987_v34  ;;  %v7981_v2 = vsel %vm7978_vm8, %v7980_v47, %v7976_v17  ;;  %vm8038_vm0 = vcmp.eq.f32.partialorder %v8037_v3, 8.507059e+37  ;;  %v5347_v38 = vmul.f32 %v14331_v57, %v14331_v57  ;;  %v11024_v34 = vld [vmem:[%s15234_s3 + $0x38] sm:$0xff] }
0x21da   :  { %8348 = vmatmul.bf16.vlgmr.msrb.gmra.mxu1 %v8118_v40  ;;  %v7996_v14 = vsel %vm7993_vm1, %v7995_v54, %v7991_v10  ;;  %v11720_v49 = vpop.eup %11719  ;;  %v8046_v32 = vmul.f32 %v7981_v2, %v14879_v39  ;;  %vm5348_vm7 = vcmask 517120   ;;  %8513 = vmatpush.bf16.msrb.mxu0 %v11024_v34  ;;  %v11023_v10 = vld [vmem:[%s15234_s3 + $0x30] sm:$0xff] }
0x21db   :  { %v8047_v42 = vmul.f32 %v7996_v14, %v14899_v18  ;;  %v8029_v27 = vmul.f32 %v11720_v49, %v7922_v61  ;;  %vm8034_vm5 = vweird.f32 %v11720_v49  ;;  %v11201_v3 = vld [vmem:[%s15235_s29] ss:$0 sm:$0xff] }
0x21dc   :  { %vm8035_vm4 = vmor %vm8033_vm11, %vm8034_vm5 }
0x21dd   :  { %v8116_v5 = vpack.c.bf16 %v8047_v42, %v8043_v60  ;;  %v8030_v37 = vsub.f32 1.0, %v8029_v27  ;;  %v11022_v42 = vld [vmem:[%s15234_s3 + $0x28] sm:$0xff] }
0x21de   :  { %8514 = vmatpush.bf16.msrb.mxu0 %v11023_v10 }
0x21df   :  { %8320 = vmatmul.bf16.vlgmr.msra.gmra.mxu3 %v8116_v5  ;;  %v8031_v18 = vmul.f32 %v11720_v49, %v8030_v37 }
0x21e1   :  { %v8032_v63 = vadd.f32 %v11720_v49, %v8031_v18 }
0x21e2   :  { %8515 = vmatpush.bf16.msrb.mxu0 %v11022_v42 }
0x21e3   :  { %v8036_v55 = vsel %vm8035_vm4, %v11720_v49, %v8032_v63  ;;  %v11019_v63 = vld [vmem:[%s15234_s3 + $0x10] sm:$0xff] }
0x21e4   :  { %v8041_v62 = vsel %vm8038_vm0, %v8040_v9, %v8036_v55 }
0x21e5   :  { %v8050_v36 = vmul.f32 %v8041_v62, %v14941_v25  ;;  %v11202_v62 = vld [vmem:[%s15236_s27] ss:$0 sm:$0xff] }
0x21e7   :  { %v8119_v48 = vpack.c.bf16 %v8050_v36, %v8046_v32  ;;  %v11018_v32 = vld [vmem:[%s15234_s3 + $0x8] sm:$0xff] }
0x21e9   :  { %8362 = vmatmul.bf16.vlgmr.msra.gmra.mxu2 %v8119_v48 }
0x2254   :  { %v8335_v31 = vpop.f32.mrf.mxu0 }
0x2257   :  { %v8349_v6 = vpop.f32.mrf.mxu1 }
0x225c   :  { %v8337_v11 = vpop.f32.mrf.mxu0 }
0x225f   :  { %v8351_v41 = vpop.f32.mrf.mxu1 }
0x2262   :  { %v8321_v43 = vpop.f32.mrf.mxu3 }
0x2263   :  { %v8336_v58 = vadd.f32 %v8335_v31, %v8321_v43  ;;  %v8429_v31 = vld [vmem:[%s15237_s26] sm:$0x3] }
0x2265   :  { %v8350_v23 = vadd.f32 %v8349_v6, %v8336_v58  ;;  %v8430_v6 = vpack.c.bf16 %v8429_v31, %v8429_v31 }
0x226a   :  { %v8323_v26 = vpop.f32.mrf.mxu3 }
0x226b   :  { %v8338_v50 = vadd.f32 %v8337_v11, %v8323_v26 }
0x226c   :  { %v8363_v22 = vpop.f32.mrf.mxu2 }
0x226d   :  { %v8364_v7 = vadd.f32 %v8363_v22, %v8350_v23  ;;  %v8352_v19 = vadd.f32 %v8351_v41, %v8338_v50  ;;  %v11017_v23 = vld [vmem:[%s15234_s3] sm:$0xff] }
0x226f   :  { %v8368_v24 = vadd.f32 %v8364_v7, %v14765_v20 }
0x2271   :  { %v8375_v39 = vadd.f32 %v11200_v4, %v8368_v24 }
0x2273   :  { %8379 = vadd.xlane.f32.xlu0 %v8375_v39 }
0x2274   :  { %v8365_v25 = vpop.f32.mrf.mxu2 }
0x2275   :  { %v8366_v44 = vadd.f32 %v8365_v25, %v8352_v19 }
0x2277   :  { %v8369_v21 = vadd.f32 %v8366_v44, %v14769_v52  ;;  %v5349_v52 = vsel %vm5348_vm7, %v5347_v38, 0.0 }
0x2279   :  { %v8376_v53 = vadd.f32 %v11200_v4, %v8369_v21 }
0x227b   :  { %8381 = vadd.xlane.f32.xlu1 %v8376_v53 }
0x22e6   :  { %v8380_v12 = vpop.xlane.xlu0 %8379 }
0x22e7   :  { %v8383_v29 = vmul.f32 %v8380_v12, %v12082_v45 }
0x22e9   :  { %v8385_v35 = vsub.f32 %v8375_v39, %v8383_v29 }
0x22eb   :  { %v8387_v15 = vmul.f32 %v8385_v35, %v8385_v35 }
0x22ed   :  { %8389 = vadd.xlane.f32.xlu2 %v8387_v15 }
0x22ee   :  { %v8382_v8 = vpop.xlane.xlu1 %8381 }
0x22ef   :  { %v8384_v20 = vmul.f32 %v8382_v8, %v12082_v45 }
0x22f1   :  { %v8386_v28 = vsub.f32 %v8376_v53, %v8384_v20 }
0x22f3   :  { %v8388_v51 = vmul.f32 %v8386_v28, %v8386_v28 }
0x22f5   :  { %5350 = vadd.xlane.f32.xlu2 %v5349_v52  ;;  %8391 = vadd.xlane.f32.xlu0 %v8388_v51 }
0x2360   :  { %v8390_v61 = vpop.xlane.xlu2 %8389 }
0x2361   :  { %v8393_v40 = vmul.f32 %v8390_v61, %v12082_v45 }
0x2363   :  { %v8395_v56 = vadd.f32 1e-05, %v8393_v40 }
0x2365   :  { %11721 = vrsqrt.f32 %v8395_v56  ;;  %vm8403_vm10 = vweird.f32 %v8395_v56 }
0x2368   :  { %v8392_v0 = vpop.xlane.xlu0 %8391  ;;  %v5351_v15 = vpop.xlane.xlu2 %5350 }
0x2369   :  { %v8394_v33 = vmul.f32 %v8392_v0, %v12082_v45  ;;  %v11021_v45 = vld [vmem:[%s15234_s3 + $0x20] sm:$0xff]  ;;  %v5352_v8 = vmax.f32 %v5351_v15, 1e-24 }
0x236a   :  { %8516 = vmatpush.bf16.msrb.mxu0 %v11021_v45 }
0x236b   :  { %v11722_v13 = vpop.eup %11721  ;;  %v8396_v54 = vadd.f32 1e-05, %v8394_v33  ;;  %vm5359_vm8 = vweird.f32 %v5352_v8 }
0x236c   :  { %v8398_v16 = vmul.f32 %v11722_v13, %v8395_v56  ;;  %vm8404_vm14 = vweird.f32 %v11722_v13 }
0x236d   :  { %11723 = vrsqrt.f32 %v8396_v54  ;;  %vm8405_vm2 = vmor %vm8403_vm10, %vm8404_vm14  ;;  %vm8413_vm1 = vweird.f32 %v8396_v54 }
0x236e   :  { %v8399_v14 = vmul.f32 %v11722_v13, %v8398_v16  ;;  %8517 = vmatpush.bf16.msrb.mxu0 %v11020_v30 }
0x2370   :  { %v8400_v60 = vmul.f32 0.5, %v8399_v14 }
0x2372   :  { %v8401_v49 = vsub.f32 1.5, %v8400_v60  ;;  %8518 = vmatpush.bf16.msrb.mxu0 %v11019_v63 }
0x2373   :  { %v11724_v46 = vpop.eup %11723 }
0x2374   :  { %v8402_v5 = vmul.f32 %v11722_v13, %v8401_v49  ;;  %v8408_v27 = vmul.f32 %v11724_v46, %v8396_v54  ;;  %vm8414_vm6 = vweird.f32 %v11724_v46 }
0x2375   :  { %vm8415_vm15 = vmor %vm8413_vm1, %vm8414_vm6 }
0x2376   :  { %v8409_v1 = vmul.f32 %v11724_v46, %v8408_v27  ;;  %v8406_v59 = vsel %vm8405_vm2, %v11722_v13, %v8402_v5  ;;  %8519 = vmatpush.bf16.msrb.mxu0 %v11018_v32 }
0x2377   :  { %v8417_v18 = vmul.f32 %v8406_v59, %v8385_v35 }
0x2378   :  { %v8410_v37 = vmul.f32 0.5, %v8409_v1 }
0x2379   :  { %v8422_v55 = vmul.f32 %v11201_v3, %v8417_v18 }
0x237a   :  { %v8411_v17 = vsub.f32 1.5, %v8410_v37  ;;  %8520 = vmatpush.bf16.msrb.mxu0 %v11017_v23 }
0x237b   :  { %v8427_v48 = vadd.f32 %v11202_v62, %v8422_v55 }
0x237c   :  { %v8412_v47 = vmul.f32 %v11724_v46, %v8411_v17 }
0x237e   :  { %v8416_v2 = vsel %vm8415_vm15, %v11724_v46, %v8412_v47 }
0x237f   :  { %v8418_v9 = vmul.f32 %v8416_v2, %v8386_v28 }
0x2381   :  { %v8423_v36 = vmul.f32 %v11201_v3, %v8418_v9 }
0x2383   :  { %v8428_v43 = vadd.f32 %v11202_v62, %v8423_v36 }
0x2385   :  { %v8431_v58 = vpack.c.bf16 %v8428_v43, %v8427_v48 }
0x2387   :  { %8442 = vmatpush.bf16.msrb.mxu3 %v8431_v58 }
0x238a   :  { %10588 = vmatmul.msk.bf16.vlgmr.msrb.gmra.mxu3 %vm5721_vm12, %v8430_v6 }
0x240d   :  { %v8444_v26 = vpop.f32.mrf.mxu3 }
0x240e   :  { %v8464_v11 = vpack.c.bf16 %v8444_v26, %v8444_v26 }
0x2410   :  { %8521 = vmatmul.bf16.vlgmr.msrb.gmra.mxu0 %v8464_v11 }
0x2415   :  { %v8446_v22 = vpop.f32.mrf.mxu3 }
0x248d   :  { %v8522_v7 = vpop.f32.mrf.mxu0 }
0x248e   :  { %v8526_v50 = vmul.f32 %v8522_v7, %v8522_v7 }
0x2490   :  { %v8527_v4 = vsel %vm5348_vm7, %v8526_v50, 0.0 }
0x2491   :  { %8528 = vadd.xlane.f32.xlu1 %v8527_v4 }
0x2495   :  { %v8524_v24 = vpop.f32.mrf.mxu0 }
0x2504   :  { %v8529_v41 = vpop.xlane.xlu1 %8528 }
0x2505   :  { %v8530_v19 = vmax.f32 %v8529_v41, 1e-24 }
0x2507   :  { %11725 = vrsqrt.f32 %v8530_v19  ;;  %vm8537_vm3 = vweird.f32 %v8530_v19 }
0x2508   :  { %11727 = vrsqrt.f32 %v5352_v8 }
0x250d   :  { %v11726_v39 = vpop.eup %11725 }
0x250e   :  { %v8532_v25 = vmul.f32 %v11726_v39, %v8530_v19  ;;  %vm8538_vm12 = vweird.f32 %v11726_v39  ;;  %v11728_v20 = vpop.eup %11727 }
0x250f   :  { %vm8539_vm13 = vmor %vm8537_vm3, %vm8538_vm12  ;;  %v5354_v38 = vmul.f32 %v11728_v20, %v5352_v8  ;;  %vm5360_vm5 = vweird.f32 %v11728_v20 }
0x2510   :  { %v8533_v44 = vmul.f32 %v11726_v39, %v8532_v25  ;;  %vm5361_vm11 = vmor %vm5359_vm8, %vm5360_vm5 }
0x2511   :  { %v5355_v28 = vmul.f32 %v11728_v20, %v5354_v38 }
0x2512   :  { %v8534_v21 = vmul.f32 0.5, %v8533_v44 }
0x2513   :  { %v5356_v51 = vmul.f32 0.5, %v5355_v28 }
0x2514   :  { %v8535_v53 = vsub.f32 1.5, %v8534_v21 }
0x2515   :  { %v5357_v52 = vsub.f32 1.5, %v5356_v51 }
0x2516   :  { %v8536_v12 = vmul.f32 %v11726_v39, %v8535_v53 }
0x2517   :  { %v5358_v61 = vmul.f32 %v11728_v20, %v5357_v52 }
0x2518   :  { %v8540_v29 = vsel %vm8539_vm13, %v11726_v39, %v8536_v12 }
0x2519   :  { %v8541_v35 = vmul.f32 %v8540_v29, %v8522_v7  ;;  %v5362_v40 = vsel %vm5361_vm11, %v11728_v20, %v5358_v61 }
0x251a   :  { %v5363_v56 = vmul.f32 %v5362_v40, %v14331_v57 }
0x251b   :  { %8543 = vrot.lane.b32.xlu0 %v8541_v35, %s11837_s13  ;;  %s11774_s13 = scalar_lea.hbm %s11773_s9, 2 }
0x251c   :  { %p11775_p5 = scmp.ne.s32.totalorder %s11773_s9, %s11774_s13  ;;  %p11778_p7 = scmp.lt.s32.totalorder %s11776_s17, %s11774_s13 }
0x251e   :  { %p11779_p8 = por %p11778_p7, %p11777_p6 }
0x2520   :  { %p11780_p9 = pnand %p11779_p8, %p11775_p5 }
0x258d   :  { %v8544_v0 = vpop.permute.xlu0 %8543 }
0x258e   :  { %v8546_v33 = vsel %vm1470_vm9, %v5363_v56, %v8544_v0 }
0x258f   :  { %8547 = vst [vmem:[#allocation5] sm:$0x3] %v8546_v33 }
0x2590   :  { %11783 = shalt.err (!%p11780_p9)
}
0x2591   :  { %8558 = dma.vmem_to_hbm [thread:$0]  %s8554_s28, 32, %s8556_s5, [#allocation4]  }
0x2592   :  { %11786 = dma.done.wait [#allocation4], 32  }
0x2593   :  { %11787 = vsyncadd [#allocation4], 4294967264 }
0x2594   :  { %8563 = vsyncpa [#allocation3], 1 }
0x2595   :  { %8564 = vsyncpa [#allocation4], 1 }

</bundles_post_ra>
